<compile_context>
chip_gen: v6e
topology: v6e:2x2x1
jax: 0.10.0
libtpu: 0.0.40
codegen_flags: <defaults>
</compile_context>

<pallas_src>
import math
from functools import partial

import jax
import jax.numpy as jnp
from jax.experimental import pallas as pl
from jax.experimental.pallas import tpu as pltpu

DTYPE = jnp.float32
MXU_DTYPE = jnp.bfloat16      # dot-operand dtype (accumulation stays f32)

# ---- small shapes consistent with the module's forward (orig -> small) ----
N_VID = 8          # 100 videos  -> 8
CHUNK = 4          # split(., 20, dim=0) -> chunks of 4   (2 chunks)
H = W = 8          # SAM spatial 64x64 -> 8x8
SP = H * W         # 4096 -> 64   (sam_hid_lin1[0] in_features)
C_SAM = 32         # 384  -> 32   (sam_hid_lin2 in_features)
HID = 64           # 1024 -> 64   (hid_dim / vcgpt feature dim)
SEQ_HALF = 32      # 256  -> 32   (per-stream token count)
NHEADS = 4
N_LAYERS = 4
FF = HID           # dim_feedfwd = hid_dim
MAX_LEN = 64       # positional-encoding table (orig 256)
LN_EPS = 1e-5
TOK_TILE = 16      # token ("batch") tile inside encoder kernels

N_CHUNKS = N_VID // CHUNK
DH = HID // NHEADS
assert N_VID % CHUNK == 0 and HID % NHEADS == 0 and SEQ_HALF % 8 == 0


# ------------------------------ small helpers -------------------------------

def _mm(a, b):
    """MXU matmul: bf16 operands, f32 accumulation (elementwise stays f32)."""
    return jnp.dot(a.astype(MXU_DTYPE), b.astype(MXU_DTYPE),
                   preferred_element_type=jnp.float32)


def _layernorm(y, g, b):
    mu = jnp.mean(y, axis=-1, keepdims=True)
    yc = y - mu
    var = jnp.mean(yc * yc, axis=-1, keepdims=True)
    return yc * jax.lax.rsqrt(var + LN_EPS) * g + b


def make_pe(max_len, d):
    position = jnp.arange(max_len, dtype=jnp.float32)[:, None]
    div_term = jnp.exp(jnp.arange(0, d, 2, dtype=jnp.float32)
                       * (-math.log(10000.0) / d))
    pe = jnp.zeros((max_len, d), dtype=DTYPE)
    pe = pe.at[:, 0::2].set(jnp.sin(position * div_term))
    pe = pe.at[:, 1::2].set(jnp.cos(position * div_term))
    return pe                                            # (max_len, d)


# ----------------------- fused pre-transformer kernel -----------------------
# Per video n (all transposes folded into weight orientation):
#   U    = W1a  @ X  + b1a          (HID, C)   W1a  stored (out,in) = (HID,SP)
#   V    = W1b  @ U  + b1b          (SEQ, C)   W1b  stored (out,in) = (SEQ,HID)
#   samf = V    @ W2 + b2           (SEQ, HID) W2   stored (in,out) = (C,HID)
#   comb = Wcs @ samf + Wcv @ v + bc             Wc split into sam/vcgpt halves
#   out  = comb * sqrt(HID) + pe[n % CHUNK]      (Transformer_Encoder prologue)

def _prep_kernel(sam_ref, v_ref, w1a_ref, b1a_ref, w1b_ref, b1b_ref,
                 w2_ref, b2_ref, wcs_ref, wcv_ref, bc_ref, pe_ref, o_ref,
                 *, scale):
    x = sam_ref[0]                                        # (SP, C_SAM)
    u = _mm(w1a_ref[...], x) + b1a_ref[...]               # (HID, C_SAM)
    vv = _mm(w1b_ref[...], u) + b1b_ref[...]              # (SEQ, C_SAM)
    samf = _mm(vv, w2_ref[...]) + b2_ref[...]             # (SEQ, HID)
    comb = (_mm(wcs_ref[...], samf) + _mm(wcv_ref[...], v_ref[0])
            + bc_ref[...])                                # (SEQ, HID)
    o_ref[0] = (comb * scale + pe_ref[0]).astype(o_ref.dtype)


def prep_combined(sam, vcgpt, p):
    """(N,1,H,W,C), (N,1,SEQ+1,HID) -> (N, SEQ, HID) transformer input."""
    sam2 = sam.reshape(N_VID, SP, C_SAM)                  # squeeze + flatten
    v = vcgpt[:, 0, 1:, :]                                # drop CLS token
    pe_n = jnp.tile(p["pe"][:CHUNK], (N_CHUNKS, 1)).reshape(N_VID, 1, HID)
    const = lambda n: (0, 0)
    return pl.pallas_call(
        partial(_prep_kernel, scale=math.sqrt(HID)),
        out_shape=jax.ShapeDtypeStruct((N_VID, SEQ_HALF, HID), DTYPE),
        grid_spec=pltpu.PrefetchScalarGridSpec(
            num_scalar_prefetch=0,
            grid=(N_VID,),
            in_specs=[
                pl.BlockSpec((1, SP, C_SAM), lambda n: (n, 0, 0)),
                pl.BlockSpec((1, SEQ_HALF, HID), lambda n: (n, 0, 0)),
                pl.BlockSpec((HID, SP), const),
                pl.BlockSpec((HID, 1), const),
                pl.BlockSpec((SEQ_HALF, HID), const),
                pl.BlockSpec((SEQ_HALF, 1), const),
                pl.BlockSpec((C_SAM, HID), const),
                pl.BlockSpec((1, HID), const),
                pl.BlockSpec((SEQ_HALF, SEQ_HALF), const),
                pl.BlockSpec((SEQ_HALF, SEQ_HALF), const),
                pl.BlockSpec((SEQ_HALF, 1), const),
                pl.BlockSpec((1, 1, HID), lambda n: (n, 0, 0)),
            ],
            out_specs=pl.BlockSpec((1, SEQ_HALF, HID), lambda n: (n, 0, 0)),
        ),
        compiler_params=pltpu.CompilerParams(
            dimension_semantics=("parallel",)),
    )(sam2, v, p["sam_lin1a_w"], p["sam_lin1a_b"], p["sam_lin1b_w"],
      p["sam_lin1b_b"], p["sam_lin2_w"], p["sam_lin2_b"],
      p["comb_w_sam"], p["comb_w_vcg"], p["comb_b"], pe_n)


# -------------------- fused transformer encoder kernels ---------------------
# Activation layout: (n_chunks, S=CHUNK, T=tokens, E=HID).  Attention mixes
# the S axis only; T is the (independent) PyTorch batch dim, tiled by the grid.
# TODO(synk): dropout (p=0.1) is treated as identity (inference semantics).

def _attn_block_kernel(x_ref, wqkv_ref, bqkv_ref, wo_ref, bo_ref,
                       g_ref, b_ref, o_ref, *, nheads, scale):
    s_len, t_len, e = x_ref.shape[1], x_ref.shape[2], x_ref.shape[3]
    dh = e // nheads
    x = x_ref[0]                                          # (S, T, E)
    x2 = x.reshape(s_len * t_len, e)                      # rows = (s, t)
    qkv = _mm(x2, wqkv_ref[...]) + bqkv_ref[...]          # (S*T, 3E)
    wo = wo_ref[...]

    attn = jnp.zeros((s_len * t_len, e), jnp.float32)
    for h in range(nheads):                               # static unroll
        q = qkv[:, h * dh:(h + 1) * dh].reshape(s_len, t_len, dh)
        k = qkv[:, e + h * dh:e + (h + 1) * dh].reshape(s_len, t_len, dh)
        v = qkv[:, 2 * e + h * dh:2 * e + (h + 1) * dh].reshape(s_len, t_len, dh)
        # scores[u, s, t, 1] = <k[u,t,:], q[s,t,:]> ; softmax over keys u
        # (leading axis) -- VPU/XLU-friendly, no in-kernel transposes.
        sc = jnp.sum(k[:, None, :, :] * q[None, :, :, :],
                     axis=-1, keepdims=True) * scale      # (S, S, T, 1)
        sc = sc - jnp.max(sc, axis=0, keepdims=True)
        pp = jnp.exp(sc)
        pp = pp * pl.reciprocal(jnp.sum(pp, axis=0, keepdims=True),
                                approx=True)
        oh = jnp.sum(pp * v[:, None, :, :], axis=0)       # (S, T, dh)
        # out-projection accumulated per head (avoids a head concat)
        attn = attn + _mm(oh.reshape(s_len * t_len, dh),
                          wo[h * dh:(h + 1) * dh, :])
    attn = attn + bo_ref[...]
    y = _layernorm(x2 + attn, g_ref[...], b_ref[...])     # post-norm residual
    o_ref[0] = y.reshape(s_len, t_len, e).astype(o_ref.dtype)


def _ffn_block_kernel(x_ref, w1_ref, b1_ref, w2_ref, b2_ref,
                      g_ref, b_ref, o_ref):
    s_len, t_len, e = x_ref.shape[1], x_ref.shape[2], x_ref.shape[3]
    x = x_ref[0]
    x2 = x.reshape(s_len * t_len, e)
    hdn = jnp.maximum(_mm(x2, w1_ref[...]) + b1_ref[...], 0.0)
    y = _mm(hdn, w2_ref[...]) + b2_ref[...]
    y = _layernorm(x2 + y, g_ref[...], b_ref[...])
    o_ref[0] = y.reshape(s_len, t_len, e).astype(o_ref.dtype)


def _enc_grid(x):
    nc, s_len, tok, e = x.shape
    tt = TOK_TILE if tok % TOK_TILE == 0 else tok
    act = pl.BlockSpec((1, s_len, tt, e), lambda c, t: (c, 0, t, 0))
    return (nc, tok // tt), act


def attn_block(x, lp):
    grid, act = _enc_grid(x)
    e = x.shape[-1]
    const = lambda c, t: (0, 0)
    return pl.pallas_call(
        partial(_attn_block_kernel, nheads=NHEADS, scale=1.0 / math.sqrt(DH)),
        out_shape=jax.ShapeDtypeStruct(x.shape, x.dtype),
        grid_spec=pltpu.PrefetchScalarGridSpec(
            num_scalar_prefetch=0,
            grid=grid,
            in_specs=[
                act,
                pl.BlockSpec((e, 3 * e), const),
                pl.BlockSpec((1, 3 * e), const),
                pl.BlockSpec((e, e), const),
                pl.BlockSpec((1, e), const),
                pl.BlockSpec((1, e), const),
                pl.BlockSpec((1, e), const),
            ],
            out_specs=act,
        ),
        compiler_params=pltpu.CompilerParams(
            dimension_semantics=("parallel", "parallel")),
    )(x, lp["in_proj_w"], lp["in_proj_b"], lp["out_proj_w"], lp["out_proj_b"],
      lp["ln1_g"], lp["ln1_b"])


def ffn_block(x, lp):
    grid, act = _enc_grid(x)
    e = x.shape[-1]
    ff = lp["lin1_w"].shape[1]
    const = lambda c, t: (0, 0)
    return pl.pallas_call(
        _ffn_block_kernel,
        out_shape=jax.ShapeDtypeStruct(x.shape, x.dtype),
        grid_spec=pltpu.PrefetchScalarGridSpec(
            num_scalar_prefetch=0,
            grid=grid,
            in_specs=[
                act,
                pl.BlockSpec((e, ff), const),
                pl.BlockSpec((1, ff), const),
                pl.BlockSpec((ff, e), const),
                pl.BlockSpec((1, e), const),
                pl.BlockSpec((1, e), const),
                pl.BlockSpec((1, e), const),
            ],
            out_specs=act,
        ),
        compiler_params=pltpu.CompilerParams(
            dimension_semantics=("parallel", "parallel")),
    )(x, lp["lin1_w"], lp["lin1_b"], lp["lin2_w"], lp["lin2_b"],
      lp["ln2_g"], lp["ln2_b"])


# ----------------------------- CombineTensors -------------------------------
# TODO(synk): the original forward loads pickled tensors from disk and moves
# them to CUDA; here the two tensors are passed in directly as arrays.

def combine_tensors_forward(sam, vcgpt, params):
    """sam: (N, 1, H, W, C_SAM), vcgpt: (N, 1, SEQ_HALF+1, HID)."""
    comb = prep_combined(sam, vcgpt, params)              # (N, SEQ, HID)
    # fold videos into (chunk, seq-position) -- free metadata reshape; chunks
    # are independent so all of them run through the encoder in one batch.
    x = comb.reshape(N_CHUNKS, CHUNK, SEQ_HALF, HID)
    for lp in params["layers"]:
        x = attn_block(x, lp)                             # MHA + add + LN1
        x = ffn_block(x, lp)                              # FFN + add + LN2
    return x.reshape(N_VID, SEQ_HALF, HID)                # == stack + reshape


# ------------------------------ parameter init ------------------------------

def _uniform(key, shape, bound):
    return jax.random.uniform(key, shape, DTYPE, -bound, bound)


def init_params(key):
    ks = iter(jax.random.split(key, 64))
    p = {}
    b = 1.0 / math.sqrt(SP)                # sam_hid_lin1[0]: SP -> HID
    p["sam_lin1a_w"] = _uniform(next(ks), (HID, SP), b)        # (out, in)
    p["sam_lin1a_b"] = _uniform(next(ks), (HID, 1), b)
    b = 1.0 / math.sqrt(HID)               # sam_hid_lin1[1]: HID -> SEQ
    p["sam_lin1b_w"] = _uniform(next(ks), (SEQ_HALF, HID), b)  # (out, in)
    p["sam_lin1b_b"] = _uniform(next(ks), (SEQ_HALF, 1), b)
    b = 1.0 / math.sqrt(C_SAM)             # sam_hid_lin2: C_SAM -> HID
    p["sam_lin2_w"] = _uniform(next(ks), (C_SAM, HID), b)      # (in, out)
    p["sam_lin2_b"] = _uniform(next(ks), (1, HID), b)
    b = 1.0 / math.sqrt(2 * SEQ_HALF)      # combined_tensor_lin: 2*SEQ -> SEQ
    p["comb_w_sam"] = _uniform(next(ks), (SEQ_HALF, SEQ_HALF), b)  # Wc[:, :SEQ]
    p["comb_w_vcg"] = _uniform(next(ks), (SEQ_HALF, SEQ_HALF), b)  # Wc[:, SEQ:]
    p["comb_b"] = _uniform(next(ks), (SEQ_HALF, 1), b)

    layers = []
    for _ in range(N_LAYERS):
        lp = {}
        b = 1.0 / math.sqrt(HID)
        lp["in_proj_w"] = _uniform(next(ks), (HID, 3 * HID), b)   # (in, out)
        lp["in_proj_b"] = _uniform(next(ks), (1, 3 * HID), b)
        lp["out_proj_w"] = _uniform(next(ks), (HID, HID), b)      # (in, out)
        lp["out_proj_b"] = _uniform(next(ks), (1, HID), b)
        lp["lin1_w"] = _uniform(next(ks), (HID, FF), b)           # (in, out)
        lp["lin1_b"] = _uniform(next(ks), (1, FF), b)
        b2 = 1.0 / math.sqrt(FF)
        lp["lin2_w"] = _uniform(next(ks), (FF, HID), b2)          # (in, out)
        lp["lin2_b"] = _uniform(next(ks), (1, HID), b2)
        lp["ln1_g"] = jnp.ones((1, HID), DTYPE)
        lp["ln1_b"] = jnp.zeros((1, HID), DTYPE)
        lp["ln2_g"] = jnp.ones((1, HID), DTYPE)
        lp["ln2_b"] = jnp.zeros((1, HID), DTYPE)
        layers.append(lp)
    p["layers"] = layers
    p["pe"] = make_pe(MAX_LEN, HID)
    return p


# ---------------------------------- main ------------------------------------

if __name__ == "__main__":
    key = jax.random.PRNGKey(0)
    k_sam, k_vcgpt, k_par = jax.random.split(key, 3)

    sam = jax.random.normal(k_sam, (N_VID, 1, H, W, C_SAM), dtype=DTYPE)
    vcgpt = jax.random.normal(k_vcgpt, (N_VID, 1, SEQ_HALF + 1, HID),
                              dtype=DTYPE)
    params = init_params(k_par)

    out = jax.jit(combine_tensors_forward)(sam, vcgpt, params)
    out = jax.block_until_ready(out)
    assert out.shape == (N_VID, SEQ_HALF, HID), out.shape
    assert bool(jnp.all(jnp.isfinite(out)))
    print("KERNEL_OK")
</pallas_src>

<mosaic_0001>
module attributes {stable_mosaic.version = 11 : i64} {
  func.func @_prep_kernel(%arg0: i32, %arg1: memref<1x64x32xf32, #tpu.memory_space<vmem>>, %arg2: memref<1x32x64xf32, #tpu.memory_space<vmem>>, %arg3: memref<64x64xf32, #tpu.memory_space<vmem>>, %arg4: memref<64x1xf32, #tpu.memory_space<vmem>>, %arg5: memref<32x64xf32, #tpu.memory_space<vmem>>, %arg6: memref<32x1xf32, #tpu.memory_space<vmem>>, %arg7: memref<32x64xf32, #tpu.memory_space<vmem>>, %arg8: memref<1x64xf32, #tpu.memory_space<vmem>>, %arg9: memref<32x32xf32, #tpu.memory_space<vmem>>, %arg10: memref<32x32xf32, #tpu.memory_space<vmem>>, %arg11: memref<32x1xf32, #tpu.memory_space<vmem>>, %arg12: memref<1x1x64xf32, #tpu.memory_space<vmem>>, %arg13: memref<1x32x64xf32, #tpu.memory_space<vmem>>) attributes {dimension_semantics = [#tpu.dimension_semantics<parallel>], iteration_bounds = array<i64: 8>, scalar_prefetch = 0 : i64, scratch_operands = 0 : i64, tpu.core_type = #tpu.core_type<tc>, window_params = [{transform_indices = @transform_0, window_bounds = array<i64: 1, 64, 32>}, {transform_indices = @transform_1, window_bounds = array<i64: 1, 32, 64>}, {pipeline_mode = #tpu.pipeline_mode<synchronous>, transform_indices = @transform_2, window_bounds = array<i64: 64, 64>}, {pipeline_mode = #tpu.pipeline_mode<synchronous>, transform_indices = @transform_3, window_bounds = array<i64: 64, 1>}, {pipeline_mode = #tpu.pipeline_mode<synchronous>, transform_indices = @transform_4, window_bounds = array<i64: 32, 64>}, {pipeline_mode = #tpu.pipeline_mode<synchronous>, transform_indices = @transform_5, window_bounds = array<i64: 32, 1>}, {pipeline_mode = #tpu.pipeline_mode<synchronous>, transform_indices = @transform_6, window_bounds = array<i64: 32, 64>}, {pipeline_mode = #tpu.pipeline_mode<synchronous>, transform_indices = @transform_7, window_bounds = array<i64: 1, 64>}, {pipeline_mode = #tpu.pipeline_mode<synchronous>, transform_indices = @transform_8, window_bounds = array<i64: 32, 32>}, {pipeline_mode = #tpu.pipeline_mode<synchronous>, transform_indices = @transform_9, window_bounds = array<i64: 32, 32>}, {pipeline_mode = #tpu.pipeline_mode<synchronous>, transform_indices = @transform_10, window_bounds = array<i64: 32, 1>}, {transform_indices = @transform_11, window_bounds = array<i64: 1, 1, 64>}, {transform_indices = @transform_12, window_bounds = array<i64: 1, 32, 64>}]} {
    %c0 = arith.constant 0 : index
    %c0_0 = arith.constant 0 : index
    %c0_1 = arith.constant 0 : index
    %0 = vector.load %arg1[%c0, %c0_0, %c0_1] : memref<1x64x32xf32, #tpu.memory_space<vmem>>, vector<1x64x32xf32>
    %1 = vector.shape_cast %0 : vector<1x64x32xf32> to vector<64x32xf32>
    %c0_2 = arith.constant 0 : index
    %c0_3 = arith.constant 0 : index
    %2 = vector.load %arg3[%c0_2, %c0_3] : memref<64x64xf32, #tpu.memory_space<vmem>>, vector<64x64xf32>
    %3 = arith.truncf %2 : vector<64x64xf32> to vector<64x64xbf16>
    %4 = arith.truncf %1 : vector<64x32xf32> to vector<64x32xbf16>
    %cst = arith.constant dense<0.000000e+00> : vector<64x32xf32>
    %5 = tpu.matmul %3, %4, %cst {dimension_numbers = #tpu.dot_dimension_numbers<[1], [0], [0], [1], [0, 0, 1, 1], [], []>} : vector<64x64xbf16>, vector<64x32xbf16>, vector<64x32xf32> -> vector<64x32xf32>
    %c0_4 = arith.constant 0 : index
    %c0_5 = arith.constant 0 : index
    %6 = vector.load %arg4[%c0_4, %c0_5] : memref<64x1xf32, #tpu.memory_space<vmem>>, vector<64x1xf32>
    %7 = vector.broadcast %6 : vector<64x1xf32> to vector<64x32xf32>
    %8 = arith.addf %5, %7 : vector<64x32xf32>
    %c0_6 = arith.constant 0 : index
    %c0_7 = arith.constant 0 : index
    %9 = vector.load %arg5[%c0_6, %c0_7] : memref<32x64xf32, #tpu.memory_space<vmem>>, vector<32x64xf32>
    %10 = arith.truncf %9 : vector<32x64xf32> to vector<32x64xbf16>
    %11 = arith.truncf %8 : vector<64x32xf32> to vector<64x32xbf16>
    %cst_8 = arith.constant dense<0.000000e+00> : vector<32x32xf32>
    %12 = tpu.matmul %10, %11, %cst_8 {dimension_numbers = #tpu.dot_dimension_numbers<[1], [0], [0], [1], [0, 0, 1, 1], [], []>} : vector<32x64xbf16>, vector<64x32xbf16>, vector<32x32xf32> -> vector<32x32xf32>
    %c0_9 = arith.constant 0 : index
    %c0_10 = arith.constant 0 : index
    %13 = vector.load %arg6[%c0_9, %c0_10] : memref<32x1xf32, #tpu.memory_space<vmem>>, vector<32x1xf32>
    %14 = vector.broadcast %13 : vector<32x1xf32> to vector<32x32xf32>
    %15 = arith.addf %12, %14 : vector<32x32xf32>
    %c0_11 = arith.constant 0 : index
    %c0_12 = arith.constant 0 : index
    %16 = vector.load %arg7[%c0_11, %c0_12] : memref<32x64xf32, #tpu.memory_space<vmem>>, vector<32x64xf32>
    %17 = arith.truncf %15 : vector<32x32xf32> to vector<32x32xbf16>
    %18 = arith.truncf %16 : vector<32x64xf32> to vector<32x64xbf16>
    %cst_13 = arith.constant dense<0.000000e+00> : vector<32x64xf32>
    %19 = tpu.matmul %17, %18, %cst_13 {dimension_numbers = #tpu.dot_dimension_numbers<[1], [0], [0], [1], [0, 0, 1, 1], [], []>} : vector<32x32xbf16>, vector<32x64xbf16>, vector<32x64xf32> -> vector<32x64xf32>
    %c0_14 = arith.constant 0 : index
    %c0_15 = arith.constant 0 : index
    %20 = vector.load %arg8[%c0_14, %c0_15] : memref<1x64xf32, #tpu.memory_space<vmem>>, vector<1x64xf32>
    %21 = vector.broadcast %20 : vector<1x64xf32> to vector<32x64xf32>
    %22 = arith.addf %19, %21 : vector<32x64xf32>
    %c0_16 = arith.constant 0 : index
    %c0_17 = arith.constant 0 : index
    %23 = vector.load %arg9[%c0_16, %c0_17] : memref<32x32xf32, #tpu.memory_space<vmem>>, vector<32x32xf32>
    %24 = arith.truncf %23 : vector<32x32xf32> to vector<32x32xbf16>
    %25 = arith.truncf %22 : vector<32x64xf32> to vector<32x64xbf16>
    %cst_18 = arith.constant dense<0.000000e+00> : vector<32x64xf32>
    %26 = tpu.matmul %24, %25, %cst_18 {dimension_numbers = #tpu.dot_dimension_numbers<[1], [0], [0], [1], [0, 0, 1, 1], [], []>} : vector<32x32xbf16>, vector<32x64xbf16>, vector<32x64xf32> -> vector<32x64xf32>
    %c0_19 = arith.constant 0 : index
    %c0_20 = arith.constant 0 : index
    %27 = vector.load %arg10[%c0_19, %c0_20] : memref<32x32xf32, #tpu.memory_space<vmem>>, vector<32x32xf32>
    %c0_21 = arith.constant 0 : index
    %c0_22 = arith.constant 0 : index
    %c0_23 = arith.constant 0 : index
    %28 = vector.load %arg2[%c0_21, %c0_22, %c0_23] : memref<1x32x64xf32, #tpu.memory_space<vmem>>, vector<1x32x64xf32>
    %29 = vector.shape_cast %28 : vector<1x32x64xf32> to vector<32x64xf32>
    %30 = arith.truncf %27 : vector<32x32xf32> to vector<32x32xbf16>
    %31 = arith.truncf %29 : vector<32x64xf32> to vector<32x64xbf16>
    %cst_24 = arith.constant dense<0.000000e+00> : vector<32x64xf32>
    %32 = tpu.matmul %30, %31, %cst_24 {dimension_numbers = #tpu.dot_dimension_numbers<[1], [0], [0], [1], [0, 0, 1, 1], [], []>} : vector<32x32xbf16>, vector<32x64xbf16>, vector<32x64xf32> -> vector<32x64xf32>
    %33 = arith.addf %26, %32 : vector<32x64xf32>
    %c0_25 = arith.constant 0 : index
    %c0_26 = arith.constant 0 : index
    %34 = vector.load %arg11[%c0_25, %c0_26] : memref<32x1xf32, #tpu.memory_space<vmem>>, vector<32x1xf32>
    %35 = vector.broadcast %34 : vector<32x1xf32> to vector<32x64xf32>
    %36 = arith.addf %33, %35 : vector<32x64xf32>
    %cst_27 = arith.constant 8.000000e+00 : f32
    %37 = vector.broadcast %cst_27 : f32 to vector<32x64xf32>
    %38 = arith.mulf %36, %37 : vector<32x64xf32>
    %c0_28 = arith.constant 0 : index
    %c0_29 = arith.constant 0 : index
    %c0_30 = arith.constant 0 : index
    %39 = vector.load %arg12[%c0_28, %c0_29, %c0_30] : memref<1x1x64xf32, #tpu.memory_space<vmem>>, vector<1x1x64xf32>
    %40 = vector.shape_cast %39 : vector<1x1x64xf32> to vector<1x64xf32>
    %41 = vector.broadcast %40 : vector<1x64xf32> to vector<32x64xf32>
    %42 = arith.addf %38, %41 : vector<32x64xf32>
    %c0_31 = arith.constant 0 : index
    %c0_32 = arith.constant 0 : index
    %c0_33 = arith.constant 0 : index
    %43 = vector.load %arg13[%c0_31, %c0_32, %c0_33] : memref<1x32x64xf32, #tpu.memory_space<vmem>>, vector<1x32x64xf32>
    %44 = vector.shape_cast %43 : vector<1x32x64xf32> to vector<32x64xf32>
    %45 = vector.shape_cast %42 : vector<32x64xf32> to vector<1x32x64xf32>
    tpu.vector_store %arg13[%c0_31, %c0_32, %c0_33], %45 {strides = array<i32>} : memref<1x32x64xf32, #tpu.memory_space<vmem>>, vector<1x32x64xf32>,
    return
  }
  func.func @transform_0(%arg0: i32) -> (i32, i32, i32) {
    %c0_i32 = arith.constant 0 : i32
    %c0_i32_0 = arith.constant 0 : i32
    %c0_i32_1 = arith.constant 0 : i32
    return %arg0, %c0_i32, %c0_i32_0 : i32, i32, i32
  }
  func.func @transform_1(%arg0: i32) -> (i32, i32, i32) {
    %c0_i32 = arith.constant 0 : i32
    %c0_i32_0 = arith.constant 0 : i32
    %c0_i32_1 = arith.constant 0 : i32
    return %arg0, %c0_i32, %c0_i32_0 : i32, i32, i32
  }
  func.func @transform_2(%arg0: i32) -> (i32, i32) {
    %c0_i32 = arith.constant 0 : i32
    %c0_i32_0 = arith.constant 0 : i32
    %c0_i32_1 = arith.constant 0 : i32
    return %c0_i32, %c0_i32_0 : i32, i32
  }
  func.func @transform_3(%arg0: i32) -> (i32, i32) {
    %c0_i32 = arith.constant 0 : i32
    %c0_i32_0 = arith.constant 0 : i32
    %c0_i32_1 = arith.constant 0 : i32
    return %c0_i32, %c0_i32_0 : i32, i32
  }
  func.func @transform_4(%arg0: i32) -> (i32, i32) {
    %c0_i32 = arith.constant 0 : i32
    %c0_i32_0 = arith.constant 0 : i32
    %c0_i32_1 = arith.constant 0 : i32
    return %c0_i32, %c0_i32_0 : i32, i32
  }
  func.func @transform_5(%arg0: i32) -> (i32, i32) {
    %c0_i32 = arith.constant 0 : i32
    %c0_i32_0 = arith.constant 0 : i32
    %c0_i32_1 = arith.constant 0 : i32
    return %c0_i32, %c0_i32_0 : i32, i32
  }
  func.func @transform_6(%arg0: i32) -> (i32, i32) {
    %c0_i32 = arith.constant 0 : i32
    %c0_i32_0 = arith.constant 0 : i32
    %c0_i32_1 = arith.constant 0 : i32
    return %c0_i32, %c0_i32_0 : i32, i32
  }
  func.func @transform_7(%arg0: i32) -> (i32, i32) {
    %c0_i32 = arith.constant 0 : i32
    %c0_i32_0 = arith.constant 0 : i32
    %c0_i32_1 = arith.constant 0 : i32
    return %c0_i32, %c0_i32_0 : i32, i32
  }
  func.func @transform_8(%arg0: i32) -> (i32, i32) {
    %c0_i32 = arith.constant 0 : i32
    %c0_i32_0 = arith.constant 0 : i32
    %c0_i32_1 = arith.constant 0 : i32
    return %c0_i32, %c0_i32_0 : i32, i32
  }
  func.func @transform_9(%arg0: i32) -> (i32, i32) {
    %c0_i32 = arith.constant 0 : i32
    %c0_i32_0 = arith.constant 0 : i32
    %c0_i32_1 = arith.constant 0 : i32
    return %c0_i32, %c0_i32_0 : i32, i32
  }
  func.func @transform_10(%arg0: i32) -> (i32, i32) {
    %c0_i32 = arith.constant 0 : i32
    %c0_i32_0 = arith.constant 0 : i32
    %c0_i32_1 = arith.constant 0 : i32
    return %c0_i32, %c0_i32_0 : i32, i32
  }
  func.func @transform_11(%arg0: i32) -> (i32, i32, i32) {
    %c0_i32 = arith.constant 0 : i32
    %c0_i32_0 = arith.constant 0 : i32
    %c0_i32_1 = arith.constant 0 : i32
    return %arg0, %c0_i32, %c0_i32_0 : i32, i32, i32
  }
  func.func @transform_12(%arg0: i32) -> (i32, i32, i32) {
    %c0_i32 = arith.constant 0 : i32
    %c0_i32_0 = arith.constant 0 : i32
    %c0_i32_1 = arith.constant 0 : i32
    return %arg0, %c0_i32, %c0_i32_0 : i32, i32, i32
  }
}

module attributes {stable_mosaic.version = 11 : i64} {
  func.func @_attn_block_kernel(%arg0: i32, %arg1: i32, %arg2: memref<1x4x16x64xf32, #tpu.memory_space<vmem>>, %arg3: memref<64x192xf32, #tpu.memory_space<vmem>>, %arg4: memref<1x192xf32, #tpu.memory_space<vmem>>, %arg5: memref<64x64xf32, #tpu.memory_space<vmem>>, %arg6: memref<1x64xf32, #tpu.memory_space<vmem>>, %arg7: memref<1x64xf32, #tpu.memory_space<vmem>>, %arg8: memref<1x64xf32, #tpu.memory_space<vmem>>, %arg9: memref<1x4x16x64xf32, #tpu.memory_space<vmem>>) attributes {dimension_semantics = [#tpu.dimension_semantics<parallel>, #tpu.dimension_semantics<parallel>], iteration_bounds = array<i64: 2, 2>, scalar_prefetch = 0 : i64, scratch_operands = 0 : i64, tpu.core_type = #tpu.core_type<tc>, window_params = [{transform_indices = @transform_0, window_bounds = array<i64: 1, 4, 16, 64>}, {pipeline_mode = #tpu.pipeline_mode<synchronous>, transform_indices = @transform_1, window_bounds = array<i64: 64, 192>}, {pipeline_mode = #tpu.pipeline_mode<synchronous>, transform_indices = @transform_2, window_bounds = array<i64: 1, 192>}, {pipeline_mode = #tpu.pipeline_mode<synchronous>, transform_indices = @transform_3, window_bounds = array<i64: 64, 64>}, {pipeline_mode = #tpu.pipeline_mode<synchronous>, transform_indices = @transform_4, window_bounds = array<i64: 1, 64>}, {pipeline_mode = #tpu.pipeline_mode<synchronous>, transform_indices = @transform_5, window_bounds = array<i64: 1, 64>}, {pipeline_mode = #tpu.pipeline_mode<synchronous>, transform_indices = @transform_6, window_bounds = array<i64: 1, 64>}, {transform_indices = @transform_7, window_bounds = array<i64: 1, 4, 16, 64>}]} {
    %c0 = arith.constant 0 : index
    %c0_0 = arith.constant 0 : index
    %c0_1 = arith.constant 0 : index
    %c0_2 = arith.constant 0 : index
    %0 = vector.load %arg2[%c0, %c0_0, %c0_1, %c0_2] : memref<1x4x16x64xf32, #tpu.memory_space<vmem>>, vector<1x4x16x64xf32>
    %1 = vector.shape_cast %0 : vector<1x4x16x64xf32> to vector<4x16x64xf32>
    %2 = vector.shape_cast %1 : vector<4x16x64xf32> to vector<64x64xf32>
    %c0_3 = arith.constant 0 : index
    %c0_4 = arith.constant 0 : index
    %3 = vector.load %arg3[%c0_3, %c0_4] : memref<64x192xf32, #tpu.memory_space<vmem>>, vector<64x192xf32>
    %4 = arith.truncf %2 : vector<64x64xf32> to vector<64x64xbf16>
    %5 = arith.truncf %3 : vector<64x192xf32> to vector<64x192xbf16>
    %cst = arith.constant dense<0.000000e+00> : vector<64x192xf32>
    %6 = tpu.matmul %4, %5, %cst {dimension_numbers = #tpu.dot_dimension_numbers<[1], [0], [0], [1], [0, 0, 1, 1], [], []>} : vector<64x64xbf16>, vector<64x192xbf16>, vector<64x192xf32> -> vector<64x192xf32>
    %c0_5 = arith.constant 0 : index
    %c0_6 = arith.constant 0 : index
    %7 = vector.load %arg4[%c0_5, %c0_6] : memref<1x192xf32, #tpu.memory_space<vmem>>, vector<1x192xf32>
    %8 = vector.broadcast %7 : vector<1x192xf32> to vector<64x192xf32>
    %9 = arith.addf %6, %8 : vector<64x192xf32>
    %c0_7 = arith.constant 0 : index
    %c0_8 = arith.constant 0 : index
    %10 = vector.load %arg5[%c0_7, %c0_8] : memref<64x64xf32, #tpu.memory_space<vmem>>, vector<64x64xf32>
    %cst_9 = arith.constant 0.000000e+00 : f32
    %11 = vector.broadcast %cst_9 : f32 to vector<64x64xf32>
    %12 = vector.extract_strided_slice %9 {offsets = [0, 0], sizes = [64, 16], strides = [1, 1]} : vector<64x192xf32> to vector<64x16xf32>
    %13 = vector.shape_cast %12 : vector<64x16xf32> to vector<4x16x16xf32>
    %14 = vector.extract_strided_slice %9 {offsets = [0, 64], sizes = [64, 16], strides = [1, 1]} : vector<64x192xf32> to vector<64x16xf32>
    %15 = vector.shape_cast %14 : vector<64x16xf32> to vector<4x16x16xf32>
    %16 = vector.extract_strided_slice %9 {offsets = [0, 128], sizes = [64, 16], strides = [1, 1]} : vector<64x192xf32> to vector<64x16xf32>
    %17 = vector.shape_cast %16 : vector<64x16xf32> to vector<4x16x16xf32>
    %18 = vector.shape_cast %15 : vector<4x16x16xf32> to vector<4x1x16x16xf32>
    %19 = vector.shape_cast %13 : vector<4x16x16xf32> to vector<1x4x16x16xf32>
    %20 = vector.broadcast %18 : vector<4x1x16x16xf32> to vector<4x4x16x16xf32>
    %21 = vector.broadcast %19 : vector<1x4x16x16xf32> to vector<4x4x16x16xf32>
    %22 = arith.mulf %20, %21 : vector<4x4x16x16xf32>
    %cst_10 = arith.constant dense<0.000000e+00> : vector<4x4x16xf32>
    %23 = vector.multi_reduction <add>, %22, %cst_10 [3] : vector<4x4x16x16xf32> to vector<4x4x16xf32>
    %24 = vector.shape_cast %23 : vector<4x4x16xf32> to vector<4x4x16x1xf32>
    %cst_11 = arith.constant 2.500000e-01 : f32
    %25 = vector.broadcast %cst_11 : f32 to vector<4x4x16x1xf32>
    %26 = arith.mulf %24, %25 : vector<4x4x16x1xf32>
    %cst_12 = arith.constant dense<0xFF800000> : vector<4x16x1xf32>
    %27 = vector.multi_reduction <maximumf>, %26, %cst_12 [0] : vector<4x4x16x1xf32> to vector<4x16x1xf32>
    %28 = vector.shape_cast %27 : vector<4x16x1xf32> to vector<1x4x16x1xf32>
    %29 = vector.broadcast %28 : vector<1x4x16x1xf32> to vector<4x4x16x1xf32>
    %30 = arith.subf %26, %29 : vector<4x4x16x1xf32>
    %31 = math.exp %30 : vector<4x4x16x1xf32>
    %cst_13 = arith.constant dense<0.000000e+00> : vector<4x16x1xf32>
    %32 = vector.multi_reduction <add>, %31, %cst_13 [0] : vector<4x4x16x1xf32> to vector<4x16x1xf32>
    %33 = vector.shape_cast %32 : vector<4x16x1xf32> to vector<1x4x16x1xf32>
    %34 = tpu.reciprocal %33 {approx = true} : vector<1x4x16x1xf32> -> vector<1x4x16x1xf32>
    %35 = vector.broadcast %34 : vector<1x4x16x1xf32> to vector<4x4x16x1xf32>
    %36 = arith.mulf %31, %35 : vector<4x4x16x1xf32>
    %37 = vector.shape_cast %17 : vector<4x16x16xf32> to vector<4x1x16x16xf32>
    %38 = vector.broadcast %36 : vector<4x4x16x1xf32> to vector<4x4x16x16xf32>
    %39 = vector.broadcast %37 : vector<4x1x16x16xf32> to vector<4x4x16x16xf32>
    %40 = arith.mulf %38, %39 : vector<4x4x16x16xf32>
    %cst_14 = arith.constant dense<0.000000e+00> : vector<4x16x16xf32>
    %41 = vector.multi_reduction <add>, %40, %cst_14 [0] : vector<4x4x16x16xf32> to vector<4x16x16xf32>
    %42 = vector.shape_cast %41 : vector<4x16x16xf32> to vector<64x16xf32>
    %43 = vector.extract_strided_slice %10 {offsets = [0, 0], sizes = [16, 64], strides = [1, 1]} : vector<64x64xf32> to vector<16x64xf32>
    %44 = arith.truncf %42 : vector<64x16xf32> to vector<64x16xbf16>
    %45 = arith.truncf %43 : vector<16x64xf32> to vector<16x64xbf16>
    %cst_15 = arith.constant dense<0.000000e+00> : vector<64x64xf32>
    %46 = tpu.matmul %44, %45, %cst_15 {dimension_numbers = #tpu.dot_dimension_numbers<[1], [0], [0], [1], [0, 0, 1, 1], [], []>} : vector<64x16xbf16>, vector<16x64xbf16>, vector<64x64xf32> -> vector<64x64xf32>
    %47 = arith.addf %11, %46 : vector<64x64xf32>
    %48 = vector.extract_strided_slice %9 {offsets = [0, 16], sizes = [64, 16], strides = [1, 1]} : vector<64x192xf32> to vector<64x16xf32>
    %49 = vector.shape_cast %48 : vector<64x16xf32> to vector<4x16x16xf32>
    %50 = vector.extract_strided_slice %9 {offsets = [0, 80], sizes = [64, 16], strides = [1, 1]} : vector<64x192xf32> to vector<64x16xf32>
    %51 = vector.shape_cast %50 : vector<64x16xf32> to vector<4x16x16xf32>
    %52 = vector.extract_strided_slice %9 {offsets = [0, 144], sizes = [64, 16], strides = [1, 1]} : vector<64x192xf32> to vector<64x16xf32>
    %53 = vector.shape_cast %52 : vector<64x16xf32> to vector<4x16x16xf32>
    %54 = vector.shape_cast %51 : vector<4x16x16xf32> to vector<4x1x16x16xf32>
    %55 = vector.shape_cast %49 : vector<4x16x16xf32> to vector<1x4x16x16xf32>
    %56 = vector.broadcast %54 : vector<4x1x16x16xf32> to vector<4x4x16x16xf32>
    %57 = vector.broadcast %55 : vector<1x4x16x16xf32> to vector<4x4x16x16xf32>
    %58 = arith.mulf %56, %57 : vector<4x4x16x16xf32>
    %cst_16 = arith.constant dense<0.000000e+00> : vector<4x4x16xf32>
    %59 = vector.multi_reduction <add>, %58, %cst_16 [3] : vector<4x4x16x16xf32> to vector<4x4x16xf32>
    %60 = vector.shape_cast %59 : vector<4x4x16xf32> to vector<4x4x16x1xf32>
    %cst_17 = arith.constant 2.500000e-01 : f32
    %61 = vector.broadcast %cst_17 : f32 to vector<4x4x16x1xf32>
    %62 = arith.mulf %60, %61 : vector<4x4x16x1xf32>
    %cst_18 = arith.constant dense<0xFF800000> : vector<4x16x1xf32>
    %63 = vector.multi_reduction <maximumf>, %62, %cst_18 [0] : vector<4x4x16x1xf32> to vector<4x16x1xf32>
    %64 = vector.shape_cast %63 : vector<4x16x1xf32> to vector<1x4x16x1xf32>
    %65 = vector.broadcast %64 : vector<1x4x16x1xf32> to vector<4x4x16x1xf32>
    %66 = arith.subf %62, %65 : vector<4x4x16x1xf32>
    %67 = math.exp %66 : vector<4x4x16x1xf32>
    %cst_19 = arith.constant dense<0.000000e+00> : vector<4x16x1xf32>
    %68 = vector.multi_reduction <add>, %67, %cst_19 [0] : vector<4x4x16x1xf32> to vector<4x16x1xf32>
    %69 = vector.shape_cast %68 : vector<4x16x1xf32> to vector<1x4x16x1xf32>
    %70 = tpu.reciprocal %69 {approx = true} : vector<1x4x16x1xf32> -> vector<1x4x16x1xf32>
    %71 = vector.broadcast %70 : vector<1x4x16x1xf32> to vector<4x4x16x1xf32>
    %72 = arith.mulf %67, %71 : vector<4x4x16x1xf32>
    %73 = vector.shape_cast %53 : vector<4x16x16xf32> to vector<4x1x16x16xf32>
    %74 = vector.broadcast %72 : vector<4x4x16x1xf32> to vector<4x4x16x16xf32>
    %75 = vector.broadcast %73 : vector<4x1x16x16xf32> to vector<4x4x16x16xf32>
    %76 = arith.mulf %74, %75 : vector<4x4x16x16xf32>
    %cst_20 = arith.constant dense<0.000000e+00> : vector<4x16x16xf32>
    %77 = vector.multi_reduction <add>, %76, %cst_20 [0] : vector<4x4x16x16xf32> to vector<4x16x16xf32>
    %78 = vector.shape_cast %77 : vector<4x16x16xf32> to vector<64x16xf32>
    %79 = vector.extract_strided_slice %10 {offsets = [16, 0], sizes = [16, 64], strides = [1, 1]} : vector<64x64xf32> to vector<16x64xf32>
    %80 = arith.truncf %78 : vector<64x16xf32> to vector<64x16xbf16>
    %81 = arith.truncf %79 : vector<16x64xf32> to vector<16x64xbf16>
    %cst_21 = arith.constant dense<0.000000e+00> : vector<64x64xf32>
    %82 = tpu.matmul %80, %81, %cst_21 {dimension_numbers = #tpu.dot_dimension_numbers<[1], [0], [0], [1], [0, 0, 1, 1], [], []>} : vector<64x16xbf16>, vector<16x64xbf16>, vector<64x64xf32> -> vector<64x64xf32>
    %83 = arith.addf %47, %82 : vector<64x64xf32>
    %84 = vector.extract_strided_slice %9 {offsets = [0, 32], sizes = [64, 16], strides = [1, 1]} : vector<64x192xf32> to vector<64x16xf32>
    %85 = vector.shape_cast %84 : vector<64x16xf32> to vector<4x16x16xf32>
    %86 = vector.extract_strided_slice %9 {offsets = [0, 96], sizes = [64, 16], strides = [1, 1]} : vector<64x192xf32> to vector<64x16xf32>
    %87 = vector.shape_cast %86 : vector<64x16xf32> to vector<4x16x16xf32>
    %88 = vector.extract_strided_slice %9 {offsets = [0, 160], sizes = [64, 16], strides = [1, 1]} : vector<64x192xf32> to vector<64x16xf32>
    %89 = vector.shape_cast %88 : vector<64x16xf32> to vector<4x16x16xf32>
    %90 = vector.shape_cast %87 : vector<4x16x16xf32> to vector<4x1x16x16xf32>
    %91 = vector.shape_cast %85 : vector<4x16x16xf32> to vector<1x4x16x16xf32>
    %92 = vector.broadcast %90 : vector<4x1x16x16xf32> to vector<4x4x16x16xf32>
    %93 = vector.broadcast %91 : vector<1x4x16x16xf32> to vector<4x4x16x16xf32>
    %94 = arith.mulf %92, %93 : vector<4x4x16x16xf32>
    %cst_22 = arith.constant dense<0.000000e+00> : vector<4x4x16xf32>
    %95 = vector.multi_reduction <add>, %94, %cst_22 [3] : vector<4x4x16x16xf32> to vector<4x4x16xf32>
    %96 = vector.shape_cast %95 : vector<4x4x16xf32> to vector<4x4x16x1xf32>
    %cst_23 = arith.constant 2.500000e-01 : f32
    %97 = vector.broadcast %cst_23 : f32 to vector<4x4x16x1xf32>
    %98 = arith.mulf %96, %97 : vector<4x4x16x1xf32>
    %cst_24 = arith.constant dense<0xFF800000> : vector<4x16x1xf32>
    %99 = vector.multi_reduction <maximumf>, %98, %cst_24 [0] : vector<4x4x16x1xf32> to vector<4x16x1xf32>
    %100 = vector.shape_cast %99 : vector<4x16x1xf32> to vector<1x4x16x1xf32>
    %101 = vector.broadcast %100 : vector<1x4x16x1xf32> to vector<4x4x16x1xf32>
    %102 = arith.subf %98, %101 : vector<4x4x16x1xf32>
    %103 = math.exp %102 : vector<4x4x16x1xf32>
    %cst_25 = arith.constant dense<0.000000e+00> : vector<4x16x1xf32>
    %104 = vector.multi_reduction <add>, %103, %cst_25 [0] : vector<4x4x16x1xf32> to vector<4x16x1xf32>
    %105 = vector.shape_cast %104 : vector<4x16x1xf32> to vector<1x4x16x1xf32>
    %106 = tpu.reciprocal %105 {approx = true} : vector<1x4x16x1xf32> -> vector<1x4x16x1xf32>
    %107 = vector.broadcast %106 : vector<1x4x16x1xf32> to vector<4x4x16x1xf32>
    %108 = arith.mulf %103, %107 : vector<4x4x16x1xf32>
    %109 = vector.shape_cast %89 : vector<4x16x16xf32> to vector<4x1x16x16xf32>
    %110 = vector.broadcast %108 : vector<4x4x16x1xf32> to vector<4x4x16x16xf32>
    %111 = vector.broadcast %109 : vector<4x1x16x16xf32> to vector<4x4x16x16xf32>
    %112 = arith.mulf %110, %111 : vector<4x4x16x16xf32>
    %cst_26 = arith.constant dense<0.000000e+00> : vector<4x16x16xf32>
    %113 = vector.multi_reduction <add>, %112, %cst_26 [0] : vector<4x4x16x16xf32> to vector<4x16x16xf32>
    %114 = vector.shape_cast %113 : vector<4x16x16xf32> to vector<64x16xf32>
    %115 = vector.extract_strided_slice %10 {offsets = [32, 0], sizes = [16, 64], strides = [1, 1]} : vector<64x64xf32> to vector<16x64xf32>
    %116 = arith.truncf %114 : vector<64x16xf32> to vector<64x16xbf16>
    %117 = arith.truncf %115 : vector<16x64xf32> to vector<16x64xbf16>
    %cst_27 = arith.constant dense<0.000000e+00> : vector<64x64xf32>
    %118 = tpu.matmul %116, %117, %cst_27 {dimension_numbers = #tpu.dot_dimension_numbers<[1], [0], [0], [1], [0, 0, 1, 1], [], []>} : vector<64x16xbf16>, vector<16x64xbf16>, vector<64x64xf32> -> vector<64x64xf32>
    %119 = arith.addf %83, %118 : vector<64x64xf32>
    %120 = vector.extract_strided_slice %9 {offsets = [0, 48], sizes = [64, 16], strides = [1, 1]} : vector<64x192xf32> to vector<64x16xf32>
    %121 = vector.shape_cast %120 : vector<64x16xf32> to vector<4x16x16xf32>
    %122 = vector.extract_strided_slice %9 {offsets = [0, 112], sizes = [64, 16], strides = [1, 1]} : vector<64x192xf32> to vector<64x16xf32>
    %123 = vector.shape_cast %122 : vector<64x16xf32> to vector<4x16x16xf32>
    %124 = vector.extract_strided_slice %9 {offsets = [0, 176], sizes = [64, 16], strides = [1, 1]} : vector<64x192xf32> to vector<64x16xf32>
    %125 = vector.shape_cast %124 : vector<64x16xf32> to vector<4x16x16xf32>
    %126 = vector.shape_cast %123 : vector<4x16x16xf32> to vector<4x1x16x16xf32>
    %127 = vector.shape_cast %121 : vector<4x16x16xf32> to vector<1x4x16x16xf32>
    %128 = vector.broadcast %126 : vector<4x1x16x16xf32> to vector<4x4x16x16xf32>
    %129 = vector.broadcast %127 : vector<1x4x16x16xf32> to vector<4x4x16x16xf32>
    %130 = arith.mulf %128, %129 : vector<4x4x16x16xf32>
    %cst_28 = arith.constant dense<0.000000e+00> : vector<4x4x16xf32>
    %131 = vector.multi_reduction <add>, %130, %cst_28 [3] : vector<4x4x16x16xf32> to vector<4x4x16xf32>
    %132 = vector.shape_cast %131 : vector<4x4x16xf32> to vector<4x4x16x1xf32>
    %cst_29 = arith.constant 2.500000e-01 : f32
    %133 = vector.broadcast %cst_29 : f32 to vector<4x4x16x1xf32>
    %134 = arith.mulf %132, %133 : vector<4x4x16x1xf32>
    %cst_30 = arith.constant dense<0xFF800000> : vector<4x16x1xf32>
    %135 = vector.multi_reduction <maximumf>, %134, %cst_30 [0] : vector<4x4x16x1xf32> to vector<4x16x1xf32>
    %136 = vector.shape_cast %135 : vector<4x16x1xf32> to vector<1x4x16x1xf32>
    %137 = vector.broadcast %136 : vector<1x4x16x1xf32> to vector<4x4x16x1xf32>
    %138 = arith.subf %134, %137 : vector<4x4x16x1xf32>
    %139 = math.exp %138 : vector<4x4x16x1xf32>
    %cst_31 = arith.constant dense<0.000000e+00> : vector<4x16x1xf32>
    %140 = vector.multi_reduction <add>, %139, %cst_31 [0] : vector<4x4x16x1xf32> to vector<4x16x1xf32>
    %141 = vector.shape_cast %140 : vector<4x16x1xf32> to vector<1x4x16x1xf32>
    %142 = tpu.reciprocal %141 {approx = true} : vector<1x4x16x1xf32> -> vector<1x4x16x1xf32>
    %143 = vector.broadcast %142 : vector<1x4x16x1xf32> to vector<4x4x16x1xf32>
    %144 = arith.mulf %139, %143 : vector<4x4x16x1xf32>
    %145 = vector.shape_cast %125 : vector<4x16x16xf32> to vector<4x1x16x16xf32>
    %146 = vector.broadcast %144 : vector<4x4x16x1xf32> to vector<4x4x16x16xf32>
    %147 = vector.broadcast %145 : vector<4x1x16x16xf32> to vector<4x4x16x16xf32>
    %148 = arith.mulf %146, %147 : vector<4x4x16x16xf32>
    %cst_32 = arith.constant dense<0.000000e+00> : vector<4x16x16xf32>
    %149 = vector.multi_reduction <add>, %148, %cst_32 [0] : vector<4x4x16x16xf32> to vector<4x16x16xf32>
    %150 = vector.shape_cast %149 : vector<4x16x16xf32> to vector<64x16xf32>
    %151 = vector.extract_strided_slice %10 {offsets = [48, 0], sizes = [16, 64], strides = [1, 1]} : vector<64x64xf32> to vector<16x64xf32>
    %152 = arith.truncf %150 : vector<64x16xf32> to vector<64x16xbf16>
    %153 = arith.truncf %151 : vector<16x64xf32> to vector<16x64xbf16>
    %cst_33 = arith.constant dense<0.000000e+00> : vector<64x64xf32>
    %154 = tpu.matmul %152, %153, %cst_33 {dimension_numbers = #tpu.dot_dimension_numbers<[1], [0], [0], [1], [0, 0, 1, 1], [], []>} : vector<64x16xbf16>, vector<16x64xbf16>, vector<64x64xf32> -> vector<64x64xf32>
    %155 = arith.addf %119, %154 : vector<64x64xf32>
    %c0_34 = arith.constant 0 : index
    %c0_35 = arith.constant 0 : index
    %156 = vector.load %arg6[%c0_34, %c0_35] : memref<1x64xf32, #tpu.memory_space<vmem>>, vector<1x64xf32>
    %157 = vector.broadcast %156 : vector<1x64xf32> to vector<64x64xf32>
    %158 = arith.addf %155, %157 : vector<64x64xf32>
    %159 = arith.addf %2, %158 : vector<64x64xf32>
    %c0_36 = arith.constant 0 : index
    %c0_37 = arith.constant 0 : index
    %160 = vector.load %arg7[%c0_36, %c0_37] : memref<1x64xf32, #tpu.memory_space<vmem>>, vector<1x64xf32>
    %c0_38 = arith.constant 0 : index
    %c0_39 = arith.constant 0 : index
    %161 = vector.load %arg8[%c0_38, %c0_39] : memref<1x64xf32, #tpu.memory_space<vmem>>, vector<1x64xf32>
    %cst_40 = arith.constant dense<0.000000e+00> : vector<64xf32>
    %162 = vector.multi_reduction <add>, %159, %cst_40 [1] : vector<64x64xf32> to vector<64xf32>
    %163 = vector.shape_cast %162 : vector<64xf32> to vector<64x1xf32>
    %cst_41 = arith.constant 6.400000e+01 : f32
    %164 = vector.broadcast %cst_41 : f32 to vector<64x1xf32>
    %165 = arith.divf %163, %164 : vector<64x1xf32>
    %166 = vector.broadcast %165 : vector<64x1xf32> to vector<64x64xf32>
    %167 = arith.subf %159, %166 : vector<64x64xf32>
    %168 = arith.mulf %167, %167 : vector<64x64xf32>
    %cst_42 = arith.constant dense<0.000000e+00> : vector<64xf32>
    %169 = vector.multi_reduction <add>, %168, %cst_42 [1] : vector<64x64xf32> to vector<64xf32>
    %170 = vector.shape_cast %169 : vector<64xf32> to vector<64x1xf32>
    %cst_43 = arith.constant 6.400000e+01 : f32
    %171 = vector.broadcast %cst_43 : f32 to vector<64x1xf32>
    %172 = arith.divf %170, %171 : vector<64x1xf32>
    %cst_44 = arith.constant 9.99999974E-6 : f32
    %173 = vector.broadcast %cst_44 : f32 to vector<64x1xf32>
    %174 = arith.addf %172, %173 : vector<64x1xf32>
    %175 = math.rsqrt %174 : vector<64x1xf32>
    %176 = vector.broadcast %175 : vector<64x1xf32> to vector<64x64xf32>
    %177 = arith.mulf %167, %176 : vector<64x64xf32>
    %178 = vector.broadcast %160 : vector<1x64xf32> to vector<64x64xf32>
    %179 = arith.mulf %177, %178 : vector<64x64xf32>
    %180 = vector.broadcast %161 : vector<1x64xf32> to vector<64x64xf32>
    %181 = arith.addf %179, %180 : vector<64x64xf32>
    %182 = vector.shape_cast %181 : vector<64x64xf32> to vector<4x16x64xf32>
    %c0_45 = arith.constant 0 : index
    %c0_46 = arith.constant 0 : index
    %c0_47 = arith.constant 0 : index
    %c0_48 = arith.constant 0 : index
    %183 = vector.load %arg9[%c0_45, %c0_46, %c0_47, %c0_48] : memref<1x4x16x64xf32, #tpu.memory_space<vmem>>, vector<1x4x16x64xf32>
    %184 = vector.shape_cast %183 : vector<1x4x16x64xf32> to vector<4x16x64xf32>
    %185 = vector.shape_cast %182 : vector<4x16x64xf32> to vector<1x4x16x64xf32>
    tpu.vector_store %arg9[%c0_45, %c0_46, %c0_47, %c0_48], %185 {strides = array<i32>} : memref<1x4x16x64xf32, #tpu.memory_space<vmem>>, vector<1x4x16x64xf32>,
    return
  }
  func.func @transform_0(%arg0: i32, %arg1: i32) -> (i32, i32, i32, i32) {
    %c0_i32 = arith.constant 0 : i32
    %c0_i32_0 = arith.constant 0 : i32
    %c0_i32_1 = arith.constant 0 : i32
    return %arg0, %c0_i32, %arg1, %c0_i32_0 : i32, i32, i32, i32
  }
  func.func @transform_1(%arg0: i32, %arg1: i32) -> (i32, i32) {
    %c0_i32 = arith.constant 0 : i32
    %c0_i32_0 = arith.constant 0 : i32
    %c0_i32_1 = arith.constant 0 : i32
    return %c0_i32, %c0_i32_0 : i32, i32
  }
  func.func @transform_2(%arg0: i32, %arg1: i32) -> (i32, i32) {
    %c0_i32 = arith.constant 0 : i32
    %c0_i32_0 = arith.constant 0 : i32
    %c0_i32_1 = arith.constant 0 : i32
    return %c0_i32, %c0_i32_0 : i32, i32
  }
  func.func @transform_3(%arg0: i32, %arg1: i32) -> (i32, i32) {
    %c0_i32 = arith.constant 0 : i32
    %c0_i32_0 = arith.constant 0 : i32
    %c0_i32_1 = arith.constant 0 : i32
    return %c0_i32, %c0_i32_0 : i32, i32
  }
  func.func @transform_4(%arg0: i32, %arg1: i32) -> (i32, i32) {
    %c0_i32 = arith.constant 0 : i32
    %c0_i32_0 = arith.constant 0 : i32
    %c0_i32_1 = arith.constant 0 : i32
    return %c0_i32, %c0_i32_0 : i32, i32
  }
  func.func @transform_5(%arg0: i32, %arg1: i32) -> (i32, i32) {
    %c0_i32 = arith.constant 0 : i32
    %c0_i32_0 = arith.constant 0 : i32
    %c0_i32_1 = arith.constant 0 : i32
    return %c0_i32, %c0_i32_0 : i32, i32
  }
  func.func @transform_6(%arg0: i32, %arg1: i32) -> (i32, i32) {
    %c0_i32 = arith.constant 0 : i32
    %c0_i32_0 = arith.constant 0 : i32
    %c0_i32_1 = arith.constant 0 : i32
    return %c0_i32, %c0_i32_0 : i32, i32
  }
  func.func @transform_7(%arg0: i32, %arg1: i32) -> (i32, i32, i32, i32) {
    %c0_i32 = arith.constant 0 : i32
    %c0_i32_0 = arith.constant 0 : i32
    %c0_i32_1 = arith.constant 0 : i32
    return %arg0, %c0_i32, %arg1, %c0_i32_0 : i32, i32, i32, i32
  }
}

module attributes {stable_mosaic.version = 11 : i64} {
  func.func @_ffn_block_kernel(%arg0: i32, %arg1: i32, %arg2: memref<1x4x16x64xf32, #tpu.memory_space<vmem>>, %arg3: memref<64x64xf32, #tpu.memory_space<vmem>>, %arg4: memref<1x64xf32, #tpu.memory_space<vmem>>, %arg5: memref<64x64xf32, #tpu.memory_space<vmem>>, %arg6: memref<1x64xf32, #tpu.memory_space<vmem>>, %arg7: memref<1x64xf32, #tpu.memory_space<vmem>>, %arg8: memref<1x64xf32, #tpu.memory_space<vmem>>, %arg9: memref<1x4x16x64xf32, #tpu.memory_space<vmem>>) attributes {dimension_semantics = [#tpu.dimension_semantics<parallel>, #tpu.dimension_semantics<parallel>], iteration_bounds = array<i64: 2, 2>, scalar_prefetch = 0 : i64, scratch_operands = 0 : i64, tpu.core_type = #tpu.core_type<tc>, window_params = [{transform_indices = @transform_0, window_bounds = array<i64: 1, 4, 16, 64>}, {pipeline_mode = #tpu.pipeline_mode<synchronous>, transform_indices = @transform_1, window_bounds = array<i64: 64, 64>}, {pipeline_mode = #tpu.pipeline_mode<synchronous>, transform_indices = @transform_2, window_bounds = array<i64: 1, 64>}, {pipeline_mode = #tpu.pipeline_mode<synchronous>, transform_indices = @transform_3, window_bounds = array<i64: 64, 64>}, {pipeline_mode = #tpu.pipeline_mode<synchronous>, transform_indices = @transform_4, window_bounds = array<i64: 1, 64>}, {pipeline_mode = #tpu.pipeline_mode<synchronous>, transform_indices = @transform_5, window_bounds = array<i64: 1, 64>}, {pipeline_mode = #tpu.pipeline_mode<synchronous>, transform_indices = @transform_6, window_bounds = array<i64: 1, 64>}, {transform_indices = @transform_7, window_bounds = array<i64: 1, 4, 16, 64>}]} {
    %c0 = arith.constant 0 : index
    %c0_0 = arith.constant 0 : index
    %c0_1 = arith.constant 0 : index
    %c0_2 = arith.constant 0 : index
    %0 = vector.load %arg2[%c0, %c0_0, %c0_1, %c0_2] : memref<1x4x16x64xf32, #tpu.memory_space<vmem>>, vector<1x4x16x64xf32>
    %1 = vector.shape_cast %0 : vector<1x4x16x64xf32> to vector<4x16x64xf32>
    %2 = vector.shape_cast %1 : vector<4x16x64xf32> to vector<64x64xf32>
    %c0_3 = arith.constant 0 : index
    %c0_4 = arith.constant 0 : index
    %3 = vector.load %arg3[%c0_3, %c0_4] : memref<64x64xf32, #tpu.memory_space<vmem>>, vector<64x64xf32>
    %4 = arith.truncf %2 : vector<64x64xf32> to vector<64x64xbf16>
    %5 = arith.truncf %3 : vector<64x64xf32> to vector<64x64xbf16>
    %cst = arith.constant dense<0.000000e+00> : vector<64x64xf32>
    %6 = tpu.matmul %4, %5, %cst {dimension_numbers = #tpu.dot_dimension_numbers<[1], [0], [0], [1], [0, 0, 1, 1], [], []>} : vector<64x64xbf16>, vector<64x64xbf16>, vector<64x64xf32> -> vector<64x64xf32>
    %c0_5 = arith.constant 0 : index
    %c0_6 = arith.constant 0 : index
    %7 = vector.load %arg4[%c0_5, %c0_6] : memref<1x64xf32, #tpu.memory_space<vmem>>, vector<1x64xf32>
    %8 = vector.broadcast %7 : vector<1x64xf32> to vector<64x64xf32>
    %9 = arith.addf %6, %8 : vector<64x64xf32>
    %cst_7 = arith.constant 0.000000e+00 : f32
    %10 = vector.broadcast %cst_7 : f32 to vector<64x64xf32>
    %11 = arith.maximumf %9, %10 : vector<64x64xf32>
    %c0_8 = arith.constant 0 : index
    %c0_9 = arith.constant 0 : index
    %12 = vector.load %arg5[%c0_8, %c0_9] : memref<64x64xf32, #tpu.memory_space<vmem>>, vector<64x64xf32>
    %13 = arith.truncf %11 : vector<64x64xf32> to vector<64x64xbf16>
    %14 = arith.truncf %12 : vector<64x64xf32> to vector<64x64xbf16>
    %cst_10 = arith.constant dense<0.000000e+00> : vector<64x64xf32>
    %15 = tpu.matmul %13, %14, %cst_10 {dimension_numbers = #tpu.dot_dimension_numbers<[1], [0], [0], [1], [0, 0, 1, 1], [], []>} : vector<64x64xbf16>, vector<64x64xbf16>, vector<64x64xf32> -> vector<64x64xf32>
    %c0_11 = arith.constant 0 : index
    %c0_12 = arith.constant 0 : index
    %16 = vector.load %arg6[%c0_11, %c0_12] : memref<1x64xf32, #tpu.memory_space<vmem>>, vector<1x64xf32>
    %17 = vector.broadcast %16 : vector<1x64xf32> to vector<64x64xf32>
    %18 = arith.addf %15, %17 : vector<64x64xf32>
    %19 = arith.addf %2, %18 : vector<64x64xf32>
    %c0_13 = arith.constant 0 : index
    %c0_14 = arith.constant 0 : index
    %20 = vector.load %arg7[%c0_13, %c0_14] : memref<1x64xf32, #tpu.memory_space<vmem>>, vector<1x64xf32>
    %c0_15 = arith.constant 0 : index
    %c0_16 = arith.constant 0 : index
    %21 = vector.load %arg8[%c0_15, %c0_16] : memref<1x64xf32, #tpu.memory_space<vmem>>, vector<1x64xf32>
    %cst_17 = arith.constant dense<0.000000e+00> : vector<64xf32>
    %22 = vector.multi_reduction <add>, %19, %cst_17 [1] : vector<64x64xf32> to vector<64xf32>
    %23 = vector.shape_cast %22 : vector<64xf32> to vector<64x1xf32>
    %cst_18 = arith.constant 6.400000e+01 : f32
    %24 = vector.broadcast %cst_18 : f32 to vector<64x1xf32>
    %25 = arith.divf %23, %24 : vector<64x1xf32>
    %26 = vector.broadcast %25 : vector<64x1xf32> to vector<64x64xf32>
    %27 = arith.subf %19, %26 : vector<64x64xf32>
    %28 = arith.mulf %27, %27 : vector<64x64xf32>
    %cst_19 = arith.constant dense<0.000000e+00> : vector<64xf32>
    %29 = vector.multi_reduction <add>, %28, %cst_19 [1] : vector<64x64xf32> to vector<64xf32>
    %30 = vector.shape_cast %29 : vector<64xf32> to vector<64x1xf32>
    %cst_20 = arith.constant 6.400000e+01 : f32
    %31 = vector.broadcast %cst_20 : f32 to vector<64x1xf32>
    %32 = arith.divf %30, %31 : vector<64x1xf32>
    %cst_21 = arith.constant 9.99999974E-6 : f32
    %33 = vector.broadcast %cst_21 : f32 to vector<64x1xf32>
    %34 = arith.addf %32, %33 : vector<64x1xf32>
    %35 = math.rsqrt %34 : vector<64x1xf32>
    %36 = vector.broadcast %35 : vector<64x1xf32> to vector<64x64xf32>
    %37 = arith.mulf %27, %36 : vector<64x64xf32>
    %38 = vector.broadcast %20 : vector<1x64xf32> to vector<64x64xf32>
    %39 = arith.mulf %37, %38 : vector<64x64xf32>
    %40 = vector.broadcast %21 : vector<1x64xf32> to vector<64x64xf32>
    %41 = arith.addf %39, %40 : vector<64x64xf32>
    %42 = vector.shape_cast %41 : vector<64x64xf32> to vector<4x16x64xf32>
    %c0_22 = arith.constant 0 : index
    %c0_23 = arith.constant 0 : index
    %c0_24 = arith.constant 0 : index
    %c0_25 = arith.constant 0 : index
    %43 = vector.load %arg9[%c0_22, %c0_23, %c0_24, %c0_25] : memref<1x4x16x64xf32, #tpu.memory_space<vmem>>, vector<1x4x16x64xf32>
    %44 = vector.shape_cast %43 : vector<1x4x16x64xf32> to vector<4x16x64xf32>
    %45 = vector.shape_cast %42 : vector<4x16x64xf32> to vector<1x4x16x64xf32>
    tpu.vector_store %arg9[%c0_22, %c0_23, %c0_24, %c0_25], %45 {strides = array<i32>} : memref<1x4x16x64xf32, #tpu.memory_space<vmem>>, vector<1x4x16x64xf32>,
    return
  }
  func.func @transform_0(%arg0: i32, %arg1: i32) -> (i32, i32, i32, i32) {
    %c0_i32 = arith.constant 0 : i32
    %c0_i32_0 = arith.constant 0 : i32
    %c0_i32_1 = arith.constant 0 : i32
    return %arg0, %c0_i32, %arg1, %c0_i32_0 : i32, i32, i32, i32
  }
  func.func @transform_1(%arg0: i32, %arg1: i32) -> (i32, i32) {
    %c0_i32 = arith.constant 0 : i32
    %c0_i32_0 = arith.constant 0 : i32
    %c0_i32_1 = arith.constant 0 : i32
    return %c0_i32, %c0_i32_0 : i32, i32
  }
  func.func @transform_2(%arg0: i32, %arg1: i32) -> (i32, i32) {
    %c0_i32 = arith.constant 0 : i32
    %c0_i32_0 = arith.constant 0 : i32
    %c0_i32_1 = arith.constant 0 : i32
    return %c0_i32, %c0_i32_0 : i32, i32
  }
  func.func @transform_3(%arg0: i32, %arg1: i32) -> (i32, i32) {
    %c0_i32 = arith.constant 0 : i32
    %c0_i32_0 = arith.constant 0 : i32
    %c0_i32_1 = arith.constant 0 : i32
    return %c0_i32, %c0_i32_0 : i32, i32
  }
  func.func @transform_4(%arg0: i32, %arg1: i32) -> (i32, i32) {
    %c0_i32 = arith.constant 0 : i32
    %c0_i32_0 = arith.constant 0 : i32
    %c0_i32_1 = arith.constant 0 : i32
    return %c0_i32, %c0_i32_0 : i32, i32
  }
  func.func @transform_5(%arg0: i32, %arg1: i32) -> (i32, i32) {
    %c0_i32 = arith.constant 0 : i32
    %c0_i32_0 = arith.constant 0 : i32
    %c0_i32_1 = arith.constant 0 : i32
    return %c0_i32, %c0_i32_0 : i32, i32
  }
  func.func @transform_6(%arg0: i32, %arg1: i32) -> (i32, i32) {
    %c0_i32 = arith.constant 0 : i32
    %c0_i32_0 = arith.constant 0 : i32
    %c0_i32_1 = arith.constant 0 : i32
    return %c0_i32, %c0_i32_0 : i32, i32
  }
  func.func @transform_7(%arg0: i32, %arg1: i32) -> (i32, i32, i32, i32) {
    %c0_i32 = arith.constant 0 : i32
    %c0_i32_0 = arith.constant 0 : i32
    %c0_i32_1 = arith.constant 0 : i32
    return %arg0, %c0_i32, %arg1, %c0_i32_0 : i32, i32, i32, i32
  }
}

module attributes {stable_mosaic.version = 11 : i64} {
  func.func @_ffn_block_kernel(%arg0: i32, %arg1: i32, %arg2: memref<1x4x16x64xf32, #tpu.memory_space<vmem>>, %arg3: memref<64x64xf32, #tpu.memory_space<vmem>>, %arg4: memref<1x64xf32, #tpu.memory_space<vmem>>, %arg5: memref<64x64xf32, #tpu.memory_space<vmem>>, %arg6: memref<1x64xf32, #tpu.memory_space<vmem>>, %arg7: memref<1x64xf32, #tpu.memory_space<vmem>>, %arg8: memref<1x64xf32, #tpu.memory_space<vmem>>, %arg9: memref<1x4x16x64xf32, #tpu.memory_space<vmem>>) attributes {dimension_semantics = [#tpu.dimension_semantics<parallel>, #tpu.dimension_semantics<parallel>], iteration_bounds = array<i64: 2, 2>, scalar_prefetch = 0 : i64, scratch_operands = 0 : i64, tpu.core_type = #tpu.core_type<tc>, window_params = [{transform_indices = @transform_0, window_bounds = array<i64: 1, 4, 16, 64>}, {pipeline_mode = #tpu.pipeline_mode<synchronous>, transform_indices = @transform_1, window_bounds = array<i64: 64, 64>}, {pipeline_mode = #tpu.pipeline_mode<synchronous>, transform_indices = @transform_2, window_bounds = array<i64: 1, 64>}, {pipeline_mode = #tpu.pipeline_mode<synchronous>, transform_indices = @transform_3, window_bounds = array<i64: 64, 64>}, {pipeline_mode = #tpu.pipeline_mode<synchronous>, transform_indices = @transform_4, window_bounds = array<i64: 1, 64>}, {pipeline_mode = #tpu.pipeline_mode<synchronous>, transform_indices = @transform_5, window_bounds = array<i64: 1, 64>}, {pipeline_mode = #tpu.pipeline_mode<synchronous>, transform_indices = @transform_6, window_bounds = array<i64: 1, 64>}, {transform_indices = @transform_7, window_bounds = array<i64: 1, 4, 16, 64>}]} {
    %c0 = arith.constant 0 : index
    %c0_0 = arith.constant 0 : index
    %c0_1 = arith.constant 0 : index
    %c0_2 = arith.constant 0 : index
    %0 = vector.load %arg2[%c0, %c0_0, %c0_1, %c0_2] : memref<1x4x16x64xf32, #tpu.memory_space<vmem>>, vector<1x4x16x64xf32>
    %1 = vector.shape_cast %0 : vector<1x4x16x64xf32> to vector<4x16x64xf32>
    %2 = vector.shape_cast %1 : vector<4x16x64xf32> to vector<64x64xf32>
    %c0_3 = arith.constant 0 : index
    %c0_4 = arith.constant 0 : index
    %3 = vector.load %arg3[%c0_3, %c0_4] : memref<64x64xf32, #tpu.memory_space<vmem>>, vector<64x64xf32>
    %4 = arith.truncf %2 : vector<64x64xf32> to vector<64x64xbf16>
    %5 = arith.truncf %3 : vector<64x64xf32> to vector<64x64xbf16>
    %cst = arith.constant dense<0.000000e+00> : vector<64x64xf32>
    %6 = tpu.matmul %4, %5, %cst {dimension_numbers = #tpu.dot_dimension_numbers<[1], [0], [0], [1], [0, 0, 1, 1], [], []>} : vector<64x64xbf16>, vector<64x64xbf16>, vector<64x64xf32> -> vector<64x64xf32>
    %c0_5 = arith.constant 0 : index
    %c0_6 = arith.constant 0 : index
    %7 = vector.load %arg4[%c0_5, %c0_6] : memref<1x64xf32, #tpu.memory_space<vmem>>, vector<1x64xf32>
    %8 = vector.broadcast %7 : vector<1x64xf32> to vector<64x64xf32>
    %9 = arith.addf %6, %8 : vector<64x64xf32>
    %cst_7 = arith.constant 0.000000e+00 : f32
    %10 = vector.broadcast %cst_7 : f32 to vector<64x64xf32>
    %11 = arith.maximumf %9, %10 : vector<64x64xf32>
    %c0_8 = arith.constant 0 : index
    %c0_9 = arith.constant 0 : index
    %12 = vector.load %arg5[%c0_8, %c0_9] : memref<64x64xf32, #tpu.memory_space<vmem>>, vector<64x64xf32>
    %13 = arith.truncf %11 : vector<64x64xf32> to vector<64x64xbf16>
    %14 = arith.truncf %12 : vector<64x64xf32> to vector<64x64xbf16>
    %cst_10 = arith.constant dense<0.000000e+00> : vector<64x64xf32>
    %15 = tpu.matmul %13, %14, %cst_10 {dimension_numbers = #tpu.dot_dimension_numbers<[1], [0], [0], [1], [0, 0, 1, 1], [], []>} : vector<64x64xbf16>, vector<64x64xbf16>, vector<64x64xf32> -> vector<64x64xf32>
    %c0_11 = arith.constant 0 : index
    %c0_12 = arith.constant 0 : index
    %16 = vector.load %arg6[%c0_11, %c0_12] : memref<1x64xf32, #tpu.memory_space<vmem>>, vector<1x64xf32>
    %17 = vector.broadcast %16 : vector<1x64xf32> to vector<64x64xf32>
    %18 = arith.addf %15, %17 : vector<64x64xf32>
    %19 = arith.addf %2, %18 : vector<64x64xf32>
    %c0_13 = arith.constant 0 : index
    %c0_14 = arith.constant 0 : index
    %20 = vector.load %arg7[%c0_13, %c0_14] : memref<1x64xf32, #tpu.memory_space<vmem>>, vector<1x64xf32>
    %c0_15 = arith.constant 0 : index
    %c0_16 = arith.constant 0 : index
    %21 = vector.load %arg8[%c0_15, %c0_16] : memref<1x64xf32, #tpu.memory_space<vmem>>, vector<1x64xf32>
    %cst_17 = arith.constant dense<0.000000e+00> : vector<64xf32>
    %22 = vector.multi_reduction <add>, %19, %cst_17 [1] : vector<64x64xf32> to vector<64xf32>
    %23 = vector.shape_cast %22 : vector<64xf32> to vector<64x1xf32>
    %cst_18 = arith.constant 6.400000e+01 : f32
    %24 = vector.broadcast %cst_18 : f32 to vector<64x1xf32>
    %25 = arith.divf %23, %24 : vector<64x1xf32>
    %26 = vector.broadcast %25 : vector<64x1xf32> to vector<64x64xf32>
    %27 = arith.subf %19, %26 : vector<64x64xf32>
    %28 = arith.mulf %27, %27 : vector<64x64xf32>
    %cst_19 = arith.constant dense<0.000000e+00> : vector<64xf32>
    %29 = vector.multi_reduction <add>, %28, %cst_19 [1] : vector<64x64xf32> to vector<64xf32>
    %30 = vector.shape_cast %29 : vector<64xf32> to vector<64x1xf32>
    %cst_20 = arith.constant 6.400000e+01 : f32
    %31 = vector.broadcast %cst_20 : f32 to vector<64x1xf32>
    %32 = arith.divf %30, %31 : vector<64x1xf32>
    %cst_21 = arith.constant 9.99999974E-6 : f32
    %33 = vector.broadcast %cst_21 : f32 to vector<64x1xf32>
    %34 = arith.addf %32, %33 : vector<64x1xf32>
    %35 = math.rsqrt %34 : vector<64x1xf32>
    %36 = vector.broadcast %35 : vector<64x1xf32> to vector<64x64xf32>
    %37 = arith.mulf %27, %36 : vector<64x64xf32>
    %38 = vector.broadcast %20 : vector<1x64xf32> to vector<64x64xf32>
    %39 = arith.mulf %37, %38 : vector<64x64xf32>
    %40 = vector.broadcast %21 : vector<1x64xf32> to vector<64x64xf32>
    %41 = arith.addf %39, %40 : vector<64x64xf32>
    %42 = vector.shape_cast %41 : vector<64x64xf32> to vector<4x16x64xf32>
    %c0_22 = arith.constant 0 : index
    %c0_23 = arith.constant 0 : index
    %c0_24 = arith.constant 0 : index
    %c0_25 = arith.constant 0 : index
    %43 = vector.load %arg9[%c0_22, %c0_23, %c0_24, %c0_25] : memref<1x4x16x64xf32, #tpu.memory_space<vmem>>, vector<1x4x16x64xf32>
    %44 = vector.shape_cast %43 : vector<1x4x16x64xf32> to vector<4x16x64xf32>
    %45 = vector.shape_cast %42 : vector<4x16x64xf32> to vector<1x4x16x64xf32>
    tpu.vector_store %arg9[%c0_22, %c0_23, %c0_24, %c0_25], %45 {strides = array<i32>} : memref<1x4x16x64xf32, #tpu.memory_space<vmem>>, vector<1x4x16x64xf32>,
    return
  }
  func.func @transform_0(%arg0: i32, %arg1: i32) -> (i32, i32, i32, i32) {
    %c0_i32 = arith.constant 0 : i32
    %c0_i32_0 = arith.constant 0 : i32
    %c0_i32_1 = arith.constant 0 : i32
    return %arg0, %c0_i32, %arg1, %c0_i32_0 : i32, i32, i32, i32
  }
  func.func @transform_1(%arg0: i32, %arg1: i32) -> (i32, i32) {
    %c0_i32 = arith.constant 0 : i32
    %c0_i32_0 = arith.constant 0 : i32
    %c0_i32_1 = arith.constant 0 : i32
    return %c0_i32, %c0_i32_0 : i32, i32
  }
  func.func @transform_2(%arg0: i32, %arg1: i32) -> (i32, i32) {
    %c0_i32 = arith.constant 0 : i32
    %c0_i32_0 = arith.constant 0 : i32
    %c0_i32_1 = arith.constant 0 : i32
    return %c0_i32, %c0_i32_0 : i32, i32
  }
  func.func @transform_3(%arg0: i32, %arg1: i32) -> (i32, i32) {
    %c0_i32 = arith.constant 0 : i32
    %c0_i32_0 = arith.constant 0 : i32
    %c0_i32_1 = arith.constant 0 : i32
    return %c0_i32, %c0_i32_0 : i32, i32
  }
  func.func @transform_4(%arg0: i32, %arg1: i32) -> (i32, i32) {
    %c0_i32 = arith.constant 0 : i32
    %c0_i32_0 = arith.constant 0 : i32
    %c0_i32_1 = arith.constant 0 : i32
    return %c0_i32, %c0_i32_0 : i32, i32
  }
  func.func @transform_5(%arg0: i32, %arg1: i32) -> (i32, i32) {
    %c0_i32 = arith.constant 0 : i32
    %c0_i32_0 = arith.constant 0 : i32
    %c0_i32_1 = arith.constant 0 : i32
    return %c0_i32, %c0_i32_0 : i32, i32
  }
  func.func @transform_6(%arg0: i32, %arg1: i32) -> (i32, i32) {
    %c0_i32 = arith.constant 0 : i32
    %c0_i32_0 = arith.constant 0 : i32
    %c0_i32_1 = arith.constant 0 : i32
    return %c0_i32, %c0_i32_0 : i32, i32
  }
  func.func @transform_7(%arg0: i32, %arg1: i32) -> (i32, i32, i32, i32) {
    %c0_i32 = arith.constant 0 : i32
    %c0_i32_0 = arith.constant 0 : i32
    %c0_i32_1 = arith.constant 0 : i32
    return %arg0, %c0_i32, %arg1, %c0_i32_0 : i32, i32, i32, i32
  }
}

</mosaic_0001>

<bundles_post_ra>
// kernel: combine_tensors_forward.11
= control target key start
LH: loop header
LB: loop body
LE: loop exit
PB: predicated region body
PF: predicated region fallthrough
CT: control target
= control target key end

     0   :  { %s1118_s24 = smov 0   ;;  %s1120_s25 = smov 0   ;;  %s1410_s0 = inlined_call_operand.vmem [shape: f32[2,4,32,64], index: 0, kind: input, shape index: {}]   ;;  %s1411_s1 = inlined_call_operand.vmem [shape: f32[64,64], index: 1, kind: input, shape index: {}]   ;;  %s1412_s2 = inlined_call_operand.vmem [shape: f32[1,64], index: 2, kind: input, shape index: {}]   ;;  %s1413_s3 = inlined_call_operand.vmem [shape: f32[64,64], index: 3, kind: input, shape index: {}]   ;;  %s1414_s4 = inlined_call_operand.vmem [shape: f32[1,64], index: 4, kind: input, shape index: {}]   ;;  %s1415_s5 = inlined_call_operand.vmem [shape: f32[1,64], index: 5, kind: input, shape index: {}]   ;;  %s1416_s6 = inlined_call_operand.vmem [shape: f32[1,64], index: 6, kind: input, shape index: {}]   ;;  %s1417_s7 = inlined_call_operand.vmem [shape: f32[2,4,32,64], index: 7, kind: output, shape index: {}]  }
   0x1   :  { %s1122_s26 = smov 0   ;;  %s1124_s27 = smov 0  }
   0x2   :  { %s1126_s28 = smov 0   ;;  %s1128_s29 = smov 0  }
   0x3   :  { %s1130_s30 = smov 0  }
   0x4 LB: > { %s26_s8 = sadd.s32 1, %s1068_s28  ;;  %s29_s9 = sadd.s32 1, %s1072_s29  ;;  %s1076_s30 = sphi %s1130_s30, %s17_s30   ;;  %s1072_s29 = sphi %s1128_s29, %s1424_s29   ;;  %s1068_s28 = sphi %s1126_s28, %s1423_s28   ;;  %s1064_s27 = sphi %s1124_s27, %s1422_s27   ;;  %s1060_s26 = sphi %s1122_s26, %s1421_s26   ;;  %s1056_s25 = sphi %s1120_s25, %s1420_s25   ;;  %s1052_s24 = sphi %s1118_s24, %s1419_s24  }
   0x5   : > { %p27_p0 = scmp.ge.s32.totalorder %s26_s8, 2  ;;  %s873_s10 = sadd.s32 4294967295, %s1076_s30  }
   0x6   : > { %p45_p1 = scmp.ne.s32.totalorder %s1056_s25, %s1052_s24  ;;  %p46_p2 = scmp.eq.s32.totalorder %s1076_s30, 0 }
   0x7   : > { %s1426_s8 = smov (%p27_p0, %s26_s8), 0  ;;  %s1428_s9 = smov (!%p27_p0, %s29_s9), %s1072_s29 }
   0x8   : > { %p31_p3 = scmp.ge.s32.totalorder %s1428_s9, 2  ;;  %p203_p4 = scmp.eq.s32.totalorder %s873_s10, 3 }
   0x9   : > { %s34_s11 = ssub.s32 %s1068_s28, %s1426_s8  ;;  %p47_p5 = por %p46_p2, %p45_p1 }
   0xa   : > { %s1430_s9 = smov (%p31_p3, %s1428_s9), 0  ;;  %p1166_p6 = por %p203_p4, %p45_p1 }
   0xb   : > { %s33_s13 = ssub.s32 %s1072_s29, %s1430_s9  ;;  %s38_s15 = sadd.s32 1, %s1056_s25 }
   0xc   : > { %s35_s14 = sor.u32 %s34_s11, %s33_s13  ;;  %p876_p8 = scmp.ge.s32.totalorder %s1076_s30, 4 }
   0xd   : > { %p36_p7 = scmp.eq.s32.totalorder %s35_s14, 0 }
   0xe   : > { %243 = sbr.rel (%p876_p8) target bundleno = 30 (0x1e), region = 40 }
   0xf   : > { %s1174_s16 = scalar_select %p36_p7, %s1056_s25, %s38_s15  }
  0x13   : > { %246 = sbr.rel (!%p47_p5) target bundleno = 30 (0x1e), region = 44  ;;  %s248_s17 = sand.u32 (%p47_p5), 1, %s1056_s25  }
  0x14   : > { %s878_s18 = sshll.u32 (%p47_p5), %s1068_s28, 1  ;;  %s877_s19 = sshll.u32 (%p47_p5), %s248_s17, 6 }
  0x15   : > { %s879_s20 = sshll.u32 (%p47_p5), %s1072_s29, 4  ;;  %s250_s13 = scalar_lea.vmem (%p47_p5), [#allocation2], %s877_s19 }
  0x16   : > { %s253_s21 = sadd.s32 (%p47_p5), %s879_s20, %s878_s18 }
  0x17   : > { %s880_s22 = sshll.u32 (%p47_p5), %s253_s21, 3 }
  0x18   : > { %s255_s11 = scalar_lea.vmem %s1410_s0, %s880_s22 }
  0x19   : > { %v298_v0 = vld [vmem:[%s255_s11] sm:$0xff]  ;;  %v300_v1 = vld [vmem:[%s255_s11 + $0x8] sm:$0xff] }
  0x1a   : > { %v302_v2 = vld [vmem:[%s255_s11 + $0x20] sm:$0xff]  ;;  %299 = vst [vmem:[%s250_s13] sm:$0xff] %v298_v0  ;;  %301 = vst [vmem:[%s250_s13 + $0x8] sm:$0xff] %v300_v1  ;;  %v304_v3 = vld [vmem:[%s255_s11 + $0x28] sm:$0xff] }
  0x1b   : > { %303 = vst [vmem:[%s250_s13 + $0x10] sm:$0xff] %v302_v2  ;;  %v306_v4 = vld [vmem:[%s255_s11 + $0x40] sm:$0xff]  ;;  %v308_v5 = vld [vmem:[%s255_s11 + $0x48] sm:$0xff]  ;;  %305 = vst [vmem:[%s250_s13 + $0x18] sm:$0xff] %v304_v3 }
  0x1c   : > { %307 = vst [vmem:[%s250_s13 + $0x20] sm:$0xff] %v306_v4  ;;  %309 = vst [vmem:[%s250_s13 + $0x28] sm:$0xff] %v308_v5  ;;  %v310_v6 = vld [vmem:[%s255_s11 + $0x60] sm:$0xff]  ;;  %v312_v7 = vld [vmem:[%s255_s11 + $0x68] sm:$0xff] }
  0x1d   : > { %311 = vst [vmem:[%s250_s13 + $0x30] sm:$0xff] %v310_v6  ;;  %313 = vst [vmem:[%s250_s13 + $0x38] sm:$0xff] %v312_v7 }
  0x1e PF: > { %p881_p9 = scmp.ge.s32.totalorder %s1076_s30, 1  ;;  %p318_p10 = scmp.lt.s32.totalorder %s1076_s30, 5 }
  0x20   : > { %p319_p11 = pnand %p881_p9, %p318_p10 }
  0x21   : > { %s325_s21 = sand.u32 (!%p319_p11), 1, %s1052_s24  }
  0x22   : > { %322 = sbr.rel (%p319_p11) target bundleno = 796 (0x31c), region = 82  ;;  %s1198_s10 = sshll.u32 (!%p319_p11), %s325_s21, 6 }
  0x23   : > { %s1207_s17 = scalar_lea.vmem (!%p319_p11), [#allocation2], %s1198_s10  ;;  %s1351_s21 = scalar_lea.vmem (!%p319_p11), [#allocation3], %s1198_s10 }
  0x27   : > { %v372_v8 = vld [vmem:[%s1411_s1 + $0x30] sm:$0xff]  ;;  %v373_v9 = vld [vmem:[%s1411_s1 + $0x38] sm:$0xff]  ;;  %v370_v10 = vld [vmem:[%s1411_s1 + $0x20] sm:$0xff]  ;;  %vm389_vm0 = vcmask 523264   ;;  %s897_s10 = sshll.u32 (%p1166_p6), %s1060_s26, 1  ;;  %s898_s22 = sshll.u32 (%p1166_p6), %s1064_s27, 4 }
  0x28   : > { %v381_v11 = vpack.c.bf16 %v373_v9, %v372_v8  ;;  %v371_v12 = vld [vmem:[%s1411_s1 + $0x28] sm:$0xff]  ;;  %v368_v14 = vld [vmem:[%s1411_s1 + $0x10] sm:$0xff]  ;;  %v369_v15 = vld [vmem:[%s1411_s1 + $0x18] sm:$0xff]  ;;  %s735_s23 = sadd.s32 (%p1166_p6), %s898_s22, %s897_s10 }
  0x29   : > { %v380_v13 = vpack.c.bf16 %v371_v12, %v370_v10  ;;  %v1210_v16 = vld [vmem:[%s1207_s17] sm:$0xff]  ;;  %v1213_v17 = vld [vmem:[%s1207_s17 + $0x8] sm:$0xff]  ;;  %v481_v18 = vld [vmem:[%s1413_s3 + $0x30] sm:$0xff]  ;;  %v379_v20 = vpack.c.bf16 %v369_v15, %v368_v14  ;;  %s899_s12 = sshll.u32 (%p1166_p6), %s735_s23, 3 }
  0x2a   : > { %918 = vmatprep.subr.bf16.mxu0 %v381_v11  ;;  %v374_v19 = vpack.c.bf16 %v1213_v17, %v1210_v16  ;;  %v482_v21 = vld [vmem:[%s1413_s3 + $0x38] sm:$0xff]  ;;  %v366_v22 = vld [vmem:[%s1411_s1] sm:$0xff]  ;;  %v367_v23 = vld [vmem:[%s1411_s1 + $0x8] sm:$0xff]  ;;  %s737_s14 = scalar_lea.vmem (%p1166_p6), %s1417_s7, %s899_s12 }
  0x2b   : > { %919 = vmatpush3.bf16.msra.mxu0 %v381_v11  ;;  %v490_v24 = vpack.c.bf16 %v482_v21, %v481_v18  ;;  %v378_v25 = vpack.c.bf16 %v367_v23, %v366_v22  ;;  %v1231_v26 = vld [vmem:[%s1207_s17 + $0x10] sm:$0xff]  ;;  %v1234_v27 = vld [vmem:[%s1207_s17 + $0x18] sm:$0xff]  ;;  %v1237_v28 = vld [vmem:[%s1207_s17 + $0x20] sm:$0xff] }
  0x2c   : > { %920 = vmatprep.subr.bf16.mxu0 %v380_v13  ;;  %926 = vmatprep.mubr.msk.bf16.mxu0 %vm389_vm0, %v374_v19  ;;  %v1240_v29 = vld [vmem:[%s1207_s17 + $0x28] sm:$0xff]  ;;  %v375_v30 = vpack.c.bf16 %v1234_v27, %v1231_v26  ;;  %v1249_v32 = vld [vmem:[%s1207_s17 + $0x30] sm:$0xff]  ;;  %v1252_v33 = vld [vmem:[%s1207_s17 + $0x38] sm:$0xff] }
  0x2d   : > { %934 = vmatprep.subr.bf16.mxu1 %v490_v24  ;;  %v376_v31 = vpack.c.bf16 %v1240_v29, %v1237_v28  ;;  %v377_v34 = vpack.c.bf16 %v1252_v33, %v1249_v32  ;;  %v479_v35 = vld [vmem:[%s1413_s3 + $0x20] sm:$0xff]  ;;  %v480_v36 = vld [vmem:[%s1413_s3 + $0x28] sm:$0xff]  ;;  %v477_v38 = vld [vmem:[%s1413_s3 + $0x10] sm:$0xff] }
  0x2e   : > { %935 = vmatpush3.bf16.msra.mxu1 %v490_v24  ;;  %v489_v37 = vpack.c.bf16 %v480_v36, %v479_v35  ;;  %v478_v39 = vld [vmem:[%s1413_s3 + $0x18] sm:$0xff]  ;;  %v475_v41 = vld [vmem:[%s1413_s3] sm:$0xff]  ;;  %v476_v42 = vld [vmem:[%s1413_s3 + $0x8] sm:$0xff] }
  0x2f   : > { %921 = vmatpush3.bf16.msra.mxu0 %v380_v13  ;;  %v488_v40 = vpack.c.bf16 %v478_v39, %v477_v38  ;;  %v487_v43 = vpack.c.bf16 %v476_v42, %v475_v41  ;;  %v884_v46 = vld [vmem:[%s1412_s2] ss:$0 sm:$0xff] }
  0x30   : > { %922 = vmatprep.subr.bf16.mxu0 %v379_v20  ;;  %936 = vmatprep.subr.bf16.mxu1 %v489_v37  ;;  %v889_v9 = vld [vmem:[%s1414_s4] ss:$0 sm:$0xff] }
  0x32   : > { %937 = vmatpush3.bf16.msra.mxu1 %v489_v37 }
  0x33   : > { %923 = vmatpush3.bf16.msra.mxu0 %v379_v20  ;;  %938 = vmatprep.subr.bf16.mxu1 %v488_v40 }
  0x34   : > { %924 = vmatprep.subr.bf16.mxu0 %v378_v25 }
  0x36   : > { %939 = vmatpush3.bf16.msra.mxu1 %v488_v40 }
  0x37   : > { %925 = vmatpush3.bf16.msra.mxu0 %v378_v25  ;;  %940 = vmatprep.subr.bf16.mxu1 %v487_v43 }
  0x3a   : > { %927 = vmatmul.mubr.msk.bf16.vlgmr.msra.gmra.mxu0 %vm389_vm0, %v375_v30  ;;  %941 = vmatpush3.bf16.msra.mxu1 %v487_v43 }
  0x3b   : > { %930 = vmatprep.mubr.msk.bf16.mxu0 %vm389_vm0, %v376_v31 }
  0x42   : > { %931 = vmatmul.mubr.msk.bf16.gmra.mxu0 %vm389_vm0, %v377_v34 }
  0xfa   : > { %v928_v44 = vpop.f32.mrf.mxu0 }
  0xfb   : > { %v445_v50 = vadd.f32 %v928_v44, %v884_v46 }
  0xfc   : > { %v436_v45 = vpop.f32.mrf.mxu0 }
  0xfd   : > { %v437_v48 = vadd.f32 %v884_v46, %v436_v45  ;;  %v469_v57 = vmax.f32 %v445_v50, 0.0 }
  0xfe   : > { %v929_v47 = vpop.f32.mrf.mxu0 }
  0xff   : > { %v448_v49 = vadd.f32 %v929_v47, %v884_v46  ;;  %v467_v55 = vmax.f32 %v437_v48, 0.0 }
 0x100   : > { %v439_v51 = vpop.f32.mrf.mxu0 }
 0x101   : > { %v440_v52 = vadd.f32 %v884_v46, %v439_v51  ;;  %v470_v53 = vmax.f32 %v448_v49, 0.0 }
 0x102   : > { %v932_v54 = vpop.f32.mrf.mxu0 }
 0x103   : > { %v468_v56 = vmax.f32 %v440_v52, 0.0  ;;  %v484_v60 = vpack.c.bf16 %v470_v53, %v469_v57  ;;  %v461_v0 = vadd.f32 %v932_v54, %v884_v46 }
 0x104   : > { %v452_v58 = vpop.f32.mrf.mxu0 }
 0x105   : > { %v483_v59 = vpack.c.bf16 %v468_v56, %v467_v55  ;;  %v453_v62 = vadd.f32 %v884_v46, %v452_v58  ;;  %v473_v6 = vmax.f32 %v461_v0, 0.0 }
 0x106   : > { %v933_v61 = vpop.f32.mrf.mxu0 }
 0x107   : > { %v464_v63 = vadd.f32 %v933_v61, %v884_v46  ;;  %942 = vmatprep.mubr.msk.bf16.mxu1 %vm389_vm0, %v483_v59  ;;  %v471_v4 = vmax.f32 %v453_v62, 0.0 }
 0x108   : > { %v455_v1 = vpop.f32.mrf.mxu0  ;;  %943 = vmatmul.mubr.msk.bf16.vlgmr.msra.gmra.mxu1 %vm389_vm0, %v484_v60 }
 0x109   : > { %v456_v2 = vadd.f32 %v884_v46, %v455_v1  ;;  %v474_v3 = vmax.f32 %v464_v63, 0.0 }
 0x10b   : > { %v472_v5 = vmax.f32 %v456_v2, 0.0  ;;  %v486_v8 = vpack.c.bf16 %v474_v3, %v473_v6 }
 0x10d   : > { %v485_v7 = vpack.c.bf16 %v472_v5, %v471_v4 }
 0x10f   : > { %946 = vmatprep.mubr.msk.bf16.mxu1 %vm389_vm0, %v485_v7 }
 0x110   : > { %947 = vmatmul.mubr.msk.bf16.gmra.mxu1 %vm389_vm0, %v486_v8 }
 0x1c8   : > { %v944_v10 = vpop.f32.mrf.mxu1 }
 0x1c9   : > { %v553_v11 = vadd.f32 %v944_v10, %v889_v9 }
 0x1ca   : > { %v544_v12 = vpop.f32.mrf.mxu1 }
 0x1cb   : > { %v545_v13 = vadd.f32 %v889_v9, %v544_v12  ;;  %v577_v14 = vadd.f32 %v553_v11, %v1231_v26 }
 0x1cc   : > { %v945_v15 = vpop.f32.mrf.mxu1 }
 0x1cd   : > { %v556_v18 = vadd.f32 %v945_v15, %v889_v9  ;;  %v591_v19 = vsel %vm389_vm0, %v577_v14, 0.0  ;;  %v575_v20 = vadd.f32 %v545_v13, %v1210_v16 }
 0x1ce   : > { %592 = vadd.xlane.f32.xlu1 %v591_v19  ;;  %v547_v21 = vpop.f32.mrf.mxu1 }
 0x1cf   : > { %v548_v22 = vadd.f32 %v889_v9, %v547_v21  ;;  %v585_v23 = vsel %vm389_vm0, %v575_v20, 0.0  ;;  %v578_v24 = vadd.f32 %v556_v18, %v1234_v27 }
 0x1d0   : > { %v948_v25 = vpop.f32.mrf.mxu1  ;;  %586 = vadd.xlane.f32.xlu0 %v585_v23 }
 0x1d1   : > { %v594_v30 = vsel %vm389_vm0, %v578_v24, 0.0  ;;  %v576_v31 = vadd.f32 %v548_v22, %v1213_v17  ;;  %v569_v34 = vadd.f32 %v948_v25, %v889_v9 }
 0x1d2   : > { %595 = vadd.xlane.f32.xlu1 %v594_v30  ;;  %v560_v26 = vpop.f32.mrf.mxu1 }
 0x1d3   : > { %v561_v35 = vadd.f32 %v889_v9, %v560_v26  ;;  %v588_v36 = vsel %vm389_vm0, %v576_v31, 0.0  ;;  %v581_v41 = vadd.f32 %v569_v34, %v1249_v32 }
 0x1d4   : > { %v949_v16 = vpop.f32.mrf.mxu1  ;;  %589 = vadd.xlane.f32.xlu0 %v588_v36 }
 0x1d5   : > { %v579_v37 = vadd.f32 %v561_v35, %v1237_v28  ;;  %v572_v39 = vadd.f32 %v949_v16, %v889_v9  ;;  %v603_v43 = vsel %vm389_vm0, %v581_v41, 0.0 }
 0x1d6   : > { %v563_v38 = vpop.f32.mrf.mxu1 }
 0x1d7   : > { %v564_v40 = vadd.f32 %v889_v9, %v563_v38  ;;  %v597_v27 = vsel %vm389_vm0, %v579_v37, 0.0  ;;  %v582_v44 = vadd.f32 %v572_v39, %v1252_v33 }
 0x1d8   : > { %598 = vadd.xlane.f32.xlu0 %v597_v27 }
 0x1d9   : > { %v580_v17 = vadd.f32 %v564_v40, %v1240_v29  ;;  %v606_v28 = vsel %vm389_vm0, %v582_v44, 0.0 }
 0x1db   : > { %v600_v42 = vsel %vm389_vm0, %v580_v17, 0.0 }
 0x1dc   : > { %601 = vadd.xlane.f32.xlu1 %v600_v42  ;;  %604 = vadd.xlane.f32.xlu0 %v603_v43 }
 0x1e0   : > { %607 = vadd.xlane.f32.xlu1 %v606_v28 }
 0x257   : > { %v593_v45 = vpop.xlane.xlu1 %592 }
 0x258   : > { %v612_v46 = vmul.f32 0.015625, %v593_v45 }
 0x259   : > { %v587_v47 = vpop.xlane.xlu0 %586 }
 0x25a   : > { %v1301_v48 = vsub.f32 %v577_v14, %v612_v46  ;;  %v610_v32 = vmul.f32 0.015625, %v587_v47  ;;  %v895_v47 = vld [vmem:[%s1416_s6] ss:$0 sm:$0xff] }
 0x25b   : > { %v596_v49 = vpop.xlane.xlu1 %595 }
 0x25c   : > { %v1303_v50 = vsub.f32 %v575_v20, %v610_v32  ;;  %v613_v29 = vmul.f32 0.015625, %v596_v49  ;;  %v628_v51 = vmul.f32 %v1301_v48, %v1301_v48 }
 0x25d   : > { %v590_v52 = vpop.xlane.xlu0 %589 }
 0x25e   : > { %v1307_v33 = vsub.f32 %v578_v24, %v613_v29  ;;  %v611_v53 = vmul.f32 0.015625, %v590_v52  ;;  %v640_v54 = vsel %vm389_vm0, %v628_v51, 0.0  ;;  %v626_v55 = vmul.f32 %v1303_v50, %v1303_v50 }
 0x25f   : > { %641 = vadd.xlane.f32.xlu0 %v640_v54 }
 0x260   : > { %v1312_v56 = vsub.f32 %v576_v31, %v611_v53  ;;  %v629_v57 = vmul.f32 %v1307_v33, %v1307_v33  ;;  %v634_v61 = vsel %vm389_vm0, %v626_v55, 0.0 }
 0x261   : > { %v599_v58 = vpop.xlane.xlu0 %598 }
 0x262   : > { %v614_v59 = vmul.f32 0.015625, %v599_v58  ;;  %v643_v60 = vsel %vm389_vm0, %v629_v57, 0.0  ;;  %v627_v62 = vmul.f32 %v1312_v56, %v1312_v56 }
 0x263   : > { %644 = vadd.xlane.f32.xlu1 %v643_v60  ;;  %635 = vadd.xlane.f32.xlu0 %v634_v61 }
 0x264   : > { %v1320_v63 = vsub.f32 %v579_v37, %v614_v59  ;;  %v637_v4 = vsel %vm389_vm0, %v627_v62, 0.0 }
 0x265   : > { %v602_v0 = vpop.xlane.xlu1 %601  ;;  %v605_v1 = vpop.xlane.xlu0 %604 }
 0x266   : > { %v615_v2 = vmul.f32 0.015625, %v602_v0  ;;  %v616_v3 = vmul.f32 0.015625, %v605_v1  ;;  %v630_v5 = vmul.f32 %v1320_v63, %v1320_v63 }
 0x267   : > { %638 = vadd.xlane.f32.xlu1 %v637_v4 }
 0x268   : > { %v1325_v6 = vsub.f32 %v580_v17, %v615_v2  ;;  %v1327_v7 = vsub.f32 %v581_v41, %v616_v3  ;;  %v646_v8 = vsel %vm389_vm0, %v630_v5, 0.0 }
 0x269   : > { %v608_v9 = vpop.xlane.xlu1 %607  ;;  %647 = vadd.xlane.f32.xlu0 %v646_v8 }
 0x26a   : > { %v617_v10 = vmul.f32 0.015625, %v608_v9  ;;  %v631_v11 = vmul.f32 %v1325_v6, %v1325_v6  ;;  %v632_v12 = vmul.f32 %v1327_v7, %v1327_v7 }
 0x26c   : > { %v1334_v13 = vsub.f32 %v582_v44, %v617_v10  ;;  %v649_v14 = vsel %vm389_vm0, %v631_v11, 0.0  ;;  %v652_v15 = vsel %vm389_vm0, %v632_v12, 0.0  ;;  %v894_v44 = vld [vmem:[%s1415_s5] ss:$0 sm:$0xff] }
 0x26d   : > { %650 = vadd.xlane.f32.xlu1 %v649_v14  ;;  %653 = vadd.xlane.f32.xlu0 %v652_v15 }
 0x26e   : > { %v633_v18 = vmul.f32 %v1334_v13, %v1334_v13 }
 0x270   : > { %v655_v19 = vsel %vm389_vm0, %v633_v18, 0.0 }
 0x271   : > { %656 = vadd.xlane.f32.xlu1 %v655_v19 }
 0x2e8   : > { %v642_v20 = vpop.xlane.xlu0 %641 }
 0x2e9   : > { %v660_v21 = vmul.f32 0.015625, %v642_v20 }
 0x2eb   : > { %v668_v22 = vadd.f32 1e-05, %v660_v21 }
 0x2ec   : > { %v645_v23 = vpop.xlane.xlu1 %644  ;;  %v636_v24 = vpop.xlane.xlu0 %635 }
 0x2ed   : > { %1006 = vrsqrt.f32 %v668_v22  ;;  %v661_v25 = vmul.f32 0.015625, %v645_v23  ;;  %v658_v30 = vmul.f32 0.015625, %v636_v24 }
 0x2ef   : > { %v669_v31 = vadd.f32 1e-05, %v661_v25  ;;  %v666_v26 = vadd.f32 1e-05, %v658_v30 }
 0x2f0   : > { %v639_v34 = vpop.xlane.xlu1 %638 }
 0x2f1   : > { %1008 = vrsqrt.f32 %v669_v31  ;;  %v659_v35 = vmul.f32 0.015625, %v639_v34 }
 0x2f2   : > { %1010 = vrsqrt.f32 %v666_v26  ;;  %v648_v36 = vpop.xlane.xlu0 %647 }
 0x2f3   : > { %v667_v16 = vadd.f32 1e-05, %v659_v35  ;;  %v662_v37 = vmul.f32 0.015625, %v648_v36 }
 0x2f5   : > { %1012 = vrsqrt.f32 %v667_v16  ;;  %v670_v38 = vadd.f32 1e-05, %v662_v37 }
 0x2f6   : > { %v651_v39 = vpop.xlane.xlu1 %650  ;;  %v654_v40 = vpop.xlane.xlu0 %653 }
 0x2f7   : > { %1014 = vrsqrt.f32 %v670_v38  ;;  %v663_v27 = vmul.f32 0.015625, %v651_v39  ;;  %v664_v41 = vmul.f32 0.015625, %v654_v40 }
 0x2f9   : > { %v671_v17 = vadd.f32 1e-05, %v663_v27  ;;  %v672_v42 = vadd.f32 1e-05, %v664_v41 }
 0x2fa   : > { %v1007_v43 = vpop.eup %1006  ;;  %v657_v28 = vpop.xlane.xlu1 %656 }
 0x2fb   : > { %v684_v45 = vmul.f32 %v1007_v43, %v1301_v48  ;;  %1016 = vrsqrt.f32 %v671_v17  ;;  %v665_v46 = vmul.f32 0.015625, %v657_v28 }
 0x2fc   : > { %1018 = vrsqrt.f32 %v672_v42 }
 0x2fd   : > { %v698_v32 = vmul.f32 %v894_v44, %v684_v45  ;;  %v673_v49 = vadd.f32 1e-05, %v665_v46 }
 0x2fe   : > { %v1009_v29 = vpop.eup %1008 }
 0x2ff   : > { %v1011_v51 = vpop.eup %1010  ;;  %v712_v52 = vadd.f32 %v895_v47, %v698_v32  ;;  %v685_v53 = vmul.f32 %v1009_v29, %v1307_v33  ;;  %1020 = vrsqrt.f32 %v673_v49 }
 0x300   : > { %v682_v54 = vmul.f32 %v1011_v51, %v1303_v50 }
 0x301   : > { %720 = vst.msk [vmem:[%s1351_s21 + $0x10] sm:$0xff] %vm389_vm0, %v712_v52  ;;  %v699_v48 = vmul.f32 %v894_v44, %v685_v53 }
 0x302   : > { %v1013_v55 = vpop.eup %1012  ;;  %v696_v57 = vmul.f32 %v894_v44, %v682_v54 }
 0x303   : > { %v713_v58 = vadd.f32 %v895_v47, %v699_v48  ;;  %v683_v59 = vmul.f32 %v1013_v55, %v1312_v56 }
 0x304   : > { %v1015_v60 = vpop.eup %1014  ;;  %v710_v33 = vadd.f32 %v895_v47, %v696_v57 }
 0x305   : > { %721 = vst.msk [vmem:[%s1351_s21 + $0x18] sm:$0xff] %vm389_vm0, %v713_v58  ;;  %v697_v50 = vmul.f32 %v894_v44, %v683_v59  ;;  %v686_v61 = vmul.f32 %v1015_v60, %v1320_v63 }
 0x306   : > { %718 = vst.msk [vmem:[%s1351_s21] sm:$0xff] %vm389_vm0, %v710_v33 }
 0x307   : > { %v711_v62 = vadd.f32 %v895_v47, %v697_v50  ;;  %v700_v0 = vmul.f32 %v894_v44, %v686_v61 }
 0x308   : > { %v1017_v1 = vpop.eup %1016 }
 0x309   : > { %v1019_v2 = vpop.eup %1018  ;;  %719 = vst.msk [vmem:[%s1351_s21 + $0x8] sm:$0xff] %vm389_vm0, %v711_v62  ;;  %v714_v3 = vadd.f32 %v895_v47, %v700_v0  ;;  %v687_v56 = vmul.f32 %v1017_v1, %v1325_v6 }
 0x30a   : > { %v688_v4 = vmul.f32 %v1019_v2, %v1327_v7 }
 0x30b   : > { %722 = vst.msk [vmem:[%s1351_s21 + $0x20] sm:$0xff] %vm389_vm0, %v714_v3  ;;  %v701_v5 = vmul.f32 %v894_v44, %v687_v56 }
 0x30c   : > { %v1021_v63 = vpop.eup %1020  ;;  %v702_v8 = vmul.f32 %v894_v44, %v688_v4  ;;  %v786_v15 = vld [vmem:[%s1351_s21 + $0x18] sm:$0xff] (%p1166_p6) }
 0x30d   : > { %v715_v9 = vadd.f32 %v895_v47, %v701_v5  ;;  %v689_v10 = vmul.f32 %v1021_v63, %v1334_v13  ;;  %v780_v6 = vld [vmem:[%s1351_s21] sm:$0xff] (%p1166_p6)  ;;  %v784_v13 = vld [vmem:[%s1351_s21 + $0x10] sm:$0xff] (%p1166_p6)  ;;  %787 = vst [vmem:[%s737_s14 + $0x28] sm:$0xff] (%p1166_p6), %v786_v15 }
 0x30e   : > { %v716_v11 = vadd.f32 %v895_v47, %v702_v8  ;;  %781 = vst [vmem:[%s737_s14] sm:$0xff] (%p1166_p6), %v780_v6  ;;  %785 = vst [vmem:[%s737_s14 + $0x20] sm:$0xff] (%p1166_p6), %v784_v13 }
 0x30f   : > { %723 = vst.msk [vmem:[%s1351_s21 + $0x28] sm:$0xff] %vm389_vm0, %v715_v9  ;;  %v703_v12 = vmul.f32 %v894_v44, %v689_v10  ;;  %732 = sbr.rel (!%p1166_p6) target bundleno = 796 (0x31c), region = 90 }
 0x310   : > { %724 = vst.msk [vmem:[%s1351_s21 + $0x30] sm:$0xff] %vm389_vm0, %v716_v11  ;;  %v782_v7 = vld [vmem:[%s1351_s21 + $0x8] sm:$0xff] (%p1166_p6) }
 0x311   : > { %v717_v14 = vadd.f32 %v895_v47, %v703_v12  ;;  %783 = vst [vmem:[%s737_s14 + $0x8] sm:$0xff] (%p1166_p6), %v782_v7 }
 0x312   : > { %v788_v18 = vld [vmem:[%s1351_s21 + $0x20] sm:$0xff] (%p1166_p6) }
 0x313   : > { %725 = vst.msk [vmem:[%s1351_s21 + $0x38] sm:$0xff] %vm389_vm0, %v717_v14  ;;  %789 = vst [vmem:[%s737_s14 + $0x40] sm:$0xff] (%p1166_p6), %v788_v18 }
 0x316   : > { %v790_v19 = vld [vmem:[%s1351_s21 + $0x28] sm:$0xff] }
 0x317   : > { %v792_v20 = vld [vmem:[%s1351_s21 + $0x30] sm:$0xff]  ;;  %791 = vst [vmem:[%s737_s14 + $0x48] sm:$0xff] %v790_v19 }
 0x318   : > { %793 = vst [vmem:[%s737_s14 + $0x60] sm:$0xff] %v792_v20 }
 0x31a   : > { %v794_v21 = vld [vmem:[%s1351_s21 + $0x38] sm:$0xff] }
 0x31b   : > { %795 = vst [vmem:[%s737_s14 + $0x68] sm:$0xff] %v794_v21 }
 0x31c PF: > { %s17_s30 = sadd.s32 1, %s1076_s30   ;;  %s1419_s24 = smov %s1056_s25 }
 0x31d   : > { %p14_p12 = scmp.ge.s32.totalorder %s17_s30, 6   ;;  %s1420_s25 = smov %s1174_s16 }
 0x31e   : > { %s1421_s26 = smov %s1068_s28  ;;  %s1422_s27 = smov %s1072_s29 }
 0x31f   : > { %s1423_s28 = smov %s1426_s8  ;;  %s1424_s29 = smov %s1430_s9 }
 0x320   :  { %16 = sbr.rel (!%p14_p12) target bundleno = 4 (0x4), region = 159 }

// kernel: combine_tensors_forward.17
= control target key start
LH: loop header
LB: loop body
LE: loop exit
PB: predicated region body
PF: predicated region fallthrough
CT: control target
= control target key end

     0   :  { %s1472_s0 = inlined_call_operand.vmem [shape: f32[2,4,32,64], index: 0, kind: input, shape index: {}]   ;;  %s1473_s1 = inlined_call_operand.vmem [shape: f32[64,64], index: 1, kind: input, shape index: {}]   ;;  %s1474_s2 = inlined_call_operand.vmem [shape: f32[1,64], index: 2, kind: input, shape index: {}]   ;;  %s1475_s3 = inlined_call_operand.vmem [shape: f32[64,64], index: 3, kind: input, shape index: {}]   ;;  %s1476_s4 = inlined_call_operand.vmem [shape: f32[1,64], index: 4, kind: input, shape index: {}]   ;;  %s1477_s5 = inlined_call_operand.vmem [shape: f32[1,64], index: 5, kind: input, shape index: {}]   ;;  %s1478_s6 = inlined_call_operand.vmem [shape: f32[1,64], index: 6, kind: input, shape index: {}]   ;;  %s1479_s7 = inlined_call_operand.hbm [shape: f32[2,4,32,64], index: 7, kind: output, shape index: {}]  }
   0x1   :  { %1481 = sst [smem:[#allocation9_spill]] %s1472_s0 }
   0x2   :  { %1482 = sst [smem:[#allocation10_spill]] %s1473_s1 }
   0x3   :  { %12 = vsyncpa [#allocation4], 0 }
   0x4   :  { %14 = vsyncpa [#allocation4 + $0x1], 0  ;;  %s1146_s24 = smov 0   ;;  %s1148_s25 = smov 0  }
   0x5   :  { %s1150_s26 = smov 0   ;;  %s1152_s27 = smov 0  }
   0x6   :  { %s1154_s28 = smov 0   ;;  %s1156_s29 = smov 0  }
   0x7   :  { %s1158_s30 = smov 0   ;;  %s1160_s8 = smov 0  }
   0x8 LB: > { %s854_s9 = sadd.s32 4294967295, %s1097_s8   ;;  %s855_s10 = sadd.s32 4294967294, %s1097_s8   ;;  %s1097_s8 = sphi %s1160_s8, %s20_s8   ;;  %s1093_s30 = sphi %s1158_s30, %s1496_s30   ;;  %s1089_s29 = sphi %s1156_s29, %s1495_s29   ;;  %s1085_s28 = sphi %s1154_s28, %s1494_s28   ;;  %s1081_s27 = sphi %s1152_s27, %s1493_s27   ;;  %s1077_s26 = sphi %s1150_s26, %s1492_s26   ;;  %s1073_s25 = sphi %s1148_s25, %s1491_s25   ;;  %s1069_s24 = sphi %s1146_s24, %s1490_s24  }
   0x9   : > { %s29_s11 = sadd.s32 1, %s1089_s29  ;;  %s32_s12 = sadd.s32 1, %s1093_s30 }
   0xa   : > { %p30_p0 = scmp.ge.s32.totalorder %s29_s11, 2  ;;  %p48_p1 = scmp.ne.s32.totalorder %s1077_s26, %s1073_s25 }
   0xb   : > { %p49_p2 = scmp.eq.s32.totalorder %s1097_s8, 0  ;;  %p206_p5 = scmp.eq.s32.totalorder %s854_s9, 3 }
   0xc   : > { %s1498_s11 = smov (%p30_p0, %s29_s11), 0  ;;  %s1500_s12 = smov (!%p30_p0, %s32_s12), %s1093_s30 }
   0xd   : > { %s37_s13 = ssub.s32 %s1089_s29, %s1498_s11  ;;  %p1198_p3 = por %p49_p2, %p48_p1 }
   0xe   : > { %p34_p4 = scmp.ge.s32.totalorder %s1500_s12, 2  ;;  %p211_p6 = scmp.ne.s32.totalorder %s1073_s25, %s1069_s24 }
   0xf   : > { %p212_p7 = scmp.eq.s32.totalorder %s855_s10, 3  ;;  %p1206_p8 = por %p206_p5, %p48_p1 }
  0x10   : > { %s1502_s12 = smov (%p34_p4, %s1500_s12), 0  ;;  %s41_s19 = sadd.s32 1, %s1077_s26 }
  0x11   : > { %1484 = sst [smem:[#allocation8_spill]] %s1502_s12  ;;  %p1210_p9 = por %p212_p7, %p211_p6 }
  0x12   : > { %s36_s17 = ssub.s32 %s1093_s30, %s1502_s12  ;;  %p857_p11 = scmp.ge.s32.totalorder %s1097_s8, 4 }
  0x13   : > { %s38_s18 = sor.u32 %s37_s13, %s36_s17 }
  0x14   : > { %p39_p10 = scmp.eq.s32.totalorder %s38_s18, 0  ;;  %246 = sbr.rel (%p857_p11) target bundleno = 39 (0x27), region = 40 }
  0x16   : > { %s1218_s20 = scalar_select %p39_p10, %s1077_s26, %s41_s19  }
  0x19   : > { %249 = sbr.rel (!%p1198_p3) target bundleno = 39 (0x27), region = 44  ;;  %s251_s21 = sand.u32 (%p1198_p3), 1, %s1077_s26  }
  0x1a   : > { %s859_s22 = sshll.u32 (%p1198_p3), %s1089_s29, 1  ;;  %s858_s23 = sshll.u32 (%p1198_p3), %s251_s21, 6 }
  0x1b   : > { %s860_s9 = sshll.u32 (%p1198_p3), %s1093_s30, 4  ;;  %s1487_s0 = sld [smem:[#allocation9_spill]] (%p1198_p3) }
  0x1c   : > { %s256_s10 = sadd.s32 (%p1198_p3), %s860_s9, %s859_s22  ;;  %s253_s19 = scalar_lea.vmem (%p1198_p3), [#allocation2], %s858_s23 }
  0x1d   : > { %s861_s12 = sshll.u32 (%p1198_p3), %s256_s10, 3 }
  0x21   : > { %s258_s18 = scalar_lea.vmem %s1487_s0, %s861_s12 }
  0x22   : > { %v301_v0 = vld [vmem:[%s258_s18] sm:$0xff]  ;;  %v303_v1 = vld [vmem:[%s258_s18 + $0x8] sm:$0xff] }
  0x23   : > { %v305_v2 = vld [vmem:[%s258_s18 + $0x20] sm:$0xff]  ;;  %302 = vst [vmem:[%s253_s19] sm:$0xff] %v301_v0  ;;  %304 = vst [vmem:[%s253_s19 + $0x8] sm:$0xff] %v303_v1  ;;  %v307_v3 = vld [vmem:[%s258_s18 + $0x28] sm:$0xff] }
  0x24   : > { %306 = vst [vmem:[%s253_s19 + $0x10] sm:$0xff] %v305_v2  ;;  %v309_v4 = vld [vmem:[%s258_s18 + $0x40] sm:$0xff]  ;;  %v311_v5 = vld [vmem:[%s258_s18 + $0x48] sm:$0xff]  ;;  %308 = vst [vmem:[%s253_s19 + $0x18] sm:$0xff] %v307_v3 }
  0x25   : > { %310 = vst [vmem:[%s253_s19 + $0x20] sm:$0xff] %v309_v4  ;;  %312 = vst [vmem:[%s253_s19 + $0x28] sm:$0xff] %v311_v5  ;;  %v313_v6 = vld [vmem:[%s258_s18 + $0x60] sm:$0xff]  ;;  %v315_v7 = vld [vmem:[%s258_s18 + $0x68] sm:$0xff] }
  0x26   : > { %314 = vst [vmem:[%s253_s19 + $0x30] sm:$0xff] %v313_v6  ;;  %316 = vst [vmem:[%s253_s19 + $0x38] sm:$0xff] %v315_v7 }
  0x27 PF: > { %p862_p12 = scmp.ge.s32.totalorder %s1097_s8, 1  ;;  %p321_p13 = scmp.lt.s32.totalorder %s1097_s8, 5 }
  0x29   : > { %p322_p0 = pnand %p862_p12, %p321_p13 }
  0x2a   : > { %s1488_s1 = sld [smem:[#allocation10_spill]] (!%p322_p0)  ;;  %s328_s10 = sand.u32 (!%p322_p0), 1, %s1073_s25  }
  0x2b   : > { %325 = sbr.rel (%p322_p0) target bundleno = 808 (0x328), region = 82  ;;  %s1246_s18 = sshll.u32 (!%p322_p0), %s328_s10, 6 }
  0x2c   : > { %s1255_s22 = scalar_lea.vmem (!%p322_p0), [#allocation2], %s1246_s18  ;;  %s1399_s13 = scalar_lea.vmem (!%p322_p0), [#allocation3], %s1246_s18 }
  0x2d   : > { %s731_s18 = scalar_lea.sflag (!%p322_p0), [#allocation4], %s328_s10 }
  0x30   : > { %v376_v8 = vld [vmem:[%s1488_s1 + $0x30] sm:$0xff]  ;;  %v377_v9 = vld [vmem:[%s1488_s1 + $0x38] sm:$0xff]  ;;  %v374_v10 = vld [vmem:[%s1488_s1 + $0x20] sm:$0xff]  ;;  %vm393_vm0 = vcmask 523264  }
  0x31   : > { %v385_v11 = vpack.c.bf16 %v377_v9, %v376_v8  ;;  %v375_v12 = vld [vmem:[%s1488_s1 + $0x28] sm:$0xff]  ;;  %v372_v14 = vld [vmem:[%s1488_s1 + $0x10] sm:$0xff]  ;;  %v373_v15 = vld [vmem:[%s1488_s1 + $0x18] sm:$0xff] }
  0x32   : > { %v384_v13 = vpack.c.bf16 %v375_v12, %v374_v10  ;;  %v1258_v16 = vld [vmem:[%s1255_s22] sm:$0xff]  ;;  %v1261_v17 = vld [vmem:[%s1255_s22 + $0x8] sm:$0xff]  ;;  %v485_v18 = vld [vmem:[%s1475_s3 + $0x30] sm:$0xff]  ;;  %v383_v20 = vpack.c.bf16 %v373_v15, %v372_v14 }
  0x33   : > { %899 = vmatprep.subr.bf16.mxu0 %v385_v11  ;;  %v378_v19 = vpack.c.bf16 %v1261_v17, %v1258_v16  ;;  %v486_v21 = vld [vmem:[%s1475_s3 + $0x38] sm:$0xff]  ;;  %v370_v22 = vld [vmem:[%s1488_s1] sm:$0xff]  ;;  %v371_v23 = vld [vmem:[%s1488_s1 + $0x8] sm:$0xff] }
  0x34   : > { %900 = vmatpush3.bf16.msra.mxu0 %v385_v11  ;;  %v494_v24 = vpack.c.bf16 %v486_v21, %v485_v18  ;;  %v382_v25 = vpack.c.bf16 %v371_v23, %v370_v22  ;;  %v1279_v26 = vld [vmem:[%s1255_s22 + $0x10] sm:$0xff]  ;;  %v1282_v27 = vld [vmem:[%s1255_s22 + $0x18] sm:$0xff]  ;;  %v1285_v28 = vld [vmem:[%s1255_s22 + $0x20] sm:$0xff] }
  0x35   : > { %901 = vmatprep.subr.bf16.mxu0 %v384_v13  ;;  %907 = vmatprep.mubr.msk.bf16.mxu0 %vm393_vm0, %v378_v19  ;;  %v1288_v29 = vld [vmem:[%s1255_s22 + $0x28] sm:$0xff]  ;;  %v379_v30 = vpack.c.bf16 %v1282_v27, %v1279_v26  ;;  %v1297_v32 = vld [vmem:[%s1255_s22 + $0x30] sm:$0xff]  ;;  %v1300_v33 = vld [vmem:[%s1255_s22 + $0x38] sm:$0xff] }
  0x36   : > { %915 = vmatprep.subr.bf16.mxu1 %v494_v24  ;;  %v380_v31 = vpack.c.bf16 %v1288_v29, %v1285_v28  ;;  %v381_v34 = vpack.c.bf16 %v1300_v33, %v1297_v32  ;;  %v483_v35 = vld [vmem:[%s1475_s3 + $0x20] sm:$0xff]  ;;  %v484_v36 = vld [vmem:[%s1475_s3 + $0x28] sm:$0xff]  ;;  %v481_v38 = vld [vmem:[%s1475_s3 + $0x10] sm:$0xff] }
  0x37   : > { %916 = vmatpush3.bf16.msra.mxu1 %v494_v24  ;;  %v493_v37 = vpack.c.bf16 %v484_v36, %v483_v35  ;;  %v482_v39 = vld [vmem:[%s1475_s3 + $0x18] sm:$0xff]  ;;  %v479_v41 = vld [vmem:[%s1475_s3] sm:$0xff]  ;;  %v480_v42 = vld [vmem:[%s1475_s3 + $0x8] sm:$0xff] }
  0x38   : > { %902 = vmatpush3.bf16.msra.mxu0 %v384_v13  ;;  %v492_v40 = vpack.c.bf16 %v482_v39, %v481_v38  ;;  %v491_v43 = vpack.c.bf16 %v480_v42, %v479_v41  ;;  %v865_v46 = vld [vmem:[%s1474_s2] ss:$0 sm:$0xff] }
  0x39   : > { %903 = vmatprep.subr.bf16.mxu0 %v383_v20  ;;  %917 = vmatprep.subr.bf16.mxu1 %v493_v37  ;;  %v870_v9 = vld [vmem:[%s1476_s4] ss:$0 sm:$0xff] }
  0x3b   : > { %918 = vmatpush3.bf16.msra.mxu1 %v493_v37 }
  0x3c   : > { %904 = vmatpush3.bf16.msra.mxu0 %v383_v20  ;;  %919 = vmatprep.subr.bf16.mxu1 %v492_v40 }
  0x3d   : > { %905 = vmatprep.subr.bf16.mxu0 %v382_v25 }
  0x3f   : > { %920 = vmatpush3.bf16.msra.mxu1 %v492_v40 }
  0x40   : > { %906 = vmatpush3.bf16.msra.mxu0 %v382_v25  ;;  %921 = vmatprep.subr.bf16.mxu1 %v491_v43 }
  0x43   : > { %908 = vmatmul.mubr.msk.bf16.vlgmr.msra.gmra.mxu0 %vm393_vm0, %v379_v30  ;;  %922 = vmatpush3.bf16.msra.mxu1 %v491_v43 }
  0x44   : > { %911 = vmatprep.mubr.msk.bf16.mxu0 %vm393_vm0, %v380_v31 }
  0x4b   : > { %912 = vmatmul.mubr.msk.bf16.gmra.mxu0 %vm393_vm0, %v381_v34 }
 0x103   : > { %v909_v44 = vpop.f32.mrf.mxu0 }
 0x104   : > { %v449_v50 = vadd.f32 %v909_v44, %v865_v46 }
 0x105   : > { %v440_v45 = vpop.f32.mrf.mxu0 }
 0x106   : > { %v441_v48 = vadd.f32 %v865_v46, %v440_v45  ;;  %v473_v57 = vmax.f32 %v449_v50, 0.0 }
 0x107   : > { %v910_v47 = vpop.f32.mrf.mxu0 }
 0x108   : > { %v452_v49 = vadd.f32 %v910_v47, %v865_v46  ;;  %v471_v55 = vmax.f32 %v441_v48, 0.0 }
 0x109   : > { %v443_v51 = vpop.f32.mrf.mxu0 }
 0x10a   : > { %v444_v52 = vadd.f32 %v865_v46, %v443_v51  ;;  %v474_v53 = vmax.f32 %v452_v49, 0.0 }
 0x10b   : > { %v913_v54 = vpop.f32.mrf.mxu0 }
 0x10c   : > { %v472_v56 = vmax.f32 %v444_v52, 0.0  ;;  %v488_v60 = vpack.c.bf16 %v474_v53, %v473_v57  ;;  %v465_v0 = vadd.f32 %v913_v54, %v865_v46 }
 0x10d   : > { %v456_v58 = vpop.f32.mrf.mxu0 }
 0x10e   : > { %v487_v59 = vpack.c.bf16 %v472_v56, %v471_v55  ;;  %v457_v62 = vadd.f32 %v865_v46, %v456_v58  ;;  %v477_v6 = vmax.f32 %v465_v0, 0.0 }
 0x10f   : > { %v914_v61 = vpop.f32.mrf.mxu0 }
 0x110   : > { %v468_v63 = vadd.f32 %v914_v61, %v865_v46  ;;  %923 = vmatprep.mubr.msk.bf16.mxu1 %vm393_vm0, %v487_v59  ;;  %v475_v4 = vmax.f32 %v457_v62, 0.0 }
 0x111   : > { %v459_v1 = vpop.f32.mrf.mxu0  ;;  %924 = vmatmul.mubr.msk.bf16.vlgmr.msra.gmra.mxu1 %vm393_vm0, %v488_v60 }
 0x112   : > { %v460_v2 = vadd.f32 %v865_v46, %v459_v1  ;;  %v478_v3 = vmax.f32 %v468_v63, 0.0 }
 0x114   : > { %v476_v5 = vmax.f32 %v460_v2, 0.0  ;;  %v490_v8 = vpack.c.bf16 %v478_v3, %v477_v6 }
 0x116   : > { %v489_v7 = vpack.c.bf16 %v476_v5, %v475_v4 }
 0x118   : > { %927 = vmatprep.mubr.msk.bf16.mxu1 %vm393_vm0, %v489_v7 }
 0x119   : > { %928 = vmatmul.mubr.msk.bf16.gmra.mxu1 %vm393_vm0, %v490_v8 }
 0x1d1   : > { %v925_v10 = vpop.f32.mrf.mxu1 }
 0x1d2   : > { %v557_v11 = vadd.f32 %v925_v10, %v870_v9 }
 0x1d3   : > { %v548_v12 = vpop.f32.mrf.mxu1 }
 0x1d4   : > { %v549_v13 = vadd.f32 %v870_v9, %v548_v12  ;;  %v581_v14 = vadd.f32 %v557_v11, %v1279_v26 }
 0x1d5   : > { %v926_v15 = vpop.f32.mrf.mxu1 }
 0x1d6   : > { %v560_v18 = vadd.f32 %v926_v15, %v870_v9  ;;  %v595_v19 = vsel %vm393_vm0, %v581_v14, 0.0  ;;  %v579_v20 = vadd.f32 %v549_v13, %v1258_v16 }
 0x1d7   : > { %596 = vadd.xlane.f32.xlu1 %v595_v19  ;;  %v551_v21 = vpop.f32.mrf.mxu1 }
 0x1d8   : > { %v552_v22 = vadd.f32 %v870_v9, %v551_v21  ;;  %v589_v23 = vsel %vm393_vm0, %v579_v20, 0.0  ;;  %v582_v24 = vadd.f32 %v560_v18, %v1282_v27 }
 0x1d9   : > { %v929_v25 = vpop.f32.mrf.mxu1  ;;  %590 = vadd.xlane.f32.xlu0 %v589_v23 }
 0x1da   : > { %v598_v30 = vsel %vm393_vm0, %v582_v24, 0.0  ;;  %v580_v31 = vadd.f32 %v552_v22, %v1261_v17  ;;  %v573_v34 = vadd.f32 %v929_v25, %v870_v9 }
 0x1db   : > { %599 = vadd.xlane.f32.xlu1 %v598_v30  ;;  %v564_v26 = vpop.f32.mrf.mxu1 }
 0x1dc   : > { %v565_v35 = vadd.f32 %v870_v9, %v564_v26  ;;  %v592_v36 = vsel %vm393_vm0, %v580_v31, 0.0  ;;  %v585_v41 = vadd.f32 %v573_v34, %v1297_v32 }
 0x1dd   : > { %v930_v16 = vpop.f32.mrf.mxu1  ;;  %593 = vadd.xlane.f32.xlu0 %v592_v36 }
 0x1de   : > { %v583_v37 = vadd.f32 %v565_v35, %v1285_v28  ;;  %v576_v39 = vadd.f32 %v930_v16, %v870_v9  ;;  %v607_v43 = vsel %vm393_vm0, %v585_v41, 0.0 }
 0x1df   : > { %v567_v38 = vpop.f32.mrf.mxu1 }
 0x1e0   : > { %v568_v40 = vadd.f32 %v870_v9, %v567_v38  ;;  %v601_v27 = vsel %vm393_vm0, %v583_v37, 0.0  ;;  %v586_v44 = vadd.f32 %v576_v39, %v1300_v33 }
 0x1e1   : > { %602 = vadd.xlane.f32.xlu0 %v601_v27 }
 0x1e2   : > { %v584_v17 = vadd.f32 %v568_v40, %v1288_v29  ;;  %v610_v28 = vsel %vm393_vm0, %v586_v44, 0.0 }
 0x1e4   : > { %v604_v42 = vsel %vm393_vm0, %v584_v17, 0.0 }
 0x1e5   : > { %605 = vadd.xlane.f32.xlu1 %v604_v42  ;;  %608 = vadd.xlane.f32.xlu0 %v607_v43 }
 0x1e9   : > { %611 = vadd.xlane.f32.xlu1 %v610_v28 }
 0x260   : > { %v597_v45 = vpop.xlane.xlu1 %596 }
 0x261   : > { %v616_v46 = vmul.f32 0.015625, %v597_v45 }
 0x262   : > { %v591_v47 = vpop.xlane.xlu0 %590 }
 0x263   : > { %v1349_v48 = vsub.f32 %v581_v14, %v616_v46  ;;  %v614_v32 = vmul.f32 0.015625, %v591_v47  ;;  %v876_v47 = vld [vmem:[%s1478_s6] ss:$0 sm:$0xff] }
 0x264   : > { %v600_v49 = vpop.xlane.xlu1 %599 }
 0x265   : > { %v1351_v50 = vsub.f32 %v579_v20, %v614_v32  ;;  %v617_v29 = vmul.f32 0.015625, %v600_v49  ;;  %v632_v51 = vmul.f32 %v1349_v48, %v1349_v48 }
 0x266   : > { %v594_v52 = vpop.xlane.xlu0 %593 }
 0x267   : > { %v1355_v33 = vsub.f32 %v582_v24, %v617_v29  ;;  %v615_v53 = vmul.f32 0.015625, %v594_v52  ;;  %v644_v54 = vsel %vm393_vm0, %v632_v51, 0.0  ;;  %v630_v55 = vmul.f32 %v1351_v50, %v1351_v50 }
 0x268   : > { %645 = vadd.xlane.f32.xlu0 %v644_v54 }
 0x269   : > { %v1360_v56 = vsub.f32 %v580_v31, %v615_v53  ;;  %v633_v57 = vmul.f32 %v1355_v33, %v1355_v33  ;;  %v638_v61 = vsel %vm393_vm0, %v630_v55, 0.0 }
 0x26a   : > { %v603_v58 = vpop.xlane.xlu0 %602 }
 0x26b   : > { %v618_v59 = vmul.f32 0.015625, %v603_v58  ;;  %v647_v60 = vsel %vm393_vm0, %v633_v57, 0.0  ;;  %v631_v62 = vmul.f32 %v1360_v56, %v1360_v56 }
 0x26c   : > { %648 = vadd.xlane.f32.xlu1 %v647_v60  ;;  %639 = vadd.xlane.f32.xlu0 %v638_v61 }
 0x26d   : > { %v1368_v63 = vsub.f32 %v583_v37, %v618_v59  ;;  %v641_v4 = vsel %vm393_vm0, %v631_v62, 0.0 }
 0x26e   : > { %v606_v0 = vpop.xlane.xlu1 %605  ;;  %v609_v1 = vpop.xlane.xlu0 %608 }
 0x26f   : > { %v619_v2 = vmul.f32 0.015625, %v606_v0  ;;  %v620_v3 = vmul.f32 0.015625, %v609_v1  ;;  %v634_v5 = vmul.f32 %v1368_v63, %v1368_v63 }
 0x270   : > { %642 = vadd.xlane.f32.xlu1 %v641_v4 }
 0x271   : > { %v1373_v6 = vsub.f32 %v584_v17, %v619_v2  ;;  %v1375_v7 = vsub.f32 %v585_v41, %v620_v3  ;;  %v650_v8 = vsel %vm393_vm0, %v634_v5, 0.0 }
 0x272   : > { %v612_v9 = vpop.xlane.xlu1 %611  ;;  %651 = vadd.xlane.f32.xlu0 %v650_v8 }
 0x273   : > { %v621_v10 = vmul.f32 0.015625, %v612_v9  ;;  %v635_v11 = vmul.f32 %v1373_v6, %v1373_v6  ;;  %v636_v12 = vmul.f32 %v1375_v7, %v1375_v7 }
 0x275   : > { %v1382_v13 = vsub.f32 %v586_v44, %v621_v10  ;;  %v653_v14 = vsel %vm393_vm0, %v635_v11, 0.0  ;;  %v656_v15 = vsel %vm393_vm0, %v636_v12, 0.0  ;;  %v875_v44 = vld [vmem:[%s1477_s5] ss:$0 sm:$0xff] }
 0x276   : > { %654 = vadd.xlane.f32.xlu1 %v653_v14  ;;  %657 = vadd.xlane.f32.xlu0 %v656_v15 }
 0x277   : > { %v637_v18 = vmul.f32 %v1382_v13, %v1382_v13 }
 0x279   : > { %v659_v19 = vsel %vm393_vm0, %v637_v18, 0.0 }
 0x27a   : > { %660 = vadd.xlane.f32.xlu1 %v659_v19 }
 0x2f1   : > { %v646_v20 = vpop.xlane.xlu0 %645 }
 0x2f2   : > { %v664_v21 = vmul.f32 0.015625, %v646_v20 }
 0x2f4   : > { %v672_v22 = vadd.f32 1e-05, %v664_v21 }
 0x2f5   : > { %v649_v23 = vpop.xlane.xlu1 %648  ;;  %v640_v24 = vpop.xlane.xlu0 %639 }
 0x2f6   : > { %1015 = vrsqrt.f32 %v672_v22  ;;  %v665_v25 = vmul.f32 0.015625, %v649_v23  ;;  %v662_v30 = vmul.f32 0.015625, %v640_v24 }
 0x2f8   : > { %v673_v31 = vadd.f32 1e-05, %v665_v25  ;;  %v670_v26 = vadd.f32 1e-05, %v662_v30 }
 0x2f9   : > { %v643_v34 = vpop.xlane.xlu1 %642 }
 0x2fa   : > { %1017 = vrsqrt.f32 %v673_v31  ;;  %v663_v35 = vmul.f32 0.015625, %v643_v34 }
 0x2fb   : > { %1019 = vrsqrt.f32 %v670_v26  ;;  %v652_v36 = vpop.xlane.xlu0 %651 }
 0x2fc   : > { %v671_v16 = vadd.f32 1e-05, %v663_v35  ;;  %v666_v37 = vmul.f32 0.015625, %v652_v36 }
 0x2fe   : > { %1021 = vrsqrt.f32 %v671_v16  ;;  %v674_v38 = vadd.f32 1e-05, %v666_v37 }
 0x2ff   : > { %v655_v39 = vpop.xlane.xlu1 %654  ;;  %v658_v40 = vpop.xlane.xlu0 %657 }
 0x300   : > { %1023 = vrsqrt.f32 %v674_v38  ;;  %v667_v27 = vmul.f32 0.015625, %v655_v39  ;;  %v668_v41 = vmul.f32 0.015625, %v658_v40 }
 0x302   : > { %v675_v17 = vadd.f32 1e-05, %v667_v27  ;;  %v676_v42 = vadd.f32 1e-05, %v668_v41 }
 0x303   : > { %v1016_v43 = vpop.eup %1015  ;;  %v661_v28 = vpop.xlane.xlu1 %660 }
 0x304   : > { %v688_v45 = vmul.f32 %v1016_v43, %v1349_v48  ;;  %1025 = vrsqrt.f32 %v675_v17  ;;  %v669_v46 = vmul.f32 0.015625, %v661_v28 }
 0x305   : > { %1027 = vrsqrt.f32 %v676_v42 }
 0x306   : > { %v702_v32 = vmul.f32 %v875_v44, %v688_v45  ;;  %v677_v49 = vadd.f32 1e-05, %v669_v46 }
 0x307   : > { %v1018_v29 = vpop.eup %1017 }
 0x308   : > { %v1020_v51 = vpop.eup %1019  ;;  %v716_v52 = vadd.f32 %v876_v47, %v702_v32  ;;  %v689_v53 = vmul.f32 %v1018_v29, %v1355_v33  ;;  %1029 = vrsqrt.f32 %v677_v49 }
 0x309   : > { %v686_v54 = vmul.f32 %v1020_v51, %v1351_v50 }
 0x30a   : > { %724 = vst.msk [vmem:[%s1399_s13 + $0x10] sm:$0xff] %vm393_vm0, %v716_v52  ;;  %v703_v48 = vmul.f32 %v875_v44, %v689_v53 }
 0x30b   : > { %v1022_v55 = vpop.eup %1021  ;;  %v700_v57 = vmul.f32 %v875_v44, %v686_v54 }
 0x30c   : > { %v717_v58 = vadd.f32 %v876_v47, %v703_v48  ;;  %v687_v59 = vmul.f32 %v1022_v55, %v1360_v56 }
 0x30d   : > { %v1024_v60 = vpop.eup %1023  ;;  %v714_v33 = vadd.f32 %v876_v47, %v700_v57 }
 0x30e   : > { %725 = vst.msk [vmem:[%s1399_s13 + $0x18] sm:$0xff] %vm393_vm0, %v717_v58  ;;  %v701_v50 = vmul.f32 %v875_v44, %v687_v59  ;;  %v690_v61 = vmul.f32 %v1024_v60, %v1368_v63 }
 0x30f   : > { %722 = vst.msk [vmem:[%s1399_s13] sm:$0xff] %vm393_vm0, %v714_v33 }
 0x310   : > { %v715_v62 = vadd.f32 %v876_v47, %v701_v50  ;;  %v704_v0 = vmul.f32 %v875_v44, %v690_v61 }
 0x311   : > { %v1026_v1 = vpop.eup %1025 }
 0x312   : > { %v1028_v2 = vpop.eup %1027  ;;  %723 = vst.msk [vmem:[%s1399_s13 + $0x8] sm:$0xff] %vm393_vm0, %v715_v62  ;;  %v718_v56 = vadd.f32 %v876_v47, %v704_v0  ;;  %v691_v3 = vmul.f32 %v1026_v1, %v1373_v6 }
 0x313   : > { %v692_v4 = vmul.f32 %v1028_v2, %v1375_v7 }
 0x314   : > { %726 = vst.msk [vmem:[%s1399_s13 + $0x20] sm:$0xff] %vm393_vm0, %v718_v56  ;;  %v705_v63 = vmul.f32 %v875_v44, %v691_v3 }
 0x315   : > { %v1030_v5 = vpop.eup %1029  ;;  %v706_v8 = vmul.f32 %v875_v44, %v692_v4 }
 0x316   : > { %v719_v9 = vadd.f32 %v876_v47, %v705_v63  ;;  %v693_v10 = vmul.f32 %v1030_v5, %v1382_v13 }
 0x317   : > { %v720_v11 = vadd.f32 %v876_v47, %v706_v8 }
 0x318   : > { %727 = vst.msk [vmem:[%s1399_s13 + $0x28] sm:$0xff] %vm393_vm0, %v719_v9  ;;  %v707_v12 = vmul.f32 %v875_v44, %v693_v10 }
 0x319   : > { %728 = vst.msk [vmem:[%s1399_s13 + $0x30] sm:$0xff] %vm393_vm0, %v720_v11 }
 0x31a   : > { %v721_v14 = vadd.f32 %v876_v47, %v707_v12 }
 0x31c   : > { %729 = vst.msk [vmem:[%s1399_s13 + $0x38] sm:$0xff] %vm393_vm0, %v721_v14 }
 0x31d   : > { %s878_s17 = sshll.u32 %s1081_s27, 1  ;;  %s879_s19 = sshll.u32 %s1085_s28, 4 }
 0x31e   : > { %s743_s12 = sadd.s32 %s879_s19, %s878_s17  ;;  %s756_s22 = sshll.u32 %s1399_s13, 4  ;;  %s757_s22 = int_to_ptr.vmem [resolvable:$true] %s756_s22 }
 0x31f   : > { %s880_s14 = sshll.u32 %s743_s12, 7  ;;  %s1099_s9 = smov 256  }
 0x320   : > { %s745_s10 = scalar_lea.hbm %s1479_s7, %s880_s14  ;;  %931 = sst [smem:[#allocation6]] (%p1206_p8), %s1099_s9 }
 0x321   : > { %s1100_s0 = smov 512   ;;  %s1101_s1 = smov 2  }
 0x322   : > { %932 = sst [smem:[#allocation6 + $0x1]] (%p1206_p8), %s1100_s0  ;;  %s1102_s27 = smov 128  }
 0x323   : > { %933 = sst [smem:[#allocation6 + $0x2]] (%p1206_p8), %s1101_s1  ;;  %s1103_s28 = smov 8  }
 0x324   : > { %934 = sst [smem:[#allocation6 + $0x3]] (%p1206_p8), %s1102_s27  ;;  %s1104_s13 = smov 131072  }
 0x325   : > { %935 = sst [smem:[#allocation6 + $0x4]] (%p1206_p8), %s1102_s27  ;;  %s1105_s17 = smov 0  }
 0x326   : > { %936 = sst [smem:[#allocation6 + $0x5]] (%p1206_p8), %s1103_s28 }
 0x327   : > { %937 = dma.general (%p1206_p8), %s757_s22, 1024, %s745_s10, %s731_s18, %s1104_s13, [#allocation6], %s1105_s17, 0  }
 0x328 PF: > { %p943_p1 = scmp.ge.s32.totalorder %s1097_s8, 2  ;;  %s784_s0 = sand.u32 1, %s1069_s24  }
 0x329   : > { %s785_s1 = scalar_lea.sflag [#allocation4], %s784_s0 }
 0x32a   : > { %p940_p2 = pnand %p943_p1, %p1210_p9 }
 0x32c   : > { %p941_p3 = pneg %p940_p2 }
 0x32e   : > { %1064 = dma.done.wait (%p941_p3), %s785_s1, 1024  }
 0x32f   : > { %1066 = vsyncadd (%p941_p3), %s785_s1, 4294966272  ;;  %s20_s8 = sadd.s32 1, %s1097_s8   ;;  %s1489_s15 = sld [smem:[#allocation8_spill]] }
 0x330   : > { %p17_p4 = scmp.ge.s32.totalorder %s20_s8, 6   ;;  %s1490_s24 = smov %s1073_s25 }
 0x331   : > { %s1491_s25 = smov %s1077_s26  ;;  %s1492_s26 = smov %s1218_s20 }
 0x332   : > { %s1493_s27 = smov %s1089_s29  ;;  %s1494_s28 = smov %s1093_s30 }
 0x333   : > { %s1495_s29 = smov %s1498_s11  ;;  %19 = sbr.rel (!%p17_p4) target bundleno = 8 (0x8), region = 131 }
 0x335   : > { %s1496_s30 = smov %s1489_s15 }
 0x338   :  { %790 = vsyncpa [#allocation4], 1 }
 0x339   :  { %792 = vsyncpa [#allocation4 + $0x1], 1 }

// kernel: combine_tensors_forward.9
= control target key start
LH: loop header
LB: loop body
LE: loop exit
PB: predicated region body
PF: predicated region fallthrough
CT: control target
= control target key end

     0   :  { %17 = vsyncpa [#allocation3], 0  ;;  %s1584_s0 = inlined_call_operand.hbm [shape: f32[8,64,32], index: 0, kind: input, shape index: {}]   ;;  %s1585_s1 = inlined_call_operand.vmem [shape: f32[8,32,64], index: 1, kind: input, shape index: {}]   ;;  %s1586_s2 = inlined_call_operand.vmem [shape: f32[64,64], index: 2, kind: input, shape index: {}]   ;;  %s1587_s3 = inlined_call_operand.vmem [shape: f32[64,1], index: 3, kind: input, shape index: {}]   ;;  %s1588_s4 = inlined_call_operand.vmem [shape: f32[32,64], index: 4, kind: input, shape index: {}]   ;;  %s1589_s5 = inlined_call_operand.vmem [shape: f32[32,1], index: 5, kind: input, shape index: {}]   ;;  %s1590_s6 = inlined_call_operand.vmem [shape: f32[32,64], index: 6, kind: input, shape index: {}]   ;;  %s1591_s7 = inlined_call_operand.vmem [shape: f32[1,64], index: 7, kind: input, shape index: {}]   ;;  %s1592_s8 = inlined_call_operand.vmem [shape: f32[32,32], index: 8, kind: input, shape index: {}]   ;;  %s1593_s9 = inlined_call_operand.vmem [shape: f32[32,32], index: 9, kind: input, shape index: {}]   ;;  %s1594_s10 = inlined_call_operand.vmem [shape: f32[32,1], index: 10, kind: input, shape index: {}]   ;;  %s1595_s11 = inlined_call_operand.vmem [shape: f32[8,1,64], index: 11, kind: input, shape index: {}]   ;;  %s1596_s12 = inlined_call_operand.vmem [shape: f32[8,32,64], index: 12, kind: output, shape index: {}]  }
   0x1   :  { %19 = vsyncpa [#allocation3 + $0x1], 0  ;;  %s1330_s21 = smov 0   ;;  %s1332_s22 = smov 0  }
   0x2   :  { %s1334_s23 = smov 0   ;;  %s1336_s24 = smov 0  }
   0x3 LB: > { %1599 = sst [smem:[#allocation5_spill]] %s1255_s23  ;;  %s1349_s25 = sadd.s32 4294967295, %s1259_s24   ;;  %s1259_s24 = sphi %s1336_s24, %s1609_s24   ;;  %s1255_s23 = sphi %s1334_s23, %s1606_s23   ;;  %s1251_s22 = sphi %s1332_s22, %s1608_s22   ;;  %s1247_s21 = sphi %s1330_s21, %s1607_s21  }
   0x4   : > { %s1352_s26 = sadd.s32 1, %s1259_s24   ;;  %s32_s28 = sadd.s32 1, %s1255_s23 }
   0x5   : > { %s29_s27 = ssub.s32 %s1259_s24, %s1352_s26  ;;  %p39_p1 = scmp.ne.s32.totalorder %s1255_s23, %s1251_s22 }
   0x6   : > { %p30_p0 = scmp.eq.s32.totalorder %s29_s27, 0  ;;  %p40_p2 = scmp.eq.s32.totalorder %s1259_s24, 0 }
   0x7   : > { %p45_p3 = scmp.ne.s32.totalorder %s1251_s22, %s1247_s21  ;;  %p46_p5 = scmp.eq.s32.totalorder %s1349_s25, 0 }
   0x8   : > { %s1362_s29 = scalar_select %p30_p0, %s1255_s23, %s32_s28  }
   0x9   : > { %p41_p4 = por %p40_p2, %p39_p1  ;;  %p1159_p6 = scmp.lt.s32.totalorder %s1259_s24, 8 }
   0xa   : > { %1600 = sst [smem:[#allocation6_spill]] %s1362_s29  ;;  %p1366_p7 = por %p46_p5, %p45_p3 }
   0xb   : > { %s363_s13 = sand.u32 1, %s1255_s23   ;;  %s1072_s15 = sshll.u32 %s1259_s24, 10 }
   0xc   : > { %s1601_s30 = scalar_select %p1366_p7, 1, 0 }
   0xd   : > { %s1047_s14 = sshll.u32 %s363_s13, 6  ;;  %s1375_s18 = scalar_lea.hbm %s1584_s0, %s1072_s15 }
   0xe   : > { %s367_s19 = scalar_lea.vmem [#allocation2], %s1047_s14  ;;  %p1379_p8 = pnand %p1159_p6, %p41_p4 }
   0xf   : > { %s374_s20 = sshll.u32 %s367_s19, 4  ;;  %s1384_s27 = scalar_lea.sflag [#allocation3], %s363_s13  ;;  %s1377_s20 = int_to_ptr.vmem [resolvable:$true] %s374_s20 }
  0x10   : > { %s1197_s28 = scalar_lea.hbm %s1375_s18, 1024  ;;  %p1199_p11 = pneg %p1379_p8 }
  0x11   : > { %p1198_p10 = scmp.ne.s32.totalorder %s1375_s18, %s1197_s28  ;;  %s1202_s14 = scalar_lea.hbm %s1584_s0, 8192 }
  0x12   : > { %p1203_p0 = scmp.lt.s32.totalorder %s1375_s18, %s1584_s0  ;;  %p1204_p1 = scmp.lt.s32.totalorder %s1202_s14, %s1197_s28 }
  0x13   : > { %p1200_p12 = pnand %p1199_p11, %p1198_p10 }
  0x14   : > { %p1205_p2 = por %p1204_p1, %p1203_p0 }
  0x15   : > { %p1201_p13 = pneg %p1200_p12 }
  0x17   : > { %p1206_p3 = pnand %p1205_p2, %p1201_p13 }
  0x19   : > { %1209 = shalt.err (!%p1206_p3)
}
  0x1a   : > { %s1210_s13 = scalar_lea.vmem %s1377_s20, 1024  ;;  %s1261_s29 = smov [#allocation2]  }
  0x1b   : > { %p1211_p4 = scmp.ne.s32.totalorder %s1377_s20, %s1210_s13  ;;  %s1215_s23 = sshll.u32 %s1261_s29, 4  ;;  %s1216_s23 = int_to_ptr.vmem [resolvable:$false] %s1215_s23 }
  0x1c   : > { %s1217_s15 = scalar_lea.vmem %s1216_s23, 2048  ;;  %p1218_p10 = scmp.lt.s32.totalorder %s1377_s20, %s1216_s23 }
  0x1d   : > { %p1213_p5 = pnand %p1211_p4, %p1199_p11  ;;  %p1219_p12 = scmp.lt.s32.totalorder %s1217_s15, %s1210_s13 }
  0x1f   : > { %p1214_p6 = pneg %p1213_p5  ;;  %p1220_p9 = por %p1219_p12, %p1218_p10 }
  0x21   : > { %p1221_p7 = pnand %p1220_p9, %p1214_p6 }
  0x23   : > { %1224 = shalt.err (!%p1221_p7)
}
  0x24   : > { %s1262_s28 = smov 128   ;;  %s1263_s16 = smov 8  }
  0x25   : > { %1158 = dma.hbm_to_vmem [thread:$0]  (!%p1379_p8), %s1375_s18, 1024, %s1377_s20, %s1384_s27, %s1262_s28, %s1262_s28, %s1263_s16  }
  0x26   : > { %p396_p11 = scmp.lt.s32.totalorder %s1259_s24, 9  ;;  %p1603_p13 = scmp.ge.s32.totalorder %s1259_s24, 1 }
  0x28   : > { %p397_p0 = pnand %p1603_p13, %p396_p11 }
  0x29   : > { %s402_s23 = sand.u32 (!%p397_p0), 1, %s1251_s22   ;;  %p1604_p7 = scmp.ne.s32.totalorder (!%p397_p0), %s1601_s30, 0 }
  0x2a   : > { %400 = sbr.rel (%p397_p0) target bundleno = 913 (0x391), region = 68  ;;  %s1051_s29 = sshll.u32 (!%p397_p0), %s402_s23, 6 }
  0x2b   : > { %s403_s14 = scalar_lea.sflag (!%p397_p0), [#allocation3], %s402_s23  ;;  %s406_s17 = scalar_lea.vmem (!%p397_p0), [#allocation2], %s1051_s29 }
  0x2f   : > { %1242 = dma.done.wait (%p1604_p7), %s403_s14, 1024  }
  0x30   : > { %1244 = vsyncadd (%p1604_p7), %s403_s14, 4294966272  ;;  %v1264_v0 = vmov 0   ;;  %v475_v1 = vld [vmem:[%s406_s17 + $0x30] sm:$0xff]  ;;  %v476_v2 = vld [vmem:[%s406_s17 + $0x38] sm:$0xff]  ;;  %vm541_vm0 = vcmask 523264   ;;  %vm723_vm1 = vcmask 261120  }
  0x31   : > { %1195 = vset.pattern.permute.xlu0 %v1264_v0  ;;  %1196 = vset.pattern.permute.xlu1 %v1264_v0  ;;  %v473_v3 = vld [vmem:[%s406_s17 + $0x20] sm:$0xff]  ;;  %v492_v4 = vpack.c.bf16 %v476_v2, %v475_v1  ;;  %v474_v5 = vld [vmem:[%s406_s17 + $0x28] sm:$0xff]  ;;  %v471_v7 = vld [vmem:[%s406_s17 + $0x10] sm:$0xff]  ;;  %p455_p8 = scmp.lt.s32.totalorder %s1349_s25, 7 }
  0x32   : > { %v491_v6 = vpack.c.bf16 %v474_v5, %v473_v3  ;;  %v472_v8 = vld [vmem:[%s406_s17 + $0x18] sm:$0xff]  ;;  %v477_v9 = vld [vmem:[%s1586_s2] sm:$0xff]  ;;  %v478_v10 = vld [vmem:[%s1586_s2 + $0x8] sm:$0xff] }
  0x33   : > { %1101 = vmatprep.subr.bf16.mxu0 %v492_v4  ;;  %v485_v11 = vpack.c.bf16 %v478_v10, %v477_v9  ;;  %v490_v12 = vpack.c.bf16 %v472_v8, %v471_v7  ;;  %v499_v13 = vld [vmem:[%s1587_s3 + $0x30] sm:$0xff]  ;;  %v469_v14 = vld [vmem:[%s406_s17] sm:$0xff]  ;;  %v470_v15 = vld [vmem:[%s406_s17 + $0x8] sm:$0xff]  ;;  %s1611_s25 = smov (!%p455_p8, %s1349_s25), 7 }
  0x34   : > { %1102 = vmatpush3.bf16.msra.mxu0 %v492_v4  ;;  %533 = vperm.xlu0 %1195, %v499_v13   ;;  %v497_v16 = vld [vmem:[%s1587_s3 + $0x20] sm:$0xff]  ;;  %v500_v17 = vld [vmem:[%s1587_s3 + $0x38] sm:$0xff]  ;;  %v498_v18 = vld [vmem:[%s1587_s3 + $0x28] sm:$0xff]  ;;  %v489_v19 = vpack.c.bf16 %v470_v15, %v469_v14  ;;  %s1073_s30 = sshll.u32 %s1611_s25, 5  ;;  %s462_s17 = scalar_lea.vmem %s1595_s11, %s1611_s25 }
  0x35   : > { %1103 = vmatprep.subr.bf16.mxu0 %v491_v6  ;;  %1109 = vmatprep.mubr.msk.bf16.mxu0 %vm541_vm0, %v485_v11  ;;  %v495_v20 = vld [vmem:[%s1587_s3 + $0x10] sm:$0xff]  ;;  %v480_v22 = vld [vmem:[%s1586_s2 + $0x18] sm:$0xff]  ;;  %v481_v24 = vld [vmem:[%s1586_s2 + $0x20] sm:$0xff]  ;;  %s459_s13 = scalar_lea.vmem %s1585_s1, %s1073_s30  ;;  %s467_s20 = scalar_lea.vmem %s1596_s12, %s1073_s30 }
  0x36   : > { %523 = vperm.xlu1 %1196, %v497_v16   ;;  %v479_v21 = vld [vmem:[%s1586_s2 + $0x10] sm:$0xff]  ;;  %v496_v23 = vld [vmem:[%s1587_s3 + $0x18] sm:$0xff]  ;;  %v482_v25 = vld [vmem:[%s1586_s2 + $0x28] sm:$0xff] }
  0x37   : > { %v486_v26 = vpack.c.bf16 %v480_v22, %v479_v21  ;;  %v493_v27 = vld [vmem:[%s1587_s3] sm:$0xff]  ;;  %v487_v28 = vpack.c.bf16 %v482_v25, %v481_v24  ;;  %v494_v29 = vld [vmem:[%s1587_s3 + $0x8] sm:$0xff]  ;;  %v483_v31 = vld [vmem:[%s1586_s2 + $0x30] sm:$0xff] }
  0x38   : > { %1104 = vmatpush3.bf16.msra.mxu0 %v491_v6  ;;  %538 = vperm.xlu0 %1195, %v500_v17   ;;  %v629_v30 = vld [vmem:[%s1589_s5] sm:$0xff]  ;;  %v484_v32 = vld [vmem:[%s1586_s2 + $0x38] sm:$0xff]  ;;  %v630_v33 = vld [vmem:[%s1589_s5 + $0x8] sm:$0xff] }
  0x39   : > { %1105 = vmatprep.subr.bf16.mxu0 %v490_v12  ;;  %v488_v34 = vpack.c.bf16 %v484_v32, %v483_v31  ;;  %v631_v35 = vld [vmem:[%s1589_s5 + $0x10] sm:$0xff]  ;;  %v632_v36 = vld [vmem:[%s1589_s5 + $0x18] sm:$0xff]  ;;  %v909_v37 = vld [vmem:[%s1594_s10] sm:$0xff] }
  0x3a   : > { %528 = vperm.xlu1 %1196, %v498_v18   ;;  %v910_v38 = vld [vmem:[%s1594_s10 + $0x8] sm:$0xff]  ;;  %v911_v39 = vld [vmem:[%s1594_s10 + $0x10] sm:$0xff]  ;;  %v912_v40 = vld [vmem:[%s1594_s10 + $0x18] sm:$0xff] }
  0x3b   : > { %v619_v41 = vld [vmem:[%s1588_s4] sm:$0xff]  ;;  %v620_v42 = vld [vmem:[%s1588_s4 + $0x8] sm:$0xff]  ;;  %v621_v8 = vld [vmem:[%s1588_s4 + $0x10] sm:$0xff] }
  0x3c   : > { %1106 = vmatpush3.bf16.msra.mxu0 %v490_v12  ;;  %513 = vperm.xlu0 %1195, %v495_v20   ;;  %v623_v43 = vpack.c.bf16 %v620_v42, %v619_v41  ;;  %v622_v9 = vld [vmem:[%s1588_s4 + $0x18] sm:$0xff]  ;;  %v710_v11 = vld [vmem:[%s1590_s6 + $0x10] sm:$0xff]  ;;  %v708_v14 = vld [vmem:[%s1590_s6] sm:$0xff] }
  0x3d   : > { %1107 = vmatprep.subr.bf16.mxu0 %v489_v19  ;;  %v624_v10 = vpack.c.bf16 %v622_v9, %v621_v8  ;;  %v711_v12 = vld [vmem:[%s1590_s6 + $0x18] sm:$0xff]  ;;  %v709_v15 = vld [vmem:[%s1590_s6 + $0x8] sm:$0xff]  ;;  %v793_v31 = vld [vmem:[%s459_s13 + $0x10] sm:$0xff] }
  0x3e   : > { %518 = vperm.xlu1 %1196, %v496_v23   ;;  %1125 = vmatprep.mubr.msk.bf16.mxu1 %vm541_vm0, %v623_v43  ;;  %v715_v13 = vpack.c.bf16 %v711_v12, %v710_v11  ;;  %v714_v16 = vpack.c.bf16 %v709_v15, %v708_v14  ;;  %v794_v32 = vld [vmem:[%s459_s13 + $0x18] sm:$0xff]  ;;  %v779_v43 = vld [vmem:[%s1592_s8] sm:$0xff] }
  0x3f   : > { %v790_v41 = vld [vmem:[%s1593_s9 + $0x18] sm:$0xff] }
  0x40   : > { %1108 = vmatpush3.bf16.msra.mxu0 %v489_v19  ;;  %503 = vperm.xlu0 %1195, %v493_v27  }
  0x42   : > { %508 = vperm.xlu1 %1196, %v494_v29  }
  0x43   : > { %1110 = vmatmul.mubr.msk.bf16.vlgmr.msra.gmra.mxu0 %vm541_vm0, %v486_v26 }
  0x44   : > { %1113 = vmatprep.mubr.msk.bf16.mxu0 %vm541_vm0, %v487_v28  ;;  %635 = vperm.xlu0 %1195, %v629_v30  }
  0x46   : > { %640 = vperm.xlu1 %1196, %v630_v33   ;;  %v798_v33 = vpack.c.bf16 %v794_v32, %v793_v31 }
  0x48   : > { %645 = vperm.xlu0 %1195, %v631_v35   ;;  %1137 = vmatprep.subr.bf16.mxu0 %v798_v33  ;;  %v792_v35 = vld [vmem:[%s459_s13 + $0x8] sm:$0xff] }
  0x49   : > { %1138 = vmatpush3.bf16.msra.mxu0 %v798_v33 }
  0x4a   : > { %650 = vperm.xlu1 %1196, %v632_v36  }
  0x4b   : > { %1114 = vmatmul.mubr.msk.bf16.gmra.mxu0 %vm541_vm0, %v488_v34  ;;  %v791_v34 = vld [vmem:[%s459_s13] sm:$0xff] }
  0x4c   : > { %915 = vperm.xlu0 %1195, %v909_v37   ;;  %v797_v36 = vpack.c.bf16 %v792_v35, %v791_v34  ;;  %v787_v37 = vld [vmem:[%s1593_s9] sm:$0xff] }
  0x4e   : > { %920 = vperm.xlu1 %1196, %v910_v38   ;;  %1139 = vmatprep.subr.bf16.mxu0 %v797_v36  ;;  %v788_v38 = vld [vmem:[%s1593_s9 + $0x8] sm:$0xff] }
  0x4f   : > { %1140 = vmatpush3.bf16.msra.mxu0 %v797_v36 }
  0x50   : > { %925 = vperm.xlu0 %1195, %v911_v39   ;;  %v795_v39 = vpack.c.bf16 %v788_v38, %v787_v37 }
  0x52   : > { %930 = vperm.xlu1 %1196, %v912_v40   ;;  %v789_v40 = vld [vmem:[%s1593_s9 + $0x10] sm:$0xff]  ;;  %1141 = vmatprep.mubr.msk.bf16.mxu0 %vm723_vm1, %v795_v39 }
  0x53   : > { %v796_v42 = vpack.c.bf16 %v790_v41, %v789_v40 }
  0x55   : > { %1142 = vmatmul.mubr.msk.bf16.vlgmr.msra.gmra.mxu0 %vm723_vm1, %v796_v42 }
  0xaf   : > { %v534_v47 = vpop.permute.xlu0 %533 }
  0xb1   : > { %v524_v45 = vpop.permute.xlu1 %523 }
  0xb3   : > { %v539_v52 = vpop.permute.xlu0 %538 }
  0xb5   : > { %v529_v50 = vpop.permute.xlu1 %528 }
  0xb7   : > { %v514_v62 = vpop.permute.xlu0 %513 }
  0xb9   : > { %v519_v57 = vpop.permute.xlu1 %518 }
  0xbb   : > { %v504_v5 = vpop.permute.xlu0 %503 }
  0xbd   : > { %v509_v2 = vpop.permute.xlu1 %508 }
  0xbf   : > { %v636_v19 = vpop.permute.xlu0 %635 }
  0xc1   : > { %v641_v17 = vpop.permute.xlu1 %640 }
  0xc3   : > { %v646_v25 = vpop.permute.xlu0 %645 }
  0xc5   : > { %v651_v22 = vpop.permute.xlu1 %650 }
 0x103   : > { %v1111_v44 = vpop.f32.mrf.mxu0 }
 0x104   : > { %v597_v1 = vadd.f32 %v1111_v44, %v514_v62  ;;  %v780_v44 = vld [vmem:[%s1592_s8 + $0x8] sm:$0xff] }
 0x105   : > { %v588_v46 = vpop.f32.mrf.mxu0 }
 0x106   : > { %v589_v6 = vadd.f32 %v588_v46, %v504_v5 }
 0x107   : > { %v1112_v48 = vpop.f32.mrf.mxu0 }
 0x108   : > { %v600_v63 = vadd.f32 %v1112_v48, %v519_v57  ;;  %v781_v57 = vld [vmem:[%s1592_s8 + $0x10] sm:$0xff] }
 0x109   : > { %v591_v49 = vpop.f32.mrf.mxu0 }
 0x10a   : > { %v626_v3 = vpack.c.bf16 %v600_v63, %v597_v1  ;;  %v592_v4 = vadd.f32 %v591_v49, %v509_v2  ;;  %v921_v63 = vpop.permute.xlu1 %920 }
 0x10b   : > { %v1115_v51 = vpop.f32.mrf.mxu0 }
 0x10c   : > { %v613_v55 = vadd.f32 %v1115_v51, %v534_v47  ;;  %v625_v7 = vpack.c.bf16 %v592_v4, %v589_v6  ;;  %v1062_v47 = vld [vmem:[%s1591_s7] ss:$0 sm:$0xff] }
 0x10d   : > { %v604_v53 = vpop.f32.mrf.mxu0 }
 0x10e   : > { %v605_v59 = vadd.f32 %v604_v53, %v524_v45  ;;  %v783_v45 = vpack.c.bf16 %v780_v44, %v779_v43  ;;  %v931_v9 = vpop.permute.xlu1 %930 }
 0x10f   : > { %v1116_v54 = vpop.f32.mrf.mxu0 }
 0x110   : > { %v616_v56 = vadd.f32 %v1116_v54, %v539_v52 }
 0x111   : > { %v607_v58 = vpop.f32.mrf.mxu0 }
 0x112   : > { %v608_v60 = vadd.f32 %v607_v58, %v529_v50  ;;  %v628_v61 = vpack.c.bf16 %v616_v56, %v613_v55  ;;  %v782_v58 = vld [vmem:[%s1592_s8 + $0x18] sm:$0xff] }
 0x114   : > { %v627_v0 = vpack.c.bf16 %v608_v60, %v605_v59  ;;  %1117 = vmatprep.subr.bf16.mxu1 %v628_v61  ;;  %v784_v59 = vpack.c.bf16 %v782_v58, %v781_v57 }
 0x115   : > { %1118 = vmatpush3.bf16.msra.mxu1 %v628_v61  ;;  %v1143_v60 = vpop.f32.mrf.mxu0  ;;  %v916_v61 = vpop.permute.xlu0 %915 }
 0x116   : > { %1119 = vmatprep.subr.bf16.mxu1 %v627_v0 }
 0x117   : > { %v839_v62 = vpop.f32.mrf.mxu0 }
 0x119   : > { %1120 = vmatpush3.bf16.msra.mxu1 %v627_v0  ;;  %v926_v1 = vpop.permute.xlu0 %925 }
 0x11a   : > { %1121 = vmatprep.subr.bf16.mxu1 %v626_v3 }
 0x11d   : > { %1122 = vmatpush3.bf16.msra.mxu1 %v626_v3  ;;  %v1144_v3 = vpop.f32.mrf.mxu0 }
 0x11e   : > { %1123 = vmatprep.subr.bf16.mxu1 %v625_v7 }
 0x121   : > { %1124 = vmatpush3.bf16.msra.mxu1 %v625_v7  ;;  %v1069_v7 = vld [vmem:[%s462_s17] ss:$0 sm:$0xff] }
 0x122   : > { %1129 = vmatprep.subr.bf16.mxu1 %v715_v13 }
 0x124   : > { %1126 = vmatmul.mubr.msk.bf16.vlgmr.msra.gmra.mxu1 %vm541_vm0, %v624_v10 }
 0x125   : > { %1130 = vmatpush3.bf16.msra.mxu1 %v715_v13  ;;  %v842_v13 = vpop.f32.mrf.mxu0 }
 0x126   : > { %1131 = vmatprep.subr.bf16.mxu1 %v714_v16 }
 0x129   : > { %1132 = vmatpush3.bf16.msra.mxu1 %v714_v16 }
 0x1e4   : > { %v1127_v18 = vpop.f32.mrf.mxu1 }
 0x1e5   : > { %v702_v28 = vadd.f32 %v1127_v18, %v646_v25 }
 0x1e6   : > { %v693_v20 = vpop.f32.mrf.mxu1 }
 0x1e7   : > { %v694_v26 = vadd.f32 %v693_v20, %v636_v19 }
 0x1e8   : > { %v1128_v21 = vpop.f32.mrf.mxu1 }
 0x1e9   : > { %v705_v23 = vadd.f32 %v1128_v21, %v651_v22 }
 0x1ea   : > { %v696_v24 = vpop.f32.mrf.mxu1 }
 0x1eb   : > { %v697_v27 = vadd.f32 %v696_v24, %v641_v17  ;;  %v713_v30 = vpack.c.bf16 %v705_v23, %v702_v28 }
 0x1ed   : > { %v712_v29 = vpack.c.bf16 %v697_v27, %v694_v26 }
 0x1ef   : > { %1133 = vmatprep.mubr.msk.bf16.mxu1 %vm723_vm1, %v712_v29 }
 0x1f0   : > { %1134 = vmatmul.mubr.msk.bf16.vlgmr.msra.gmra.mxu1 %vm723_vm1, %v713_v30 }
 0x1f1   : > { %1149 = vmatprep.mubr.msk.bf16.mxu1 %vm723_vm1, %v783_v45 }
 0x2b0   : > { %v1135_v46 = vpop.f32.mrf.mxu1 }
 0x2b1   : > { %v773_v50 = vadd.f32 %v1135_v46, %v1062_v47 }
 0x2b2   : > { %v764_v48 = vpop.f32.mrf.mxu1 }
 0x2b3   : > { %v765_v53 = vadd.f32 %v1062_v47, %v764_v48 }
 0x2b4   : > { %v1136_v49 = vpop.f32.mrf.mxu1 }
 0x2b5   : > { %v776_v51 = vadd.f32 %v1136_v49, %v1062_v47 }
 0x2b6   : > { %v767_v52 = vpop.f32.mrf.mxu1 }
 0x2b7   : > { %v786_v54 = vpack.c.bf16 %v776_v51, %v773_v50  ;;  %v768_v55 = vadd.f32 %v1062_v47, %v767_v52 }
 0x2b9   : > { %v785_v56 = vpack.c.bf16 %v768_v55, %v765_v53  ;;  %1145 = vmatprep.subr.bf16.mxu1 %v786_v54 }
 0x2ba   : > { %1146 = vmatpush3.bf16.msra.mxu1 %v786_v54 }
 0x2bb   : > { %1147 = vmatprep.subr.bf16.mxu1 %v785_v56 }
 0x2be   : > { %1148 = vmatpush3.bf16.msra.mxu1 %v785_v56 }
 0x2c1   : > { %1150 = vmatmul.mubr.msk.bf16.vlgmr.msra.gmra.mxu1 %vm723_vm1, %v784_v59 }
 0x381   : > { %v1151_v0 = vpop.f32.mrf.mxu1 }
 0x382   : > { %v903_v2 = vadd.f32 %v1151_v0, %v1143_v60 }
 0x383   : > { %v894_v4 = vpop.f32.mrf.mxu1 }
 0x384   : > { %v935_v5 = vadd.f32 %v926_v1, %v903_v2  ;;  %v895_v6 = vadd.f32 %v894_v4, %v839_v62 }
 0x385   : > { %v1152_v8 = vpop.f32.mrf.mxu1 }
 0x386   : > { %v939_v10 = vmul.f32 8.0, %v935_v5  ;;  %v933_v11 = vadd.f32 %v916_v61, %v895_v6  ;;  %v906_v12 = vadd.f32 %v1152_v8, %v1144_v3 }
 0x387   : > { %v897_v14 = vpop.f32.mrf.mxu1 }
 0x388   : > { %v950_v15 = vadd.f32 %v1069_v7, %v939_v10  ;;  %v937_v16 = vmul.f32 8.0, %v933_v11  ;;  %v936_v17 = vadd.f32 %v931_v9, %v906_v12  ;;  %v898_v18 = vadd.f32 %v897_v14, %v842_v13 }
 0x38a   : > { %954 = vst.msk [vmem:[%s467_s20 + $0x10] sm:$0xff] %vm541_vm0, %v950_v15  ;;  %v948_v19 = vadd.f32 %v1069_v7, %v937_v16  ;;  %v940_v20 = vmul.f32 8.0, %v936_v17  ;;  %v934_v21 = vadd.f32 %v921_v63, %v898_v18 }
 0x38c   : > { %952 = vst.msk [vmem:[%s467_s20] sm:$0xff] %vm541_vm0, %v948_v19  ;;  %v951_v22 = vadd.f32 %v1069_v7, %v940_v20  ;;  %v938_v23 = vmul.f32 8.0, %v934_v21 }
 0x38e   : > { %955 = vst.msk [vmem:[%s467_s20 + $0x18] sm:$0xff] %vm541_vm0, %v951_v22  ;;  %v949_v24 = vadd.f32 %v1069_v7, %v938_v23 }
 0x390   : > { %953 = vst.msk [vmem:[%s467_s20 + $0x8] sm:$0xff] %vm541_vm0, %v949_v24 }
 0x391 PF: > { %s1605_s25 = sld [smem:[#allocation5_spill]]  ;;  %p22_p9 = scmp.ge.s32.totalorder %s1352_s26, 10  }
 0x392   : > { %s1606_s23 = sld [smem:[#allocation6_spill]]  ;;  %s1607_s21 = smov %s1251_s22 }
 0x393   : > { %s1609_s24 = smov %s1352_s26  ;;  %24 = sbr.rel (!%p22_p9) target bundleno = 3 (0x3), region = 114 }
 0x397   : > { %s1608_s22 = smov %s1605_s25 }
 0x398   :  { %977 = vsyncpa [#allocation3], 1 }
 0x399   :  { %979 = vsyncpa [#allocation3 + $0x1], 1 }

// kernel: combine_tensors_forward.10
= control target key start
LH: loop header
LB: loop body
LE: loop exit
PB: predicated region body
PF: predicated region fallthrough
CT: control target
= control target key end

     0   :  { %s3891_s24 = smov 0   ;;  %s3893_s25 = smov 0   ;;  %s6406_s0 = inlined_call_operand.vmem [shape: f32[2,4,32,64], index: 0, kind: input, shape index: {}]   ;;  %s6407_s1 = inlined_call_operand.vmem [shape: f32[64,192], index: 1, kind: input, shape index: {}]   ;;  %s6408_s2 = inlined_call_operand.vmem [shape: f32[1,192], index: 2, kind: input, shape index: {}]   ;;  %s6409_s3 = inlined_call_operand.vmem [shape: f32[64,64], index: 3, kind: input, shape index: {}]   ;;  %s6410_s4 = inlined_call_operand.vmem [shape: f32[1,64], index: 4, kind: input, shape index: {}]   ;;  %s6411_s5 = inlined_call_operand.vmem [shape: f32[1,64], index: 5, kind: input, shape index: {}]   ;;  %s6412_s6 = inlined_call_operand.vmem [shape: f32[1,64], index: 6, kind: input, shape index: {}]   ;;  %s6413_s7 = inlined_call_operand.vmem [shape: f32[2,4,32,64], index: 7, kind: output, shape index: {}]  }
   0x1   :  { %s3895_s26 = smov 0   ;;  %s3897_s27 = smov 0  }
   0x2   :  { %s3899_s28 = smov 0   ;;  %s3901_s29 = smov 0  }
   0x3   :  { %s3903_s30 = smov 0  }
   0x4 LB: > { %s26_s8 = sadd.s32 1, %s3833_s28  ;;  %s29_s9 = sadd.s32 1, %s3837_s29  ;;  %s3841_s30 = sphi %s3903_s30, %s17_s30   ;;  %s3837_s29 = sphi %s3901_s29, %s6667_s29   ;;  %s3833_s28 = sphi %s3899_s28, %s6666_s28   ;;  %s3829_s27 = sphi %s3897_s27, %s6665_s27   ;;  %s3825_s26 = sphi %s3895_s26, %s6664_s26   ;;  %s3821_s25 = sphi %s3893_s25, %s6663_s25   ;;  %s3817_s24 = sphi %s3891_s24, %s6662_s24  }
   0x5   : > { %p27_p0 = scmp.ge.s32.totalorder %s26_s8, 2  ;;  %s3277_s10 = sadd.s32 4294967295, %s3841_s30  }
   0x6   : > { %p45_p1 = scmp.ne.s32.totalorder %s3821_s25, %s3817_s24  ;;  %p46_p2 = scmp.eq.s32.totalorder %s3841_s30, 0 }
   0x7   : > { %s6669_s8 = smov (%p27_p0, %s26_s8), 0  ;;  %s6671_s9 = smov (!%p27_p0, %s29_s9), %s3837_s29 }
   0x8   : > { %p31_p3 = scmp.ge.s32.totalorder %s6671_s9, 2  ;;  %p203_p4 = scmp.eq.s32.totalorder %s3277_s10, 3 }
   0x9   : > { %s34_s11 = ssub.s32 %s3833_s28, %s6669_s8  ;;  %p47_p5 = por %p46_p2, %p45_p1 }
   0xa   : > { %s6673_s9 = smov (%p31_p3, %s6671_s9), 0  ;;  %p3939_p6 = por %p203_p4, %p45_p1 }
   0xb   : > { %s33_s13 = ssub.s32 %s3837_s29, %s6673_s9  ;;  %s38_s15 = sadd.s32 1, %s3821_s25 }
   0xc   : > { %s35_s14 = sor.u32 %s34_s11, %s33_s13  ;;  %p3280_p8 = scmp.ge.s32.totalorder %s3841_s30, 4 }
   0xd   : > { %p36_p7 = scmp.eq.s32.totalorder %s35_s14, 0 }
   0xe   : > { %243 = sbr.rel (%p3280_p8) target bundleno = 30 (0x1e), region = 40 }
   0xf   : > { %s3947_s16 = scalar_select %p36_p7, %s3821_s25, %s38_s15  }
  0x13   : > { %246 = sbr.rel (!%p47_p5) target bundleno = 30 (0x1e), region = 44  ;;  %s248_s17 = sand.u32 (%p47_p5), 1, %s3821_s25  }
  0x14   : > { %s3282_s18 = sshll.u32 (%p47_p5), %s3833_s28, 1  ;;  %s3281_s19 = sshll.u32 (%p47_p5), %s248_s17, 6 }
  0x15   : > { %s3283_s20 = sshll.u32 (%p47_p5), %s3837_s29, 4  ;;  %s250_s13 = scalar_lea.vmem (%p47_p5), [#allocation2], %s3281_s19 }
  0x16   : > { %s253_s21 = sadd.s32 (%p47_p5), %s3283_s20, %s3282_s18 }
  0x17   : > { %s3284_s22 = sshll.u32 (%p47_p5), %s253_s21, 3 }
  0x18   : > { %s255_s11 = scalar_lea.vmem %s6406_s0, %s3284_s22 }
  0x19   : > { %v298_v0 = vld [vmem:[%s255_s11] sm:$0xff]  ;;  %v300_v1 = vld [vmem:[%s255_s11 + $0x8] sm:$0xff] }
  0x1a   : > { %v302_v2 = vld [vmem:[%s255_s11 + $0x20] sm:$0xff]  ;;  %299 = vst [vmem:[%s250_s13] sm:$0xff] %v298_v0  ;;  %301 = vst [vmem:[%s250_s13 + $0x8] sm:$0xff] %v300_v1  ;;  %v304_v3 = vld [vmem:[%s255_s11 + $0x28] sm:$0xff] }
  0x1b   : > { %303 = vst [vmem:[%s250_s13 + $0x10] sm:$0xff] %v302_v2  ;;  %v306_v4 = vld [vmem:[%s255_s11 + $0x40] sm:$0xff]  ;;  %v308_v5 = vld [vmem:[%s255_s11 + $0x48] sm:$0xff]  ;;  %305 = vst [vmem:[%s250_s13 + $0x18] sm:$0xff] %v304_v3 }
  0x1c   : > { %307 = vst [vmem:[%s250_s13 + $0x20] sm:$0xff] %v306_v4  ;;  %309 = vst [vmem:[%s250_s13 + $0x28] sm:$0xff] %v308_v5  ;;  %v310_v6 = vld [vmem:[%s255_s11 + $0x60] sm:$0xff]  ;;  %v312_v7 = vld [vmem:[%s255_s11 + $0x68] sm:$0xff] }
  0x1d   : > { %311 = vst [vmem:[%s250_s13 + $0x30] sm:$0xff] %v310_v6  ;;  %313 = vst [vmem:[%s250_s13 + $0x38] sm:$0xff] %v312_v7 }
  0x1e PF: > { %p3285_p9 = scmp.ge.s32.totalorder %s3841_s30, 1  ;;  %p318_p10 = scmp.lt.s32.totalorder %s3841_s30, 5 }
  0x20   : > { %p319_p11 = pnand %p3285_p9, %p318_p10 }
  0x22   : > { %322 = sbr.rel (%p319_p11) target bundleno = 1728 (0x6c0), region = 82 }
  0x27   : > { %v379_v8 = vld [vmem:[%s6407_s1 + $0x68] sm:$0xff]  ;;  %v381_v9 = vld [vmem:[%s6407_s1 + $0x78] sm:$0xff]  ;;  %v378_v10 = vld [vmem:[%s6407_s1 + $0x60] sm:$0xff]  ;;  %v3843_v15 = vmov 0   ;;  %s325_s23 = sand.u32 1, %s3817_s24   ;;  %vm406_vm0 = vcmask 523264   ;;  %v396_v45 = vlaneseq }
  0x28   : > { %v393_v11 = vpack.c.bf16 %v381_v9, %v379_v8  ;;  %v380_v12 = vld [vmem:[%s6407_s1 + $0x70] sm:$0xff]  ;;  %v375_v13 = vld [vmem:[%s6407_s1 + $0x48] sm:$0xff]  ;;  %v377_v14 = vld [vmem:[%s6407_s1 + $0x58] sm:$0xff]  ;;  %451 = vmatprep.mubr.bf16.mxu0 %v3843_v15  ;;  %s4001_s24 = sshll.u32 %s325_s23, 6  ;;  %s3844_s14 = smov 64   ;;  %vm692_vm1 = vcmask 130048  }
  0x29   : > { %v392_v16 = vpack.c.bf16 %v380_v12, %v378_v10  ;;  %v391_v17 = vpack.c.bf16 %v377_v14, %v375_v13  ;;  %v374_v18 = vld [vmem:[%s6407_s1 + $0x40] sm:$0xff]  ;;  %v376_v19 = vld [vmem:[%s6407_s1 + $0x50] sm:$0xff]  ;;  %v371_v20 = vld [vmem:[%s6407_s1 + $0x28] sm:$0xff]  ;;  %s4010_s11 = scalar_lea.vmem [#allocation2], %s4001_s24  ;;  %v4024_v46 = vshrl.u32 %v396_v45, 7  ;;  %s3845_s15 = smov 48  }
  0x2a   : > { %427 = vmatprep.subr.bf16.mxu0 %v393_v11  ;;  %v373_v21 = vld [vmem:[%s6407_s1 + $0x38] sm:$0xff]  ;;  %v390_v22 = vpack.c.bf16 %v376_v19, %v374_v18  ;;  %v370_v24 = vld [vmem:[%s6407_s1 + $0x20] sm:$0xff]  ;;  %v372_v25 = vld [vmem:[%s6407_s1 + $0x30] sm:$0xff]  ;;  %s3846_s17 = smov 32   ;;  %s3847_s18 = smov 16   ;;  %vm1538_vm2 = vcmask 261248  }
  0x2b   : > { %428 = vmatpush1.bf16.msra.mxu0 %v392_v16  ;;  %v389_v23 = vpack.c.bf16 %v373_v21, %v371_v20  ;;  %v367_v26 = vld [vmem:[%s6407_s1 + $0x8] sm:$0xff]  ;;  %v369_v27 = vld [vmem:[%s6407_s1 + $0x18] sm:$0xff]  ;;  %v388_v28 = vpack.c.bf16 %v372_v25, %v370_v24  ;;  %v366_v30 = vld [vmem:[%s6407_s1] sm:$0xff]  ;;  %v398_v47 = vsub.s32 0, %v4024_v46  ;;  %vm2206_vm3 = vcmask 392448   ;;  %s3848_s19 = smov 112  }
  0x2c   : > { %429 = vmatprep.subr.bf16.mxu0 %v391_v17  ;;  %v387_v29 = vpack.c.bf16 %v369_v27, %v367_v26  ;;  %v368_v31 = vld [vmem:[%s6407_s1 + $0x10] sm:$0xff]  ;;  %v358_v33 = vld [vmem:[%s4010_s11] sm:$0xff]  ;;  %v359_v34 = vld [vmem:[%s4010_s11 + $0x8] sm:$0xff]  ;;  %s3849_s20 = smov 96   ;;  %vm2805_vm4 = vcmask 523648   ;;  %s3850_s21 = smov 80  }
  0x2d   : > { %v386_v32 = vpack.c.bf16 %v368_v31, %v366_v30  ;;  %v382_v35 = vpack.c.bf16 %v359_v34, %v358_v33  ;;  %v360_v36 = vld [vmem:[%s4010_s11 + $0x10] sm:$0xff]  ;;  %v361_v37 = vld [vmem:[%s4010_s11 + $0x18] sm:$0xff]  ;;  %v362_v39 = vld [vmem:[%s4010_s11 + $0x20] sm:$0xff]  ;;  %s3313_s22 = sshll.u32 (%p3939_p6), %s3829_s27, 4 }
  0x2e   : > { %v383_v38 = vpack.c.bf16 %v361_v37, %v360_v36  ;;  %v363_v40 = vld [vmem:[%s4010_s11 + $0x28] sm:$0xff]  ;;  %v364_v42 = vld [vmem:[%s4010_s11 + $0x30] sm:$0xff]  ;;  %v365_v43 = vld [vmem:[%s4010_s11 + $0x38] sm:$0xff] }
  0x2f   : > { %430 = vmatpush1.bf16.msra.mxu0 %v390_v22  ;;  %v384_v41 = vpack.c.bf16 %v363_v40, %v362_v39  ;;  %v385_v44 = vpack.c.bf16 %v365_v43, %v364_v42  ;;  %v4030_v48 = vld [vmem:[%s6408_s2] sm:$0x3] }
  0x30   : > { %431 = vmatprep.subr.bf16.mxu0 %v389_v23  ;;  %v399_v49 = vrot.slane %v4030_v48, %v398_v47 }
  0x33   : > { %432 = vmatpush1.bf16.msra.mxu0 %v388_v28 }
  0x34   : > { %433 = vmatprep.subr.bf16.mxu0 %v387_v29 }
  0x37   : > { %434 = vmatpush1.bf16.msra.mxu0 %v386_v32 }
  0x3a   : > { %3288 = vmatmul.mubr.msk.bf16.vlgmr.msra.gmra.mxu0 %vm406_vm0, %v382_v35 }
  0x3b   : > { %461 = vmatprep.mubr.bf16.mxu0 %v3843_v15 }
  0x42   : > { %3289 = vmatmul.mubr.msk.bf16.gmra.mxu0 %vm406_vm0, %v383_v38 }
  0x43   : > { %471 = vmatprep.mubr.bf16.mxu0 %v3843_v15 }
  0x4a   : > { %3290 = vmatmul.mubr.msk.bf16.gmra.mxu0 %vm406_vm0, %v384_v41 }
  0x4b   : > { %481 = vmatprep.mubr.bf16.mxu0 %v3843_v15 }
  0x52   : > { %3291 = vmatmul.mubr.msk.bf16.gmra.mxu0 %vm406_vm0, %v385_v44 }
  0xfa   : > { %v453_v50 = vpop.f32.mrf.mxu0 }
  0xfb   : > { %v4033_v51 = vadd.f32 %v453_v50, %v399_v49 }
  0xfc   : > { %v4035_v52 = vpop.f32.mrf.mxu0 }
  0xfd   : > { %508 = vrot.lane.b32.xlu0 %v4033_v51, %s3844_s14 }
  0xfe   : > { %v457_v53 = vpop.f32.mrf.mxu0 }
  0xff   : > { %v4039_v54 = vadd.f32 %v457_v53, %v399_v49 }
 0x100   : > { %v4041_v55 = vpop.f32.mrf.mxu0 }
 0x101   : > { %510 = vrot.lane.b32.xlu0 %v4039_v54, %s3844_s14 }
 0x102   : > { %v463_v56 = vpop.f32.mrf.mxu0 }
 0x103   : > { %v4045_v57 = vadd.f32 %v463_v56, %v399_v49 }
 0x104   : > { %v4047_v58 = vpop.f32.mrf.mxu0 }
 0x105   : > { %6467 = vst [vmem:[#allocation4_spill] sm:$0xff] %v4047_v58  ;;  %512 = vrot.lane.b32.xlu1 %v4045_v57, %s3844_s14 }
 0x106   : > { %v467_v59 = vpop.f32.mrf.mxu0 }
 0x107   : > { %v4051_v60 = vadd.f32 %v467_v59, %v399_v49 }
 0x108   : > { %v4053_v61 = vpop.f32.mrf.mxu0 }
 0x109   : > { %6468 = vst [vmem:[#allocation5_spill] sm:$0xff] %v4053_v61  ;;  %514 = vrot.lane.b32.xlu1 %v4051_v60, %s3844_s14 }
 0x10a   : > { %v473_v62 = vpop.f32.mrf.mxu0 }
 0x10b   : > { %v4057_v63 = vadd.f32 %v473_v62, %v399_v49 }
 0x10c   : > { %v4059_v0 = vpop.f32.mrf.mxu0 }
 0x10d   : > { %6469 = vst [vmem:[#allocation6_spill] sm:$0xff] %v4059_v0  ;;  %516 = vrot.lane.b32.xlu0 %v4057_v63, %s3844_s14 }
 0x10e   : > { %v477_v1 = vpop.f32.mrf.mxu0 }
 0x10f   : > { %v4063_v2 = vadd.f32 %v477_v1, %v399_v49 }
 0x110   : > { %v4065_v3 = vpop.f32.mrf.mxu0 }
 0x111   : > { %6470 = vst [vmem:[#allocation7_spill] sm:$0xff] %v4065_v3  ;;  %518 = vrot.lane.b32.xlu1 %v4063_v2, %s3844_s14 }
 0x112   : > { %v483_v4 = vpop.f32.mrf.mxu0 }
 0x113   : > { %v4069_v5 = vadd.f32 %v483_v4, %v399_v49 }
 0x114   : > { %v4071_v6 = vpop.f32.mrf.mxu0 }
 0x115   : > { %6471 = vst [vmem:[#allocation8_spill] sm:$0xff] %v4071_v6  ;;  %520 = vrot.lane.b32.xlu0 %v4069_v5, %s3844_s14 }
 0x116   : > { %v487_v7 = vpop.f32.mrf.mxu0 }
 0x117   : > { %v4075_v8 = vadd.f32 %v487_v7, %v399_v49 }
 0x119   : > { %522 = vrot.lane.b32.xlu1 %v4075_v8, %s3844_s14 }
 0x16f   : > { %v509_v9 = vpop.permute.xlu0 %508 }
 0x170   : > { %v532_v10 = vmul.f32 %v509_v9, %v4033_v51  ;;  %v540_v11 = vmul.f32 %v509_v9, %v4045_v57  ;;  %v548_v12 = vmul.f32 %v509_v9, %v4057_v63  ;;  %v556_v13 = vmul.f32 %v509_v9, %v4069_v5 }
 0x172   : > { %1098 = vrot.lane.b32.xlu1 %v532_v10, %s3845_s15  ;;  %596 = vrot.lane.b32.xlu0 %v532_v10, %s3844_s14 }
 0x173   : > { %v511_v14 = vpop.permute.xlu0 %510 }
 0x174   : > { %v533_v15 = vmul.f32 %v511_v14, %v4039_v54  ;;  %v541_v16 = vmul.f32 %v511_v14, %v4051_v60  ;;  %v549_v17 = vmul.f32 %v511_v14, %v4063_v2  ;;  %v557_v18 = vmul.f32 %v511_v14, %v4075_v8 }
 0x176   : > { %1114 = vrot.lane.b32.xlu1 %v540_v11, %s3845_s15  ;;  %628 = vrot.lane.b32.xlu0 %v548_v12, %s3844_s14 }
 0x177   : > { %v513_v19 = vpop.permute.xlu1 %512 }
 0x178   : > { %v534_v20 = vmul.f32 %v513_v19, %v4033_v51  ;;  %v542_v21 = vmul.f32 %v513_v19, %v4045_v57  ;;  %v550_v22 = vmul.f32 %v513_v19, %v4057_v63  ;;  %v558_v23 = vmul.f32 %v513_v19, %v4069_v5 }
 0x17a   : > { %1130 = vrot.lane.b32.xlu1 %v548_v12, %s3845_s15  ;;  %644 = vrot.lane.b32.xlu0 %v556_v13, %s3844_s14 }
 0x17b   : > { %v515_v24 = vpop.permute.xlu1 %514 }
 0x17c   : > { %v535_v25 = vmul.f32 %v515_v24, %v4039_v54  ;;  %v543_v26 = vmul.f32 %v515_v24, %v4051_v60  ;;  %v551_v27 = vmul.f32 %v515_v24, %v4063_v2  ;;  %v559_v28 = vmul.f32 %v515_v24, %v4075_v8 }
 0x17e   : > { %1146 = vrot.lane.b32.xlu1 %v556_v13, %s3845_s15  ;;  %1100 = vrot.lane.b32.xlu0 %v533_v15, %s3845_s15 }
 0x17f   : > { %v517_v29 = vpop.permute.xlu0 %516 }
 0x180   : > { %v536_v41 = vmul.f32 %v517_v29, %v4033_v51  ;;  %v544_v44 = vmul.f32 %v517_v29, %v4045_v57  ;;  %v552_v49 = vmul.f32 %v517_v29, %v4057_v63  ;;  %v560_v56 = vmul.f32 %v517_v29, %v4069_v5 }
 0x182   : > { %1766 = vrot.lane.b32.xlu1 %v532_v10, %s3846_s17  ;;  %1116 = vrot.lane.b32.xlu0 %v541_v16, %s3845_s15 }
 0x183   : > { %v519_v30 = vpop.permute.xlu1 %518 }
 0x184   : > { %v537_v1 = vmul.f32 %v519_v30, %v4039_v54  ;;  %v545_v9 = vmul.f32 %v519_v30, %v4051_v60 }
 0x186   : > { %1782 = vrot.lane.b32.xlu1 %v540_v11, %s3846_s17  ;;  %1132 = vrot.lane.b32.xlu0 %v549_v17, %s3845_s15 }
 0x187   : > { %v4151_v31 = vpop.permute.xlu0 %520 }
 0x18a   : > { %1798 = vrot.lane.b32.xlu1 %v548_v12, %s3846_s17  ;;  %1148 = vrot.lane.b32.xlu0 %v557_v18, %s3845_s15 }
 0x18b   : > { %v4153_v32 = vpop.permute.xlu1 %522 }
 0x18e   : > { %1814 = vrot.lane.b32.xlu1 %v556_v13, %s3846_s17  ;;  %1768 = vrot.lane.b32.xlu0 %v533_v15, %s3846_s17 }
 0x192   : > { %2365 = vrot.lane.b32.xlu1 %v532_v10, %s3847_s18  ;;  %1784 = vrot.lane.b32.xlu0 %v541_v16, %s3846_s17 }
 0x196   : > { %2381 = vrot.lane.b32.xlu1 %v540_v11, %s3847_s18  ;;  %1800 = vrot.lane.b32.xlu0 %v549_v17, %s3846_s17 }
 0x19a   : > { %2397 = vrot.lane.b32.xlu1 %v548_v12, %s3847_s18  ;;  %1816 = vrot.lane.b32.xlu0 %v557_v18, %s3846_s17  ;;  %v553_v12 = vmul.f32 %v519_v30, %v4063_v2 }
 0x19e   : > { %2413 = vrot.lane.b32.xlu1 %v556_v13, %s3847_s18  ;;  %2367 = vrot.lane.b32.xlu0 %v533_v15, %s3847_s18 }
 0x1a2   : > { %612 = vrot.lane.b32.xlu1 %v540_v11, %s3844_s14  ;;  %2383 = vrot.lane.b32.xlu0 %v541_v16, %s3847_s18 }
 0x1a6   : > { %614 = vrot.lane.b32.xlu1 %v541_v16, %s3844_s14  ;;  %2399 = vrot.lane.b32.xlu0 %v549_v17, %s3847_s18 }
 0x1aa   : > { %630 = vrot.lane.b32.xlu1 %v549_v17, %s3844_s14  ;;  %2415 = vrot.lane.b32.xlu0 %v557_v18, %s3847_s18 }
 0x1ae   : > { %646 = vrot.lane.b32.xlu1 %v557_v18, %s3844_s14  ;;  %598 = vrot.lane.b32.xlu0 %v533_v15, %s3844_s14  ;;  %v561_v15 = vmul.f32 %v519_v30, %v4075_v8 }
 0x1b2   : > { %600 = vrot.lane.b32.xlu0 %v534_v20, %s3844_s14  ;;  %1102 = vrot.lane.b32.xlu1 %v534_v20, %s3845_s15 }
 0x1b6   : > { %616 = vrot.lane.b32.xlu0 %v542_v21, %s3844_s14  ;;  %1118 = vrot.lane.b32.xlu1 %v542_v21, %s3845_s15 }
 0x1ba   : > { %632 = vrot.lane.b32.xlu0 %v550_v22, %s3844_s14  ;;  %1134 = vrot.lane.b32.xlu1 %v550_v22, %s3845_s15 }
 0x1be   : > { %648 = vrot.lane.b32.xlu0 %v558_v23, %s3844_s14  ;;  %1150 = vrot.lane.b32.xlu1 %v558_v23, %s3845_s15 }
 0x1c2   : > { %1104 = vrot.lane.b32.xlu0 %v535_v25, %s3845_s15  ;;  %1770 = vrot.lane.b32.xlu1 %v534_v20, %s3846_s17 }
 0x1c6   : > { %1120 = vrot.lane.b32.xlu0 %v543_v26, %s3845_s15  ;;  %1786 = vrot.lane.b32.xlu1 %v542_v21, %s3846_s17 }
 0x1ca   : > { %1136 = vrot.lane.b32.xlu0 %v551_v27, %s3845_s15  ;;  %1802 = vrot.lane.b32.xlu1 %v550_v22, %s3846_s17 }
 0x1ce   : > { %1152 = vrot.lane.b32.xlu0 %v559_v28, %s3845_s15  ;;  %1818 = vrot.lane.b32.xlu1 %v558_v23, %s3846_s17 }
 0x1d2   : > { %1772 = vrot.lane.b32.xlu0 %v535_v25, %s3846_s17  ;;  %2369 = vrot.lane.b32.xlu1 %v534_v20, %s3847_s18 }
 0x1d6   : > { %1788 = vrot.lane.b32.xlu0 %v543_v26, %s3846_s17  ;;  %2385 = vrot.lane.b32.xlu1 %v542_v21, %s3847_s18 }
 0x1da   : > { %1804 = vrot.lane.b32.xlu0 %v551_v27, %s3846_s17  ;;  %2401 = vrot.lane.b32.xlu1 %v550_v22, %s3847_s18 }
 0x1de   : > { %1820 = vrot.lane.b32.xlu0 %v559_v28, %s3846_s17  ;;  %2417 = vrot.lane.b32.xlu1 %v558_v23, %s3847_s18 }
 0x1e2   : > { %2371 = vrot.lane.b32.xlu0 %v535_v25, %s3847_s18  ;;  %602 = vrot.lane.b32.xlu1 %v535_v25, %s3844_s14 }
 0x1e4   : > { %v4157_v33 = vpop.permute.xlu1 %1098  ;;  %v4159_v34 = vpop.permute.xlu0 %596 }
 0x1e5   : > { %6472 = vst [vmem:[#allocation9_spill] sm:$0xff] %v4159_v34  ;;  %v1194_v0 = vsel %vm692_vm1, %v4157_v33, 0.0 }
 0x1e6   : > { %2387 = vrot.lane.b32.xlu0 %v543_v26, %s3847_s18  ;;  %618 = vrot.lane.b32.xlu1 %v543_v26, %s3844_s14 }
 0x1e8   : > { %v4163_v35 = vpop.permute.xlu1 %1114  ;;  %v4165_v36 = vpop.permute.xlu0 %628 }
 0x1e9   : > { %6473 = vst [vmem:[#allocation10_spill] sm:$0xff] %v4165_v36 }
 0x1ea   : > { %2403 = vrot.lane.b32.xlu0 %v551_v27, %s3847_s18  ;;  %634 = vrot.lane.b32.xlu1 %v551_v27, %s3844_s14 }
 0x1ec   : > { %v4169_v37 = vpop.permute.xlu1 %1130  ;;  %v4171_v38 = vpop.permute.xlu0 %644 }
 0x1ed   : > { %6474 = vst [vmem:[#allocation11_spill] sm:$0xff] %v4171_v38  ;;  %v1242_v3 = vsel %vm692_vm1, %v4169_v37, 0.0 }
 0x1ee   : > { %2419 = vrot.lane.b32.xlu0 %v559_v28, %s3847_s18  ;;  %650 = vrot.lane.b32.xlu1 %v559_v28, %s3844_s14 }
 0x1f0   : > { %v4175_v39 = vpop.permute.xlu1 %1146  ;;  %v4177_v40 = vpop.permute.xlu0 %1100 }
 0x1f2   : > { %604 = vrot.lane.b32.xlu0 %v536_v41, %s3844_s14  ;;  %1106 = vrot.lane.b32.xlu1 %v536_v41, %s3845_s15 }
 0x1f4   : > { %v4182_v42 = vpop.permute.xlu1 %1766  ;;  %v4184_v43 = vpop.permute.xlu0 %1116 }
 0x1f5   : > { %v1862_v37 = vsel %vm692_vm1, %v4182_v42, 0.0 }
 0x1f6   : > { %620 = vrot.lane.b32.xlu0 %v544_v44, %s3844_s14  ;;  %1122 = vrot.lane.b32.xlu1 %v544_v44, %s3845_s15 }
 0x1f8   : > { %v4189_v45 = vpop.permute.xlu1 %1782  ;;  %v4191_v47 = vpop.permute.xlu0 %1132 }
 0x1fa   : > { %636 = vrot.lane.b32.xlu0 %v552_v49, %s3844_s14  ;;  %1138 = vrot.lane.b32.xlu1 %v552_v49, %s3845_s15 }
 0x1fc   : > { %v4196_v50 = vpop.permute.xlu1 %1798  ;;  %v4198_v53 = vpop.permute.xlu0 %1148 }
 0x1fe   : > { %652 = vrot.lane.b32.xlu0 %v560_v56, %s3844_s14  ;;  %1154 = vrot.lane.b32.xlu1 %v560_v56, %s3845_s15 }
 0x200   : > { %v4203_v59 = vpop.permute.xlu1 %1814  ;;  %v4205_v62 = vpop.permute.xlu0 %1768 }
 0x202   : > { %1108 = vrot.lane.b32.xlu0 %v537_v1, %s3845_s15  ;;  %1774 = vrot.lane.b32.xlu1 %v536_v41, %s3846_s17 }
 0x204   : > { %v4210_v4 = vpop.permute.xlu1 %2365  ;;  %v4212_v7 = vpop.permute.xlu0 %1784 }
 0x206   : > { %1124 = vrot.lane.b32.xlu0 %v545_v9, %s3845_s15  ;;  %1790 = vrot.lane.b32.xlu1 %v544_v44, %s3846_s17 }
 0x208   : > { %v4217_v10 = vpop.permute.xlu1 %2381  ;;  %v4219_v11 = vpop.permute.xlu0 %1800 }
 0x20a   : > { %1140 = vrot.lane.b32.xlu0 %v553_v12, %s3845_s15  ;;  %1806 = vrot.lane.b32.xlu1 %v552_v49, %s3846_s17 }
 0x20c   : > { %v4224_v13 = vpop.permute.xlu1 %2397  ;;  %v4226_v14 = vpop.permute.xlu0 %1816 }
 0x20d   : > { %6475 = vst [vmem:[#allocation12_spill] sm:$0xff] %v4224_v13 }
 0x20e   : > { %1156 = vrot.lane.b32.xlu0 %v561_v15, %s3845_s15  ;;  %1822 = vrot.lane.b32.xlu1 %v560_v56, %s3846_s17 }
 0x210   : > { %v4231_v16 = vpop.permute.xlu1 %2413  ;;  %v4233_v17 = vpop.permute.xlu0 %2367 }
 0x211   : > { %6476 = vst [vmem:[#allocation13_spill] sm:$0xff] %v4231_v16 }
 0x212   : > { %1776 = vrot.lane.b32.xlu0 %v537_v1, %s3846_s17  ;;  %2373 = vrot.lane.b32.xlu1 %v536_v41, %s3847_s18 }
 0x214   : > { %v4237_v18 = vpop.permute.xlu1 %612  ;;  %v4239_v19 = vpop.permute.xlu0 %2383 }
 0x215   : > { %6477 = vst [vmem:[#allocation14_spill] sm:$0xff] %v4237_v18 }
 0x216   : > { %1792 = vrot.lane.b32.xlu0 %v545_v9, %s3846_s17  ;;  %2389 = vrot.lane.b32.xlu1 %v544_v44, %s3847_s18 }
 0x218   : > { %v4243_v20 = vpop.permute.xlu1 %614  ;;  %v4245_v21 = vpop.permute.xlu0 %2399 }
 0x219   : > { %6478 = vst [vmem:[#allocation15_spill] sm:$0xff] %v4243_v20  ;;  %6479 = vst [vmem:[#allocation16_spill] sm:$0xff] %v4245_v21 }
 0x21a   : > { %1808 = vrot.lane.b32.xlu0 %v553_v12, %s3846_s17  ;;  %2405 = vrot.lane.b32.xlu1 %v552_v49, %s3847_s18 }
 0x21c   : > { %v4249_v22 = vpop.permute.xlu1 %630  ;;  %v4251_v23 = vpop.permute.xlu0 %2415 }
 0x21d   : > { %6480 = vst [vmem:[#allocation17_spill] sm:$0xff] %v4249_v22  ;;  %6481 = vst [vmem:[#allocation18_spill] sm:$0xff] %v4251_v23 }
 0x21e   : > { %1824 = vrot.lane.b32.xlu0 %v561_v15, %s3846_s17  ;;  %2421 = vrot.lane.b32.xlu1 %v560_v56, %s3847_s18  ;;  %v538_v56 = vmul.f32 %v4151_v31, %v4033_v51  ;;  %v554_v51 = vmul.f32 %v4151_v31, %v4057_v63  ;;  %v539_v63 = vmul.f32 %v4153_v32, %v4039_v54 }
 0x21f   : > { %v555_v54 = vmul.f32 %v4153_v32, %v4063_v2 }
 0x220   : > { %v4255_v24 = vpop.permute.xlu1 %646  ;;  %v4257_v25 = vpop.permute.xlu0 %598 }
 0x221   : > { %6482 = vst [vmem:[#allocation19_spill] sm:$0xff] %v4255_v24  ;;  %6483 = vst [vmem:[#allocation20_spill] sm:$0xff] %v4257_v25 }
 0x222   : > { %2375 = vrot.lane.b32.xlu0 %v537_v1, %s3847_s18  ;;  %606 = vrot.lane.b32.xlu1 %v537_v1, %s3844_s14 }
 0x224   : > { %v4261_v26 = vpop.permute.xlu0 %600  ;;  %v4263_v27 = vpop.permute.xlu1 %1102 }
 0x225   : > { %6484 = vst [vmem:[#allocation21_spill] sm:$0xff] %v4261_v26 }
 0x226   : > { %2391 = vrot.lane.b32.xlu0 %v545_v9, %s3847_s18  ;;  %622 = vrot.lane.b32.xlu1 %v545_v9, %s3844_s14 }
 0x228   : > { %v4267_v28 = vpop.permute.xlu0 %616  ;;  %v4269_v29 = vpop.permute.xlu1 %1118 }
 0x229   : > { %6485 = vst [vmem:[#allocation22_spill] sm:$0xff] %v4267_v28 }
 0x22a   : > { %2407 = vrot.lane.b32.xlu0 %v553_v12, %s3847_s18  ;;  %638 = vrot.lane.b32.xlu1 %v553_v12, %s3844_s14  ;;  %v546_v12 = vmul.f32 %v4151_v31, %v4045_v57  ;;  %v562_v57 = vmul.f32 %v4151_v31, %v4069_v5  ;;  %v547_v5 = vmul.f32 %v4153_v32, %v4051_v60 }
 0x22b   : > { %v563_v60 = vmul.f32 %v4153_v32, %v4075_v8 }
 0x22c   : > { %v4273_v30 = vpop.permute.xlu0 %632  ;;  %v4275_v41 = vpop.permute.xlu1 %1134 }
 0x22d   : > { %6486 = vst [vmem:[#allocation23_spill] sm:$0xff] %v4273_v30 }
 0x22e   : > { %2423 = vrot.lane.b32.xlu0 %v561_v15, %s3847_s18  ;;  %654 = vrot.lane.b32.xlu1 %v561_v15, %s3844_s14 }
 0x230   : > { %v4279_v44 = vpop.permute.xlu0 %648  ;;  %v4281_v49 = vpop.permute.xlu1 %1150 }
 0x231   : > { %6487 = vst [vmem:[#allocation24_spill] sm:$0xff] %v4279_v44 }
 0x232   : > { %608 = vrot.lane.b32.xlu0 %v538_v56, %s3844_s14  ;;  %1110 = vrot.lane.b32.xlu1 %v538_v56, %s3845_s15 }
 0x234   : > { %v4287_v1 = vpop.permute.xlu0 %1104  ;;  %v4289_v9 = vpop.permute.xlu1 %1770 }
 0x236   : > { %624 = vrot.lane.b32.xlu0 %v546_v12, %s3844_s14  ;;  %1126 = vrot.lane.b32.xlu1 %v546_v12, %s3845_s15 }
 0x238   : > { %v4295_v15 = vpop.permute.xlu0 %1120  ;;  %v4297_v44 = vpop.permute.xlu1 %1786 }
 0x23a   : > { %640 = vrot.lane.b32.xlu0 %v554_v51, %s3844_s14  ;;  %1142 = vrot.lane.b32.xlu1 %v554_v51, %s3845_s15 }
 0x23c   : > { %v4303_v30 = vpop.permute.xlu0 %1136  ;;  %v4305_v28 = vpop.permute.xlu1 %1802 }
 0x23e   : > { %656 = vrot.lane.b32.xlu0 %v562_v57, %s3844_s14  ;;  %1158 = vrot.lane.b32.xlu1 %v562_v57, %s3845_s15 }
 0x240   : > { %v4311_v24 = vpop.permute.xlu0 %1152  ;;  %v4313_v26 = vpop.permute.xlu1 %1818 }
 0x242   : > { %1112 = vrot.lane.b32.xlu0 %v539_v63, %s3845_s15  ;;  %1778 = vrot.lane.b32.xlu1 %v538_v56, %s3846_s17 }
 0x244   : > { %v4319_v22 = vpop.permute.xlu0 %1772  ;;  %v4321_v25 = vpop.permute.xlu1 %2369 }
 0x246   : > { %1128 = vrot.lane.b32.xlu0 %v547_v5, %s3845_s15  ;;  %1794 = vrot.lane.b32.xlu1 %v546_v12, %s3846_s17 }
 0x248   : > { %v4327_v31 = vpop.permute.xlu0 %1788  ;;  %v4329_v23 = vpop.permute.xlu1 %2385 }
 0x24a   : > { %1144 = vrot.lane.b32.xlu0 %v555_v54, %s3845_s15  ;;  %1810 = vrot.lane.b32.xlu1 %v554_v51, %s3846_s17 }
 0x24c   : > { %v4335_v20 = vpop.permute.xlu0 %1804  ;;  %v4337_v18 = vpop.permute.xlu1 %2401 }
 0x24d   : > { %6488 = vst [vmem:[#allocation25_spill] sm:$0xff] %v4337_v18 }
 0x24e   : > { %1160 = vrot.lane.b32.xlu0 %v563_v60, %s3845_s15  ;;  %1826 = vrot.lane.b32.xlu1 %v562_v57, %s3846_s17 }
 0x250   : > { %v4343_v21 = vpop.permute.xlu0 %1820  ;;  %v4345_v38 = vpop.permute.xlu1 %2417 }
 0x251   : > { %6489 = vst [vmem:[#allocation26_spill] sm:$0xff] %v4345_v38 }
 0x252   : > { %1780 = vrot.lane.b32.xlu0 %v539_v63, %s3846_s17  ;;  %2377 = vrot.lane.b32.xlu1 %v538_v56, %s3847_s18 }
 0x254   : > { %v4349_v2 = vpop.permute.xlu0 %2371  ;;  %v4351_v16 = vpop.permute.xlu1 %602 }
 0x255   : > { %6490 = vst [vmem:[#allocation27_spill] sm:$0xff] %v4351_v16 }
 0x256   : > { %1796 = vrot.lane.b32.xlu0 %v547_v5, %s3846_s17  ;;  %2393 = vrot.lane.b32.xlu1 %v546_v12, %s3847_s18 }
 0x258   : > { %v4355_v8 = vpop.permute.xlu0 %2387  ;;  %v4357_v32 = vpop.permute.xlu1 %618 }
 0x259   : > { %6491 = vst [vmem:[#allocation28_spill] sm:$0xff] %v4357_v32 }
 0x25a   : > { %1812 = vrot.lane.b32.xlu0 %v555_v54, %s3846_s17  ;;  %2409 = vrot.lane.b32.xlu1 %v554_v51, %s3847_s18 }
 0x25c   : > { %v4361_v38 = vpop.permute.xlu0 %2403  ;;  %v4363_v18 = vpop.permute.xlu1 %634 }
 0x25d   : > { %6492 = vst [vmem:[#allocation29_spill] sm:$0xff] %v4361_v38  ;;  %6493 = vst [vmem:[#allocation30_spill] sm:$0xff] %v4363_v18 }
 0x25e   : > { %1828 = vrot.lane.b32.xlu0 %v563_v60, %s3846_s17  ;;  %2425 = vrot.lane.b32.xlu1 %v562_v57, %s3847_s18 }
 0x260   : > { %v4367_v56 = vpop.permute.xlu0 %2419  ;;  %v4369_v16 = vpop.permute.xlu1 %650 }
 0x261   : > { %6494 = vst [vmem:[#allocation31_spill] sm:$0xff] %v4367_v56  ;;  %6495 = vst [vmem:[#allocation32_spill] sm:$0xff] %v4369_v16 }
 0x262   : > { %2379 = vrot.lane.b32.xlu0 %v539_v63, %s3847_s18  ;;  %610 = vrot.lane.b32.xlu1 %v539_v63, %s3844_s14 }
 0x264   : > { %v4373_v12 = vpop.permute.xlu0 %604  ;;  %v4375_v32 = vpop.permute.xlu1 %1106 }
 0x265   : > { %6496 = vst [vmem:[#allocation33_spill] sm:$0xff] %v4373_v12 }
 0x266   : > { %2395 = vrot.lane.b32.xlu0 %v547_v5, %s3847_s18  ;;  %626 = vrot.lane.b32.xlu1 %v547_v5, %s3844_s14 }
 0x268   : > { %v4379_v51 = vpop.permute.xlu0 %620  ;;  %v4381_v18 = vpop.permute.xlu1 %1122 }
 0x269   : > { %6497 = vst [vmem:[#allocation34_spill] sm:$0xff] %v4379_v51 }
 0x26a   : > { %2411 = vrot.lane.b32.xlu0 %v555_v54, %s3847_s18  ;;  %642 = vrot.lane.b32.xlu1 %v555_v54, %s3844_s14 }
 0x26c   : > { %v4385_v57 = vpop.permute.xlu0 %636  ;;  %v4387_v16 = vpop.permute.xlu1 %1138 }
 0x26d   : > { %6498 = vst [vmem:[#allocation35_spill] sm:$0xff] %v4385_v57 }
 0x26e   : > { %2427 = vrot.lane.b32.xlu0 %v563_v60, %s3847_s18  ;;  %658 = vrot.lane.b32.xlu1 %v563_v60, %s3844_s14 }
 0x270   : > { %v4391_v63 = vpop.permute.xlu0 %652  ;;  %v4393_v12 = vpop.permute.xlu1 %1154 }
 0x271   : > { %6499 = vst [vmem:[#allocation36_spill] sm:$0xff] %v4391_v63  ;;  %v1218_v63 = vsel %vm692_vm1, %v4163_v35, 0.0  ;;  %v1266_v35 = vsel %vm692_vm1, %v4175_v39, 0.0  ;;  %v1886_v39 = vsel %vm692_vm1, %v4189_v45, 0.0  ;;  %v1889_v45 = vsel %vm692_vm1, %v4212_v7, 0.0 }
 0x274   : > { %v4395_v5 = vpop.permute.xlu0 %1108  ;;  %v4397_v51 = vpop.permute.xlu1 %1774 }
 0x278   : > { %v4399_v56 = vpop.permute.xlu0 %1124  ;;  %v4401_v38 = vpop.permute.xlu1 %1790 }
 0x27c   : > { %v4403_v54 = vpop.permute.xlu0 %1140  ;;  %v4405_v57 = vpop.permute.xlu1 %1806 }
 0x280   : > { %v4407_v36 = vpop.permute.xlu0 %1156  ;;  %v4409_v13 = vpop.permute.xlu1 %1822 }
 0x284   : > { %v4411_v60 = vpop.permute.xlu0 %1776  ;;  %v4415_v34 = vpop.permute.xlu1 %2373 }
 0x288   : > { %v4417_v6 = vpop.permute.xlu0 %1792  ;;  %v4423_v61 = vpop.permute.xlu1 %2389 }
 0x28c   : > { %v4425_v58 = vpop.permute.xlu0 %1808 }
 0x28d   : > { %1219 = vadd.xlane.f32.xlu0 %v1218_v63  ;;  %v1910_v63 = vsel %vm692_vm1, %v4196_v50, 0.0  ;;  %v2461_v50 = vsel %vm692_vm1, %v4210_v4, 0.0  ;;  %v1245_v4 = vsel %vm692_vm1, %v4191_v47, 0.0  ;;  %v1865_v47 = vsel %vm692_vm1, %v4205_v62, 0.0 }
 0x28e   : > { %v1892_v62 = vsel %vm692_vm1, %v4297_v44, 0.0  ;;  %v1940_v44 = vsel %vm692_vm1, %v4313_v26, 0.0  ;;  %v1227_v26 = vsel %vm692_vm1, %v4295_v15, 0.0  ;;  %v1275_v15 = vsel %vm692_vm1, %v4311_v24, 0.0 }
 0x28f   : > { %v1898_v24 = vsel %vm692_vm1, %v4401_v38, 0.0  ;;  %v1946_v38 = vsel %vm692_vm1, %v4409_v13, 0.0 }
 0x290   : > { %v4437_v33 = vpop.permute.xlu0 %1824 }
 0x291   : > { %1243 = vadd.xlane.f32.xlu0 %v1242_v3  ;;  %v4433_v3 = vpop.permute.xlu1 %2405 }
 0x292   : > { %1195 = vadd.xlane.f32.xlu1 %v1194_v0  ;;  %v1934_v0 = vsel %vm692_vm1, %v4203_v59, 0.0  ;;  %v1221_v59 = vsel %vm692_vm1, %v4184_v43, 0.0  ;;  %v1269_v43 = vsel %vm692_vm1, %v4198_v53, 0.0  ;;  %v1868_v53 = vsel %vm692_vm1, %v4289_v9, 0.0 }
 0x293   : > { %v1916_v9 = vsel %vm692_vm1, %v4305_v28, 0.0  ;;  %v1203_v28 = vsel %vm692_vm1, %v4287_v1, 0.0  ;;  %v1251_v1 = vsel %vm692_vm1, %v4303_v30, 0.0  ;;  %v1874_v30 = vsel %vm692_vm1, %v4397_v51, 0.0 }
 0x294   : > { %v4445_v42 = vpop.permute.xlu0 %2375 }
 0x295   : > { %1267 = vadd.xlane.f32.xlu0 %v1266_v35  ;;  %v4443_v35 = vpop.permute.xlu1 %2421 }
 0x296   : > { %1911 = vadd.xlane.f32.xlu1 %v1910_v63  ;;  %v1197_v63 = vsel %vm692_vm1, %v4177_v40, 0.0  ;;  %v1913_v40 = vsel %vm692_vm1, %v4219_v11, 0.0  ;;  %v1200_v11 = vsel %vm692_vm1, %v4263_v27, 0.0 }
 0x299   : > { %1863 = vadd.xlane.f32.xlu0 %v1862_v37  ;;  %v4453_v37 = vpop.permute.xlu1 %606 }
 0x29a   : > { %1935 = vadd.xlane.f32.xlu1 %v1934_v0  ;;  %v4457_v0 = vpop.permute.xlu0 %2391 }
 0x29d   : > { %1887 = vadd.xlane.f32.xlu0 %v1886_v39  ;;  %v4463_v39 = vpop.permute.xlu1 %622 }
 0x29e   : > { %2462 = vadd.xlane.f32.xlu1 %v2461_v50  ;;  %v4465_v7 = vpop.permute.xlu0 %2407  ;;  %v1937_v50 = vsel %vm692_vm1, %v4226_v14, 0.0  ;;  %v1224_v14 = vsel %vm692_vm1, %v4269_v29, 0.0  ;;  %v1272_v29 = vsel %vm692_vm1, %v4281_v49, 0.0 }
 0x2a1   : > { %1198 = vadd.xlane.f32.xlu0 %v1197_v63  ;;  %v4473_v63 = vpop.permute.xlu1 %638 }
 0x2a2   : > { %1222 = vadd.xlane.f32.xlu1 %v1221_v59  ;;  %v4477_v59 = vpop.permute.xlu0 %2423 }
 0x2a5   : > { %1890 = vadd.xlane.f32.xlu0 %v1889_v45  ;;  %v4483_v45 = vpop.permute.xlu1 %654 }
 0x2a6   : > { %1246 = vadd.xlane.f32.xlu1 %v1245_v4  ;;  %v4485_v27 = vpop.permute.xlu0 %608  ;;  %v1248_v4 = vsel %vm692_vm1, %v4275_v41, 0.0  ;;  %v1871_v41 = vsel %vm692_vm1, %v4319_v22, 0.0  ;;  %v1919_v22 = vsel %vm692_vm1, %v4335_v20, 0.0  ;;  %v1206_v20 = vsel %vm692_vm1, %v4375_v32, 0.0 }
 0x2a7   : > { %v1922_v32 = vsel %vm692_vm1, %v4405_v57, 0.0 }
 0x2a9   : > { %1914 = vadd.xlane.f32.xlu0 %v1913_v40  ;;  %v4493_v40 = vpop.permute.xlu1 %1110 }
 0x2aa   : > { %1270 = vadd.xlane.f32.xlu1 %v1269_v43  ;;  %v4497_v43 = vpop.permute.xlu0 %624 }
 0x2ad   : > { %1938 = vadd.xlane.f32.xlu0 %v1937_v50  ;;  %v4503_v50 = vpop.permute.xlu1 %1126 }
 0x2ae   : > { %1866 = vadd.xlane.f32.xlu1 %v1865_v47  ;;  %v4505_v49 = vpop.permute.xlu0 %640  ;;  %v1895_v47 = vsel %vm692_vm1, %v4327_v31, 0.0  ;;  %v1943_v31 = vsel %vm692_vm1, %v4343_v21, 0.0 }
 0x2b1   : > { %1201 = vadd.xlane.f32.xlu0 %v1200_v11  ;;  %v4513_v11 = vpop.permute.xlu1 %1142 }
 0x2b2   : > { %1869 = vadd.xlane.f32.xlu1 %v1868_v53  ;;  %v4517_v53 = vpop.permute.xlu0 %656 }
 0x2b5   : > { %1225 = vadd.xlane.f32.xlu0 %v1224_v14  ;;  %v1159_v14 = vpop.permute.xlu1 %1158 }
 0x2b6   : > { %1893 = vadd.xlane.f32.xlu1 %v1892_v62  ;;  %v4523_v62 = vpop.permute.xlu0 %1112 }
 0x2b9   : > { %1249 = vadd.xlane.f32.xlu0 %v1248_v4  ;;  %v1230_v4 = vsel %vm692_vm1, %v4381_v18, 0.0  ;;  %v1779_v21 = vpop.permute.xlu1 %1778  ;;  %v1278_v18 = vsel %vm692_vm1, %v4393_v12, 0.0  ;;  %v1233_v12 = vsel %vm692_vm1, %v4399_v56, 0.0 }
 0x2ba   : > { %1917 = vadd.xlane.f32.xlu1 %v1916_v9  ;;  %v4533_v9 = vpop.permute.xlu0 %1128 }
 0x2bd   : > { %1273 = vadd.xlane.f32.xlu0 %v1272_v29  ;;  %v1254_v29 = vsel %vm692_vm1, %v4387_v16, 0.0  ;;  %v1795_v51 = vpop.permute.xlu1 %1794  ;;  %v1209_v16 = vsel %vm692_vm1, %v4395_v5, 0.0  ;;  %v1949_v5 = vsel %vm692_vm1, %v4437_v33, 0.0  ;;  %v1236_v33 = vsel %vm692_vm1, %v4503_v50, 0.0 }
 0x2be   : > { %1941 = vadd.xlane.f32.xlu1 %v1940_v44  ;;  %v1145_v44 = vpop.permute.xlu0 %1144 }
 0x2c1   : > { %1872 = vadd.xlane.f32.xlu0 %v1871_v41  ;;  %v1877_v41 = vsel %vm692_vm1, %v4411_v60, 0.0  ;;  %v1925_v60 = vsel %vm692_vm1, %v4425_v58, 0.0  ;;  %v1880_v58 = vsel %vm692_vm1, %v1779_v21, 0.0  ;;  %v1284_v21 = vsel %vm692_vm1, %v1159_v14, 0.0 }
 0x2c2   : > { %1204 = vadd.xlane.f32.xlu1 %v1203_v28  ;;  %v1811_v28 = vpop.permute.xlu1 %1810  ;;  %v1161_v57 = vpop.permute.xlu0 %1160  ;;  %v1239_v14 = vsel %vm692_vm1, %v4533_v9, 0.0  ;;  %v2464_v9 = vsel %vm692_vm1, %v4233_v17, 0.0  ;;  %v2488_v17 = vsel %vm692_vm1, %v4239_v19, 0.0  ;;  %v402_v19 = vsub.s32 1, %v4024_v46 }
 0x2c5   : > { %1896 = vadd.xlane.f32.xlu0 %v1895_v47  ;;  %v1901_v47 = vsel %vm692_vm1, %v4417_v6, 0.0  ;;  %v1281_v6 = vsel %vm692_vm1, %v4407_v36, 0.0  ;;  %v1260_v36 = vsel %vm692_vm1, %v4513_v11, 0.0  ;;  %v1215_v11 = vsel %vm692_vm1, %v4523_v62, 0.0 }
 0x2c6   : > { %1228 = vadd.xlane.f32.xlu1 %v1227_v26  ;;  %v1827_v13 = vpop.permute.xlu1 %1826  ;;  %v1781_v26 = vpop.permute.xlu0 %1780 }
 0x2c9   : > { %1920 = vadd.xlane.f32.xlu0 %v1919_v22  ;;  %v1257_v22 = vsel %vm692_vm1, %v4403_v54, 0.0 }
 0x2ca   : > { %1252 = vadd.xlane.f32.xlu1 %v1251_v1  ;;  %v4557_v1 = vpop.permute.xlu1 %2377  ;;  %v1797_v56 = vpop.permute.xlu0 %1796 }
 0x2cd   : > { %1944 = vadd.xlane.f32.xlu0 %v1943_v31  ;;  %v1212_v31 = vsel %vm692_vm1, %v4493_v40, 0.0  ;;  %v1928_v40 = vsel %vm692_vm1, %v1811_v28, 0.0  ;;  %v1263_v28 = vsel %vm692_vm1, %v1145_v44, 0.0  ;;  %v2473_v44 = vsel %vm692_vm1, %v4415_v34, 0.0 }
 0x2ce   : > { %1276 = vadd.xlane.f32.xlu1 %v1275_v15  ;;  %v4564_v54 = vpop.permute.xlu1 %2393  ;;  %v1813_v15 = vpop.permute.xlu0 %1812  ;;  %v2497_v34 = vsel %vm692_vm1, %v4423_v61, 0.0 }
 0x2d1   : > { %1207 = vadd.xlane.f32.xlu0 %v1206_v20  ;;  %v1904_v20 = vsel %vm692_vm1, %v1795_v51, 0.0  ;;  %v1907_v51 = vsel %vm692_vm1, %v1797_v56, 0.0 }
 0x2d2   : > { %1875 = vadd.xlane.f32.xlu1 %v1874_v30  ;;  %v4571_v30 = vpop.permute.xlu1 %2409 }
 0x2d5   : > { %1231 = vadd.xlane.f32.xlu0 %v1230_v4  ;;  %v1829_v4 = vpop.permute.xlu0 %1828 }
 0x2d6   : > { %1899 = vadd.xlane.f32.xlu1 %v1898_v24  ;;  %v1952_v24 = vsel %vm692_vm1, %v1827_v13, 0.0  ;;  %v4576_v50 = vpop.permute.xlu1 %2425 }
 0x2d9   : > { %1255 = vadd.xlane.f32.xlu0 %v1254_v29  ;;  %v4578_v29 = vpop.permute.xlu0 %2379 }
 0x2da   : > { %1923 = vadd.xlane.f32.xlu1 %v1922_v32  ;;  %v1883_v32 = vsel %vm692_vm1, %v1781_v26, 0.0  ;;  %v2482_v46 = vsel %vm692_vm1, %v4578_v29, 0.0  ;;  %v2494_v29 = vsel %vm692_vm1, %v4355_v8, 0.0 }
 0x2dd   : > { %1279 = vadd.xlane.f32.xlu0 %v1278_v18  ;;  %v4584_v18 = vpop.permute.xlu1 %610 }
 0x2de   : > { %1947 = vadd.xlane.f32.xlu1 %v1946_v38  ;;  %v4588_v38 = vpop.permute.xlu0 %2395 }
 0x2e1   : > { %1878 = vadd.xlane.f32.xlu0 %v1877_v41  ;;  %v1931_v41 = vsel %vm692_vm1, %v1813_v15, 0.0 }
 0x2e2   : > { %1210 = vadd.xlane.f32.xlu1 %v1209_v16  ;;  %v4592_v16 = vpop.permute.xlu1 %626  ;;  %v4594_v62 = vpop.permute.xlu0 %2411 }
 0x2e5   : > { %1902 = vadd.xlane.f32.xlu0 %v1901_v47  ;;  %v1955_v47 = vsel %vm692_vm1, %v1829_v4, 0.0  ;;  %v2470_v4 = vsel %vm692_vm1, %v4349_v2, 0.0  ;;  %v2491_v2 = vsel %vm692_vm1, %v4329_v23, 0.0  ;;  %v489_v23 = vpop.f32.mrf.mxu0 }
 0x2e6   : > { %1234 = vadd.xlane.f32.xlu1 %v1233_v12  ;;  %v1287_v12 = vsel %vm692_vm1, %v1161_v57, 0.0  ;;  %v4600_v13 = vpop.permute.xlu1 %642  ;;  %v4604_v26 = vpop.permute.xlu0 %2427  ;;  %v2485_v57 = vsel %vm692_vm1, %v4217_v10, 0.0  ;;  %v2467_v10 = vsel %vm692_vm1, %v4321_v25, 0.0  ;;  %v403_v25 = vrot.slane %v4030_v48, %v402_v19 }
 0x2e9   : > { %1926 = vadd.xlane.f32.xlu0 %v1925_v60  ;;  %v2476_v60 = vsel %vm692_vm1, %v4445_v42, 0.0 }
 0x2ea   : > { %1258 = vadd.xlane.f32.xlu1 %v1257_v22 }
 0x2ed   : > { %1950 = vadd.xlane.f32.xlu0 %v1949_v5  ;;  %v4610_v5 = vpop.permute.xlu1 %658 }
 0x2ee   : > { %1282 = vadd.xlane.f32.xlu1 %v1281_v6 }
 0x2f1   : > { %1213 = vadd.xlane.f32.xlu0 %v1212_v31 }
 0x2f2   : > { %1881 = vadd.xlane.f32.xlu1 %v1880_v58  ;;  %v2500_v58 = vsel %vm692_vm1, %v4457_v0, 0.0  ;;  %v2479_v0 = vsel %vm692_vm1, %v4557_v1, 0.0 }
 0x2f5   : > { %1237 = vadd.xlane.f32.xlu0 %v1236_v33 }
 0x2f6   : > { %1905 = vadd.xlane.f32.xlu1 %v1904_v20 }
 0x2f9   : > { %1261 = vadd.xlane.f32.xlu0 %v1260_v36 }
 0x2fa   : > { %1929 = vadd.xlane.f32.xlu1 %v1928_v40 }
 0x2fd   : > { %1285 = vadd.xlane.f32.xlu0 %v1284_v21 }
 0x2fe   : > { %1953 = vadd.xlane.f32.xlu1 %v1952_v24 }
 0x301   : > { %1884 = vadd.xlane.f32.xlu0 %v1883_v32 }
 0x302   : > { %1216 = vadd.xlane.f32.xlu1 %v1215_v11 }
 0x305   : > { %1908 = vadd.xlane.f32.xlu0 %v1907_v51 }
 0x306   : > { %1240 = vadd.xlane.f32.xlu1 %v1239_v14 }
 0x309   : > { %1932 = vadd.xlane.f32.xlu0 %v1931_v41 }
 0x30a   : > { %1264 = vadd.xlane.f32.xlu1 %v1263_v28 }
 0x30d   : > { %1956 = vadd.xlane.f32.xlu0 %v1955_v47 }
 0x30e   : > { %1288 = vadd.xlane.f32.xlu1 %v1287_v12 }
 0x311   : > { %2465 = vadd.xlane.f32.xlu0 %v2464_v9 }
 0x312   : > { %2474 = vadd.xlane.f32.xlu1 %v2473_v44 }
 0x315   : > { %2477 = vadd.xlane.f32.xlu0 %v2476_v60  ;;  %v4633_v60 = vadd.f32 %v4035_v52, %v403_v25  ;;  %v6504_v52 = vld [vmem:[#allocation5_spill] sm:$0xff] }
 0x316   : > { %v1220_v22 = vpop.xlane.xlu0 %1219  ;;  %2486 = vadd.xlane.f32.xlu1 %v2485_v57  ;;  %v2503_v57 = vsel %vm692_vm1, %v4564_v54, 0.0  ;;  %v6508_v54 = vld [vmem:[#allocation7_spill] sm:$0xff] }
 0x317   : > { %v1298_v31 = vmul.f32 0.25, %v1220_v22 }
 0x319   : > { %2489 = vadd.xlane.f32.xlu0 %v2488_v17 }
 0x31a   : > { %v1244_v6 = vpop.xlane.xlu0 %1243  ;;  %2498 = vadd.xlane.f32.xlu1 %v2497_v34 }
 0x31b   : > { %v1196_v56 = vpop.xlane.xlu1 %1195  ;;  %v1306_v15 = vmul.f32 0.25, %v1244_v6  ;;  %v4640_v6 = vadd.f32 %v4041_v55, %v403_v25  ;;  %v6510_v55 = vld [vmem:[#allocation8_spill] sm:$0xff] }
 0x31c   : > { %v1290_v42 = vmul.f32 0.25, %v1196_v56  ;;  %v6502_v56 = vld [vmem:[#allocation4_spill] sm:$0xff] }
 0x31d   : > { %2501 = vadd.xlane.f32.xlu0 %v2500_v58  ;;  %6501 = vst [vmem:[#allocation38_spill] sm:$0xff] %v4640_v6  ;;  %v6506_v58 = vld [vmem:[#allocation6_spill] sm:$0xff] }
 0x31e   : > { %v1322_v33 = vmax.f32 %v1290_v42, %v1298_v31  ;;  %v1268_v20 = vpop.xlane.xlu0 %1267  ;;  %2468 = vadd.xlane.f32.xlu1 %v2467_v10  ;;  %v4649_v8 = vadd.f32 %v6506_v58, %v403_v25  ;;  %v6521_v58 = vld [vmem:[#allocation15_spill] sm:$0xff] }
 0x31f   : > { %v1314_v36 = vmul.f32 0.25, %v1268_v20  ;;  %v1912_v61 = vpop.xlane.xlu1 %1911 }
 0x320   : > { %v1323_v40 = vmax.f32 %v1322_v33, %v1306_v15  ;;  %v1974_v17 = vmul.f32 0.25, %v1912_v61  ;;  %6507 = vst [vmem:[#allocation6_spill] sm:$0xff] %v4649_v8  ;;  %v4657_v61 = vadd.f32 %v489_v23, %v403_v25 }
 0x321   : > { %2471 = vadd.xlane.f32.xlu0 %v2470_v4  ;;  %v6513_v4 = vld [vmem:[#allocation9_spill] sm:$0xff] }
 0x322   : > { %v1324_v21 = vmax.f32 %v1323_v40, %v1314_v36  ;;  %v1864_v24 = vpop.xlane.xlu0 %1863  ;;  %2480 = vadd.xlane.f32.xlu1 %v2479_v0  ;;  %6512 = vst [vmem:[#allocation39_spill] sm:$0xff] %v4657_v61  ;;  %v2506_v40 = vsel %vm692_vm1, %v4588_v38, 0.0  ;;  %v4663_v0 = vsel %vm692_vm1, %v6513_v4, 0.0  ;;  %v6516_v38 = vld [vmem:[#allocation13_spill] sm:$0xff] }
 0x323   : > { %v1936_v32 = vpop.xlane.xlu1 %1935  ;;  %v1958_v9 = vmul.f32 0.25, %v1864_v24  ;;  %v6514_v24 = vld [vmem:[#allocation12_spill] sm:$0xff] }
 0x324   : > { %v1346_v11 = vsub.f32 %v1290_v42, %v1324_v21  ;;  %v1354_v51 = vsub.f32 %v1298_v31, %v1324_v21  ;;  %v1362_v14 = vsub.f32 %v1306_v15, %v1324_v21  ;;  %v1370_v41 = vsub.f32 %v1314_v36, %v1324_v21 }
 0x325   : > { %2483 = vadd.xlane.f32.xlu0 %v2482_v46  ;;  %v4643_v31 = vadd.f32 %v6502_v56, %v403_v25  ;;  %v4646_v42 = vadd.f32 %v6504_v52, %v403_v25  ;;  %v4652_v15 = vadd.f32 %v6508_v54, %v403_v25  ;;  %v1982_v33 = vmul.f32 0.25, %v1936_v32  ;;  %v6520_v56 = vld [vmem:[#allocation14_spill] sm:$0xff] }
 0x326   : > { %v1378_v28 = vmul.f32 1.442695, %v1346_v11  ;;  %v1394_v47 = vmul.f32 1.442695, %v1354_v51  ;;  %v1888_v1 = vpop.xlane.xlu0 %1887  ;;  %2492 = vadd.xlane.f32.xlu1 %v2491_v2  ;;  %v1410_v12 = vmul.f32 1.442695, %v1362_v14  ;;  %v4655_v36 = vadd.f32 %v6510_v55, %v403_v25 }
 0x327   : > { %v1966_v44 = vmul.f32 0.25, %v1888_v1  ;;  %v4630_v48 = vpop.xlane.xlu1 %2462  ;;  %v1426_v22 = vmul.f32 1.442695, %v1370_v41  ;;  %6503 = vst [vmem:[#allocation4_spill] sm:$0xff] %v4643_v31  ;;  %6505 = vst [vmem:[#allocation5_spill] sm:$0xff] %v4646_v42  ;;  %v2509_v32 = vsel %vm692_vm1, %v6514_v24, 0.0 }
 0x328   : > { %6500 = vst [vmem:[#allocation37_spill] sm:$0xff] %v4630_v48  ;;  %3443 = vpow2.f32 %v1378_v28  ;;  %6509 = vst [vmem:[#allocation7_spill] sm:$0xff] %v4652_v15  ;;  %v6515_v11 = vld [vmem:[#allocation10_spill] sm:$0xff]  ;;  %v4677_v41 = vsel %vm692_vm1, %v6516_v38, 0.0  ;;  %v6517_v2 = vld [vmem:[#allocation11_spill] sm:$0xff]  ;;  %v4689_v52 = vsel %vm692_vm1, %v6520_v56, 0.0 }
 0x329   : > { %3445 = vpow2.f32 %v1394_v47  ;;  %v1990_v34 = vmax.f32 %v1958_v9, %v1966_v44  ;;  %2495 = vadd.xlane.f32.xlu0 %v2494_v29  ;;  %6511 = vst [vmem:[#allocation8_spill] sm:$0xff] %v4655_v36  ;;  %v4669_v51 = vsel %vm692_vm1, %v6515_v11, 0.0  ;;  %v4681_v28 = vsel %vm692_vm1, %v6517_v2, 0.0  ;;  %v6525_v11 = vld [vmem:[#allocation21_spill] sm:$0xff]  ;;  %v6526_v2 = vld [vmem:[#allocation19_spill] sm:$0xff] }
 0x32a   : > { %v1199_v10 = vpop.xlane.xlu0 %1198  ;;  %2504 = vadd.xlane.f32.xlu1 %v2503_v57  ;;  %3447 = vpow2.f32 %v1410_v12  ;;  %6518 = vst [vmem:[#allocation9_spill] sm:$0xff] %v4681_v28  ;;  %v4715_v38 = vsel %vm692_vm1, %v6525_v11, 0.0 }
 0x32b   : > { %v1991_v20 = vmax.f32 %v1990_v34, %v1974_v17  ;;  %v1223_v19 = vpop.xlane.xlu1 %1222  ;;  %3449 = vpow2.f32 %v1426_v22  ;;  %v4671_v14 = vmul.f32 0.25, %v1199_v10  ;;  %v6519_v22 = vld [vmem:[#allocation16_spill] sm:$0xff]  ;;  %v4693_v10 = vsel %vm692_vm1, %v6521_v58, 0.0 }
 0x32c   : > { %v4673_v25 = vmul.f32 0.25, %v1223_v19  ;;  %v2512_v34 = vsel %vm692_vm1, %v6519_v22, 0.0 }
 0x32d   : > { %v1992_v21 = vmax.f32 %v1991_v20, %v1982_v33  ;;  %2507 = vadd.xlane.f32.xlu0 %v2506_v40  ;;  %v6523_v40 = vld [vmem:[#allocation20_spill] sm:$0xff] }
 0x32e   : > { %v1891_v46 = vpop.xlane.xlu0 %1890  ;;  %2510 = vadd.xlane.f32.xlu1 %v2509_v32  ;;  %v1325_v19 = vmax.f32 %v4671_v14, %v4673_v25  ;;  %v4705_v4 = vsel %vm692_vm1, %v6523_v40, 0.0  ;;  %v2524_v32 = vsel %vm692_vm1, %v4465_v7, 0.0  ;;  %v6529_v7 = vld [vmem:[#allocation22_spill] sm:$0xff] }
 0x32f   : > { %v2014_v47 = vsub.f32 %v1958_v9, %v1992_v21  ;;  %v2022_v1 = vsub.f32 %v1966_v44, %v1992_v21  ;;  %v2030_v12 = vsub.f32 %v1974_v17, %v1992_v21  ;;  %v2038_v29 = vsub.f32 %v1982_v33, %v1992_v21  ;;  %v1247_v57 = vpop.xlane.xlu1 %1246  ;;  %v6522_v44 = vld [vmem:[#allocation18_spill] sm:$0xff]  ;;  %v6524_v21 = vld [vmem:[#allocation17_spill] sm:$0xff] }
 0x330   : > { %v4683_v23 = vmul.f32 0.25, %v1247_v57  ;;  %v2521_v9 = vsel %vm692_vm1, %v4433_v3, 0.0  ;;  %v4699_v17 = vsel %vm692_vm1, %v6522_v44, 0.0  ;;  %v4709_v24 = vsel %vm692_vm1, %v6524_v21, 0.0  ;;  %v6531_v44 = vld [vmem:[#allocation24_spill] sm:$0xff]  ;;  %v6533_v21 = vld [vmem:[#allocation26_spill] sm:$0xff] }
 0x331   : > { %v2046_v54 = vmul.f32 1.442695, %v2014_v47  ;;  %v2062_v20 = vmul.f32 1.442695, %v2022_v1  ;;  %2513 = vadd.xlane.f32.xlu0 %v2512_v34  ;;  %v2078_v33 = vmul.f32 1.442695, %v2030_v12 }
 0x332   : > { %v1915_v55 = vpop.xlane.xlu0 %1914  ;;  %2522 = vadd.xlane.f32.xlu1 %v2521_v9  ;;  %v4719_v47 = vsel %vm692_vm1, %v6526_v2, 0.0  ;;  %v2094_v1 = vmul.f32 1.442695, %v2038_v29  ;;  %v1326_v12 = vmax.f32 %v1325_v19, %v4683_v23  ;;  %v6528_v34 = vld [vmem:[#allocation25_spill] sm:$0xff]  ;;  %v4728_v58 = vsel %vm692_vm1, %v6529_v7, 0.0 }
 0x333   : > { %3451 = vpow2.f32 %v2046_v54  ;;  %v1271_v3 = vpop.xlane.xlu1 %1270  ;;  %6527 = vst [vmem:[#allocation12_spill] sm:$0xff] %v4719_v47  ;;  %v2515_v56 = vsel %vm692_vm1, %v6528_v34, 0.0  ;;  %v6530_v54 = vld [vmem:[#allocation23_spill] sm:$0xff]  ;;  %v4736_v29 = vsel %vm692_vm1, %v6531_v44, 0.0  ;;  %v6535_v7 = vld [vmem:[#allocation29_spill] sm:$0xff]  ;;  %v6536_v44 = vld [vmem:[#allocation28_spill] sm:$0xff] }
 0x334   : > { %3453 = vpow2.f32 %v2062_v20  ;;  %v1315_v57 = vmul.f32 0.25, %v1271_v3  ;;  %v4732_v9 = vsel %vm692_vm1, %v6530_v54, 0.0  ;;  %6532 = vst [vmem:[#allocation10_spill] sm:$0xff] %v4736_v29  ;;  %v4742_v3 = vsel %vm692_vm1, %v6533_v21, 0.0 }
 0x335   : > { %v4722_v22 = vpop.eup %3443  ;;  %2525 = vadd.xlane.f32.xlu0 %v2524_v32  ;;  %3455 = vpow2.f32 %v2078_v33  ;;  %v6534_v32 = vld [vmem:[#allocation27_spill] sm:$0xff]  ;;  %v2518_v54 = vsel %vm692_vm1, %v6535_v7, 0.0  ;;  %v4754_v33 = vsel %vm692_vm1, %v6536_v44, 0.0  ;;  %v1967_v7 = vmul.f32 0.25, %v1891_v46 }
 0x336   : > { %v4738_v20 = vpop.eup %3445  ;;  %v1327_v19 = vmax.f32 %v1326_v12, %v1315_v57  ;;  %v1939_v40 = vpop.xlane.xlu0 %1938  ;;  %2516 = vadd.xlane.f32.xlu1 %v2515_v56  ;;  %v4746_v11 = vsel %vm692_vm1, %v6534_v32, 0.0  ;;  %v6537_v12 = vld [vmem:[#allocation30_spill] sm:$0xff]  ;;  %3457 = vpow2.f32 %v2094_v1  ;;  %v2527_v44 = vsel %vm692_vm1, %v4571_v30, 0.0 }
 0x337   : > { %v1442_v2 = vadd.f32 %v4738_v20, %v4722_v22  ;;  %v1867_v34 = vpop.xlane.xlu1 %1866  ;;  %v4758_v56 = vsel %vm692_vm1, %v6537_v12, 0.0  ;;  %v4760_v21 = vpop.eup %3447 }
 0x338   : > { %6538 = vst [vmem:[#allocation13_spill] sm:$0xff] %v4758_v56  ;;  %v1347_v32 = vsub.f32 %v4671_v14, %v1327_v19  ;;  %v1355_v29 = vsub.f32 %v4673_v25, %v1327_v19  ;;  %v1363_v47 = vsub.f32 %v4683_v23, %v1327_v19  ;;  %v1959_v15 = vmul.f32 0.25, %v1867_v34  ;;  %v4768_v28 = vpop.eup %3449  ;;  %v6539_v14 = vld [vmem:[#allocation31_spill] sm:$0xff] }
 0x339   : > { %v1443_v61 = vadd.f32 %v4760_v21, %v1442_v2  ;;  %2519 = vadd.xlane.f32.xlu0 %v2518_v54  ;;  %v1371_v12 = vsub.f32 %v1315_v57, %v1327_v19  ;;  %v4772_v25 = vsel %vm692_vm1, %v6539_v14, 0.0  ;;  %v1975_v2 = vmul.f32 0.25, %v1915_v55  ;;  %v6540_v54 = vld [vmem:[#allocation32_spill] sm:$0xff]  ;;  %v6543_v14 = vld [vmem:[#allocation35_spill] sm:$0xff] }
 0x33a   : > { %v1380_v42 = vmul.f32 1.442695, %v1347_v32  ;;  %v1396_v56 = vmul.f32 1.442695, %v1355_v29  ;;  %v1202_v1 = vpop.xlane.xlu0 %1201  ;;  %2528 = vadd.xlane.f32.xlu1 %v2527_v44  ;;  %v1993_v46 = vmax.f32 %v1959_v15, %v1967_v7  ;;  %v4777_v48 = vsel %vm692_vm1, %v6540_v54, 0.0  ;;  %v6541_v29 = vld [vmem:[#allocation33_spill] sm:$0xff] }
 0x33b   : > { %v1444_v23 = vadd.f32 %v4768_v28, %v1443_v61  ;;  %v1870_v34 = vpop.xlane.xlu1 %1869  ;;  %v1412_v30 = vmul.f32 1.442695, %v1363_v47  ;;  %v2530_v57 = vsel %vm692_vm1, %v4594_v62, 0.0  ;;  %v4783_v19 = vsel %vm692_vm1, %v6541_v29, 0.0  ;;  %v6542_v61 = vld [vmem:[#allocation34_spill] sm:$0xff]  ;;  %v6545_v29 = vld [vmem:[#allocation36_spill] sm:$0xff] }
 0x33c   : > { %3459 = vpow2.f32 %v1380_v42  ;;  %v1983_v32 = vmul.f32 0.25, %v1939_v40  ;;  %v1994_v44 = vmax.f32 %v1993_v46, %v1975_v2  ;;  %v4787_v55 = vsel %vm692_vm1, %v6542_v61, 0.0 }
 0x33d   : > { %2531 = vadd.xlane.f32.xlu0 %v2530_v57  ;;  %v4791_v54 = vsel %vm692_vm1, %v6543_v14, 0.0  ;;  %3461 = vpow2.f32 %v1396_v56  ;;  %v1428_v42 = vmul.f32 1.442695, %v1371_v12  ;;  %v2545_v62 = vsel %vm692_vm1, %v4443_v35, 0.0 }
 0x33e   : > { %6544 = vst [vmem:[#allocation11_spill] sm:$0xff] %v4791_v54  ;;  %v1226_v47 = vpop.xlane.xlu0 %1225  ;;  %2534 = vadd.xlane.f32.xlu1 %v4677_v41  ;;  %v4798_v40 = vsel %vm692_vm1, %v6545_v29, 0.0  ;;  %3463 = vrcp.f32 %v1444_v23  ;;  %v1995_v46 = vmax.f32 %v1994_v44, %v1983_v32  ;;  %v4802_v61 = vsel %vm692_vm1, %v4453_v37, 0.0 }
 0x33f   : > { %6546 = vst [vmem:[#allocation16_spill] sm:$0xff] %v4798_v40  ;;  %v1894_v57 = vpop.xlane.xlu1 %1893  ;;  %v4806_v56 = vsel %vm692_vm1, %v4463_v39, 0.0  ;;  %3465 = vpow2.f32 %v1412_v30  ;;  %v4810_v41 = vmul.f32 0.25, %v1870_v34  ;;  %v4816_v23 = vsel %vm692_vm1, %v4473_v63, 0.0 }
 0x340   : > { %6547 = vst [vmem:[#allocation14_spill] sm:$0xff] %v4806_v56  ;;  %v4808_v12 = vpop.eup %3451  ;;  %v4812_v35 = vmul.f32 0.25, %v1894_v57  ;;  %6548 = vst [vmem:[#allocation15_spill] sm:$0xff] %v4816_v23  ;;  %v2015_v14 = vsub.f32 %v1959_v15, %v1995_v46  ;;  %v2023_v37 = vsub.f32 %v1967_v7, %v1995_v46  ;;  %v2031_v29 = vsub.f32 %v1975_v2, %v1995_v46 }
 0x341   : > { %v4818_v44 = vpop.eup %3453  ;;  %v4820_v40 = vmul.f32 0.25, %v1226_v47  ;;  %2537 = vadd.xlane.f32.xlu0 %v4699_v17  ;;  %3467 = vpow2.f32 %v1428_v42  ;;  %v2039_v34 = vsub.f32 %v1983_v32, %v1995_v46  ;;  %v1292_v7 = vmul.f32 0.25, %v1202_v1 }
 0x342   : > { %v2110_v39 = vadd.f32 %v4818_v44, %v4808_v12  ;;  %v1996_v30 = vmax.f32 %v4810_v41, %v4812_v35  ;;  %v1250_v57 = vpop.xlane.xlu0 %1249  ;;  %2546 = vadd.xlane.f32.xlu1 %v2545_v62  ;;  %v4827_v63 = vpop.eup %3455  ;;  %v2048_v23 = vmul.f32 1.442695, %v2015_v14  ;;  %v2064_v15 = vmul.f32 1.442695, %v2023_v37 }
 0x343   : > { %v1918_v2 = vpop.xlane.xlu1 %1917  ;;  %v2548_v47 = vsel %vm692_vm1, %v4477_v59, 0.0  ;;  %v2080_v54 = vmul.f32 1.442695, %v2031_v29  ;;  %v1308_v56 = vmul.f32 0.25, %v1250_v57  ;;  %v4832_v32 = vpop.eup %3457  ;;  %v1328_v46 = vmax.f32 %v1292_v7, %v4820_v40 }
 0x344   : > { %v2111_v17 = vadd.f32 %v4827_v63, %v2110_v39  ;;  %v1976_v42 = vmul.f32 0.25, %v1918_v2  ;;  %3469 = vpow2.f32 %v2048_v23  ;;  %v4837_v62 = vsel %vm692_vm1, %v4485_v27, 0.0 }
 0x345   : > { %2549 = vadd.xlane.f32.xlu0 %v2548_v47  ;;  %v4841_v1 = vsel %vm692_vm1, %v4483_v45, 0.0  ;;  %3471 = vpow2.f32 %v2064_v15  ;;  %v2096_v14 = vmul.f32 1.442695, %v2039_v34  ;;  %v1329_v23 = vmax.f32 %v1328_v46, %v1308_v56 }
 0x346   : > { %6549 = vst [vmem:[#allocation18_spill] sm:$0xff] %v4841_v1  ;;  %v2112_v59 = vadd.f32 %v4832_v32, %v2111_v17  ;;  %v1997_v37 = vmax.f32 %v1996_v30, %v1976_v42  ;;  %v1274_v29 = vpop.xlane.xlu0 %1273  ;;  %2540 = vadd.xlane.f32.xlu1 %v4742_v3  ;;  %v4847_v2 = vsel %vm692_vm1, %v4497_v43, 0.0  ;;  %v4851_v27 = vsel %vm692_vm1, %v4505_v49, 0.0 }
 0x347   : > { %v1316_v39 = vmul.f32 0.25, %v1274_v29  ;;  %v1942_v57 = vpop.xlane.xlu1 %1941  ;;  %3473 = vpow2.f32 %v2080_v54  ;;  %v2551_v34 = vsel %vm692_vm1, %v4576_v50, 0.0  ;;  %v4857_v30 = vsel %vm692_vm1, %v4517_v53, 0.0 }
 0x348   : > { %v1984_v45 = vmul.f32 0.25, %v1942_v57  ;;  %6550 = vst [vmem:[#allocation20_spill] sm:$0xff] %v4857_v30  ;;  %3475 = vrcp.f32 %v2112_v59  ;;  %v4864_v43 = vsel %vm692_vm1, %v4584_v18, 0.0  ;;  %v4868_v49 = vsel %vm692_vm1, %v4592_v16, 0.0 }
 0x349   : > { %v4859_v3 = vpop.eup %3459  ;;  %v1330_v15 = vmax.f32 %v1329_v23, %v1316_v39  ;;  %2543 = vadd.xlane.f32.xlu0 %v4772_v25  ;;  %3477 = vpow2.f32 %v2096_v14  ;;  %v2554_v53 = vsel %vm692_vm1, %v4604_v26, 0.0  ;;  %v4874_v47 = vsel %vm692_vm1, %v4600_v13, 0.0 }
 0x34a   : > { %v1998_v50 = vmax.f32 %v1997_v37, %v1984_v45  ;;  %v1873_v54 = vpop.xlane.xlu0 %1872  ;;  %2552 = vadd.xlane.f32.xlu1 %v2551_v34  ;;  %6551 = vst [vmem:[#allocation17_spill] sm:$0xff] %v4874_v47  ;;  %v4876_v25 = vpop.eup %3461 }
 0x34b   : > { %v1348_v17 = vsub.f32 %v1292_v7, %v1330_v15  ;;  %v1356_v18 = vsub.f32 %v4820_v40, %v1330_v15  ;;  %v1364_v46 = vsub.f32 %v1308_v56, %v1330_v15  ;;  %v1372_v59 = vsub.f32 %v1316_v39, %v1330_v15  ;;  %v1205_v16 = vpop.xlane.xlu1 %1204  ;;  %v3464_v14 = vpop.eup %3463 }
 0x34c   : > { %v1445_v37 = vadd.f32 %v4876_v25, %v4859_v3  ;;  %v2016_v29 = vsub.f32 %v4810_v41, %v1998_v50  ;;  %v2024_v26 = vsub.f32 %v4812_v35, %v1998_v50  ;;  %v2032_v23 = vsub.f32 %v1976_v42, %v1998_v50  ;;  %v4883_v13 = vpop.eup %3465 }
 0x34d   : > { %v1382_v57 = vmul.f32 1.442695, %v1348_v17  ;;  %v1398_v34 = vmul.f32 1.442695, %v1356_v18  ;;  %v1414_v7 = vmul.f32 1.442695, %v1364_v46  ;;  %v2040_v30 = vsub.f32 %v1984_v45, %v1998_v50  ;;  %2555 = vadd.xlane.f32.xlu0 %v2554_v53 }
 0x34e   : > { %v1446_v40 = vadd.f32 %v4883_v13, %v1445_v37  ;;  %v1430_v56 = vmul.f32 1.442695, %v1372_v59  ;;  %v2050_v39 = vmul.f32 1.442695, %v2016_v29  ;;  %v2066_v15 = vmul.f32 1.442695, %v2024_v26  ;;  %v1897_v1 = vpop.xlane.xlu0 %1896  ;;  %694 = vadd.xlane.f32.xlu1 %v4663_v0  ;;  %v4887_v47 = vpop.eup %3467 }
 0x34f   : > { %3479 = vpow2.f32 %v1382_v57  ;;  %v2082_v41 = vmul.f32 1.442695, %v2032_v23  ;;  %v2098_v35 = vmul.f32 1.442695, %v2040_v30  ;;  %v4889_v42 = vmul.f32 0.25, %v1873_v54  ;;  %v1229_v17 = vpop.xlane.xlu1 %1228 }
 0x350   : > { %v1447_v18 = vadd.f32 %v4887_v47, %v1446_v40  ;;  %3481 = vpow2.f32 %v1398_v34  ;;  %v4892_v45 = vmul.f32 0.25, %v1205_v16  ;;  %v4894_v50 = vmul.f32 0.25, %v1897_v1 }
 0x351   : > { %3483 = vpow2.f32 %v1414_v7  ;;  %v4896_v53 = vmul.f32 0.25, %v1229_v17  ;;  %697 = vadd.xlane.f32.xlu0 %v4705_v4  ;;  %v1474_v0 = vmul.f32 %v3464_v14, %v4722_v22  ;;  %v1482_v46 = vmul.f32 %v3464_v14, %v4738_v20  ;;  %v4901_v30 = vpop.eup %3469 }
 0x352   : > { %3485 = vrcp.f32 %v1447_v18  ;;  %v1999_v54 = vmax.f32 %v4889_v42, %v4894_v50  ;;  %v1921_v59 = vpop.xlane.xlu0 %1920  ;;  %718 = vadd.xlane.f32.xlu1 %v4689_v52  ;;  %v1490_v1 = vmul.f32 %v3464_v14, %v4760_v21  ;;  %v1498_v16 = vmul.f32 %v3464_v14, %v4768_v28  ;;  %v4908_v37 = vpop.eup %3471 }
 0x353   : > { %3487 = vpow2.f32 %v1430_v56  ;;  %v1331_v4 = vmax.f32 %v4892_v45, %v4896_v53  ;;  %v1977_v22 = vmul.f32 0.25, %v1921_v59  ;;  %v1253_v20 = vpop.xlane.xlu1 %1252  ;;  %v1506_v29 = vmul.f32 %v1474_v0, %v4633_v60 }
 0x354   : > { %v2113_v26 = vadd.f32 %v4908_v37, %v4901_v30  ;;  %3489 = vpow2.f32 %v2050_v39  ;;  %v1309_v23 = vmul.f32 0.25, %v1253_v20  ;;  %v1514_v52 = vmul.f32 %v1482_v46, %v4643_v31  ;;  %v4916_v21 = vpop.eup %3473 }
 0x355   : > { %3491 = vpow2.f32 %v2066_v15  ;;  %v2000_v28 = vmax.f32 %v1999_v54, %v1977_v22  ;;  %721 = vadd.xlane.f32.xlu0 %v4693_v10  ;;  %v1522_v14 = vmul.f32 %v1490_v1, %v4649_v8  ;;  %v1530_v57 = vmul.f32 %v1498_v16, %v4655_v36  ;;  %v3476_v34 = vpop.eup %3475 }
 0x356   : > { %v2114_v7 = vadd.f32 %v4916_v21, %v2113_v26  ;;  %3493 = vpow2.f32 %v2082_v41  ;;  %v1332_v40 = vmax.f32 %v1331_v4, %v1309_v23  ;;  %v1945_v56 = vpop.xlane.xlu0 %1944  ;;  %700 = vadd.xlane.f32.xlu1 %v4715_v38  ;;  %v1539_v39 = vsel %vm1538_vm2, %v1506_v29, 0.0  ;;  %v4924_v17 = vpop.eup %3477 }
 0x357   : > { %3495 = vpow2.f32 %v2098_v35  ;;  %v1985_v15 = vmul.f32 0.25, %v1945_v56  ;;  %v1277_v18 = vpop.xlane.xlu1 %1276  ;;  %v1540_v10 = vsel %vm1538_vm2, %v1514_v52, 0.0  ;;  %v1542_v0 = vsel %vm1538_vm2, %v1522_v14, 0.0 }
 0x358   : > { %v2115_v46 = vadd.f32 %v4924_v17, %v2114_v7  ;;  %v1317_v54 = vmul.f32 0.25, %v1277_v18  ;;  %v1541_v59 = vadd.f32 %v1540_v10, %v1539_v39  ;;  %v1544_v41 = vsel %vm1538_vm2, %v1530_v57, 0.0 }
 0x359   : > { %v2001_v1 = vmax.f32 %v2000_v28, %v1985_v15  ;;  %703 = vadd.xlane.f32.xlu0 %v4746_v11  ;;  %v4932_v38 = vmul.f32 %v3476_v34, %v4808_v12  ;;  %v4935_v35 = vmul.f32 %v3476_v34, %v4818_v44  ;;  %v4938_v16 = vmul.f32 %v3476_v34, %v4827_v63 }
 0x35a   : > { %3497 = vrcp.f32 %v2115_v46  ;;  %v1333_v4 = vmax.f32 %v1332_v40, %v1317_v54  ;;  %v1208_v20 = vpop.xlane.xlu0 %1207  ;;  %724 = vadd.xlane.f32.xlu1 %v4728_v58  ;;  %v1543_v29 = vadd.f32 %v1542_v0, %v1541_v59  ;;  %v4942_v26 = vmul.f32 %v3476_v34, %v4832_v32 }
 0x35b   : > { %v2017_v11 = vsub.f32 %v4889_v42, %v2001_v1  ;;  %v2025_v12 = vsub.f32 %v4894_v50, %v2001_v1  ;;  %v2033_v52 = vsub.f32 %v1977_v22, %v2001_v1  ;;  %v2041_v28 = vsub.f32 %v1985_v15, %v2001_v1  ;;  %v1876_v44 = vpop.xlane.xlu1 %1875 }
 0x35c   : > { %v4946_v14 = vpop.eup %3479  ;;  %v1349_v63 = vsub.f32 %v4892_v45, %v1333_v4  ;;  %v1357_v57 = vsub.f32 %v4896_v53, %v1333_v4  ;;  %v1365_v7 = vsub.f32 %v1309_v23, %v1333_v4  ;;  %v1373_v40 = vsub.f32 %v1317_v54, %v1333_v4 }
 0x35d   : > { %v4950_v58 = vpop.eup %3481  ;;  %v2052_v56 = vmul.f32 1.442695, %v2017_v11  ;;  %v2068_v32 = vmul.f32 1.442695, %v2025_v12  ;;  %v2084_v34 = vmul.f32 1.442695, %v2033_v52  ;;  %727 = vadd.xlane.f32.xlu0 %v4754_v33  ;;  %v4953_v42 = vadd.f32 %v1544_v41, %v1543_v29 }
 0x35e   : > { %v4955_v50 = vpop.eup %3483  ;;  %v1448_v22 = vadd.f32 %v4950_v58, %v4946_v14  ;;  %v2100_v39 = vmul.f32 1.442695, %v2041_v28  ;;  %v1384_v45 = vmul.f32 1.442695, %v1349_v63  ;;  %v1232_v15 = vpop.xlane.xlu0 %1231  ;;  %742 = vadd.xlane.f32.xlu1 %v4669_v51  ;;  %v4962_v53 = vsel %vm692_vm1, %v4610_v5, 0.0 }
 0x35f   : > { %v3486_v23 = vpop.eup %3485  ;;  %3499 = vpow2.f32 %v2052_v56  ;;  %v1400_v18 = vmul.f32 1.442695, %v1357_v57  ;;  %v1416_v33 = vmul.f32 1.442695, %v1365_v7  ;;  %v1432_v10 = vmul.f32 1.442695, %v1373_v40  ;;  %v1900_v0 = vpop.xlane.xlu1 %1899 }
 0x360   : > { %v4964_v46 = vpop.eup %3487  ;;  %v1449_v54 = vadd.f32 %v4955_v50, %v1448_v22  ;;  %3501 = vpow2.f32 %v2068_v32  ;;  %v4967_v59 = vmul.f32 0.25, %v1208_v20  ;;  %v4969_v41 = vmul.f32 0.25, %v1232_v15  ;;  %v6556_v32 = vld [vmem:[#allocation13_spill] sm:$0xff] }
 0x361   : > { %v4971_v51 = vpop.eup %3489  ;;  %3503 = vpow2.f32 %v2084_v34  ;;  %v4973_v5 = vmul.f32 0.25, %v1876_v44  ;;  %745 = vadd.xlane.f32.xlu0 %v4709_v24  ;;  %v1475_v1 = vmul.f32 %v3486_v23, %v4859_v3  ;;  %v1483_v4 = vmul.f32 %v3486_v23, %v4876_v25  ;;  %v6557_v34 = vld [vmem:[#allocation5_spill] sm:$0xff] }
 0x362   : > { %v4978_v29 = vpop.eup %3491  ;;  %v1450_v11 = vadd.f32 %v4964_v46, %v1449_v54  ;;  %3505 = vpow2.f32 %v2100_v39  ;;  %v4981_v20 = vmul.f32 0.25, %v1900_v0  ;;  %v1256_v12 = vpop.xlane.xlu0 %1255  ;;  %748 = vadd.xlane.f32.xlu1 %v4732_v9  ;;  %v1491_v52 = vmul.f32 %v3486_v23, %v4883_v13  ;;  %v6555_v13 = vld [vmem:[#allocation37_spill] sm:$0xff]  ;;  %v6560_v54 = vld [vmem:[#allocation39_spill] sm:$0xff] }
 0x363   : > { %6552 = vst [vmem:[#allocation21_spill] sm:$0xff] %v4978_v29  ;;  %v4985_v28 = vpop.eup %3493  ;;  %v2116_v24 = vadd.f32 %v4978_v29, %v4971_v51  ;;  %3507 = vpow2.f32 %v1384_v45  ;;  %v1334_v3 = vmax.f32 %v4967_v59, %v4969_v41  ;;  %v1310_v25 = vmul.f32 0.25, %v1256_v12  ;;  %v1924_v44 = vpop.xlane.xlu1 %1923  ;;  %v6558_v0 = vld [vmem:[#allocation9_spill] sm:$0xff] }
 0x364   : > { %6553 = vst [vmem:[#allocation19_spill] sm:$0xff] %v4985_v28  ;;  %v4991_v63 = vpop.eup %3495  ;;  %3509 = vrcp.f32 %v1450_v11  ;;  %v1978_v57 = vmul.f32 0.25, %v1924_v44  ;;  %v1499_v7 = vmul.f32 %v3486_v23, %v4887_v47  ;;  %v1507_v9 = vmul.f32 %v1475_v1, %v4640_v6  ;;  %v6559_v47 = vld [vmem:[#allocation7_spill] sm:$0xff] }
 0x365   : > { %6554 = vst [vmem:[#allocation25_spill] sm:$0xff] %v4991_v63  ;;  %v4996_v40 = vmul.f32 0.25, %v6555_v13  ;;  %v2117_v56 = vadd.f32 %v4985_v28, %v2116_v24  ;;  %3511 = vpow2.f32 %v1400_v18  ;;  %751 = vadd.xlane.f32.xlu0 %v6556_v32  ;;  %v1515_v22 = vmul.f32 %v1483_v4, %v6557_v34 }
 0x366   : > { %v2002_v39 = vmax.f32 %v4973_v5, %v4981_v20  ;;  %v1335_v45 = vmax.f32 %v1334_v3, %v1310_v25  ;;  %v1280_v15 = vpop.xlane.xlu0 %1279  ;;  %766 = vadd.xlane.f32.xlu1 %v6558_v0  ;;  %v1523_v23 = vmul.f32 %v1491_v52, %v6559_v47  ;;  %v1531_v1 = vmul.f32 %v1499_v7, %v6560_v54  ;;  %v6561_v0 = vld [vmem:[#allocation12_spill] sm:$0xff] }
 0x367   : > { %v3498_v11 = vpop.eup %3497  ;;  %v2118_v12 = vadd.f32 %v4991_v63, %v2117_v56  ;;  %3513 = vpow2.f32 %v1416_v33  ;;  %v1318_v18 = vmul.f32 0.25, %v1280_v15  ;;  %v1948_v24 = vpop.xlane.xlu1 %1947  ;;  %v1546_v44 = vsel %vm1538_vm2, %v1507_v9, 0.0  ;;  %v6562_v33 = vld [vmem:[#allocation10_spill] sm:$0xff] }
 0x368   : > { %3515 = vpow2.f32 %v1432_v10  ;;  %v2003_v4 = vmax.f32 %v2002_v39, %v1978_v57  ;;  %v1986_v13 = vmul.f32 0.25, %v1948_v24  ;;  %v1547_v3 = vsel %vm1538_vm2, %v1515_v22, 0.0 }
 0x369   : > { %3517 = vrcp.f32 %v2118_v12  ;;  %v1336_v32 = vmax.f32 %v1335_v45, %v1318_v18  ;;  %769 = vadd.xlane.f32.xlu0 %v6561_v0  ;;  %v1549_v52 = vsel %vm1538_vm2, %v1523_v23, 0.0  ;;  %v1551_v7 = vsel %vm1538_vm2, %v1531_v1, 0.0 }
 0x36a   : > { %v2004_v28 = vmax.f32 %v2003_v4, %v1986_v13  ;;  %v1879_v56 = vpop.xlane.xlu0 %1878  ;;  %772 = vadd.xlane.f32.xlu1 %v6562_v33  ;;  %v1548_v15 = vadd.f32 %v1547_v3, %v1546_v44  ;;  %v5014_v9 = vmul.f32 %v3498_v11, %v4901_v30  ;;  %v5017_v10 = vmul.f32 %v3498_v11, %v4908_v37 }
 0x36b   : > { %v1350_v22 = vsub.f32 %v4967_v59, %v1336_v32  ;;  %v1358_v39 = vsub.f32 %v4969_v41, %v1336_v32  ;;  %v1366_v45 = vsub.f32 %v1310_v25, %v1336_v32  ;;  %v1374_v12 = vsub.f32 %v1318_v18, %v1336_v32  ;;  %v1211_v23 = vpop.xlane.xlu1 %1210 }
 0x36c   : > { %v5021_v24 = vpop.eup %3499  ;;  %v2018_v1 = vsub.f32 %v4973_v5, %v2004_v28  ;;  %v2026_v4 = vsub.f32 %v4981_v20, %v2004_v28  ;;  %v2034_v44 = vsub.f32 %v1978_v57, %v2004_v28  ;;  %v2042_v3 = vsub.f32 %v1986_v13, %v2004_v28 }
 0x36d   : > { %6563 = vst [vmem:[#allocation22_spill] sm:$0xff] %v5021_v24  ;;  %v5025_v30 = vpop.eup %3501  ;;  %v1386_v0 = vmul.f32 1.442695, %v1350_v22  ;;  %v1402_v37 = vmul.f32 1.442695, %v1358_v39  ;;  %775 = vadd.xlane.f32.xlu0 %v4777_v48  ;;  %v5029_v59 = vmul.f32 %v3498_v11, %v4916_v21  ;;  %v1550_v20 = vadd.f32 %v1549_v52, %v1548_v15 }
 0x36e   : > { %6564 = vst [vmem:[#allocation23_spill] sm:$0xff] %v5025_v30  ;;  %v1418_v33 = vmul.f32 1.442695, %v1366_v45  ;;  %v5031_v41 = vpop.eup %3503  ;;  %v2119_v25 = vadd.f32 %v5025_v30, %v5021_v24  ;;  %v1434_v5 = vmul.f32 1.442695, %v1374_v12  ;;  %v1903_v18 = vpop.xlane.xlu0 %1902  ;;  %706 = vadd.xlane.f32.xlu1 %v4783_v19  ;;  %v5037_v28 = vmul.f32 %v3498_v11, %v4924_v17 }
 0x36f   : > { %6565 = vst [vmem:[#allocation24_spill] sm:$0xff] %v5031_v41  ;;  %v5039_v57 = vpop.eup %3505  ;;  %3519 = vpow2.f32 %v1386_v0  ;;  %v2054_v48 = vmul.f32 1.442695, %v2018_v1  ;;  %v2070_v13 = vmul.f32 1.442695, %v2026_v4  ;;  %v1235_v32 = vpop.xlane.xlu1 %1234  ;;  %v5044_v12 = vmul.f32 0.25, %v1903_v18 }
 0x370   : > { %6566 = vst [vmem:[#allocation26_spill] sm:$0xff] %v5039_v57  ;;  %v2086_v21 = vmul.f32 1.442695, %v2034_v44  ;;  %v5041_v22 = vpop.eup %3507  ;;  %v2120_v39 = vadd.f32 %v5031_v41, %v2119_v25  ;;  %3521 = vpow2.f32 %v1402_v37  ;;  %v2102_v45 = vmul.f32 1.442695, %v2042_v3 }
 0x371   : > { %v3510_v19 = vpop.eup %3509  ;;  %3523 = vpow2.f32 %v1418_v33  ;;  %v5046_v52 = vmul.f32 0.25, %v1879_v56  ;;  %v5048_v17 = vmul.f32 0.25, %v1211_v23  ;;  %v5050_v11 = vmul.f32 0.25, %v1235_v32  ;;  %709 = vadd.xlane.f32.xlu0 %v4802_v61 }
 0x372   : > { %v5053_v15 = vpop.eup %3511  ;;  %v2121_v1 = vadd.f32 %v5039_v57, %v2120_v39  ;;  %3525 = vpow2.f32 %v1434_v5  ;;  %v1927_v4 = vpop.xlane.xlu0 %1926  ;;  %730 = vadd.xlane.f32.xlu1 %v4787_v55  ;;  %v5057_v44 = vadd.f32 %v1551_v7, %v1550_v20  ;;  %v1476_v3 = vmul.f32 %v3510_v19, %v4946_v14 }
 0x373   : > { %v1451_v56 = vadd.f32 %v5053_v15, %v5041_v22  ;;  %3527 = vpow2.f32 %v2054_v48  ;;  %v1979_v23 = vmul.f32 0.25, %v1927_v4  ;;  %v1259_v0 = vpop.xlane.xlu1 %1258  ;;  %v5064_v61 = vmul.f32 %v4932_v38, %v4633_v60  ;;  %v6567_v38 = vld [vmem:[#allocation14_spill] sm:$0xff] }
 0x374   : > { %v5066_v37 = vpop.eup %3513  ;;  %3529 = vrcp.f32 %v2121_v1  ;;  %v2005_v55 = vmax.f32 %v5046_v52, %v5044_v12  ;;  %v5070_v7 = vmul.f32 0.25, %v1259_v0  ;;  %v1484_v14 = vmul.f32 %v3510_v19, %v4950_v58 }
 0x375   : > { %v5073_v33 = vpop.eup %3515  ;;  %v1452_v25 = vadd.f32 %v5066_v37, %v1451_v56  ;;  %3531 = vpow2.f32 %v2070_v13  ;;  %v1337_v5 = vmax.f32 %v5048_v17, %v5050_v11  ;;  %733 = vadd.xlane.f32.xlu0 %v6567_v38  ;;  %v1492_v18 = vmul.f32 %v3510_v19, %v4955_v50 }
 0x376   : > { %v5080_v20 = vpop.eup %3517  ;;  %3533 = vpow2.f32 %v2086_v21  ;;  %v2006_v48 = vmax.f32 %v2005_v55, %v1979_v23  ;;  %v1951_v32 = vpop.xlane.xlu0 %1950  ;;  %712 = vadd.xlane.f32.xlu1 %v4837_v62  ;;  %v1500_v58 = vmul.f32 %v3510_v19, %v4964_v46  ;;  %v1508_v39 = vmul.f32 %v1476_v3, %v4633_v60 }
 0x377   : > { %6568 = vst [vmem:[#allocation27_spill] sm:$0xff] %v5080_v20  ;;  %v1453_v13 = vadd.f32 %v5073_v33, %v1452_v25  ;;  %v1338_v1 = vmax.f32 %v1337_v5, %v5070_v7  ;;  %v1987_v4 = vmul.f32 0.25, %v1951_v32  ;;  %v1283_v56 = vpop.xlane.xlu1 %1282  ;;  %v1516_v0 = vmul.f32 %v1484_v14, %v4643_v31 }
 0x378   : > { %3535 = vpow2.f32 %v2102_v45  ;;  %v1319_v50 = vmul.f32 0.25, %v1283_v56  ;;  %v1524_v21 = vmul.f32 %v1492_v18, %v4649_v8  ;;  %v1553_v55 = vsel %vm1538_vm2, %v1508_v39, 0.0 }
 0x379   : > { %3537 = vrcp.f32 %v1453_v13  ;;  %v2007_v62 = vmax.f32 %v2006_v48, %v1987_v4  ;;  %715 = vadd.xlane.f32.xlu0 %v4864_v43  ;;  %v1554_v19 = vsel %vm1538_vm2, %v1516_v0, 0.0  ;;  %v1532_v45 = vmul.f32 %v1500_v58, %v4655_v36 }
 0x37a   : > { %v1339_v3 = vmax.f32 %v1338_v1, %v1319_v50  ;;  %v1214_v25 = vpop.xlane.xlu0 %1213  ;;  %736 = vadd.xlane.f32.xlu1 %v4847_v2  ;;  %v1555_v14 = vadd.f32 %v1554_v19, %v1553_v55  ;;  %v1556_v5 = vsel %vm1538_vm2, %v1524_v21, 0.0 }
 0x37b   : > { %v2019_v38 = vsub.f32 %v5046_v52, %v2007_v62  ;;  %v2027_v18 = vsub.f32 %v5044_v12, %v2007_v62  ;;  %v2035_v48 = vsub.f32 %v1979_v23, %v2007_v62  ;;  %v2043_v43 = vsub.f32 %v1987_v4, %v2007_v62  ;;  %v1882_v32 = vpop.xlane.xlu1 %1881 }
 0x37c   : > { %v5099_v39 = vpop.eup %3519  ;;  %v1351_v13 = vsub.f32 %v5048_v17, %v1339_v3  ;;  %v1359_v1 = vsub.f32 %v5050_v11, %v1339_v3  ;;  %v1367_v2 = vsub.f32 %v5070_v7, %v1339_v3  ;;  %v1375_v56 = vsub.f32 %v1319_v50, %v1339_v3  ;;  %v6569_v7 = vld [vmem:[#allocation11_spill] sm:$0xff] }
 0x37d   : > { %v5104_v58 = vpop.eup %3521  ;;  %v2056_v0 = vmul.f32 1.442695, %v2019_v38  ;;  %v2072_v21 = vmul.f32 1.442695, %v2027_v18  ;;  %v2088_v55 = vmul.f32 1.442695, %v2035_v48  ;;  %739 = vadd.xlane.f32.xlu0 %v4868_v49  ;;  %v5109_v12 = vmul.f32 %v5014_v9, %v4640_v6 }
 0x37e   : > { %v5111_v52 = vpop.eup %3523  ;;  %v1454_v17 = vadd.f32 %v5104_v58, %v5099_v39  ;;  %v2104_v11 = vmul.f32 1.442695, %v2043_v43  ;;  %v1238_v23 = vpop.xlane.xlu0 %1237  ;;  %754 = vadd.xlane.f32.xlu1 %v6569_v7  ;;  %v1557_v4 = vadd.f32 %v1556_v5, %v1555_v14  ;;  %v1558_v50 = vsel %vm1538_vm2, %v1532_v45, 0.0 }
 0x37f   : > { %v5117_v62 = vpop.eup %3525  ;;  %3539 = vpow2.f32 %v2056_v0  ;;  %v1388_v49 = vmul.f32 1.442695, %v1351_v13  ;;  %v1404_v19 = vmul.f32 1.442695, %v1359_v1  ;;  %v1420_v9 = vmul.f32 1.442695, %v1367_v2  ;;  %v1906_v3 = vpop.xlane.xlu1 %1905 }
 0x380   : > { %v5119_v38 = vpop.eup %3527  ;;  %v1455_v18 = vadd.f32 %v5111_v52, %v1454_v17  ;;  %3541 = vpow2.f32 %v2072_v21  ;;  %v1436_v48 = vmul.f32 1.442695, %v1375_v56  ;;  %v5122_v43 = vmul.f32 0.25, %v1238_v23  ;;  %v6571_v13 = vld [vmem:[#allocation15_spill] sm:$0xff] }
 0x381   : > { %v5124_v7 = vpop.eup %3529  ;;  %3543 = vpow2.f32 %v2088_v55  ;;  %v5126_v45 = vmul.f32 0.25, %v1214_v25  ;;  %v5128_v14 = vmul.f32 0.25, %v1882_v32  ;;  %v5130_v5 = vmul.f32 0.25, %v1906_v3  ;;  %757 = vadd.xlane.f32.xlu0 %v6571_v13 }
 0x382   : > { %6570 = vst [vmem:[#allocation29_spill] sm:$0xff] %v5124_v7  ;;  %v5133_v1 = vpop.eup %3531  ;;  %v1456_v2 = vadd.f32 %v5117_v62, %v1455_v18  ;;  %3545 = vpow2.f32 %v2104_v11  ;;  %v1262_v0 = vpop.xlane.xlu0 %1261  ;;  %760 = vadd.xlane.f32.xlu1 %v4851_v27  ;;  %v5137_v56 = vadd.f32 %v1558_v50, %v1557_v4  ;;  %v2182_v25 = vmul.f32 %v4935_v35, %v4643_v31 }
 0x383   : > { %v5141_v21 = vpop.eup %3533  ;;  %v2122_v32 = vadd.f32 %v5133_v1, %v5119_v38  ;;  %3547 = vpow2.f32 %v1388_v49  ;;  %v1340_v55 = vmax.f32 %v5126_v45, %v5122_v43  ;;  %v1312_v17 = vmul.f32 0.25, %v1262_v0  ;;  %v1930_v23 = vpop.xlane.xlu1 %1929  ;;  %v6572_v49 = vld [vmem:[#allocation17_spill] sm:$0xff] }
 0x384   : > { %3549 = vrcp.f32 %v1456_v2  ;;  %v2008_v27 = vmax.f32 %v5128_v14, %v5130_v5  ;;  %v1980_v11 = vmul.f32 0.25, %v1930_v23  ;;  %v5151_v4 = vmul.f32 %v5017_v10, %v6557_v34  ;;  %v6573_v23 = vld [vmem:[#allocation16_spill] sm:$0xff] }
 0x385   : > { %v5153_v35 = vpop.eup %3535  ;;  %v2123_v50 = vadd.f32 %v5141_v21, %v2122_v32  ;;  %3551 = vpow2.f32 %v1404_v19  ;;  %763 = vadd.xlane.f32.xlu0 %v6572_v49  ;;  %v5159_v3 = vmul.f32 %v4938_v16, %v4649_v8  ;;  %v5163_v18 = vmul.f32 %v5029_v59, %v6559_v47 }
 0x386   : > { %v3538_v13 = vpop.eup %3537  ;;  %3553 = vpow2.f32 %v1420_v9  ;;  %v1341_v2 = vmax.f32 %v1340_v55, %v1312_v17  ;;  %v2009_v10 = vmax.f32 %v2008_v27, %v1980_v11  ;;  %v1286_v0 = vpop.xlane.xlu0 %1285  ;;  %778 = vadd.xlane.f32.xlu1 %v6573_v23  ;;  %v5168_v19 = vmul.f32 %v4942_v26, %v4655_v36  ;;  %v6574_v23 = vld [vmem:[#allocation18_spill] sm:$0xff] }
 0x387   : > { %v2124_v32 = vadd.f32 %v5153_v35, %v2123_v50  ;;  %v1320_v49 = vmul.f32 0.25, %v1286_v0  ;;  %v1954_v16 = vpop.xlane.xlu1 %1953  ;;  %v1477_v46 = vmul.f32 %v3538_v13, %v5041_v22  ;;  %v5174_v59 = vmul.f32 %v5037_v28, %v6560_v54 }
 0x388   : > { %3555 = vpow2.f32 %v1436_v48  ;;  %v5176_v9 = vmul.f32 0.25, %v1954_v16  ;;  %v1485_v55 = vmul.f32 %v3538_v13, %v5053_v15  ;;  %v1493_v27 = vmul.f32 %v3538_v13, %v5066_v37  ;;  %v6575_v48 = vld [vmem:[#allocation20_spill] sm:$0xff] }
 0x389   : > { %3557 = vrcp.f32 %v2124_v32  ;;  %v1342_v26 = vmax.f32 %v1341_v2, %v1320_v49  ;;  %781 = vadd.xlane.f32.xlu0 %v6574_v23  ;;  %v1501_v50 = vmul.f32 %v3538_v13, %v5073_v33  ;;  %v2207_v22 = vsel %vm2206_vm3, %v5064_v61, 0.0 }
 0x38a   : > { %v5185_v0 = vmax.f32 %v2009_v10, %v5176_v9  ;;  %v1885_v28 = vpop.xlane.xlu0 %1884  ;;  %784 = vadd.xlane.f32.xlu1 %v6575_v48  ;;  %v1509_v16 = vmul.f32 %v1477_v46, %v4640_v6  ;;  %v1517_v15 = vmul.f32 %v1485_v55, %v6557_v34  ;;  %v2208_v37 = vsel %vm2206_vm3, %v2182_v25, 0.0 }
 0x38b   : > { %v1352_v2 = vsub.f32 %v5126_v45, %v1342_v26  ;;  %v1360_v32 = vsub.f32 %v5122_v43, %v1342_v26  ;;  %v1368_v33 = vsub.f32 %v1312_v17, %v1342_v26  ;;  %v1376_v13 = vsub.f32 %v1320_v49, %v1342_v26  ;;  %v1217_v23 = vpop.xlane.xlu1 %1216 }
 0x38c   : > { %v5193_v61 = vpop.eup %3539  ;;  %v2020_v10 = vsub.f32 %v5128_v14, %v5185_v0  ;;  %v2028_v48 = vsub.f32 %v5130_v5, %v5185_v0  ;;  %v2036_v46 = vsub.f32 %v1980_v11, %v5185_v0  ;;  %v1525_v55 = vmul.f32 %v1493_v27, %v6559_v47 }
 0x38d   : > { %v5201_v25 = vpop.eup %3541  ;;  %v1390_v45 = vmul.f32 1.442695, %v1352_v2  ;;  %v1406_v57 = vmul.f32 1.442695, %v1360_v32  ;;  %v1422_v43 = vmul.f32 1.442695, %v1368_v33  ;;  %787 = vadd.xlane.f32.xlu0 %v4962_v53  ;;  %v2209_v17 = vadd.f32 %v2208_v37, %v2207_v22 }
 0x38e   : > { %v5204_v49 = vpop.eup %3543  ;;  %v2125_v14 = vadd.f32 %v5201_v25, %v5193_v61  ;;  %v1438_v26 = vmul.f32 1.442695, %v1376_v13  ;;  %v2044_v5 = vsub.f32 %v5176_v9, %v5185_v0  ;;  %v1909_v11 = vpop.xlane.xlu0 %1908  ;;  %v1533_v27 = vmul.f32 %v1501_v50, %v6560_v54 }
 0x38f   : > { %v5211_v63 = vpop.eup %3545  ;;  %3559 = vpow2.f32 %v1390_v45  ;;  %v2058_v2 = vmul.f32 1.442695, %v2020_v10  ;;  %v2074_v32 = vmul.f32 1.442695, %v2028_v48  ;;  %v2090_v33 = vmul.f32 1.442695, %v2036_v46  ;;  %v1241_v53 = vpop.xlane.xlu1 %1240 }
 0x390   : > { %v5213_v22 = vpop.eup %3547  ;;  %v2126_v37 = vadd.f32 %v5204_v49, %v2125_v14  ;;  %3561 = vpow2.f32 %v1406_v57  ;;  %v5216_v41 = vmul.f32 0.25, %v1885_v28  ;;  %v5218_v13 = vmul.f32 0.25, %v1909_v11 }
 0x391   : > { %v5220_v9 = vpop.eup %3549  ;;  %3563 = vpow2.f32 %v1422_v43  ;;  %v5222_v50 = vmul.f32 0.25, %v1241_v53  ;;  %v1560_v0 = vsel %vm1538_vm2, %v1509_v16, 0.0  ;;  %v1561_v10 = vsel %vm1538_vm2, %v1517_v15, 0.0 }
 0x392   : > { %v5226_v48 = vpop.eup %3551  ;;  %v2127_v46 = vadd.f32 %v5211_v63, %v2126_v37  ;;  %3565 = vpow2.f32 %v1438_v26  ;;  %v5229_v45 = vmul.f32 0.25, %v1217_v23  ;;  %v1933_v57 = vpop.xlane.xlu0 %1932  ;;  %v1562_v28 = vadd.f32 %v1561_v10, %v1560_v0 }
 0x393   : > { %v5231_v14 = vpop.eup %3553  ;;  %v1457_v43 = vadd.f32 %v5226_v48, %v5213_v22  ;;  %3567 = vpow2.f32 %v2058_v2  ;;  %v2011_v16 = vmax.f32 %v5216_v41, %v5218_v13  ;;  %v1981_v11 = vmul.f32 0.25, %v1933_v57  ;;  %v1265_v15 = vpop.xlane.xlu1 %1264 }
 0x394   : > { %3569 = vrcp.f32 %v2127_v46  ;;  %v1343_v53 = vmax.f32 %v5229_v45, %v5222_v50  ;;  %v1313_v26 = vmul.f32 0.25, %v1265_v15  ;;  %v1563_v23 = vsel %vm1538_vm2, %v1525_v55, 0.0 }
 0x395   : > { %v5240_v37 = vpop.eup %3555  ;;  %v1458_v0 = vadd.f32 %v5231_v14, %v1457_v43  ;;  %3571 = vpow2.f32 %v2074_v32  ;;  %v2106_v10 = vmul.f32 1.442695, %v2044_v5  ;;  %v1564_v30 = vadd.f32 %v1563_v23, %v1562_v28 }
 0x396   : > { %v5243_v2 = vpop.eup %3557  ;;  %3573 = vpow2.f32 %v2090_v33  ;;  %v2012_v29 = vmax.f32 %v2011_v16, %v1981_v11  ;;  %v1344_v57 = vmax.f32 %v1343_v53, %v1313_v26  ;;  %v1957_v7 = vpop.xlane.xlu0 %1956  ;;  %v1565_v46 = vsel %vm1538_vm2, %v1533_v27, 0.0 }
 0x397   : > { %v1459_v24 = vadd.f32 %v5240_v37, %v1458_v0  ;;  %v1989_v15 = vmul.f32 0.25, %v1957_v7  ;;  %v1289_v20 = vpop.xlane.xlu1 %1288  ;;  %v2210_v55 = vsel %vm2206_vm3, %v5159_v3, 0.0  ;;  %v2212_v32 = vsel %vm2206_vm3, %v5168_v19, 0.0 }
 0x398   : > { %v1321_v5 = vmul.f32 0.25, %v1289_v20  ;;  %v2211_v28 = vadd.f32 %v2210_v55, %v2209_v17  ;;  %v2214_v33 = vsel %vm2206_vm3, %v5109_v12, 0.0  ;;  %v2215_v43 = vsel %vm2206_vm3, %v5151_v4, 0.0 }
 0x399   : > { %3575 = vpow2.f32 %v2106_v10  ;;  %v2013_v27 = vmax.f32 %v2012_v29, %v1989_v15  ;;  %v1566_v16 = vadd.f32 %v1565_v46, %v1564_v30  ;;  %v2216_v53 = vadd.f32 %v2215_v43, %v2214_v33 }
 0x39a   : > { %3577 = vrcp.f32 %v1459_v24  ;;  %v1345_v7 = vmax.f32 %v1344_v57, %v1321_v5  ;;  %v2466_v23 = vpop.xlane.xlu0 %2465  ;;  %v5255_v0 = vadd.f32 %v2212_v32, %v2211_v28  ;;  %v2217_v3 = vsel %vm2206_vm3, %v5163_v18, 0.0 }
 0x39b   : > { %v2021_v20 = vsub.f32 %v5216_v41, %v2013_v27  ;;  %v2029_v19 = vsub.f32 %v5218_v13, %v2013_v27  ;;  %v2037_v12 = vsub.f32 %v1981_v11, %v2013_v27  ;;  %v2045_v17 = vsub.f32 %v1989_v15, %v2013_v27  ;;  %v2475_v24 = vpop.xlane.xlu1 %2474 }
 0x39c   : > { %v6576_v29 = vpack.c.bf16 %v5057_v44, %v4953_v42  ;;  %v5265_v30 = vpop.eup %3559  ;;  %v1353_v4 = vsub.f32 %v5229_v45, %v1345_v7  ;;  %v1361_v10 = vsub.f32 %v5222_v50, %v1345_v7  ;;  %v1369_v18 = vsub.f32 %v1313_v26, %v1345_v7 }
 0x39d   : > { %v1377_v57 = vsub.f32 %v1321_v5, %v1345_v7  ;;  %v5269_v41 = vpop.eup %3561  ;;  %v2060_v13 = vmul.f32 1.442695, %v2021_v20  ;;  %v2076_v11 = vmul.f32 1.442695, %v2029_v19  ;;  %v2092_v46 = vmul.f32 1.442695, %v2037_v12 }
 0x39e   : > { %1604 = vrot.lane.b32.xlu1 %v6576_v29, %s3848_s19  ;;  %v2218_v15 = vadd.f32 %v2217_v3, %v2216_v53  ;;  %v5271_v55 = vpop.eup %3563  ;;  %v1460_v42 = vadd.f32 %v5269_v41, %v5265_v30  ;;  %v2108_v44 = vmul.f32 1.442695, %v2045_v17  ;;  %v2478_v32 = vpop.xlane.xlu0 %2477  ;;  %v1596_v28 = vpack.c.bf16 %v1566_v16, %v5137_v56 }
 0x39f   : > { %v2219_v50 = vsel %vm2206_vm3, %v5174_v59, 0.0  ;;  %v5278_v45 = vpop.eup %3565  ;;  %3579 = vpow2.f32 %v2060_v13  ;;  %v1392_v26 = vmul.f32 1.442695, %v1353_v4  ;;  %v1408_v5 = vmul.f32 1.442695, %v1361_v10  ;;  %v2487_v43 = vpop.xlane.xlu1 %2486 }
 0x3a0   : > { %v1424_v33 = vmul.f32 1.442695, %v1369_v18  ;;  %v5280_v27 = vpop.eup %3567  ;;  %v1461_v53 = vadd.f32 %v5271_v55, %v1460_v42  ;;  %3581 = vpow2.f32 %v2076_v11  ;;  %v1440_v7 = vmul.f32 1.442695, %v1377_v57 }
 0x3a1   : > { %v5283_v3 = vmul.f32 0.25, %v2466_v23  ;;  %v3570_v20 = vpop.eup %3569  ;;  %3583 = vpow2.f32 %v2092_v46  ;;  %v5285_v56 = vmul.f32 0.25, %v2475_v24  ;;  %v5287_v59 = vmul.f32 0.25, %v2487_v43 }
 0x3a2   : > { %v2220_v16 = vadd.f32 %v2219_v50, %v2218_v15  ;;  %v5289_v19 = vpop.eup %3571  ;;  %v1462_v12 = vadd.f32 %v5278_v45, %v1461_v53  ;;  %3585 = vpow2.f32 %v2108_v44  ;;  %v5292_v17 = vmul.f32 0.25, %v2478_v32  ;;  %v2490_v29 = vpop.xlane.xlu0 %2489 }
 0x3a3   : > { %6577 = vst [vmem:[#allocation28_spill] sm:$0xff] %v5289_v19  ;;  %v2146_v4 = vmul.f32 %v5243_v2, %v5119_v38  ;;  %v5296_v23 = vpop.eup %3573  ;;  %v2128_v24 = vadd.f32 %v5289_v19, %v5280_v27  ;;  %3587 = vpow2.f32 %v1392_v26  ;;  %v2589_v10 = vmax.f32 %v4996_v40, %v5287_v59  ;;  %1606 = vrot.lane.b32.xlu0 %v1596_v28, %s3848_s19  ;;  %v2499_v18 = vpop.xlane.xlu1 %2498 }
 0x3a4   : > { %6578 = vst [vmem:[#allocation30_spill] sm:$0xff] %v5296_v23  ;;  %v2147_v57 = vmul.f32 %v3570_v20, %v5193_v61  ;;  %v5304_v13 = vmul.f32 0.25, %v2490_v29  ;;  %v5306_v11 = vmul.f32 0.25, %v2499_v18  ;;  %v2263_v38 = vpack.c.bf16 %v2220_v16, %v5255_v0 }
 0x3a5   : > { %v2154_v46 = vmul.f32 %v5243_v2, %v5133_v1  ;;  %v2129_v15 = vadd.f32 %v5296_v23, %v2128_v24  ;;  %3589 = vpow2.f32 %v1408_v5  ;;  %v2155_v42 = vmul.f32 %v3570_v20, %v5201_v25  ;;  %v6593_v23 = vld [vmem:[#allocation24_spill] sm:$0xff] }
 0x3a6   : > { %v2162_v44 = vmul.f32 %v5243_v2, %v5141_v21  ;;  %v5315_v32 = vpop.eup %3575  ;;  %3591 = vrcp.f32 %v1462_v12  ;;  %v2502_v28 = vpop.xlane.xlu0 %2501  ;;  %v2163_v0 = vmul.f32 %v3570_v20, %v5204_v49  ;;  %v2170_v1 = vmul.f32 %v5243_v2, %v5153_v35 }
 0x3a7   : > { %6579 = vst [vmem:[#allocation31_spill] sm:$0xff] %v5315_v32  ;;  %v3578_v50 = vpop.eup %3577  ;;  %v2130_v26 = vadd.f32 %v5315_v32, %v2129_v15  ;;  %3593 = vpow2.f32 %v1424_v33  ;;  %v5323_v25 = vmul.f32 0.25, %v2502_v28  ;;  %2272 = vrot.lane.b32.xlu0 %v2263_v38, %s3849_s20  ;;  %v2469_v21 = vpop.xlane.xlu1 %2468  ;;  %v2171_v5 = vmul.f32 %v3570_v20, %v5211_v63 }
 0x3a8   : > { %v2178_v49 = vmul.f32 %v2146_v4, %v4633_v60  ;;  %v2179_v53 = vmul.f32 %v2147_v57, %v4640_v6  ;;  %v2186_v35 = vmul.f32 %v2154_v46, %v4643_v31  ;;  %3595 = vpow2.f32 %v1440_v7 }
 0x3a9   : > { %v5332_v2 = vmul.f32 0.25, %v2469_v21  ;;  %v2187_v33 = vmul.f32 %v2155_v42, %v6557_v34  ;;  %v2194_v16 = vmul.f32 %v2162_v44, %v4649_v8  ;;  %3597 = vrcp.f32 %v2130_v26 }
 0x3aa   : > { %v2472_v12 = vpop.xlane.xlu0 %2471  ;;  %v2195_v63 = vmul.f32 %v2163_v0, %v6559_v47  ;;  %v2202_v20 = vmul.f32 %v2170_v1, %v4655_v36  ;;  %v2235_v29 = vsel %vm2206_vm3, %v2178_v49, 0.0  ;;  %v2203_v7 = vmul.f32 %v2171_v5, %v6560_v54 }
 0x3ab   : > { %v2481_v24 = vpop.xlane.xlu1 %2480  ;;  %v2236_v18 = vsel %vm2206_vm3, %v2186_v35, 0.0  ;;  %v2242_v57 = vsel %vm2206_vm3, %v2179_v53, 0.0  ;;  %v5346_v46 = vmul.f32 0.25, %v2472_v12  ;;  %v2238_v42 = vsel %vm2206_vm3, %v2194_v16, 0.0 }
 0x3ac   : > { %v5344_v38 = vpop.eup %3579  ;;  %v2237_v15 = vadd.f32 %v2236_v18, %v2235_v29  ;;  %v2243_v44 = vsel %vm2206_vm3, %v2187_v33, 0.0  ;;  %v2240_v0 = vsel %vm2206_vm3, %v2202_v20, 0.0  ;;  %v2245_v26 = vsel %vm2206_vm3, %v2195_v63, 0.0 }
 0x3ad   : > { %6580 = vst [vmem:[#allocation32_spill] sm:$0xff] %v5344_v38  ;;  %v5350_v28 = vpop.eup %3581  ;;  %v2244_v1 = vadd.f32 %v2243_v44, %v2242_v57  ;;  %v1478_v21 = vmul.f32 %v5220_v9, %v5099_v39  ;;  %v1479_v16 = vmul.f32 %v3578_v50, %v5213_v22  ;;  %v1486_v33 = vmul.f32 %v5220_v9, %v5104_v58 }
 0x3ae   : > { %6581 = vst [vmem:[#allocation33_spill] sm:$0xff] %v5350_v28  ;;  %v5356_v5 = vpop.eup %3583  ;;  %v2131_v49 = vadd.f32 %v5350_v28, %v5344_v38  ;;  %v2484_v53 = vpop.xlane.xlu0 %2483  ;;  %v2239_v35 = vadd.f32 %v2238_v42, %v2237_v15  ;;  %v2247_v63 = vsel %vm2206_vm3, %v2203_v7, 0.0  ;;  %v1487_v29 = vmul.f32 %v3578_v50, %v5226_v48 }
 0x3af   : > { %6582 = vst [vmem:[#allocation34_spill] sm:$0xff] %v5356_v5  ;;  %v5363_v12 = vpop.eup %3585  ;;  %v2246_v20 = vadd.f32 %v2245_v26, %v2244_v1  ;;  %v1494_v39 = vmul.f32 %v5220_v9, %v5111_v52  ;;  %v2493_v18 = vpop.xlane.xlu1 %2492  ;;  %v1495_v22 = vmul.f32 %v3578_v50, %v5231_v14  ;;  %v1502_v58 = vmul.f32 %v5220_v9, %v5117_v62 }
 0x3b0   : > { %6583 = vst [vmem:[#allocation35_spill] sm:$0xff] %v5363_v12  ;;  %v5369_v57 = vpop.eup %3587  ;;  %v2132_v15 = vadd.f32 %v5356_v5, %v2131_v49  ;;  %v2241_v42 = vadd.f32 %v2240_v0, %v2239_v35  ;;  %v1503_v1 = vmul.f32 %v3578_v50, %v5240_v37  ;;  %v1510_v7 = vmul.f32 %v1478_v21, %v4633_v60 }
 0x3b1   : > { %v2248_v44 = vadd.f32 %v2247_v63, %v2246_v20  ;;  %v1511_v48 = vmul.f32 %v1479_v16, %v4640_v6  ;;  %v1518_v4 = vmul.f32 %v1486_v33, %v4643_v31  ;;  %v1519_v0 = vmul.f32 %v1487_v29, %v6557_v34 }
 0x3b2   : > { %v5378_v26 = vpop.eup %3589  ;;  %v2133_v52 = vadd.f32 %v5363_v12, %v2132_v15  ;;  %v1526_v14 = vmul.f32 %v1494_v39, %v4649_v8  ;;  %v2496_v49 = vpop.xlane.xlu0 %2495  ;;  %v5386_v9 = vmul.f32 0.25, %v2481_v24  ;;  %v1534_v50 = vmul.f32 %v1502_v58, %v4655_v36 }
 0x3b3   : > { %v3592_v35 = vpop.eup %3591  ;;  %v1463_v62 = vadd.f32 %v5378_v26, %v5369_v57  ;;  %v2265_v37 = vpack.c.bf16 %v2248_v44, %v2241_v42  ;;  %v2505_v21 = vpop.xlane.xlu1 %2504  ;;  %v1527_v20 = vmul.f32 %v1495_v22, %v6559_v47  ;;  %v1535_v33 = vmul.f32 %v1503_v1, %v6560_v54 }
 0x3b4   : > { %v5389_v16 = vpop.eup %3593  ;;  %v1567_v63 = vsel %vm1538_vm2, %v1510_v7, 0.0  ;;  %v1568_v29 = vsel %vm1538_vm2, %v1518_v4, 0.0  ;;  %3599 = vrcp.f32 %v2133_v52  ;;  %v5396_v15 = vmul.f32 0.25, %v2484_v53 }
 0x3b5   : > { %v1464_v39 = vadd.f32 %v5389_v16, %v1463_v62  ;;  %2276 = vrot.lane.b32.xlu0 %v2265_v37, %s3849_s20  ;;  %v1569_v24 = vadd.f32 %v1568_v29, %v1567_v63  ;;  %v5399_v42 = vpop.eup %3595  ;;  %v1570_v58 = vsel %vm1538_vm2, %v1526_v14, 0.0  ;;  %v1572_v22 = vsel %vm1538_vm2, %v1534_v50, 0.0 }
 0x3b6   : > { %v1574_v44 = vsel %vm1538_vm2, %v1511_v48, 0.0  ;;  %v1575_v1 = vsel %vm1538_vm2, %v1519_v0, 0.0  ;;  %v2508_v7 = vpop.xlane.xlu0 %2507  ;;  %v5405_v4 = vpop.eup %3597  ;;  %v5408_v61 = vmul.f32 0.25, %v2493_v18  ;;  %v1577_v63 = vsel %vm1538_vm2, %v1527_v20, 0.0 }
 0x3b7   : > { %v1465_v52 = vadd.f32 %v5399_v42, %v1464_v39  ;;  %v1571_v53 = vadd.f32 %v1570_v58, %v1569_v24  ;;  %v1576_v62 = vadd.f32 %v1575_v1, %v1574_v44  ;;  %v2511_v37 = vpop.xlane.xlu1 %2510  ;;  %v1579_v14 = vsel %vm1538_vm2, %v1535_v33, 0.0 }
 0x3b8   : > { %v5412_v29 = vmul.f32 0.25, %v2496_v49  ;;  %v5414_v50 = vmul.f32 0.25, %v2505_v21  ;;  %v2595_v0 = vmax.f32 %v5332_v2, %v5408_v61  ;;  %v5418_v43 = vmul.f32 0.25, %v2508_v7 }
 0x3b9   : > { %3601 = vrcp.f32 %v1465_v52  ;;  %v1578_v48 = vadd.f32 %v1577_v63, %v1576_v62  ;;  %v1573_v39 = vadd.f32 %v1572_v22, %v1571_v53  ;;  %v5424_v24 = vmul.f32 0.25, %v2511_v37  ;;  %v6585_v53 = vld [vmem:[#allocation27_spill] sm:$0xff] }
 0x3ba   : > { %6584 = vst [vmem:[#allocation36_spill] sm:$0xff] %v5418_v43  ;;  %v2598_v18 = vmax.f32 %v5346_v46, %v5412_v29  ;;  %v2607_v20 = vmax.f32 %v5386_v9, %v5414_v50  ;;  %v2514_v49 = vpop.xlane.xlu0 %2513  ;;  %v1480_v44 = vmul.f32 %v3592_v35, %v5265_v30  ;;  %v1488_v1 = vmul.f32 %v3592_v35, %v5269_v41 }
 0x3bb   : > { %v1580_v33 = vadd.f32 %v1579_v14, %v1578_v48  ;;  %v5426_v21 = vmul.f32 0.25, %v2514_v49  ;;  %v2523_v58 = vpop.xlane.xlu1 %2522  ;;  %v1496_v22 = vmul.f32 %v3592_v35, %v5271_v55  ;;  %v1504_v52 = vmul.f32 %v3592_v35, %v5278_v45  ;;  %v6586_v35 = vld [vmem:[#allocation22_spill] sm:$0xff] }
 0x3bc   : > { %v5430_v7 = vmul.f32 0.25, %v2523_v58  ;;  %v2144_v62 = vmul.f32 %v6585_v53, %v4971_v51  ;;  %v2610_v63 = vmax.f32 %v5396_v15, %v5418_v43  ;;  %v1512_v14 = vmul.f32 %v1480_v44, %v4633_v60  ;;  %v6587_v51 = vld [vmem:[#allocation29_spill] sm:$0xff] }
 0x3bd   : > { %v1597_v37 = vpack.c.bf16 %v1580_v33, %v1573_v39  ;;  %v1520_v48 = vmul.f32 %v1488_v1, %v4643_v31  ;;  %v2590_v30 = vmax.f32 %v2589_v10, %v5424_v24  ;;  %v1528_v55 = vmul.f32 %v1496_v22, %v4649_v8  ;;  %v6588_v1 = vld [vmem:[#allocation21_spill] sm:$0xff] }
 0x3be   : > { %v2526_v41 = vpop.xlane.xlu0 %2525  ;;  %v1536_v45 = vmul.f32 %v1504_v52, %v4655_v36  ;;  %v2145_v39 = vmul.f32 %v6587_v51, %v6586_v35  ;;  %v1581_v58 = vsel %vm1538_vm2, %v1512_v14, 0.0  ;;  %v2152_v10 = vmul.f32 %v6585_v53, %v6588_v1  ;;  %v6592_v1 = vld [vmem:[#allocation19_spill] sm:$0xff] }
 0x3bf   : > { %1608 = vrot.lane.b32.xlu1 %v1597_v37, %s3848_s19  ;;  %v5449_v49 = vmul.f32 0.25, %v2526_v41  ;;  %v2517_v33 = vpop.xlane.xlu1 %2516  ;;  %v1582_v44 = vsel %vm1538_vm2, %v1520_v48, 0.0  ;;  %v6589_v22 = vmax.f32 %v5283_v3, %v5304_v13  ;;  %v6590_v35 = vmax.f32 %v5285_v56, %v5306_v11  ;;  %v6591_v48 = vld [vmem:[#allocation23_spill] sm:$0xff] }
 0x3c0   : > { %v5465_v41 = vmul.f32 0.25, %v2517_v33  ;;  %v1583_v12 = vadd.f32 %v1582_v44, %v1581_v58  ;;  %v1584_v14 = vsel %vm1538_vm2, %v1528_v55, 0.0  ;;  %v2153_v32 = vmul.f32 %v6587_v51, %v6591_v48  ;;  %v6595_v33 = vld [vmem:[#allocation25_spill] sm:$0xff]  ;;  %v6596_v44 = vld [vmem:[#allocation26_spill] sm:$0xff] }
 0x3c1   : > { %v2593_v52 = vmax.f32 %v6589_v22, %v5426_v21  ;;  %v5463_v37 = vmax.f32 %v6590_v35, %v5430_v7  ;;  %v2160_v5 = vmul.f32 %v6585_v53, %v6592_v1  ;;  %v2161_v22 = vmul.f32 %v6587_v51, %v6593_v23  ;;  %v5474_v28 = vpop.eup %3599 }
 0x3c2   : > { %6594 = vst [vmem:[#allocation37_spill] sm:$0xff] %v5474_v28  ;;  %v2520_v19 = vpop.xlane.xlu0 %2519  ;;  %v1585_v43 = vadd.f32 %v1584_v14, %v1583_v12  ;;  %v1586_v35 = vsel %vm1538_vm2, %v1536_v45, 0.0  ;;  %v2168_v58 = vmul.f32 %v6585_v53, %v6595_v33  ;;  %v2169_v55 = vmul.f32 %v6587_v51, %v6596_v44 }
 0x3c3   : > { %v6597_v48 = vmax.f32 %v5292_v17, %v5323_v25  ;;  %v5487_v38 = vmul.f32 0.25, %v2520_v19  ;;  %v2529_v23 = vpop.xlane.xlu1 %2528  ;;  %v2176_v28 = vmul.f32 %v2144_v62, %v4633_v60  ;;  %v2184_v12 = vmul.f32 %v2152_v10, %v4643_v31 }
 0x3c4   : > { %v5492_v45 = vmax.f32 %v2595_v0, %v5465_v41  ;;  %v5494_v53 = vmul.f32 0.25, %v2529_v23  ;;  %v5496_v14 = vadd.f32 %v1586_v35, %v1585_v43  ;;  %v5499_v51 = vmul.f32 %v2145_v39, %v4640_v6 }
 0x3c5   : > { %v5485_v1 = vmax.f32 %v6597_v48, %v5449_v49  ;;  %v5502_v33 = vmax.f32 %v2598_v18, %v5487_v38  ;;  %v5505_v19 = vmul.f32 %v2153_v32, %v6557_v34  ;;  %v2192_v62 = vmul.f32 %v2160_v5, %v4649_v8 }
 0x3c6   : > { %v5509_v10 = vmul.f32 %v2161_v22, %v6559_v47  ;;  %v3602_v0 = vpop.eup %3601  ;;  %v5512_v44 = vmax.f32 %v2607_v20, %v5494_v53  ;;  %v2532_v43 = vpop.xlane.xlu0 %2531  ;;  %v2200_v35 = vmul.f32 %v2168_v58, %v4655_v36  ;;  %v2221_v39 = vsel %vm2206_vm3, %v2176_v28, 0.0 }
 0x3c7   : > { %v2222_v18 = vsel %vm2206_vm3, %v2184_v12, 0.0  ;;  %v5517_v48 = vmul.f32 0.25, %v2532_v43  ;;  %v2535_v32 = vpop.xlane.xlu1 %2534  ;;  %v1481_v23 = vmul.f32 %v3602_v0, %v5369_v57  ;;  %v1489_v5 = vmul.f32 %v3602_v0, %v5378_v26 }
 0x3c8   : > { %v1497_v22 = vmul.f32 %v3602_v0, %v5389_v16  ;;  %v2581_v8 = vmul.f32 0.25, %v2535_v32  ;;  %v1505_v20 = vmul.f32 %v3602_v0, %v5399_v42  ;;  %v5524_v31 = vmul.f32 %v2169_v55, %v6560_v54 }
 0x3c9   : > { %v2223_v58 = vadd.f32 %v2222_v18, %v2221_v39  ;;  %v1513_v28 = vmul.f32 %v1481_v23, %v4640_v6  ;;  %v1521_v12 = vmul.f32 %v1489_v5, %v6557_v34  ;;  %v2224_v36 = vsel %vm2206_vm3, %v2192_v62, 0.0 }
 0x3ca   : > { %v1529_v43 = vmul.f32 %v1497_v22, %v6559_v47  ;;  %v5531_v57 = vmax.f32 %v2610_v63, %v5517_v48  ;;  %v2591_v26 = vmax.f32 %v2590_v30, %v2581_v8  ;;  %v2538_v16 = vpop.xlane.xlu0 %2537  ;;  %v2226_v42 = vsel %vm2206_vm3, %v2200_v35, 0.0 }
 0x3cb   : > { %v2225_v32 = vadd.f32 %v2224_v36, %v2223_v58  ;;  %v2582_v0 = vmul.f32 0.25, %v2538_v16  ;;  %v2547_v55 = vpop.xlane.xlu1 %2546  ;;  %v1537_v39 = vmul.f32 %v1505_v20, %v6560_v54  ;;  %v1588_v18 = vsel %vm1538_vm2, %v1513_v28, 0.0 }
 0x3cc   : > { %v1589_v23 = vsel %vm1538_vm2, %v1521_v12, 0.0  ;;  %v2613_v5 = vsub.f32 %v4996_v40, %v2591_v26  ;;  %v2621_v62 = vsub.f32 %v5287_v59, %v2591_v26  ;;  %v2629_v63 = vsub.f32 %v5424_v24, %v2591_v26 }
 0x3cd   : > { %v2637_v22 = vsub.f32 %v2581_v8, %v2591_v26  ;;  %v2594_v30 = vmax.f32 %v2593_v52, %v2582_v0  ;;  %v2585_v47 = vmul.f32 0.25, %v2547_v55  ;;  %v1590_v36 = vadd.f32 %v1589_v23, %v1588_v18 }
 0x3ce   : > { %v1591_v35 = vsel %vm1538_vm2, %v1529_v43, 0.0  ;;  %v2645_v58 = vmul.f32 1.442695, %v2613_v5  ;;  %v2661_v16 = vmul.f32 1.442695, %v2621_v62  ;;  %v2550_v20 = vpop.xlane.xlu0 %2549  ;;  %v5541_v54 = vadd.f32 %v2226_v42, %v2225_v32 }
 0x3cf   : > { %v2677_v34 = vmul.f32 1.442695, %v2629_v63  ;;  %v2693_v28 = vmul.f32 1.442695, %v2637_v22  ;;  %v2614_v12 = vsub.f32 %v5283_v3, %v2594_v30  ;;  %v2622_v40 = vsub.f32 %v5304_v13, %v2594_v30  ;;  %v2541_v24 = vpop.xlane.xlu1 %2540 }
 0x3d0   : > { %v2630_v59 = vsub.f32 %v5426_v21, %v2594_v30  ;;  %3603 = vpow2.f32 %v2645_v58  ;;  %v2638_v8 = vsub.f32 %v2582_v0, %v2594_v30  ;;  %v2603_v52 = vmax.f32 %v5463_v37, %v2585_v47 }
 0x3d1   : > { %v2586_v26 = vmul.f32 0.25, %v2550_v20  ;;  %3605 = vpow2.f32 %v2661_v16  ;;  %v2647_v43 = vmul.f32 1.442695, %v2614_v12  ;;  %v2663_v55 = vmul.f32 1.442695, %v2622_v40 }
 0x3d2   : > { %v2679_v18 = vmul.f32 1.442695, %v2630_v59  ;;  %3607 = vpow2.f32 %v2677_v34  ;;  %v2695_v32 = vmul.f32 1.442695, %v2638_v8  ;;  %v2617_v42 = vsub.f32 %v5285_v56, %v2603_v52  ;;  %v2544_v23 = vpop.xlane.xlu0 %2543 }
 0x3d3   : > { %v2625_v3 = vsub.f32 %v5306_v11, %v2603_v52  ;;  %3609 = vpow2.f32 %v2693_v28  ;;  %v2633_v13 = vsub.f32 %v5430_v7, %v2603_v52  ;;  %v2641_v21 = vsub.f32 %v2585_v47, %v2603_v52  ;;  %v5551_v5 = vpop.xlane.xlu1 %2552 }
 0x3d4   : > { %v2606_v0 = vmax.f32 %v5485_v1, %v2586_v26  ;;  %3611 = vpow2.f32 %v2647_v43  ;;  %v2653_v37 = vmul.f32 1.442695, %v2617_v42  ;;  %v1592_v62 = vadd.f32 %v1591_v35, %v1590_v36 }
 0x3d5   : > { %v1593_v63 = vsel %vm1538_vm2, %v1537_v39, 0.0  ;;  %3613 = vpow2.f32 %v2663_v55  ;;  %v2669_v34 = vmul.f32 1.442695, %v2625_v3  ;;  %v2685_v22 = vmul.f32 1.442695, %v2633_v13 }
 0x3d6   : > { %v2618_v56 = vsub.f32 %v5292_v17, %v2606_v0  ;;  %3615 = vpow2.f32 %v2679_v18  ;;  %v2626_v11 = vsub.f32 %v5323_v25, %v2606_v0  ;;  %v2634_v7 = vsub.f32 %v5449_v49, %v2606_v0  ;;  %v2556_v30 = vpop.xlane.xlu0 %2555 }
 0x3d7   : > { %v2642_v47 = vsub.f32 %v2586_v26, %v2606_v0  ;;  %3617 = vpow2.f32 %v2695_v32  ;;  %v2701_v1 = vmul.f32 1.442695, %v2641_v21  ;;  %v1594_v58 = vadd.f32 %v1593_v63, %v1592_v62  ;;  %v5557_v20 = vpop.xlane.xlu1 %694 }
 0x3d8   : > { %v2583_v16 = vmul.f32 0.25, %v2541_v24  ;;  %3619 = vpow2.f32 %v2653_v37  ;;  %v2655_v39 = vmul.f32 1.442695, %v2618_v56  ;;  %v2671_v36 = vmul.f32 1.442695, %v2626_v11 }
 0x3d9   : > { %v2228_v35 = vsel %vm2206_vm3, %v5499_v51, 0.0  ;;  %3621 = vpow2.f32 %v2669_v34  ;;  %v1598_v17 = vpack.c.bf16 %v1594_v58, %v5496_v14  ;;  %v2584_v49 = vmul.f32 0.25, %v2544_v23 }
 0x3da   : > { %v2597_v25 = vmax.f32 %v5492_v45, %v2583_v16  ;;  %3623 = vpow2.f32 %v2685_v22  ;;  %v2687_v28 = vmul.f32 1.442695, %v2634_v7  ;;  %v2703_v12 = vmul.f32 1.442695, %v2642_v47  ;;  %v5565_v59 = vpop.xlane.xlu0 %697 }
 0x3db   : > { %v2229_v40 = vsel %vm2206_vm3, %v5505_v19, 0.0  ;;  %3625 = vpow2.f32 %v2701_v1  ;;  %1610 = vrot.lane.b32.xlu1 %v1598_v17, %s3848_s19  ;;  %v5571_v8 = vpop.xlane.xlu1 %718  ;;  %v2600_v52 = vmax.f32 %v5502_v33, %v2584_v49  ;;  %v2231_v18 = vsel %vm2206_vm3, %v5509_v10, 0.0 }
 0x3dc   : > { %v2615_v24 = vsub.f32 %v5332_v2, %v2597_v25  ;;  %v2623_v51 = vsub.f32 %v5408_v61, %v2597_v25  ;;  %v2631_v14 = vsub.f32 %v5465_v41, %v2597_v25  ;;  %3627 = vpow2.f32 %v2655_v39 }
 0x3dd   : > { %v2639_v45 = vsub.f32 %v2583_v16, %v2597_v25  ;;  %v2230_v26 = vadd.f32 %v2229_v40, %v2228_v35  ;;  %v5574_v43 = vpop.eup %3603  ;;  %3629 = vpow2.f32 %v2671_v36  ;;  %v2616_v41 = vsub.f32 %v5346_v46, %v2600_v52 }
 0x3de   : > { %v2649_v19 = vmul.f32 1.442695, %v2615_v24  ;;  %v2665_v55 = vmul.f32 1.442695, %v2623_v51  ;;  %v5578_v2 = vpop.eup %3605  ;;  %3631 = vpow2.f32 %v2687_v28  ;;  %v2681_v61 = vmul.f32 1.442695, %v2631_v14  ;;  %v5582_v42 = vpop.xlane.xlu0 %721 }
 0x3df   : > { %v2624_v32 = vsub.f32 %v5412_v29, %v2600_v52  ;;  %v5584_v33 = vpop.eup %3607  ;;  %v2709_v3 = vadd.f32 %v5578_v2, %v5574_v43  ;;  %3633 = vpow2.f32 %v2703_v12  ;;  %v2697_v23 = vmul.f32 1.442695, %v2639_v45  ;;  %v5589_v10 = vpop.xlane.xlu1 %700 }
 0x3e0   : > { %v2632_v13 = vsub.f32 %v5487_v38, %v2600_v52  ;;  %v5591_v21 = vpop.eup %3609  ;;  %3635 = vpow2.f32 %v2649_v19  ;;  %v2640_v0 = vsub.f32 %v2584_v49, %v2600_v52  ;;  %v2651_v46 = vmul.f32 1.442695, %v2616_v41 }
 0x3e1   : > { %v2232_v37 = vadd.f32 %v2231_v18, %v2230_v26  ;;  %v5593_v29 = vpop.eup %3611  ;;  %v2710_v62 = vadd.f32 %v5584_v33, %v2709_v3  ;;  %3637 = vpow2.f32 %v2665_v55  ;;  %v2667_v63 = vmul.f32 1.442695, %v2624_v32  ;;  %v6600_v55 = vld [vmem:[#allocation32_spill] sm:$0xff]  ;;  %v6601_v18 = vld [vmem:[#allocation37_spill] sm:$0xff] }
 0x3e2   : > { %v2233_v34 = vsel %vm2206_vm3, %v5524_v31, 0.0  ;;  %v5598_v22 = vpop.eup %3613  ;;  %3639 = vpow2.f32 %v2681_v61  ;;  %v2587_v56 = vmul.f32 0.25, %v5551_v5  ;;  %v5601_v11 = vmul.f32 0.25, %v2556_v30  ;;  %v5603_v7 = vpop.xlane.xlu0 %703  ;;  %v6602_v3 = vld [vmem:[#allocation36_spill] sm:$0xff] }
 0x3e3   : > { %v2234_v38 = vadd.f32 %v2233_v34, %v2232_v37  ;;  %v5605_v47 = vpop.eup %3615  ;;  %v2711_v1 = vadd.f32 %v5591_v21, %v2710_v62  ;;  %v2712_v58 = vadd.f32 %v5598_v22, %v5593_v29  ;;  %3641 = vpow2.f32 %v2697_v23  ;;  %v5610_v31 = vpop.xlane.xlu1 %724 }
 0x3e4   : > { %v2683_v16 = vmul.f32 1.442695, %v2632_v13  ;;  %v5612_v39 = vpop.eup %3617  ;;  %3643 = vpow2.f32 %v2651_v46  ;;  %v2699_v36 = vmul.f32 1.442695, %v2640_v0  ;;  %v2609_v30 = vmax.f32 %v5512_v44, %v2587_v56 }
 0x3e5   : > { %v2264_v5 = vpack.c.bf16 %v2234_v38, %v5541_v54  ;;  %v5616_v35 = vpop.eup %3619  ;;  %3645 = vrcp.f32 %v2711_v1  ;;  %v2713_v17 = vadd.f32 %v5605_v47, %v2712_v58  ;;  %v2612_v25 = vmax.f32 %v5531_v57, %v5601_v11 }
 0x3e6   : > { %v2148_v49 = vmul.f32 %v5405_v4, %v5280_v27  ;;  %v5623_v28 = vpop.eup %3621  ;;  %3647 = vpow2.f32 %v2667_v63  ;;  %v2619_v54 = vsub.f32 %v5386_v9, %v2609_v30  ;;  %v2627_v44 = vsub.f32 %v5414_v50, %v2609_v30  ;;  %v5629_v40 = vpop.xlane.xlu0 %727 }
 0x3e7   : > { %2274 = vrot.lane.b32.xlu1 %v2264_v5, %s3849_s20  ;;  %v2635_v12 = vsub.f32 %v5494_v53, %v2609_v30  ;;  %v5631_v24 = vpop.eup %3623  ;;  %v2714_v57 = vadd.f32 %v5612_v39, %v2713_v17  ;;  %v2721_v27 = vadd.f32 %v5623_v28, %v5616_v35  ;;  %3649 = vpow2.f32 %v2683_v16  ;;  %v5636_v14 = vpop.xlane.xlu1 %742  ;;  %v6607_v5 = vld [vmem:[#allocation33_spill] sm:$0xff]  ;;  %v6608_v17 = vld [vmem:[#allocation30_spill] sm:$0xff] }
 0x3e8   : > { %6598 = vst [vmem:[#allocation13_spill] sm:$0xff] %v5631_v24  ;;  %v2643_v51 = vsub.f32 %v2587_v56, %v2609_v30  ;;  %v5638_v45 = vpop.eup %3625  ;;  %3651 = vpow2.f32 %v2699_v36  ;;  %v2657_v9 = vmul.f32 1.442695, %v2619_v54  ;;  %v2673_v50 = vmul.f32 1.442695, %v2627_v44 }
 0x3e9   : > { %6599 = vst [vmem:[#allocation9_spill] sm:$0xff] %v5638_v45  ;;  %v2689_v52 = vmul.f32 1.442695, %v2635_v12  ;;  %v5640_v53 = vpop.eup %3627  ;;  %3653 = vrcp.f32 %v2714_v57  ;;  %v2722_v26 = vadd.f32 %v5631_v24, %v2721_v27  ;;  %v2620_v19 = vsub.f32 %v5396_v15, %v2612_v25  ;;  %v6610_v12 = vld [vmem:[#allocation34_spill] sm:$0xff]  ;;  %v6612_v27 = vld [vmem:[#allocation35_spill] sm:$0xff] }
 0x3ea   : > { %v2149_v61 = vmul.f32 %v6601_v18, %v6600_v55  ;;  %v5646_v41 = vpop.eup %3629  ;;  %3655 = vpow2.f32 %v2657_v9  ;;  %v2705_v32 = vmul.f32 1.442695, %v2643_v51  ;;  %v2628_v23 = vsub.f32 %v6602_v3, %v2612_v25  ;;  %v5650_v0 = vpop.xlane.xlu0 %745  ;;  %v6615_v3 = vld [vmem:[#allocation4_spill] sm:$0xff] }
 0x3eb   : > { %v2636_v13 = vsub.f32 %v5517_v48, %v2612_v25  ;;  %v5652_v46 = vpop.eup %3631  ;;  %v2723_v37 = vadd.f32 %v5638_v45, %v2722_v26  ;;  %v2724_v15 = vadd.f32 %v5646_v41, %v5640_v53  ;;  %3657 = vpow2.f32 %v2673_v50  ;;  %v5657_v63 = vpop.xlane.xlu1 %748  ;;  %v6605_v48 = vld [vmem:[#allocation28_spill] sm:$0xff] }
 0x3ec   : > { %6603 = vst [vmem:[#allocation12_spill] sm:$0xff] %v5652_v46  ;;  %v2659_v62 = vmul.f32 1.442695, %v2620_v19  ;;  %v5659_v34 = vpop.eup %3633  ;;  %3659 = vpow2.f32 %v2689_v52  ;;  %v2644_v38 = vsub.f32 %v5601_v11, %v2612_v25  ;;  %v2675_v56 = vmul.f32 1.442695, %v2628_v23  ;;  %v6611_v25 = vld [vmem:[#allocation31_spill] sm:$0xff] }
 0x3ed   : > { %6604 = vst [vmem:[#allocation10_spill] sm:$0xff] %v5659_v34  ;;  %v2156_v1 = vmul.f32 %v5405_v4, %v6605_v48  ;;  %v5664_v58 = vpop.eup %3635  ;;  %v2725_v16 = vadd.f32 %v5652_v46, %v2724_v15  ;;  %v2691_v36 = vmul.f32 1.442695, %v2636_v13  ;;  %v2157_v30 = vmul.f32 %v6601_v18, %v6607_v5 }
 0x3ee   : > { %6606 = vst [vmem:[#allocation14_spill] sm:$0xff] %v5664_v58  ;;  %v2164_v54 = vmul.f32 %v5405_v4, %v6608_v17  ;;  %v5671_v44 = vpop.eup %3637  ;;  %3661 = vpow2.f32 %v2705_v32  ;;  %v2165_v11 = vmul.f32 %v6601_v18, %v6610_v12  ;;  %v2172_v57 = vmul.f32 %v5405_v4, %v6611_v25  ;;  %v5691_v23 = vpop.xlane.xlu0 %751  ;;  %v6620_v17 = vld [vmem:[#allocation8_spill] sm:$0xff]  ;;  %v6622_v25 = vld [vmem:[#allocation39_spill] sm:$0xff] }
 0x3ef   : > { %6609 = vst [vmem:[#allocation11_spill] sm:$0xff] %v5671_v44  ;;  %v2173_v51 = vmul.f32 %v6601_v18, %v6612_v27  ;;  %v5679_v9 = vpop.eup %3639  ;;  %v2726_v50 = vadd.f32 %v5659_v34, %v2725_v16  ;;  %v2715_v52 = vadd.f32 %v5671_v44, %v5664_v58  ;;  %3663 = vpow2.f32 %v2659_v62  ;;  %v5685_v19 = vpop.xlane.xlu1 %766  ;;  %v6617_v62 = vld [vmem:[#allocation5_spill] sm:$0xff] }
 0x3f0   : > { %6613 = vst [vmem:[#allocation15_spill] sm:$0xff] %v5679_v9  ;;  %v2180_v26 = vmul.f32 %v2148_v49, %v4633_v60  ;;  %v5687_v55 = vpop.eup %3641  ;;  %3665 = vpow2.f32 %v2675_v56  ;;  %v2707_v32 = vmul.f32 1.442695, %v2644_v38  ;;  %v2181_v4 = vmul.f32 %v2149_v61, %v4640_v6  ;;  %v6618_v49 = vld [vmem:[#allocation6_spill] sm:$0xff]  ;;  %v6619_v56 = vld [vmem:[#allocation7_spill] sm:$0xff] }
 0x3f1   : > { %6614 = vst [vmem:[#allocation17_spill] sm:$0xff] %v5687_v55  ;;  %v2188_v18 = vmul.f32 %v2156_v1, %v6615_v3  ;;  %v5693_v13 = vpop.eup %3643  ;;  %3667 = vrcp.f32 %v2723_v37  ;;  %v2716_v15 = vadd.f32 %v5679_v9, %v2715_v52  ;;  %v2189_v48 = vmul.f32 %v2157_v30, %v6617_v62 }
 0x3f2   : > { %6616 = vst [vmem:[#allocation16_spill] sm:$0xff] %v5693_v13  ;;  %v2196_v16 = vmul.f32 %v2164_v54, %v6618_v49  ;;  %v5698_v5 = vpop.eup %3645  ;;  %3669 = vpow2.f32 %v2691_v36  ;;  %v2197_v38 = vmul.f32 %v2165_v11, %v6619_v56  ;;  %v2204_v61 = vmul.f32 %v2172_v57, %v6620_v17 }
 0x3f3   : > { %v2249_v1 = vsel %vm2206_vm3, %v2180_v26, 0.0  ;;  %v5703_v12 = vpop.eup %3647  ;;  %3671 = vrcp.f32 %v2726_v50  ;;  %v2717_v37 = vadd.f32 %v5687_v55, %v2716_v15  ;;  %v2205_v27 = vmul.f32 %v2173_v51, %v6622_v25  ;;  %v773_v52 = vpop.xlane.xlu1 %772 }
 0x3f4   : > { %6621 = vst [vmem:[#allocation18_spill] sm:$0xff] %v5703_v12  ;;  %v2250_v30 = vsel %vm2206_vm3, %v2188_v18, 0.0  ;;  %v5708_v54 = vpop.eup %3649  ;;  %v2718_v36 = vadd.f32 %v5703_v12, %v5693_v13  ;;  %3673 = vpow2.f32 %v2707_v32  ;;  %v2256_v57 = vsel %vm2206_vm3, %v2181_v4, 0.0 }
 0x3f5   : > { %6623 = vst [vmem:[#allocation20_spill] sm:$0xff] %v5708_v54  ;;  %v2251_v11 = vadd.f32 %v2250_v30, %v2249_v1  ;;  %v5713_v26 = vpop.eup %3651  ;;  %3675 = vrcp.f32 %v2717_v37  ;;  %v2252_v50 = vsel %vm2206_vm3, %v2196_v16, 0.0  ;;  %v2254_v15 = vsel %vm2206_vm3, %v2204_v61, 0.0  ;;  %v770_v1 = vpop.xlane.xlu0 %769 }
 0x3f6   : > { %6624 = vst [vmem:[#allocation27_spill] sm:$0xff] %v5713_v26  ;;  %v2257_v51 = vsel %vm2206_vm3, %v2189_v48, 0.0  ;;  %v5718_v18 = vpop.eup %3653  ;;  %v2719_v55 = vadd.f32 %v5708_v54, %v2718_v36  ;;  %v2259_v32 = vsel %vm2206_vm3, %v2197_v38, 0.0  ;;  %v2261_v4 = vsel %vm2206_vm3, %v2205_v27, 0.0 }
 0x3f7   : > { %v2253_v9 = vadd.f32 %v2252_v50, %v2251_v11  ;;  %v2258_v44 = vadd.f32 %v2257_v51, %v2256_v57  ;;  %v5722_v30 = vpop.eup %3655  ;;  %v5726_v37 = vmul.f32 0.25, %v5557_v20  ;;  %v5729_v16 = vmul.f32 0.25, %v5571_v8  ;;  %v5734_v61 = vpop.xlane.xlu1 %706 }
 0x3f8   : > { %6625 = vst [vmem:[#allocation22_spill] sm:$0xff] %v5722_v30  ;;  %v5732_v48 = vmul.f32 0.25, %v5582_v42  ;;  %v5736_v36 = vpop.eup %3657  ;;  %v2720_v38 = vadd.f32 %v5713_v26, %v2719_v55  ;;  %v5740_v57 = vmul.f32 0.25, %v5565_v59  ;;  %v5743_v27 = vmul.f32 0.25, %v5589_v10 }
 0x3f9   : > { %6626 = vst [vmem:[#allocation29_spill] sm:$0xff] %v5736_v36  ;;  %v2260_v11 = vadd.f32 %v2259_v32, %v2258_v44  ;;  %v5745_v20 = vpop.eup %3659  ;;  %v2727_v8 = vadd.f32 %v5736_v36, %v5722_v30  ;;  %v2255_v42 = vadd.f32 %v2254_v15, %v2253_v9  ;;  %v5750_v50 = vmul.f32 0.25, %v5603_v7 }
 0x3fa   : > { %6627 = vst [vmem:[#allocation21_spill] sm:$0xff] %v5745_v20  ;;  %v5753_v51 = vmul.f32 0.25, %v5610_v31  ;;  %v821_v59 = vmax.f32 %v5726_v37, %v5729_v16  ;;  %v5758_v44 = vmul.f32 0.25, %v5629_v40  ;;  %v805_v10 = vmul.f32 0.25, %v5636_v14 }
 0x3fb   : > { %v2262_v55 = vadd.f32 %v2261_v4, %v2260_v11  ;;  %v5761_v32 = vpop.eup %3661  ;;  %v2728_v36 = vadd.f32 %v5745_v20, %v2727_v8  ;;  %v824_v7 = vmax.f32 %v5740_v57, %v5732_v48  ;;  %v806_v9 = vmul.f32 0.25, %v5650_v0  ;;  %v731_v15 = vpop.xlane.xlu1 %730 }
 0x3fc   : > { %6628 = vst [vmem:[#allocation23_spill] sm:$0xff] %v5761_v32  ;;  %v5768_v31 = vmul.f32 0.25, %v5657_v63  ;;  %v5770_v4 = vpop.eup %3663  ;;  %v827_v40 = vmax.f32 %v5743_v27, %v5753_v51  ;;  %v830_v14 = vmax.f32 %v5750_v50, %v5758_v44  ;;  %v5777_v8 = vmul.f32 0.25, %v5691_v23  ;;  %v776_v20 = vpop.xlane.xlu0 %775 }
 0x3fd   : > { %6629 = vst [vmem:[#allocation19_spill] sm:$0xff] %v5770_v4  ;;  %v2266_v11 = vpack.c.bf16 %v2262_v55, %v2255_v42  ;;  %v5779_v30 = vpop.eup %3665  ;;  %v2729_v0 = vadd.f32 %v5761_v32, %v2728_v36  ;;  %v822_v63 = vmax.f32 %v821_v59, %v805_v10  ;;  %v825_v26 = vmax.f32 %v824_v7, %v806_v9 }
 0x3fe   : > { %6630 = vst [vmem:[#allocation24_spill] sm:$0xff] %v5779_v30  ;;  %v813_v54 = vmul.f32 0.25, %v5685_v19  ;;  %v5783_v12 = vpop.eup %3667  ;;  %v2730_v42 = vadd.f32 %v5779_v30, %v5770_v4  ;;  %v828_v55 = vmax.f32 %v827_v40, %v5768_v31  ;;  %v814_v23 = vmul.f32 0.25, %v770_v1 }
 0x3ff   : > { %2278 = vrot.lane.b32.xlu1 %v2266_v11, %s3849_s20  ;;  %v815_v13 = vmul.f32 0.25, %v773_v52  ;;  %v5789_v58 = vpop.eup %3669  ;;  %3677 = vrcp.f32 %v2720_v38  ;;  %v831_v36 = vmax.f32 %v830_v14, %v5777_v8  ;;  %v5792_v7 = vpop.xlane.xlu1 %712  ;;  %v816_v4 = vmul.f32 0.25, %v776_v20 }
 0x400   : > { %6631 = vst [vmem:[#allocation25_spill] sm:$0xff] %v5789_v58  ;;  %v823_v59 = vmax.f32 %v822_v63, %v813_v54  ;;  %v5794_v19 = vpop.eup %3671  ;;  %v2731_v32 = vadd.f32 %v5789_v58, %v2730_v42  ;;  %v826_v34 = vmax.f32 %v825_v26, %v814_v23  ;;  %v710_v26 = vpop.xlane.xlu0 %709  ;;  %3679 = vrcp.f32 %v2729_v0 }
 0x401   : > { %v829_v30 = vmax.f32 %v828_v55, %v815_v13  ;;  %v5797_v11 = vpop.eup %3673 }
 0x402   : > { %v845_v1 = vsub.f32 %v5726_v37, %v823_v59  ;;  %v853_v52 = vsub.f32 %v5729_v16, %v823_v59  ;;  %v861_v40 = vsub.f32 %v805_v10, %v823_v59  ;;  %v869_v38 = vsub.f32 %v813_v54, %v823_v59  ;;  %v5801_v45 = vpop.eup %3675 }
 0x403   : > { %v2732_v14 = vadd.f32 %v5797_v11, %v2731_v32  ;;  %v846_v63 = vsub.f32 %v5740_v57, %v826_v34  ;;  %v854_v46 = vsub.f32 %v5732_v48, %v826_v34  ;;  %v862_v42 = vsub.f32 %v806_v9, %v826_v34  ;;  %v5806_v24 = vpop.xlane.xlu1 %736 }
 0x404   : > { %v877_v20 = vmul.f32 1.442695, %v845_v1  ;;  %v893_v55 = vmul.f32 1.442695, %v853_v52  ;;  %v909_v58 = vmul.f32 1.442695, %v861_v40  ;;  %v870_v16 = vsub.f32 %v814_v23, %v826_v34 }
 0x405   : > { %3681 = vrcp.f32 %v2732_v14  ;;  %v925_v37 = vmul.f32 1.442695, %v869_v38  ;;  %v5809_v54 = vmul.f32 0.25, %v5734_v61  ;;  %v879_v10 = vmul.f32 1.442695, %v846_v63 }
 0x406   : > { %3683 = vpow2.f32 %v877_v20  ;;  %v895_v32 = vmul.f32 1.442695, %v854_v46  ;;  %v847_v57 = vsub.f32 %v5743_v27, %v829_v30  ;;  %v911_v48 = vmul.f32 1.442695, %v862_v42  ;;  %v734_v46 = vpop.xlane.xlu0 %733 }
 0x407   : > { %3685 = vpow2.f32 %v893_v55  ;;  %v855_v9 = vsub.f32 %v5753_v51, %v829_v30  ;;  %v863_v0 = vsub.f32 %v5768_v31, %v829_v30  ;;  %v871_v59 = vsub.f32 %v815_v13, %v829_v30  ;;  %v5816_v34 = vpop.xlane.xlu1 %754 }
 0x408   : > { %3687 = vpow2.f32 %v909_v58  ;;  %v832_v1 = vmax.f32 %v831_v36, %v816_v4  ;;  %v5814_v52 = vmul.f32 0.25, %v731_v15  ;;  %v927_v61 = vmul.f32 1.442695, %v870_v16 }
 0x409   : > { %3689 = vpow2.f32 %v925_v37  ;;  %v881_v23 = vmul.f32 1.442695, %v847_v57  ;;  %v5818_v40 = vmul.f32 0.25, %v710_v26  ;;  %v897_v58 = vmul.f32 1.442695, %v855_v9 }
 0x40a   : > { %3691 = vpow2.f32 %v879_v10  ;;  %v848_v27 = vsub.f32 %v5750_v50, %v832_v1  ;;  %v856_v51 = vsub.f32 %v5758_v44, %v832_v1  ;;  %v864_v31 = vsub.f32 %v5777_v8, %v832_v1 }
 0x40b   : > { %3693 = vpow2.f32 %v895_v32  ;;  %v913_v13 = vmul.f32 1.442695, %v863_v0  ;;  %v872_v30 = vsub.f32 %v816_v4, %v832_v1  ;;  %v929_v15 = vmul.f32 1.442695, %v871_v59  ;;  %v5827_v14 = vpop.xlane.xlu1 %760 }
 0x40c   : > { %3695 = vpow2.f32 %v911_v48  ;;  %v833_v36 = vmax.f32 %v5809_v54, %v5814_v52  ;;  %v5825_v38 = vmul.f32 0.25, %v734_v46  ;;  %v5829_v63 = vpop.eup %3677  ;;  %v883_v50 = vmul.f32 1.442695, %v848_v27 }
 0x40d   : > { %3697 = vpow2.f32 %v927_v61  ;;  %v899_v44 = vmul.f32 1.442695, %v856_v51  ;;  %v915_v42 = vmul.f32 1.442695, %v864_v31  ;;  %v931_v8 = vmul.f32 1.442695, %v872_v30  ;;  %v5849_v32 = vpop.eup %3679 }
 0x40e   : > { %3699 = vpow2.f32 %v881_v23  ;;  %v2741_v4 = vmul.f32 %v5698_v5, %v5574_v43  ;;  %v2742_v26 = vmul.f32 %v5718_v18, %v5593_v29  ;;  %v2749_v20 = vmul.f32 %v5698_v5, %v5578_v2  ;;  %v716_v2 = vpop.xlane.xlu0 %715 }
 0x40f   : > { %3701 = vpow2.f32 %v897_v58  ;;  %v2750_v55 = vmul.f32 %v5718_v18, %v5598_v22  ;;  %v2757_v37 = vmul.f32 %v5698_v5, %v5584_v33  ;;  %v836_v16 = vmax.f32 %v5818_v40, %v5825_v38  ;;  %v5847_v10 = vpop.xlane.xlu1 %778 }
 0x410   : > { %3703 = vpow2.f32 %v913_v13  ;;  %v2758_v43 = vmul.f32 %v5718_v18, %v5605_v47  ;;  %v2765_v29 = vmul.f32 %v5698_v5, %v5591_v21  ;;  %v2766_v22 = vmul.f32 %v5718_v18, %v5612_v39 }
 0x411   : > { %3705 = vpow2.f32 %v929_v15  ;;  %v2773_v33 = vmul.f32 %v2741_v4, %v4633_v60  ;;  %v2781_v57 = vmul.f32 %v2749_v20, %v6615_v3  ;;  %v2774_v47 = vmul.f32 %v2742_v26, %v4640_v6 }
 0x412   : > { %v5855_v48 = vpop.eup %3681  ;;  %3707 = vpow2.f32 %v883_v50  ;;  %v2782_v21 = vmul.f32 %v2750_v55, %v6617_v62  ;;  %v2789_v5 = vmul.f32 %v2757_v37, %v6618_v49  ;;  %v5863_v0 = vmul.f32 0.25, %v5792_v7  ;;  %v740_v20 = vpop.xlane.xlu0 %739 }
 0x413   : > { %v5860_v9 = vpop.eup %3683  ;;  %3709 = vpow2.f32 %v899_v44  ;;  %v2797_v39 = vmul.f32 %v2765_v29, %v6620_v17  ;;  %v5868_v59 = vmul.f32 0.25, %v716_v2  ;;  %v2790_v1 = vmul.f32 %v2758_v43, %v6619_v56  ;;  %v5873_v46 = vpop.xlane.xlu1 %784 }
 0x414   : > { %v5866_v18 = vpop.eup %3685  ;;  %v2806_v61 = vsel %vm2805_vm4, %v2773_v33, 0.0  ;;  %v2807_v23 = vsel %vm2805_vm4, %v2781_v57, 0.0  ;;  %3711 = vpow2.f32 %v915_v42  ;;  %v2798_v51 = vmul.f32 %v2766_v22, %v6622_v25 }
 0x415   : > { %v5875_v27 = vpop.eup %3687  ;;  %v941_v7 = vadd.f32 %v5866_v18, %v5860_v9  ;;  %v2808_v31 = vadd.f32 %v2807_v23, %v2806_v61  ;;  %3713 = vpow2.f32 %v931_v8  ;;  %v2809_v13 = vsel %vm2805_vm4, %v2789_v5, 0.0 }
 0x416   : > { %v5880_v58 = vpop.eup %3689  ;;  %v2813_v30 = vsel %vm2805_vm4, %v2774_v47, 0.0  ;;  %v2814_v15 = vsel %vm2805_vm4, %v2782_v21, 0.0  ;;  %v2811_v26 = vsel %vm2805_vm4, %v2797_v39, 0.0  ;;  %v2816_v37 = vsel %vm2805_vm4, %v2790_v1, 0.0  ;;  %v6633_v39 = vld [vmem:[#allocation13_spill] sm:$0xff] }
 0x417   : > { %v5885_v50 = vpop.eup %3691  ;;  %v942_v44 = vadd.f32 %v5875_v27, %v941_v7  ;;  %v2810_v4 = vadd.f32 %v2809_v13, %v2808_v31  ;;  %v2815_v42 = vadd.f32 %v2814_v15, %v2813_v30  ;;  %v2745_v8 = vmul.f32 %v5783_v12, %v5616_v35  ;;  %v1605_v2 = vpop.permute.xlu1 %1604  ;;  %v6634_v31 = vld [vmem:[#allocation12_spill] sm:$0xff] }
 0x418   : > { %v5889_v55 = vpop.eup %3693  ;;  %v2746_v43 = vmul.f32 %v5794_v19, %v5640_v53  ;;  %v2753_v29 = vmul.f32 %v5783_v12, %v5623_v28  ;;  %v5903_v21 = vmul.f32 0.25, %v5806_v24  ;;  %3339 = vmatprep.mubr.msk.bf16.mxu1 %vm692_vm1, %v1605_v2  ;;  %v2818_v53 = vsel %vm2805_vm4, %v2798_v51, 0.0  ;;  %v6635_v51 = vld [vmem:[#allocation9_spill] sm:$0xff]  ;;  %v6638_v2 = vld [vmem:[#allocation16_spill] sm:$0xff] }
 0x419   : > { %v5898_v22 = vpop.eup %3695  ;;  %v944_v33 = vadd.f32 %v5889_v55, %v5885_v50  ;;  %v2812_v57 = vadd.f32 %v2811_v26, %v2810_v4  ;;  %v2817_v47 = vadd.f32 %v2816_v37, %v2815_v42  ;;  %v5909_v5 = vmul.f32 0.25, %v740_v20  ;;  %v6636_v4 = vld [vmem:[#allocation10_spill] sm:$0xff] }
 0x41a   : > { %v5906_v35 = vpop.eup %3697  ;;  %v2754_v28 = vmul.f32 %v5794_v19, %v5646_v41  ;;  %v2761_v1 = vmul.f32 %v5783_v12, %v6633_v39  ;;  %v943_v23 = vadd.f32 %v5880_v58, %v942_v44  ;;  %v2762_v13 = vmul.f32 %v5794_v19, %v6634_v31 }
 0x41b   : > { %6632 = vst [vmem:[#allocation26_spill] sm:$0xff] %v5906_v35  ;;  %v5915_v61 = vpop.eup %3699  ;;  %v945_v24 = vadd.f32 %v5898_v22, %v944_v33  ;;  %v2819_v7 = vadd.f32 %v2818_v53, %v2817_v47  ;;  %v2769_v15 = vmul.f32 %v5783_v12, %v6635_v51  ;;  %v2770_v41 = vmul.f32 %v5794_v19, %v6636_v4 }
 0x41c   : > { %v5921_v30 = vpop.eup %3701  ;;  %v2777_v26 = vmul.f32 %v2745_v8, %v4633_v60  ;;  %v2778_v42 = vmul.f32 %v2746_v43, %v4640_v6  ;;  %v2785_v33 = vmul.f32 %v2753_v29, %v6615_v3  ;;  %v2786_v19 = vmul.f32 %v2754_v28, %v6617_v62  ;;  %v758_v29 = vpop.xlane.xlu0 %757 }
 0x41d   : > { %v5929_v20 = vpop.eup %3703  ;;  %v947_v44 = vadd.f32 %v5921_v30, %v5915_v61  ;;  %v2862_v37 = vpack.c.bf16 %v2819_v7, %v2812_v57  ;;  %v946_v12 = vadd.f32 %v5906_v35, %v945_v24  ;;  %v2793_v8 = vmul.f32 %v2761_v1, %v6618_v49 }
 0x41e   : > { %v5936_v47 = vpop.eup %3705  ;;  %v2801_v43 = vmul.f32 %v2769_v15, %v6620_v17  ;;  %v2794_v57 = vmul.f32 %v2762_v13, %v6619_v56  ;;  %v2834_v24 = vsel %vm2805_vm4, %v2777_v26, 0.0  ;;  %3715 = vrcp.f32 %v943_v23 }
 0x41f   : > { %v5942_v53 = vpop.eup %3707  ;;  %v948_v39 = vadd.f32 %v5929_v20, %v947_v44  ;;  %2871 = vrot.lane.b32.xlu0 %v2862_v37, %s3850_s21  ;;  %v2802_v28 = vmul.f32 %v2770_v41, %v6622_v25  ;;  %v2835_v1 = vsel %vm2805_vm4, %v2785_v33, 0.0  ;;  %v2841_v31 = vsel %vm2805_vm4, %v2778_v42, 0.0 }
 0x420   : > { %v5950_v7 = vpop.eup %3709  ;;  %v2836_v4 = vadd.f32 %v2835_v1, %v2834_v24  ;;  %v2842_v44 = vsel %vm2805_vm4, %v2786_v19, 0.0  ;;  %3717 = vrcp.f32 %v946_v12  ;;  %v2837_v26 = vsel %vm2805_vm4, %v2793_v8, 0.0  ;;  %v6637_v1 = vld [vmem:[#allocation14_spill] sm:$0xff] }
 0x421   : > { %v949_v51 = vadd.f32 %v5936_v47, %v948_v39  ;;  %v950_v15 = vadd.f32 %v5950_v7, %v5942_v53  ;;  %v5959_v13 = vpop.eup %3711  ;;  %v2839_v23 = vsel %vm2805_vm4, %v2801_v43, 0.0  ;;  %v2843_v41 = vadd.f32 %v2842_v44, %v2841_v31  ;;  %v6640_v44 = vld [vmem:[#allocation18_spill] sm:$0xff] }
 0x422   : > { %v5963_v37 = vpop.eup %3713  ;;  %v2838_v33 = vadd.f32 %v2837_v26, %v2836_v4  ;;  %v2844_v39 = vsel %vm2805_vm4, %v2794_v57, 0.0  ;;  %v2846_v19 = vsel %vm2805_vm4, %v2802_v28, 0.0  ;;  %v2743_v12 = vmul.f32 %v5801_v45, %v6637_v1  ;;  %v6641_v28 = vld [vmem:[#allocation15_spill] sm:$0xff] }
 0x423   : > { %3719 = vrcp.f32 %v949_v51  ;;  %v951_v42 = vadd.f32 %v5959_v13, %v950_v15  ;;  %v2845_v24 = vadd.f32 %v2844_v39, %v2843_v41  ;;  %v2744_v8 = vmul.f32 %v5829_v63, %v6638_v2  ;;  %v6639_v15 = vld [vmem:[#allocation11_spill] sm:$0xff]  ;;  %v6642_v39 = vld [vmem:[#allocation20_spill] sm:$0xff]  ;;  %v6643_v2 = vld [vmem:[#allocation17_spill] sm:$0xff] }
 0x424   : > { %v2840_v31 = vadd.f32 %v2839_v23, %v2838_v33  ;;  %v5974_v51 = vmul.f32 0.25, %v5816_v34  ;;  %v2751_v4 = vmul.f32 %v5801_v45, %v6639_v15  ;;  %v2752_v26 = vmul.f32 %v5829_v63, %v6640_v44 }
 0x425   : > { %v952_v43 = vadd.f32 %v5963_v37, %v951_v42  ;;  %v2847_v57 = vadd.f32 %v2846_v19, %v2845_v24  ;;  %v2759_v41 = vmul.f32 %v5801_v45, %v6641_v28  ;;  %v2760_v1 = vmul.f32 %v5829_v63, %v6642_v39  ;;  %v6644_v42 = vld [vmem:[#allocation27_spill] sm:$0xff] }
 0x426   : > { %v2767_v23 = vmul.f32 %v5801_v45, %v6643_v2  ;;  %v2768_v34 = vmul.f32 %v5829_v63, %v6644_v42  ;;  %v2775_v33 = vmul.f32 %v2743_v12, %v4633_v60  ;;  %v2776_v24 = vmul.f32 %v2744_v8, %v4640_v6  ;;  %v764_v2 = vpop.xlane.xlu0 %763 }
 0x427   : > { %3721 = vrcp.f32 %v952_v43  ;;  %v2864_v15 = vpack.c.bf16 %v2847_v57, %v2840_v31  ;;  %v2783_v19 = vmul.f32 %v2751_v4, %v6615_v3  ;;  %v2784_v44 = vmul.f32 %v2752_v26, %v6617_v62 }
 0x428   : > { %v2791_v28 = vmul.f32 %v2759_v41, %v6618_v49  ;;  %v2792_v39 = vmul.f32 %v2760_v1, %v6619_v56  ;;  %v2799_v43 = vmul.f32 %v2767_v23, %v6620_v17  ;;  %v2800_v45 = vmul.f32 %v2768_v34, %v6622_v25 }
 0x429   : > { %2875 = vrot.lane.b32.xlu1 %v2864_v15, %s3850_s21  ;;  %v2820_v63 = vsel %vm2805_vm4, %v2775_v33, 0.0  ;;  %v2821_v12 = vsel %vm2805_vm4, %v2783_v19, 0.0  ;;  %v2827_v8 = vsel %vm2805_vm4, %v2776_v24, 0.0  ;;  %v2828_v31 = vsel %vm2805_vm4, %v2784_v44, 0.0  ;;  %v6645_v19 = vld [vmem:[#allocation22_spill] sm:$0xff] }
 0x42a   : > { %v6005_v4 = vmax.f32 %v833_v36, %v5974_v51  ;;  %v6007_v57 = vmul.f32 0.25, %v758_v29  ;;  %v2822_v26 = vadd.f32 %v2821_v12, %v2820_v63  ;;  %v2829_v41 = vadd.f32 %v2828_v31, %v2827_v8  ;;  %v6646_v29 = vld [vmem:[#allocation19_spill] sm:$0xff]  ;;  %v6648_v12 = vld [vmem:[#allocation24_spill] sm:$0xff] }
 0x42b   : > { %v2823_v1 = vsel %vm2805_vm4, %v2791_v28, 0.0  ;;  %v2830_v23 = vsel %vm2805_vm4, %v2792_v39, 0.0  ;;  %v6012_v42 = vmul.f32 0.25, %v5827_v14  ;;  %v6014_v34 = vmul.f32 0.25, %v764_v2  ;;  %v6016_v33 = vpop.eup %3715  ;;  %v6647_v39 = vld [vmem:[#allocation29_spill] sm:$0xff] }
 0x42c   : > { %v2824_v15 = vadd.f32 %v2823_v1, %v2822_v26  ;;  %v2831_v24 = vadd.f32 %v2830_v23, %v2829_v41  ;;  %v2747_v36 = vmul.f32 %v5849_v32, %v6645_v19  ;;  %v2748_v44 = vmul.f32 %v5855_v48, %v6646_v29  ;;  %v6649_v41 = vld [vmem:[#allocation21_spill] sm:$0xff]  ;;  %v782_v29 = vpop.xlane.xlu0 %781 }
 0x42d   : > { %v2825_v63 = vsel %vm2805_vm4, %v2799_v43, 0.0  ;;  %v2832_v28 = vsel %vm2805_vm4, %v2800_v45, 0.0  ;;  %v2755_v14 = vmul.f32 %v5849_v32, %v6647_v39  ;;  %v2756_v2 = vmul.f32 %v5855_v48, %v6648_v12  ;;  %v6028_v8 = vpop.eup %3717  ;;  %v6650_v23 = vld [vmem:[#allocation25_spill] sm:$0xff]  ;;  %v6651_v39 = vld [vmem:[#allocation23_spill] sm:$0xff] }
 0x42e   : > { %v2826_v31 = vadd.f32 %v2825_v63, %v2824_v15  ;;  %v2833_v26 = vadd.f32 %v2832_v28, %v2831_v24  ;;  %v2763_v1 = vmul.f32 %v5849_v32, %v6649_v41  ;;  %v2764_v19 = vmul.f32 %v5855_v48, %v6650_v23 }
 0x42f   : > { %v837_v45 = vmax.f32 %v836_v16, %v6007_v57  ;;  %v2771_v12 = vmul.f32 %v5849_v32, %v6651_v39  ;;  %v2779_v35 = vmul.f32 %v2747_v36, %v4633_v60  ;;  %v2780_v15 = vmul.f32 %v2748_v44, %v4640_v6 }
 0x430   : > { %v3720_v43 = vpop.eup %3719  ;;  %v6653_v63 = vmax.f32 %v5863_v0, %v5903_v21  ;;  %v6654_v41 = vmax.f32 %v5868_v59, %v5909_v5  ;;  %v2772_v32 = vmul.f32 %v5855_v48, %v5797_v11  ;;  %v2863_v23 = vpack.c.bf16 %v2833_v26, %v2826_v31 }
 0x431   : > { %v6043_v24 = vmul.f32 %v3720_v43, %v5915_v61  ;;  %v2787_v36 = vmul.f32 %v2755_v14, %v6615_v3  ;;  %v2788_v44 = vmul.f32 %v2756_v2, %v6617_v62  ;;  %v2795_v61 = vmul.f32 %v2763_v1, %v6618_v49 }
 0x432   : > { %v840_v28 = vmax.f32 %v6653_v63, %v6012_v42  ;;  %v843_v16 = vmax.f32 %v6654_v41, %v6014_v34  ;;  %v6059_v39 = vmul.f32 %v3720_v43, %v5921_v30  ;;  %v6062_v63 = vmul.f32 %v3720_v43, %v5929_v20  ;;  %2873 = vrot.lane.b32.xlu0 %v2863_v23, %s3850_s21 }
 0x433   : > { %6652 = vst [vmem:[#allocation32_spill] sm:$0xff] %v6043_v24  ;;  %v2796_v24 = vmul.f32 %v2764_v19, %v6619_v56  ;;  %v2803_v41 = vmul.f32 %v2771_v12, %v6620_v17  ;;  %v6067_v11 = vmul.f32 %v3720_v43, %v5936_v47  ;;  %v2848_v48 = vsel %vm2805_vm4, %v2779_v35, 0.0  ;;  %v788_v47 = vpop.xlane.xlu0 %787 }
 0x434   : > { %v3722_v6 = vpop.eup %3721  ;;  %v2849_v14 = vsel %vm2805_vm4, %v2787_v36, 0.0  ;;  %v2855_v30 = vsel %vm2805_vm4, %v2780_v15, 0.0  ;;  %v2804_v31 = vmul.f32 %v2772_v32, %v6622_v25  ;;  %v2851_v26 = vsel %vm2805_vm4, %v2795_v61, 0.0 }
 0x435   : > { %6655 = vst [vmem:[#allocation37_spill] sm:$0xff] %v6067_v11  ;;  %v6074_v2 = vmul.f32 %v3722_v6, %v5942_v53  ;;  %v6077_v20 = vmul.f32 %v3722_v6, %v5950_v7  ;;  %v6082_v1 = vmul.f32 %v3722_v6, %v5959_v13  ;;  %v6085_v35 = vmul.f32 %v3722_v6, %v5963_v37  ;;  %v494_v53 = vld [vmem:[%s6409_s3 + $0x10] sm:$0xff]  ;;  %v495_v7 = vld [vmem:[%s6409_s3 + $0x18] sm:$0xff] }
 0x436   : > { %v2850_v19 = vadd.f32 %v2849_v14, %v2848_v48  ;;  %v2856_v43 = vsel %vm2805_vm4, %v2788_v44, 0.0  ;;  %v2853_v12 = vsel %vm2805_vm4, %v2803_v41, 0.0  ;;  %v2858_v13 = vsel %vm2805_vm4, %v2796_v24, 0.0 }
 0x437   : > { %6656 = vst [vmem:[#allocation36_spill] sm:$0xff] %v6085_v35  ;;  %v2857_v15 = vadd.f32 %v2856_v43, %v2855_v30  ;;  %v817_v32 = vmul.f32 0.25, %v5847_v10  ;;  %v818_v37 = vmul.f32 0.25, %v782_v29  ;;  %v819_v23 = vmul.f32 0.25, %v5873_v46 }
 0x438   : > { %v2852_v6 = vadd.f32 %v2851_v26, %v2850_v19  ;;  %v6098_v36 = vmul.f32 0.25, %v788_v47  ;;  %v2860_v61 = vsel %vm2805_vm4, %v2804_v31, 0.0  ;;  %v1599_v14 = vpack.c.bf16 %v495_v7, %v494_v53  ;;  %v1609_v53 = vpop.permute.xlu1 %1608 }
 0x439   : > { %v2859_v44 = vadd.f32 %v2858_v13, %v2857_v15  ;;  %v835_v48 = vmax.f32 %v6005_v4, %v817_v32  ;;  %v838_v11 = vmax.f32 %v837_v45, %v818_v37  ;;  %v841_v41 = vmax.f32 %v840_v28, %v819_v23  ;;  %v1607_v45 = vpop.permute.xlu0 %1606 }
 0x43a   : > { %v2854_v35 = vadd.f32 %v2853_v12, %v2852_v6  ;;  %v6103_v30 = vmax.f32 %v843_v16, %v6098_v36  ;;  %3337 = vmatprep.subr.bf16.mxu1 %v1599_v14 }
 0x43b   : > { %v2861_v24 = vadd.f32 %v2860_v61, %v2859_v44  ;;  %v849_v10 = vsub.f32 %v5809_v54, %v835_v48  ;;  %v857_v29 = vsub.f32 %v5814_v52, %v835_v48  ;;  %v865_v46 = vsub.f32 %v5974_v51, %v835_v48  ;;  %3338 = vmatpush3.bf16.msra.mxu1 %v1599_v14 }
 0x43c   : > { %v873_v26 = vsub.f32 %v817_v32, %v835_v48  ;;  %v850_v31 = vsub.f32 %v5818_v40, %v838_v11  ;;  %v858_v4 = vsub.f32 %v5825_v38, %v838_v11  ;;  %v866_v47 = vsub.f32 %v6007_v57, %v838_v11 }
 0x43d   : > { %v2865_v28 = vpack.c.bf16 %v2861_v24, %v2854_v35  ;;  %v885_v16 = vmul.f32 1.442695, %v849_v10  ;;  %v901_v19 = vmul.f32 1.442695, %v857_v29  ;;  %v917_v43 = vmul.f32 1.442695, %v865_v46 }
 0x43e   : > { %v933_v54 = vmul.f32 1.442695, %v873_v26  ;;  %v874_v7 = vsub.f32 %v818_v37, %v838_v11  ;;  %v887_v52 = vmul.f32 1.442695, %v850_v31  ;;  %v973_v51 = vmul.f32 %v6016_v33, %v5860_v9  ;;  %3340 = vmatmul.mubr.msk.bf16.vlgmr.msra.gmra.mxu1 %vm692_vm1, %v1607_v45  ;;  %v492_v26 = vld [vmem:[%s6409_s3] sm:$0xff]  ;;  %v493_v31 = vld [vmem:[%s6409_s3 + $0x8] sm:$0xff] }
 0x43f   : > { %2877 = vrot.lane.b32.xlu1 %v2865_v28, %s3850_s21  ;;  %3723 = vpow2.f32 %v885_v16  ;;  %v903_v40 = vmul.f32 1.442695, %v858_v4  ;;  %v851_v38 = vsub.f32 %v5863_v0, %v841_v41  ;;  %v859_v57 = vsub.f32 %v5903_v21, %v841_v41  ;;  %3343 = vmatprep.mubr.msk.bf16.mxu1 %vm692_vm1, %v1609_v53  ;;  %s6346_s21 = scalar_lea.vmem [#allocation3], %s4001_s24  ;;  %s3312_s24 = sshll.u32 (%p3939_p6), %s3825_s26, 1 }
 0x440   : > { %3725 = vpow2.f32 %v901_v19  ;;  %v919_v35 = vmul.f32 1.442695, %v866_v47  ;;  %v867_v12 = vsub.f32 %v6012_v42, %v841_v41  ;;  %v875_v15 = vsub.f32 %v819_v23, %v841_v41  ;;  %s3139_s10 = sadd.s32 (%p3939_p6), %s3313_s22, %s3312_s24 }
 0x441   : > { %3727 = vpow2.f32 %v917_v43  ;;  %v935_v11 = vmul.f32 1.442695, %v874_v7  ;;  %v889_v9 = vmul.f32 1.442695, %v851_v38  ;;  %v852_v13 = vsub.f32 %v5868_v59, %v6103_v30  ;;  %s3314_s12 = sshll.u32 (%p3939_p6), %s3139_s10, 3 }
 0x442   : > { %3729 = vpow2.f32 %v933_v54  ;;  %v905_v32 = vmul.f32 1.442695, %v859_v57  ;;  %v921_v0 = vmul.f32 1.442695, %v867_v12  ;;  %v860_v21 = vsub.f32 %v5909_v5, %v6103_v30  ;;  %s3141_s14 = scalar_lea.vmem (%p3939_p6), %s6413_s7, %s3314_s12 }
 0x443   : > { %3731 = vpow2.f32 %v887_v52  ;;  %v937_v6 = vmul.f32 1.442695, %v875_v15  ;;  %v868_v42 = vsub.f32 %v6014_v34, %v6103_v30  ;;  %v876_v37 = vsub.f32 %v6098_v36, %v6103_v30  ;;  %v6658_v30 = vld [vmem:[#allocation38_spill] sm:$0xff] }
 0x444   : > { %3733 = vpow2.f32 %v903_v40  ;;  %v891_v23 = vmul.f32 1.442695, %v852_v13  ;;  %v974_v44 = vmul.f32 %v6028_v8, %v5885_v50  ;;  %v981_v59 = vmul.f32 %v6016_v33, %v5866_v18  ;;  %v6657_v50 = vld [vmem:[#allocation26_spill] sm:$0xff] }
 0x445   : > { %3735 = vpow2.f32 %v919_v35  ;;  %v907_v61 = vmul.f32 1.442695, %v860_v21  ;;  %v923_v48 = vmul.f32 1.442695, %v868_v42  ;;  %v982_v5 = vmul.f32 %v6028_v8, %v5889_v55  ;;  %v6659_v35 = vld [vmem:[#allocation32_spill] sm:$0xff] }
 0x446   : > { %3737 = vpow2.f32 %v935_v11  ;;  %v989_v34 = vmul.f32 %v6016_v33, %v5875_v27  ;;  %v990_v36 = vmul.f32 %v6028_v8, %v5898_v22  ;;  %v997_v14 = vmul.f32 %v6016_v33, %v5880_v58 }
 0x447   : > { %3739 = vpow2.f32 %v889_v9  ;;  %v998_v18 = vmul.f32 %v6028_v8, %v6657_v50  ;;  %v1005_v41 = vmul.f32 %v973_v51, %v4633_v60  ;;  %v1006_v24 = vmul.f32 %v974_v44, %v6658_v30  ;;  %v499_v50 = vld [vmem:[%s6409_s3 + $0x38] sm:$0xff] }
 0x448   : > { %3741 = vpow2.f32 %v905_v32  ;;  %v1013_v55 = vmul.f32 %v981_v59, %v6615_v3  ;;  %v1014_v10 = vmul.f32 %v982_v5, %v6617_v62  ;;  %v1021_v27 = vmul.f32 %v989_v34, %v6618_v49 }
 0x449   : > { %3743 = vpow2.f32 %v921_v0  ;;  %v1022_v22 = vmul.f32 %v990_v36, %v6619_v56  ;;  %v1029_v58 = vmul.f32 %v997_v14, %v6620_v17  ;;  %v1030_v33 = vmul.f32 %v998_v18, %v6622_v25  ;;  %v497_v36 = vld [vmem:[%s6409_s3 + $0x28] sm:$0xff]  ;;  %v498_v14 = vld [vmem:[%s6409_s3 + $0x30] sm:$0xff] }
 0x44a   : > { %3745 = vpow2.f32 %v937_v6  ;;  %v939_v8 = vmul.f32 1.442695, %v876_v37  ;;  %v1037_v29 = vsel %vm692_vm1, %v1005_v41, 0.0  ;;  %v1038_v46 = vsel %vm692_vm1, %v1013_v55, 0.0  ;;  %v6661_v41 = vld [vmem:[#allocation36_spill] sm:$0xff] }
 0x44b   : > { %3747 = vpow2.f32 %v891_v23  ;;  %v1039_v4 = vadd.f32 %v1038_v46, %v1037_v29  ;;  %v1040_v47 = vsel %vm692_vm1, %v1021_v27, 0.0  ;;  %v1044_v45 = vsel %vm692_vm1, %v1006_v24, 0.0 }
 0x44c   : > { %v6159_v28 = vpop.eup %3723  ;;  %3749 = vpow2.f32 %v907_v61  ;;  %v1042_v16 = vsel %vm692_vm1, %v1029_v58, 0.0  ;;  %v1045_v19 = vsel %vm692_vm1, %v1014_v10, 0.0  ;;  %v1047_v43 = vsel %vm692_vm1, %v1022_v22, 0.0  ;;  %v496_v61 = vld [vmem:[%s6409_s3 + $0x20] sm:$0xff] }
 0x44d   : > { %v6164_v53 = vpop.eup %3725  ;;  %v1041_v54 = vadd.f32 %v1040_v47, %v1039_v4  ;;  %v1046_v7 = vadd.f32 %v1045_v19, %v1044_v45  ;;  %v1049_v52 = vsel %vm692_vm1, %v1030_v33, 0.0  ;;  %v1097_v51 = vpack.c.bf16 %v493_v31, %v492_v26  ;;  %v1611_v57 = vpop.permute.xlu1 %1610 }
 0x44e   : > { %v6167_v40 = vpop.eup %3727  ;;  %v953_v38 = vadd.f32 %v6164_v53, %v6159_v28  ;;  %3751 = vpow2.f32 %v923_v48  ;;  %v1007_v12 = vmul.f32 %v6659_v35, %v4633_v60  ;;  %v1008_v15 = vmul.f32 %v6074_v2, %v6658_v30  ;;  %3344 = vmatmul.mubr.msk.bf16.gmra.mxu1 %vm692_vm1, %v1611_v57  ;;  %v6660_v48 = vld [vmem:[#allocation37_spill] sm:$0xff] }
 0x44f   : > { %v6175_v11 = vpop.eup %3729  ;;  %3753 = vpow2.f32 %v939_v8  ;;  %v1043_v9 = vadd.f32 %v1042_v16, %v1041_v54  ;;  %v1048_v13 = vadd.f32 %v1047_v43, %v1046_v7  ;;  %3347 = vmatprep.subr.bf16.mxu1 %v1097_v51  ;;  %v1015_v32 = vmul.f32 %v6059_v39, %v6615_v3 }
 0x450   : > { %v6180_v0 = vpop.eup %3731  ;;  %v954_v21 = vadd.f32 %v6167_v40, %v953_v38  ;;  %3348 = vmatpush3.bf16.msra.mxu1 %v1097_v51  ;;  %v1016_v6 = vmul.f32 %v6077_v20, %v6617_v62  ;;  %v1023_v2 = vmul.f32 %v6062_v63, %v6618_v49  ;;  %v1024_v42 = vmul.f32 %v6082_v1, %v6619_v56 }
 0x451   : > { %v6189_v37 = vpop.eup %3733  ;;  %v1050_v23 = vadd.f32 %v1049_v52, %v1048_v13  ;;  %v1051_v44 = vsel %vm692_vm1, %v1007_v12, 0.0  ;;  %v1052_v39 = vsel %vm692_vm1, %v1015_v32, 0.0  ;;  %v1058_v59 = vsel %vm692_vm1, %v1008_v15, 0.0 }
 0x452   : > { %v3736_v20 = vpop.eup %3735  ;;  %v1031_v63 = vmul.f32 %v6660_v48, %v6620_v17  ;;  %v955_v5 = vadd.f32 %v6175_v11, %v954_v21  ;;  %v956_v1 = vadd.f32 %v6189_v37, %v6180_v0  ;;  %v1053_v34 = vadd.f32 %v1052_v39, %v1051_v44 }
 0x453   : > { %v3738_v18 = vpop.eup %3737  ;;  %v1032_v24 = vmul.f32 %v6661_v41, %v6622_v25  ;;  %v1093_v55 = vpack.c.bf16 %v1050_v23, %v1043_v9  ;;  %v1054_v10 = vsel %vm692_vm1, %v1023_v2, 0.0  ;;  %v1059_v27 = vsel %vm692_vm1, %v1016_v6, 0.0 }
 0x454   : > { %v6215_v22 = vpop.eup %3739  ;;  %3755 = vrcp.f32 %v955_v5  ;;  %v957_v58 = vadd.f32 %v3736_v20, %v956_v1  ;;  %v1055_v33 = vadd.f32 %v1054_v10, %v1053_v34  ;;  %v1060_v8 = vadd.f32 %v1059_v27, %v1058_v59 }
 0x455   : > { %v3742_v29 = vpop.eup %3741  ;;  %3349 = vmatprep.mubr.msk.bf16.mxu1 %vm692_vm1, %v1093_v55  ;;  %v1061_v46 = vsel %vm692_vm1, %v1024_v42, 0.0  ;;  %v2267_v26 = vpack.c.bf16 %v497_v36, %v496_v61  ;;  %v6219_v31 = vpack.c.bf16 %v499_v50, %v498_v14  ;;  %v1056_v43 = vsel %vm692_vm1, %v1031_v63, 0.0 }
 0x456   : > { %v3744_v4 = vpop.eup %3743  ;;  %v958_v47 = vadd.f32 %v3738_v18, %v957_v58  ;;  %v959_v45 = vadd.f32 %v3742_v29, %v6215_v22  ;;  %v1062_v16 = vadd.f32 %v1061_v46, %v1060_v8  ;;  %v1063_v54 = vsel %vm692_vm1, %v1032_v24, 0.0 }
 0x457   : > { %v3746_v19 = vpop.eup %3745  ;;  %3357 = vmatprep.subr.bf16.mxu1 %v2267_v26  ;;  %3367 = vmatprep.subr.bf16.mxu0 %v6219_v31  ;;  %v1057_v51 = vadd.f32 %v1056_v43, %v1055_v33 }
 0x458   : > { %v3748_v7 = vpop.eup %3747  ;;  %3757 = vrcp.f32 %v958_v47  ;;  %v960_v52 = vadd.f32 %v3744_v4, %v959_v45  ;;  %v1064_v38 = vadd.f32 %v1063_v54, %v1062_v16  ;;  %3368 = vmatpush3.bf16.msra.mxu0 %v6219_v31 }
 0x459   : > { %v3750_v57 = vpop.eup %3749 }
 0x45a   : > { %v961_v35 = vadd.f32 %v3746_v19, %v960_v52  ;;  %v962_v12 = vadd.f32 %v3750_v57, %v3748_v7  ;;  %v1094_v15 = vpack.c.bf16 %v1064_v38, %v1057_v51 }
 0x45b   : > { %v3752_v9 = vpop.eup %3751 }
 0x45c   : > { %v3754_v13 = vpop.eup %3753  ;;  %3759 = vrcp.f32 %v961_v35  ;;  %v963_v32 = vadd.f32 %v3752_v9, %v962_v12  ;;  %3350 = vmatmul.mubr.msk.bf16.vlgmr.msra.gmra.mxu1 %vm692_vm1, %v1094_v15 }
 0x45d   : > { %3358 = vmatpush3.bf16.msra.mxu1 %v2267_v26 }
 0x45e   : > { %v964_v21 = vadd.f32 %v3754_v13, %v963_v32  ;;  %3377 = vmatprep.subr.bf16.mxu1 %v6219_v31 }
 0x460   : > { %3761 = vrcp.f32 %v964_v21 }
 0x461   : > { %v3756_v6 = vpop.eup %3755 }
 0x462   : > { %v977_v2 = vmul.f32 %v3756_v6, %v6159_v28  ;;  %v985_v42 = vmul.f32 %v3756_v6, %v6164_v53  ;;  %v993_v23 = vmul.f32 %v3756_v6, %v6167_v40  ;;  %v1001_v44 = vmul.f32 %v3756_v6, %v6175_v11 }
 0x464   : > { %v1009_v39 = vmul.f32 %v977_v2, %v4633_v60  ;;  %v1017_v59 = vmul.f32 %v985_v42, %v6615_v3  ;;  %v1025_v48 = vmul.f32 %v993_v23, %v6618_v49  ;;  %v1033_v28 = vmul.f32 %v1001_v44, %v6620_v17  ;;  %v2273_v23 = vpop.permute.xlu0 %2272  ;;  %v2275_v44 = vpop.permute.xlu1 %2274 }
 0x465   : > { %v3758_v61 = vpop.eup %3757 }
 0x466   : > { %v978_v63 = vmul.f32 %v3758_v61, %v6180_v0  ;;  %v986_v5 = vmul.f32 %v3758_v61, %v6189_v37  ;;  %v994_v1 = vmul.f32 %v3758_v61, %v3736_v20  ;;  %v1002_v34 = vmul.f32 %v3758_v61, %v3738_v18 }
 0x467   : > { %v1065_v53 = vsel %vm692_vm1, %v1009_v39, 0.0  ;;  %v1066_v40 = vsel %vm692_vm1, %v1017_v59, 0.0  ;;  %v1068_v37 = vsel %vm692_vm1, %v1025_v48, 0.0  ;;  %v1070_v58 = vsel %vm692_vm1, %v1033_v28, 0.0 }
 0x468   : > { %v1010_v11 = vmul.f32 %v978_v63, %v6658_v30  ;;  %v1018_v36 = vmul.f32 %v986_v5, %v6617_v62  ;;  %v1026_v14 = vmul.f32 %v994_v1, %v6619_v56  ;;  %v1034_v50 = vmul.f32 %v1002_v34, %v6622_v25  ;;  %v2277_v39 = vpop.permute.xlu0 %2276 }
 0x469   : > { %v3760_v41 = vpop.eup %3759  ;;  %v1067_v0 = vadd.f32 %v1066_v40, %v1065_v53 }
 0x46a   : > { %v1072_v20 = vsel %vm692_vm1, %v1010_v11, 0.0  ;;  %v1073_v18 = vsel %vm692_vm1, %v1018_v36, 0.0  ;;  %v979_v10 = vmul.f32 %v3760_v41, %v6215_v22  ;;  %v987_v27 = vmul.f32 %v3760_v41, %v3742_v29 }
 0x46b   : > { %v1069_v24 = vadd.f32 %v1068_v37, %v1067_v0  ;;  %v1074_v55 = vadd.f32 %v1073_v18, %v1072_v20  ;;  %v1075_v33 = vsel %vm692_vm1, %v1026_v14, 0.0  ;;  %v1077_v8 = vsel %vm692_vm1, %v1034_v50, 0.0 }
 0x46c   : > { %v995_v46 = vmul.f32 %v3760_v41, %v3744_v4  ;;  %v1003_v45 = vmul.f32 %v3760_v41, %v3746_v19  ;;  %v1011_v16 = vmul.f32 %v979_v10, %v4633_v60  ;;  %v1019_v43 = vmul.f32 %v987_v27, %v6615_v3 }
 0x46d   : > { %v3762_v26 = vpop.eup %3761  ;;  %v1076_v47 = vadd.f32 %v1075_v33, %v1074_v55  ;;  %v1071_v22 = vadd.f32 %v1070_v58, %v1069_v24 }
 0x46e   : > { %v980_v54 = vmul.f32 %v3762_v26, %v3748_v7  ;;  %v988_v52 = vmul.f32 %v3762_v26, %v3750_v57  ;;  %v996_v51 = vmul.f32 %v3762_v26, %v3752_v9  ;;  %v1004_v38 = vmul.f32 %v3762_v26, %v3754_v13 }
 0x46f   : > { %v1078_v29 = vadd.f32 %v1077_v8, %v1076_v47  ;;  %v1027_v35 = vmul.f32 %v995_v46, %v6618_v49  ;;  %v1079_v12 = vsel %vm692_vm1, %v1011_v16, 0.0  ;;  %v1035_v60 = vmul.f32 %v1003_v45, %v6620_v17  ;;  %v3308_v45 = vld [vmem:[%s6410_s4] ss:$0 sm:$0xff] }
 0x470   : > { %v1012_v15 = vmul.f32 %v980_v54, %v6658_v30  ;;  %v1020_v4 = vmul.f32 %v988_v52, %v6617_v62  ;;  %v1028_v19 = vmul.f32 %v996_v51, %v6619_v56  ;;  %v1080_v3 = vsel %vm692_vm1, %v1019_v43, 0.0 }
 0x471   : > { %v1095_v32 = vpack.c.bf16 %v1078_v29, %v1071_v22  ;;  %v1036_v7 = vmul.f32 %v1004_v38, %v6622_v25  ;;  %v1081_v57 = vadd.f32 %v1080_v3, %v1079_v12  ;;  %v1082_v30 = vsel %vm692_vm1, %v1027_v35, 0.0  ;;  %v2279_v59 = vpop.permute.xlu1 %2278 }
 0x472   : > { %v1086_v9 = vsel %vm692_vm1, %v1012_v15, 0.0  ;;  %v1087_v49 = vsel %vm692_vm1, %v1020_v4, 0.0  ;;  %v1089_v56 = vsel %vm692_vm1, %v1028_v19, 0.0  ;;  %v1084_v17 = vsel %vm692_vm1, %v1035_v60, 0.0  ;;  %v3779_v60 = vld [vmem:[%s4010_s11 + $0x10] sm:$0xff] }
 0x473   : > { %3353 = vmatprep.mubr.msk.bf16.mxu1 %vm692_vm1, %v1095_v32  ;;  %v1088_v13 = vadd.f32 %v1087_v49, %v1086_v9  ;;  %v1083_v62 = vadd.f32 %v1082_v30, %v1081_v57  ;;  %v1091_v6 = vsel %vm692_vm1, %v1036_v7, 0.0  ;;  %v3780_v30 = vld [vmem:[%s4010_s11] sm:$0xff] }
 0x475   : > { %v1090_v21 = vadd.f32 %v1089_v56, %v1088_v13  ;;  %v1085_v2 = vadd.f32 %v1084_v17, %v1083_v62 }
 0x477   : > { %v1092_v25 = vadd.f32 %v1091_v6, %v1090_v21 }
 0x479   : > { %v1096_v42 = vpack.c.bf16 %v1092_v25, %v1085_v2 }
 0x47b   : > { %3354 = vmatmul.mubr.msk.bf16.gmra.mxu1 %vm692_vm1, %v1096_v42  ;;  %v3781_v42 = vld [vmem:[%s4010_s11 + $0x8] sm:$0xff] }
 0x47c   : > { %3359 = vmatprep.mubr.msk.bf16.mxu1 %vm692_vm1, %v2273_v23 }
 0x483   : > { %3360 = vmatmul.mubr.msk.bf16.vlgmr.msra.gmra.mxu1 %vm692_vm1, %v2275_v44  ;;  %v3782_v44 = vld [vmem:[%s4010_s11 + $0x18] sm:$0xff] }
 0x484   : > { %3363 = vmatprep.mubr.msk.bf16.mxu1 %vm692_vm1, %v2277_v39  ;;  %3378 = vmatpush3.bf16.msra.mxu1 %v6219_v31 }
 0x48b   : > { %3364 = vmatmul.mubr.msk.bf16.gmra.mxu1 %vm692_vm1, %v2279_v59 }
 0x491   : > { %v2872_v61 = vpop.permute.xlu0 %2871 }
 0x492   : > { %3369 = vmatprep.mubr.msk.bf16.mxu0 %vm692_vm1, %v2872_v61 }
 0x49b   : > { %v2876_v48 = vpop.permute.xlu1 %2875 }
 0x49c   : > { %3373 = vmatprep.mubr.msk.bf16.mxu1 %vm692_vm1, %v2876_v48 }
 0x4a4   : > { %v2874_v63 = vpop.permute.xlu0 %2873 }
 0x4a5   : > { %3370 = vmatmul.mubr.msk.bf16.vlgmr.msra.gmra.mxu0 %vm692_vm1, %v2874_v63 }
 0x4b1   : > { %v2878_v5 = vpop.permute.xlu1 %2877 }
 0x4b2   : > { %3374 = vmatmul.mubr.msk.bf16.vlgmr.msra.gmra.mxu1 %vm692_vm1, %v2878_v5 }
 0x4fe   : > { %v3341_v1 = vpop.f32.mrf.mxu1 }
 0x500   : > { %v1658_v34 = vpop.f32.mrf.mxu1 }
 0x502   : > { %v3342_v28 = vpop.f32.mrf.mxu1 }
 0x504   : > { %v1661_v53 = vpop.f32.mrf.mxu1 }
 0x50e   : > { %v3345_v31 = vpop.f32.mrf.mxu1 }
 0x510   : > { %v1674_v40 = vpop.f32.mrf.mxu1 }
 0x512   : > { %v3346_v11 = vpop.f32.mrf.mxu1 }
 0x514   : > { %v1677_v36 = vpop.f32.mrf.mxu1 }
 0x51c   : > { %v3351_v14 = vpop.f32.mrf.mxu1 }
 0x51d   : > { %v1744_v33 = vadd.f32 %v3351_v14, %v3341_v1 }
 0x51e   : > { %v1735_v50 = vpop.f32.mrf.mxu1 }
 0x51f   : > { %v1736_v46 = vadd.f32 %v1735_v50, %v1658_v34 }
 0x520   : > { %v3352_v41 = vpop.f32.mrf.mxu1 }
 0x521   : > { %v1747_v16 = vadd.f32 %v3352_v41, %v3342_v28 }
 0x522   : > { %v1738_v0 = vpop.f32.mrf.mxu1 }
 0x523   : > { %v1739_v38 = vadd.f32 %v1738_v0, %v1661_v53 }
 0x53b   : > { %v3355_v37 = vpop.f32.mrf.mxu1 }
 0x53c   : > { %v1760_v62 = vadd.f32 %v3355_v37, %v3345_v31  ;;  %v3783_v37 = vld [vmem:[%s4010_s11 + $0x20] sm:$0xff] }
 0x53d   : > { %v1751_v20 = vpop.f32.mrf.mxu1 }
 0x53e   : > { %v1752_v17 = vadd.f32 %v1751_v20, %v1674_v40 }
 0x53f   : > { %v3356_v18 = vpop.f32.mrf.mxu1 }
 0x540   : > { %v1763_v59 = vadd.f32 %v3356_v18, %v3346_v11 }
 0x541   : > { %v1754_v24 = vpop.f32.mrf.mxu1 }
 0x542   : > { %v1755_v1 = vadd.f32 %v1754_v24, %v1677_v36 }
 0x543   : > { %v3361_v55 = vpop.f32.mrf.mxu1 }
 0x544   : > { %v2359_v26 = vadd.f32 %v3361_v55, %v1744_v33  ;;  %v3784_v55 = vld [vmem:[%s4010_s11 + $0x30] sm:$0xff] }
 0x545   : > { %v2326_v10 = vpop.f32.mrf.mxu1 }
 0x546   : > { %v2357_v43 = vadd.f32 %v2326_v10, %v1736_v46  ;;  %v3786_v46 = vld [vmem:[%s4010_s11 + $0x38] sm:$0xff] }
 0x547   : > { %v3362_v27 = vpop.f32.mrf.mxu1 }
 0x548   : > { %v2360_v22 = vadd.f32 %v3362_v27, %v1747_v16  ;;  %v3785_v27 = vld [vmem:[%s4010_s11 + $0x28] sm:$0xff] }
 0x549   : > { %v2329_v58 = vpop.f32.mrf.mxu1 }
 0x54a   : > { %v2358_v15 = vadd.f32 %v2329_v58, %v1739_v38 }
 0x54b   : > { %v3365_v8 = vpop.f32.mrf.mxu1 }
 0x54c   : > { %v2363_v6 = vadd.f32 %v3365_v8, %v1760_v62 }
 0x54d   : > { %v2342_v54 = vpop.f32.mrf.mxu1 }
 0x54e   : > { %v2361_v61 = vadd.f32 %v2342_v54, %v1752_v17 }
 0x54f   : > { %v3366_v4 = vpop.f32.mrf.mxu1 }
 0x550   : > { %v2364_v34 = vadd.f32 %v3366_v4, %v1763_v59 }
 0x551   : > { %v2345_v56 = vpop.f32.mrf.mxu1 }
 0x552   : > { %v2362_v40 = vadd.f32 %v2345_v56, %v1755_v1 }
 0x565   : > { %v3371_v47 = vpop.f32.mrf.mxu0 }
 0x566   : > { %v2958_v52 = vadd.f32 %v3371_v47, %v2359_v26 }
 0x567   : > { %v2925_v51 = vpop.f32.mrf.mxu0 }
 0x568   : > { %v2973_v29 = vadd.f32 %v3308_v45, %v2958_v52  ;;  %v2956_v35 = vadd.f32 %v2925_v51, %v2357_v43 }
 0x569   : > { %v3372_v12 = vpop.f32.mrf.mxu0 }
 0x56a   : > { %v2971_v19 = vadd.f32 %v3308_v45, %v2956_v35  ;;  %v2959_v32 = vadd.f32 %v3372_v12, %v2360_v22  ;;  %v2981_v3 = vadd.f32 %v3779_v60, %v2973_v29 }
 0x56b   : > { %v2928_v7 = vpop.f32.mrf.mxu0 }
 0x56c   : > { %v2974_v57 = vadd.f32 %v3308_v45, %v2959_v32  ;;  %v2957_v9 = vadd.f32 %v2928_v7, %v2358_v15  ;;  %v2995_v49 = vsel %vm406_vm0, %v2981_v3, 0.0  ;;  %v2979_v13 = vadd.f32 %v3780_v30, %v2971_v19 }
 0x56d   : > { %2996 = vadd.xlane.f32.xlu0 %v2995_v49 }
 0x56e   : > { %v2972_v21 = vadd.f32 %v3308_v45, %v2957_v9  ;;  %v2989_v25 = vsel %vm406_vm0, %v2979_v13, 0.0  ;;  %v2982_v39 = vadd.f32 %v3782_v44, %v2974_v57 }
 0x570   : > { %v2980_v23 = vadd.f32 %v3781_v42, %v2972_v21  ;;  %v2998_v31 = vsel %vm406_vm0, %v2982_v39, 0.0 }
 0x571   : > { %2990 = vadd.xlane.f32.xlu0 %v2989_v25 }
 0x572   : > { %v3375_v2 = vpop.f32.mrf.mxu1  ;;  %v2992_v5 = vsel %vm406_vm0, %v2980_v23, 0.0 }
 0x573   : > { %v2962_v48 = vadd.f32 %v3375_v2, %v2363_v6  ;;  %2993 = vadd.xlane.f32.xlu1 %v2992_v5 }
 0x574   : > { %v2941_v63 = vpop.f32.mrf.mxu1 }
 0x575   : > { %v2960_v28 = vadd.f32 %v2941_v63, %v2361_v61  ;;  %v2977_v14 = vadd.f32 %v3308_v45, %v2962_v48  ;;  %2999 = vadd.xlane.f32.xlu0 %v2998_v31 }
 0x576   : > { %v3376_v53 = vpop.f32.mrf.mxu1 }
 0x577   : > { %v2975_v50 = vadd.f32 %v3308_v45, %v2960_v28  ;;  %v2963_v11 = vadd.f32 %v3376_v53, %v2364_v34  ;;  %v2985_v10 = vadd.f32 %v3784_v55, %v2977_v14 }
 0x578   : > { %v2944_v41 = vpop.f32.mrf.mxu1 }
 0x579   : > { %v2961_v0 = vadd.f32 %v2944_v41, %v2362_v40  ;;  %v2983_v20 = vadd.f32 %v3783_v37, %v2975_v50  ;;  %v2978_v18 = vadd.f32 %v3308_v45, %v2963_v11  ;;  %v3007_v8 = vsel %vm406_vm0, %v2985_v10, 0.0 }
 0x57b   : > { %v2976_v36 = vadd.f32 %v3308_v45, %v2961_v0  ;;  %v3001_v24 = vsel %vm406_vm0, %v2983_v20, 0.0  ;;  %v2986_v26 = vadd.f32 %v3786_v46, %v2978_v18 }
 0x57c   : > { %3002 = vadd.xlane.f32.xlu1 %v3001_v24 }
 0x57d   : > { %v2984_v58 = vadd.f32 %v3785_v27, %v2976_v36  ;;  %v3010_v47 = vsel %vm406_vm0, %v2986_v26, 0.0 }
 0x57f   : > { %v3004_v33 = vsel %vm406_vm0, %v2984_v58, 0.0 }
 0x580   : > { %3005 = vadd.xlane.f32.xlu0 %v3004_v33  ;;  %3008 = vadd.xlane.f32.xlu1 %v3007_v8 }
 0x584   : > { %3011 = vadd.xlane.f32.xlu0 %v3010_v47 }
 0x5f6   : > { %v2997_v16 = vpop.xlane.xlu0 %2996 }
 0x5f7   : > { %v3016_v45 = vmul.f32 0.015625, %v2997_v16 }
 0x5f9   : > { %v6297_v43 = vsub.f32 %v2981_v3, %v3016_v45 }
 0x5fa   : > { %v2991_v54 = vpop.xlane.xlu0 %2990 }
 0x5fb   : > { %v3014_v52 = vmul.f32 0.015625, %v2991_v54  ;;  %v3032_v51 = vmul.f32 %v6297_v43, %v6297_v43 }
 0x5fc   : > { %v2994_v38 = vpop.xlane.xlu1 %2993 }
 0x5fd   : > { %v6301_v22 = vsub.f32 %v2979_v13, %v3014_v52  ;;  %v3015_v29 = vmul.f32 0.015625, %v2994_v38  ;;  %v3044_v35 = vsel %vm406_vm0, %v3032_v51, 0.0 }
 0x5fe   : > { %v3000_v12 = vpop.xlane.xlu0 %2999  ;;  %3045 = vadd.xlane.f32.xlu1 %v3044_v35 }
 0x5ff   : > { %v3017_v15 = vmul.f32 0.015625, %v3000_v12  ;;  %v3030_v4 = vmul.f32 %v6301_v22, %v6301_v22  ;;  %v6306_v19 = vsub.f32 %v2980_v23, %v3015_v29 }
 0x601   : > { %v6308_v32 = vsub.f32 %v2982_v39, %v3017_v15  ;;  %v3038_v60 = vsel %vm406_vm0, %v3030_v4, 0.0  ;;  %v3031_v49 = vmul.f32 %v6306_v19, %v6306_v19 }
 0x602   : > { %3039 = vadd.xlane.f32.xlu1 %v3038_v60 }
 0x603   : > { %v3033_v7 = vmul.f32 %v6308_v32, %v6308_v32  ;;  %v3041_v6 = vsel %vm406_vm0, %v3031_v49, 0.0 }
 0x605   : > { %v3003_v3 = vpop.xlane.xlu1 %3002  ;;  %v3047_v9 = vsel %vm406_vm0, %v3033_v7, 0.0 }
 0x606   : > { %v3018_v57 = vmul.f32 0.015625, %v3003_v3  ;;  %3048 = vadd.xlane.f32.xlu0 %v3047_v9 }
 0x608   : > { %v6316_v30 = vsub.f32 %v2983_v20, %v3018_v57 }
 0x609   : > { %v3006_v13 = vpop.xlane.xlu0 %3005  ;;  %v3009_v62 = vpop.xlane.xlu1 %3008 }
 0x60a   : > { %v3019_v56 = vmul.f32 0.015625, %v3006_v13  ;;  %v3020_v21 = vmul.f32 0.015625, %v3009_v62  ;;  %v3034_v17 = vmul.f32 %v6316_v30, %v6316_v30  ;;  %3042 = vadd.xlane.f32.xlu0 %v3041_v6 }
 0x60c   : > { %v6321_v2 = vsub.f32 %v2984_v58, %v3019_v56  ;;  %v6323_v25 = vsub.f32 %v2985_v10, %v3020_v21  ;;  %v3050_v42 = vsel %vm406_vm0, %v3034_v17, 0.0  ;;  %v3309_v58 = vld [vmem:[%s6411_s5] ss:$0 sm:$0xff] }
 0x60d   : > { %v3012_v23 = vpop.xlane.xlu0 %3011  ;;  %3051 = vadd.xlane.f32.xlu1 %v3050_v42 }
 0x60e   : > { %v3021_v44 = vmul.f32 0.015625, %v3012_v23  ;;  %v3036_v39 = vmul.f32 %v6323_v25, %v6323_v25  ;;  %v3035_v59 = vmul.f32 %v6321_v2, %v6321_v2 }
 0x610   : > { %v6330_v61 = vsub.f32 %v2986_v26, %v3021_v44  ;;  %v3056_v48 = vsel %vm406_vm0, %v3036_v39, 0.0  ;;  %v3053_v63 = vsel %vm406_vm0, %v3035_v59, 0.0  ;;  %v3310_v26 = vld [vmem:[%s6412_s6] ss:$0 sm:$0xff] }
 0x611   : > { %3057 = vadd.xlane.f32.xlu1 %v3056_v48  ;;  %3054 = vadd.xlane.f32.xlu0 %v3053_v63 }
 0x612   : > { %v3037_v5 = vmul.f32 %v6330_v61, %v6330_v61 }
 0x614   : > { %v3059_v1 = vsel %vm406_vm0, %v3037_v5, 0.0 }
 0x615   : > { %3060 = vadd.xlane.f32.xlu0 %v3059_v1 }
 0x687   : > { %v3046_v34 = vpop.xlane.xlu1 %3045 }
 0x688   : > { %v3064_v28 = vmul.f32 0.015625, %v3046_v34 }
 0x68a   : > { %v3072_v53 = vadd.f32 1e-05, %v3064_v28 }
 0x68b   : > { %v3040_v31 = vpop.xlane.xlu1 %3039 }
 0x68c   : > { %3763 = vrsqrt.f32 %v3072_v53  ;;  %v3062_v40 = vmul.f32 0.015625, %v3040_v31 }
 0x68e   : > { %v3070_v14 = vadd.f32 1e-05, %v3062_v40 }
 0x68f   : > { %v3049_v50 = vpop.xlane.xlu0 %3048 }
 0x690   : > { %3765 = vrsqrt.f32 %v3070_v14  ;;  %v3065_v11 = vmul.f32 0.015625, %v3049_v50 }
 0x692   : > { %v3073_v41 = vadd.f32 1e-05, %v3065_v11 }
 0x693   : > { %v3043_v0 = vpop.xlane.xlu0 %3042 }
 0x694   : > { %3767 = vrsqrt.f32 %v3073_v41  ;;  %v3063_v20 = vmul.f32 0.015625, %v3043_v0 }
 0x696   : > { %v3052_v37 = vpop.xlane.xlu1 %3051  ;;  %v3071_v36 = vadd.f32 1e-05, %v3063_v20 }
 0x697   : > { %v3066_v18 = vmul.f32 0.015625, %v3052_v37 }
 0x698   : > { %3769 = vrsqrt.f32 %v3071_v36 }
 0x699   : > { %v3074_v24 = vadd.f32 1e-05, %v3066_v18  ;;  %v3764_v27 = vpop.eup %3763 }
 0x69a   : > { %v3058_v55 = vpop.xlane.xlu1 %3057  ;;  %v3055_v10 = vpop.xlane.xlu0 %3054  ;;  %v3088_v46 = vmul.f32 %v3764_v27, %v6297_v43 }
 0x69b   : > { %3771 = vrsqrt.f32 %v3074_v24  ;;  %v3068_v33 = vmul.f32 0.015625, %v3058_v55  ;;  %v3067_v8 = vmul.f32 0.015625, %v3055_v10 }
 0x69c   : > { %v3102_v45 = vmul.f32 %v3309_v58, %v3088_v46 }
 0x69d   : > { %v3076_v47 = vadd.f32 1e-05, %v3068_v33  ;;  %v3075_v16 = vadd.f32 1e-05, %v3067_v8  ;;  %v3766_v52 = vpop.eup %3765 }
 0x69e   : > { %v3061_v54 = vpop.xlane.xlu0 %3060  ;;  %v3116_v38 = vadd.f32 %v3310_v26, %v3102_v45  ;;  %v3086_v29 = vmul.f32 %v3766_v52, %v6301_v22 }
 0x69f   : > { %3773 = vrsqrt.f32 %v3076_v47  ;;  %v3069_v51 = vmul.f32 0.015625, %v3061_v54 }
 0x6a0   : > { %3775 = vrsqrt.f32 %v3075_v16  ;;  %3124 = vst.msk [vmem:[%s6346_s21 + $0x10] sm:$0xff] %vm406_vm0, %v3116_v38  ;;  %v3100_v43 = vmul.f32 %v3309_v58, %v3086_v29 }
 0x6a1   : > { %v3077_v35 = vadd.f32 1e-05, %v3069_v51  ;;  %v3768_v12 = vpop.eup %3767 }
 0x6a2   : > { %v3114_v15 = vadd.f32 %v3310_v26, %v3100_v43  ;;  %v3089_v4 = vmul.f32 %v3768_v12, %v6308_v32 }
 0x6a3   : > { %3777 = vrsqrt.f32 %v3077_v35 }
 0x6a4   : > { %3122 = vst.msk [vmem:[%s6346_s21] sm:$0xff] %vm406_vm0, %v3114_v15  ;;  %v3103_v60 = vmul.f32 %v3309_v58, %v3089_v4 }
 0x6a5   : > { %v3770_v22 = vpop.eup %3769 }
 0x6a6   : > { %v3117_v7 = vadd.f32 %v3310_v26, %v3103_v60  ;;  %v3087_v57 = vmul.f32 %v3770_v22, %v6306_v19 }
 0x6a8   : > { %v3772_v3 = vpop.eup %3771  ;;  %3125 = vst.msk [vmem:[%s6346_s21 + $0x18] sm:$0xff] %vm406_vm0, %v3117_v7  ;;  %v3101_v49 = vmul.f32 %v3309_v58, %v3087_v57 }
 0x6a9   : > { %v3090_v9 = vmul.f32 %v3772_v3, %v6316_v30 }
 0x6aa   : > { %v3115_v32 = vadd.f32 %v3310_v26, %v3101_v49 }
 0x6ab   : > { %v3104_v13 = vmul.f32 %v3309_v58, %v3090_v9 }
 0x6ac   : > { %v3774_v62 = vpop.eup %3773  ;;  %3123 = vst.msk [vmem:[%s6346_s21 + $0x8] sm:$0xff] %vm406_vm0, %v3115_v32 }
 0x6ad   : > { %v3776_v56 = vpop.eup %3775  ;;  %v3118_v21 = vadd.f32 %v3310_v26, %v3104_v13  ;;  %v3092_v17 = vmul.f32 %v3774_v62, %v6323_v25 }
 0x6ae   : > { %v3091_v6 = vmul.f32 %v3776_v56, %v6321_v2  ;;  %v3184_v2 = vld [vmem:[%s6346_s21] sm:$0xff] (%p3939_p6) }
 0x6af   : > { %3126 = vst.msk [vmem:[%s6346_s21 + $0x20] sm:$0xff] %vm406_vm0, %v3118_v21  ;;  %v3106_v19 = vmul.f32 %v3309_v58, %v3092_v17  ;;  %v3190_v63 = vld [vmem:[%s6346_s21 + $0x18] sm:$0xff] (%p3939_p6)  ;;  %3185 = vst [vmem:[%s3141_s14] sm:$0xff] (%p3939_p6), %v3184_v2 }
 0x6b0   : > { %v3778_v30 = vpop.eup %3777  ;;  %v3105_v42 = vmul.f32 %v3309_v58, %v3091_v6  ;;  %3191 = vst [vmem:[%s3141_s14 + $0x28] sm:$0xff] (%p3939_p6), %v3190_v63 }
 0x6b1   : > { %v3120_v23 = vadd.f32 %v3310_v26, %v3106_v19  ;;  %v3093_v44 = vmul.f32 %v3778_v30, %v6330_v61  ;;  %v3188_v61 = vld [vmem:[%s6346_s21 + $0x10] sm:$0xff] (%p3939_p6) }
 0x6b2   : > { %v3119_v39 = vadd.f32 %v3310_v26, %v3105_v42  ;;  %3189 = vst [vmem:[%s3141_s14 + $0x20] sm:$0xff] (%p3939_p6), %v3188_v61 }
 0x6b3   : > { %3128 = vst.msk [vmem:[%s6346_s21 + $0x30] sm:$0xff] %vm406_vm0, %v3120_v23  ;;  %v3107_v59 = vmul.f32 %v3309_v58, %v3093_v44  ;;  %3136 = sbr.rel (!%p3939_p6) target bundleno = 1728 (0x6c0), region = 90  ;;  %v3186_v25 = vld [vmem:[%s6346_s21 + $0x8] sm:$0xff] (%p3939_p6) }
 0x6b4   : > { %3127 = vst.msk [vmem:[%s6346_s21 + $0x28] sm:$0xff] %vm406_vm0, %v3119_v39  ;;  %3187 = vst [vmem:[%s3141_s14 + $0x8] sm:$0xff] (%p3939_p6), %v3186_v25 }
 0x6b5   : > { %v3121_v48 = vadd.f32 %v3310_v26, %v3107_v59 }
 0x6b6   : > { %v3192_v5 = vld [vmem:[%s6346_s21 + $0x20] sm:$0xff] (%p3939_p6) }
 0x6b7   : > { %3129 = vst.msk [vmem:[%s6346_s21 + $0x38] sm:$0xff] %vm406_vm0, %v3121_v48  ;;  %3193 = vst [vmem:[%s3141_s14 + $0x40] sm:$0xff] (%p3939_p6), %v3192_v5 }
 0x6ba   : > { %v3196_v34 = vld [vmem:[%s6346_s21 + $0x30] sm:$0xff] }
 0x6bb   : > { %v3194_v1 = vld [vmem:[%s6346_s21 + $0x28] sm:$0xff]  ;;  %3197 = vst [vmem:[%s3141_s14 + $0x60] sm:$0xff] %v3196_v34 }
 0x6bc   : > { %3195 = vst [vmem:[%s3141_s14 + $0x48] sm:$0xff] %v3194_v1 }
 0x6be   : > { %v3198_v28 = vld [vmem:[%s6346_s21 + $0x38] sm:$0xff] }
 0x6bf   : > { %3199 = vst [vmem:[%s3141_s14 + $0x68] sm:$0xff] %v3198_v28 }
 0x6c0 PF: > { %s17_s30 = sadd.s32 1, %s3841_s30   ;;  %s6662_s24 = smov %s3821_s25 }
 0x6c1   : > { %p14_p12 = scmp.ge.s32.totalorder %s17_s30, 6   ;;  %s6663_s25 = smov %s3947_s16 }
 0x6c2   : > { %s6664_s26 = smov %s3833_s28  ;;  %s6665_s27 = smov %s3837_s29 }
 0x6c3   : > { %s6666_s28 = smov %s6669_s8  ;;  %s6667_s29 = smov %s6673_s9 }
 0x6c4   :  { %16 = sbr.rel (!%p14_p12) target bundleno = 4 (0x4), region = 159 }

</bundles_post_ra>
